<compile_context>
chip_gen: v6e
topology: v6e:2x2x1
jax: 0.10.0
libtpu: 0.0.40
codegen_flags: <defaults>
</compile_context>

<pallas_src>
import jax
import jax.numpy as jnp
from jax.experimental import pallas as pl
from jax.experimental.pallas import tpu as pltpu


def _round_up(x, m):
    return (x + m - 1) // m * m


# ----------------------------------------------------------------------------
# Fused GEMM kernel: out = maybe_relu((A @ B) * scale + bias [+ residual])
# Grid = (M tiles ["parallel"], K tiles ["arbitrary", innermost]).
# f32 accumulation in a VMEM scratch; single bf16 writeback in the epilogue.
# ----------------------------------------------------------------------------
def _make_fused_matmul_kernel(apply_relu, has_residual):
    def kernel(*refs):
        if has_residual:
            a_ref, b_ref, sb_ref, res_ref, o_ref, acc_ref = refs
        else:
            a_ref, b_ref, sb_ref, o_ref, acc_ref = refs
        k = pl.program_id(1)

        @pl.when(k == 0)
        def _():
            acc_ref[...] = jnp.zeros_like(acc_ref)

        acc_ref[...] += jnp.dot(a_ref[...], b_ref[...],
                                preferred_element_type=jnp.float32)

        @pl.when(k == pl.num_programs(1) - 1)
        def _():
            out = acc_ref[...] * sb_ref[0:1, :] + sb_ref[1:2, :]
            if has_residual:
                out = out + res_ref[...].astype(jnp.float32)
            if apply_relu:
                out = jnp.maximum(out, 0.0)
            o_ref[...] = out.astype(o_ref.dtype)

    return kernel


def _pick_tk(K):
    # Largest K tile (multiple of 128) that divides K exactly; otherwise run
    # the whole K extent in one step (147/576/64 cases) -- never pad K.
    for cand in (512, 384, 256, 128):
        if K % cand == 0:
            return cand
    return K


def fused_matmul(a_bf16, b_bf16, sb, residual=None, relu=True,
                 out_dtype=jnp.bfloat16):
    """a: (M, K) bf16 patches, b: (K, N) bf16 weights, sb: (2, N) f32."""
    M, K = a_bf16.shape
    K2, N = b_bf16.shape
    assert K == K2

    # tm multiple of 16 so bf16 blocks line up with (16, 128) sublane packing.
    tm = 256 if M > 256 else _round_up(M, 16)
    Mp = _round_up(M, tm)
    tk = _pick_tk(K)
    num_k = K // tk

    a_p = a_bf16 if Mp == M else jnp.pad(a_bf16, ((0, Mp - M), (0, 0)))

    inputs = [a_p, b_bf16, sb]
    in_specs = [
        pl.BlockSpec((tm, tk), lambda m, k: (m, k)),
        pl.BlockSpec((tk, N), lambda m, k: (k, 0)),
        pl.BlockSpec((2, N), lambda m, k: (0, 0)),      # k-invariant: one fetch
    ]

    has_res = residual is not None
    if has_res:
        r = residual
        if Mp != M:
            r = jnp.pad(r, ((0, Mp - M), (0, 0)))
        inputs.append(r)
        # k-invariant index map -> fetched once per M tile, not per K step.
        in_specs.append(pl.BlockSpec((tm, N), lambda m, k: (m, 0)))

    out = pl.pallas_call(
        _make_fused_matmul_kernel(relu, has_res),
        out_shape=jax.ShapeDtypeStruct((Mp, N), out_dtype),
        grid_spec=pltpu.PrefetchScalarGridSpec(
            num_scalar_prefetch=0,
            grid=(Mp // tm, num_k),
            in_specs=in_specs,
            out_specs=pl.BlockSpec((tm, N), lambda m, k: (m, 0)),
            scratch_shapes=[pltpu.VMEM((tm, N), jnp.float32)],
        ),
        compiler_params=pltpu.CompilerParams(
            dimension_semantics=("parallel", "arbitrary")),
    )(*inputs)
    return out if Mp == M else out[:M]


# ----------------------------------------------------------------------------
# MaxPool 3x3 / stride 2 / pad 1.
# Plain-JAX maximum tree over the 9 strided views (single fused HBM pass).
# ----------------------------------------------------------------------------
def max_pool_3x3_s2(x):
    N, H, W, C = x.shape
    xp = jnp.pad(x, ((0, 0), (1, 1), (1, 1), (0, 0)),
                 constant_values=-jnp.inf)
    Ho = (H + 2 - 3) // 2 + 1
    Wo = (W + 2 - 3) // 2 + 1
    out = None
    for i in range(3):
        for j in range(3):
            v = xp[:, i:i + 2 * Ho:2, j:j + 2 * Wo:2, :]
            out = v if out is None else jnp.maximum(out, v)
    return out


# ----------------------------------------------------------------------------
# Global average pool (Pallas mean-reduction over the spatial axis, f32 out)
# ----------------------------------------------------------------------------
def _mean_over_axis1_kernel(x_ref, o_ref):
    o_ref[...] = jnp.mean(x_ref[...].astype(jnp.float32), axis=1)


def global_avg_pool(x):
    N, H, W, C = x.shape
    xf = x.reshape(N, H * W, C)
    return pl.pallas_call(
        _mean_over_axis1_kernel,
        out_shape=jax.ShapeDtypeStruct((N, C), jnp.float32),
        grid=(1,),
        in_specs=[pl.BlockSpec((N, H * W, C), lambda i: (0, 0, 0))],
        out_specs=pl.BlockSpec((N, C), lambda i: (0, 0)),
    )(xf)


# ----------------------------------------------------------------------------
# Conv2d (im2col built in bf16, fused by XLA) + folded BatchNorm + optional
# residual / ReLU, with the GEMM hot path in the fused Pallas kernel above.
# Outputs bf16; the next layer consumes it directly (no extra cast pass).
# ----------------------------------------------------------------------------
def conv2d_bn(x, p, stride, pad, relu=True, residual=None):
    N, H, W, Cin = x.shape
    w2, sb = p["w2"], p["sb"]
    K, Cout = w2.shape
    kh = kw = int(round((K // Cin) ** 0.5))

    Ho = (H + 2 * pad - kh) // stride + 1
    Wo = (W + 2 * pad - kw) // stride + 1

    xb = x.astype(jnp.bfloat16)
    if pad > 0:
        xb = jnp.pad(xb, ((0, 0), (pad, pad), (pad, pad), (0, 0)))

    if kh == 1 and kw == 1:
        patches = xb[:, 0:stride * Ho:stride,
                     0:stride * Wo:stride, :].reshape(N * Ho * Wo, Cin)
    else:
        cols = []
        for i in range(kh):
            for j in range(kw):
                cols.append(xb[:, i:i + stride * Ho:stride,
                               j:j + stride * Wo:stride, :])
        patches = jnp.concatenate(cols, axis=-1).reshape(
            N * Ho * Wo, kh * kw * Cin)

    res2 = None if residual is None else residual.reshape(N * Ho * Wo, Cout)
    out = fused_matmul(patches, w2, sb, residual=res2, relu=relu,
                       out_dtype=jnp.bfloat16)
    return out.reshape(N, Ho, Wo, Cout)


# ----------------------------------------------------------------------------
# Deterministic synthetic parameters for truncated resnet18.
# Weight reshape -> (K, Cout) bf16 and scale/bias packing hoisted to init.
# ----------------------------------------------------------------------------
def _fold_bn(gamma, beta, mean, var, eps=1e-5):
    scale = gamma / jnp.sqrt(var + eps)
    bias = beta - mean * scale
    return scale, bias


def init_resnet18_params(key):
    keys = iter(jax.random.split(key, 128))

    def conv_bn(kh, kw, cin, cout):
        w = 0.05 * jax.random.normal(next(keys), (kh, kw, cin, cout),
                                     jnp.float32)
        gamma = 1.0 + 0.1 * jax.random.normal(next(keys), (cout,), jnp.float32)
        beta = 0.1 * jax.random.normal(next(keys), (cout,), jnp.float32)
        mean = jnp.zeros((cout,), jnp.float32)
        var = jnp.ones((cout,), jnp.float32)
        s, b = _fold_bn(gamma, beta, mean, var)
        return {
            "w2": w.reshape(kh * kw * cin, cout).astype(jnp.bfloat16),
            "sb": jnp.stack([s, b]).astype(jnp.float32),   # (2, cout)
        }

    params = {"stem": conv_bn(7, 7, 3, 64)}
    stage_channels = [64, 128, 256, 512]
    cin = 64
    for si, cout in enumerate(stage_channels):
        blocks = []
        for bi in range(2):
            stride = 2 if (si > 0 and bi == 0) else 1
            in_ch = cin if bi == 0 else cout
            blk = {
                "conv1": conv_bn(3, 3, in_ch, cout),
                "conv2": conv_bn(3, 3, cout, cout),
            }
            if stride != 1 or in_ch != cout:
                blk["down"] = conv_bn(1, 1, in_ch, cout)
            blocks.append(blk)
        params[f"layer{si + 1}"] = blocks
        cin = cout
    return params


# ----------------------------------------------------------------------------
# PretrainedModel.forward equivalent: truncated resnet18 -> flatten(N, -1)
# ----------------------------------------------------------------------------
def pretrained_model_forward(params, images_nchw):
    x = jnp.transpose(images_nchw, (0, 2, 3, 1))                   # NHWC
    x = conv2d_bn(x, params["stem"], stride=2, pad=3, relu=True)
    x = max_pool_3x3_s2(x)
    for li in range(4):
        for bi, blk in enumerate(params[f"layer{li + 1}"]):
            stride = 2 if (li > 0 and bi == 0) else 1
            identity = x
            if "down" in blk:
                identity = conv2d_bn(x, blk["down"], stride=stride, pad=0,
                                     relu=False)
            out = conv2d_bn(x, blk["conv1"], stride=stride, pad=1, relu=True)
            x = conv2d_bn(out, blk["conv2"], stride=1, pad=1, relu=True,
                          residual=identity)
    feat = global_avg_pool(x)                  # avgpool -> (N, 512) f32
    return feat.reshape(feat.shape[0], -1)     # features.view(N, -1)


if __name__ == "__main__":
    key = jax.random.PRNGKey(0)
    pkey, xkey = jax.random.split(key)
    params = init_resnet18_params(pkey)
    # Scaled-down input: module nominally takes (N, 3, 224, 224) NCHW;
    # we use a small 32x32 spatial size for the demo.
    images = jax.random.normal(xkey, (2, 3, 32, 32), jnp.float32)
    fwd = jax.jit(pretrained_model_forward)
    feats = fwd(params, images)
    feats = jax.block_until_ready(feats)
    assert feats.shape == (2, 512), feats.shape
    assert bool(jnp.all(jnp.isfinite(feats)))
    print("KERNEL_OK")
</pallas_src>

<mosaic_0001>
module attributes {stable_mosaic.version = 11 : i64} {
  func.func @kernel(%arg0: i32, %arg1: i32, %arg2: memref<256x147xbf16, #tpu.memory_space<vmem>>, %arg3: memref<147x64xbf16, #tpu.memory_space<vmem>>, %arg4: memref<2x64xf32, #tpu.memory_space<vmem>>, %arg5: memref<256x64xbf16, #tpu.memory_space<vmem>>, %arg6: memref<256x64xf32, #tpu.memory_space<vmem>>) attributes {dimension_semantics = [#tpu.dimension_semantics<parallel>, #tpu.dimension_semantics<arbitrary>], iteration_bounds = array<i64: 2, 1>, scalar_prefetch = 0 : i64, scratch_operands = 1 : i64, tpu.core_type = #tpu.core_type<tc>, window_params = [{transform_indices = @transform_0, window_bounds = array<i64: 256, 147>}, {transform_indices = @transform_1, window_bounds = array<i64: 147, 64>}, {pipeline_mode = #tpu.pipeline_mode<synchronous>, transform_indices = @transform_2, window_bounds = array<i64: 2, 64>}, {transform_indices = @transform_3, window_bounds = array<i64: 256, 64>}]} {
    %c0_i32 = arith.constant 0 : i32
    %0 = arith.cmpi eq, %arg1, %c0_i32 : i32
    %1 = arith.extui %0 : i1 to i32
    %c0_i32_0 = arith.constant 0 : i32
    %2 = arith.cmpi ne, %1, %c0_i32_0 : i32
    scf.if %2 {
      %cst_10 = arith.constant 0.000000e+00 : f32
      %12 = vector.broadcast %cst_10 : f32 to vector<256x64xf32>
      %c0_11 = arith.constant 0 : index
      %c0_12 = arith.constant 0 : index
      %13 = vector.load %arg6[%c0_11, %c0_12] : memref<256x64xf32, #tpu.memory_space<vmem>>, vector<256x64xf32>
      tpu.vector_store %arg6[%c0_11, %c0_12], %12 {strides = array<i32>} : memref<256x64xf32, #tpu.memory_space<vmem>>, vector<256x64xf32>,
    } else {
    }
    %c0 = arith.constant 0 : index
    %c0_1 = arith.constant 0 : index
    %3 = vector.load %arg6[%c0, %c0_1] : memref<256x64xf32, #tpu.memory_space<vmem>>, vector<256x64xf32>
    %c0_2 = arith.constant 0 : index
    %c0_3 = arith.constant 0 : index
    %4 = vector.load %arg2[%c0_2, %c0_3] : memref<256x147xbf16, #tpu.memory_space<vmem>>, vector<256x147xbf16>
    %c0_4 = arith.constant 0 : index
    %c0_5 = arith.constant 0 : index
    %5 = vector.load %arg3[%c0_4, %c0_5] : memref<147x64xbf16, #tpu.memory_space<vmem>>, vector<147x64xbf16>
    %cst = arith.constant dense<0.000000e+00> : vector<256x64xf32>
    %6 = tpu.matmul %4, %5, %cst {dimension_numbers = #tpu.dot_dimension_numbers<[1], [0], [0], [1], [0, 0, 1, 1], [], []>} : vector<256x147xbf16>, vector<147x64xbf16>, vector<256x64xf32> -> vector<256x64xf32>
    %7 = arith.addf %3, %6 : vector<256x64xf32>
    %c0_6 = arith.constant 0 : index
    %c0_7 = arith.constant 0 : index
    %8 = vector.load %arg6[%c0_6, %c0_7] : memref<256x64xf32, #tpu.memory_space<vmem>>, vector<256x64xf32>
    tpu.vector_store %arg6[%c0_6, %c0_7], %7 {strides = array<i32>} : memref<256x64xf32, #tpu.memory_space<vmem>>, vector<256x64xf32>,
    %c0_i32_8 = arith.constant 0 : i32
    %9 = arith.cmpi eq, %arg1, %c0_i32_8 : i32
    %10 = arith.extui %9 : i1 to i32
    %c0_i32_9 = arith.constant 0 : i32
    %11 = arith.cmpi ne, %10, %c0_i32_9 : i32
    scf.if %11 {
      %c0_10 = arith.constant 0 : index
      %c0_11 = arith.constant 0 : index
      %12 = vector.load %arg6[%c0_10, %c0_11] : memref<256x64xf32, #tpu.memory_space<vmem>>, vector<256x64xf32>
      %c0_12 = arith.constant 0 : index
      %c0_13 = arith.constant 0 : index
      %13 = vector.load %arg4[%c0_12, %c0_13] : memref<2x64xf32, #tpu.memory_space<vmem>>, vector<1x64xf32>
      %14 = vector.broadcast %13 : vector<1x64xf32> to vector<256x64xf32>
      %15 = arith.mulf %12, %14 : vector<256x64xf32>
      %c1 = arith.constant 1 : index
      %c0_14 = arith.constant 0 : index
      %16 = vector.load %arg4[%c1, %c0_14] : memref<2x64xf32, #tpu.memory_space<vmem>>, vector<1x64xf32>
      %17 = vector.broadcast %16 : vector<1x64xf32> to vector<256x64xf32>
      %18 = arith.addf %15, %17 : vector<256x64xf32>
      %cst_15 = arith.constant 0.000000e+00 : f32
      %19 = vector.broadcast %cst_15 : f32 to vector<256x64xf32>
      %20 = arith.maximumf %18, %19 : vector<256x64xf32>
      %21 = arith.truncf %20 : vector<256x64xf32> to vector<256x64xbf16>
      %c0_16 = arith.constant 0 : index
      %c0_17 = arith.constant 0 : index
      %22 = vector.load %arg5[%c0_16, %c0_17] : memref<256x64xbf16, #tpu.memory_space<vmem>>, vector<256x64xbf16>
      tpu.vector_store %arg5[%c0_16, %c0_17], %21 {strides = array<i32>} : memref<256x64xbf16, #tpu.memory_space<vmem>>, vector<256x64xbf16>,
    } else {
    }
    return
  }
  func.func @transform_0(%arg0: i32, %arg1: i32) -> (i32, i32) {
    %c0_i32 = arith.constant 0 : i32
    return %arg0, %arg1 : i32, i32
  }
  func.func @transform_1(%arg0: i32, %arg1: i32) -> (i32, i32) {
    %c0_i32 = arith.constant 0 : i32
    %c0_i32_0 = arith.constant 0 : i32
    return %arg1, %c0_i32 : i32, i32
  }
  func.func @transform_2(%arg0: i32, %arg1: i32) -> (i32, i32) {
    %c0_i32 = arith.constant 0 : i32
    %c0_i32_0 = arith.constant 0 : i32
    %c0_i32_1 = arith.constant 0 : i32
    return %c0_i32, %c0_i32_0 : i32, i32
  }
  func.func @transform_3(%arg0: i32, %arg1: i32) -> (i32, i32) {
    %c0_i32 = arith.constant 0 : i32
    %c0_i32_0 = arith.constant 0 : i32
    return %arg0, %c0_i32 : i32, i32
  }
}

module attributes {stable_mosaic.version = 11 : i64} {
  func.func @kernel(%arg0: i32, %arg1: i32, %arg2: memref<128x576xbf16, #tpu.memory_space<vmem>>, %arg3: memref<576x64xbf16, #tpu.memory_space<vmem>>, %arg4: memref<2x64xf32, #tpu.memory_space<vmem>>, %arg5: memref<128x64xbf16, #tpu.memory_space<vmem>>, %arg6: memref<128x64xf32, #tpu.memory_space<vmem>>) attributes {dimension_semantics = [#tpu.dimension_semantics<parallel>, #tpu.dimension_semantics<arbitrary>], iteration_bounds = array<i64: 1, 1>, scalar_prefetch = 0 : i64, scratch_operands = 1 : i64, tpu.core_type = #tpu.core_type<tc>, window_params = [{transform_indices = @transform_0, window_bounds = array<i64: 128, 576>}, {transform_indices = @transform_1, window_bounds = array<i64: 576, 64>}, {pipeline_mode = #tpu.pipeline_mode<synchronous>, transform_indices = @transform_2, window_bounds = array<i64: 2, 64>}, {transform_indices = @transform_3, window_bounds = array<i64: 128, 64>}]} {
    %c0_i32 = arith.constant 0 : i32
    %0 = arith.cmpi eq, %arg1, %c0_i32 : i32
    %1 = arith.extui %0 : i1 to i32
    %c0_i32_0 = arith.constant 0 : i32
    %2 = arith.cmpi ne, %1, %c0_i32_0 : i32
    scf.if %2 {
      %cst_10 = arith.constant 0.000000e+00 : f32
      %12 = vector.broadcast %cst_10 : f32 to vector<128x64xf32>
      %c0_11 = arith.constant 0 : index
      %c0_12 = arith.constant 0 : index
      %13 = vector.load %arg6[%c0_11, %c0_12] : memref<128x64xf32, #tpu.memory_space<vmem>>, vector<128x64xf32>
      tpu.vector_store %arg6[%c0_11, %c0_12], %12 {strides = array<i32>} : memref<128x64xf32, #tpu.memory_space<vmem>>, vector<128x64xf32>,
    } else {
    }
    %c0 = arith.constant 0 : index
    %c0_1 = arith.constant 0 : index
    %3 = vector.load %arg6[%c0, %c0_1] : memref<128x64xf32, #tpu.memory_space<vmem>>, vector<128x64xf32>
    %c0_2 = arith.constant 0 : index
    %c0_3 = arith.constant 0 : index
    %4 = vector.load %arg2[%c0_2, %c0_3] : memref<128x576xbf16, #tpu.memory_space<vmem>>, vector<128x576xbf16>
    %c0_4 = arith.constant 0 : index
    %c0_5 = arith.constant 0 : index
    %5 = vector.load %arg3[%c0_4, %c0_5] : memref<576x64xbf16, #tpu.memory_space<vmem>>, vector<576x64xbf16>
    %cst = arith.constant dense<0.000000e+00> : vector<128x64xf32>
    %6 = tpu.matmul %4, %5, %cst {dimension_numbers = #tpu.dot_dimension_numbers<[1], [0], [0], [1], [0, 0, 1, 1], [], []>} : vector<128x576xbf16>, vector<576x64xbf16>, vector<128x64xf32> -> vector<128x64xf32>
    %7 = arith.addf %3, %6 : vector<128x64xf32>
    %c0_6 = arith.constant 0 : index
    %c0_7 = arith.constant 0 : index
    %8 = vector.load %arg6[%c0_6, %c0_7] : memref<128x64xf32, #tpu.memory_space<vmem>>, vector<128x64xf32>
    tpu.vector_store %arg6[%c0_6, %c0_7], %7 {strides = array<i32>} : memref<128x64xf32, #tpu.memory_space<vmem>>, vector<128x64xf32>,
    %c0_i32_8 = arith.constant 0 : i32
    %9 = arith.cmpi eq, %arg1, %c0_i32_8 : i32
    %10 = arith.extui %9 : i1 to i32
    %c0_i32_9 = arith.constant 0 : i32
    %11 = arith.cmpi ne, %10, %c0_i32_9 : i32
    scf.if %11 {
      %c0_10 = arith.constant 0 : index
      %c0_11 = arith.constant 0 : index
      %12 = vector.load %arg6[%c0_10, %c0_11] : memref<128x64xf32, #tpu.memory_space<vmem>>, vector<128x64xf32>
      %c0_12 = arith.constant 0 : index
      %c0_13 = arith.constant 0 : index
      %13 = vector.load %arg4[%c0_12, %c0_13] : memref<2x64xf32, #tpu.memory_space<vmem>>, vector<1x64xf32>
      %14 = vector.broadcast %13 : vector<1x64xf32> to vector<128x64xf32>
      %15 = arith.mulf %12, %14 : vector<128x64xf32>
      %c1 = arith.constant 1 : index
      %c0_14 = arith.constant 0 : index
      %16 = vector.load %arg4[%c1, %c0_14] : memref<2x64xf32, #tpu.memory_space<vmem>>, vector<1x64xf32>
      %17 = vector.broadcast %16 : vector<1x64xf32> to vector<128x64xf32>
      %18 = arith.addf %15, %17 : vector<128x64xf32>
      %cst_15 = arith.constant 0.000000e+00 : f32
      %19 = vector.broadcast %cst_15 : f32 to vector<128x64xf32>
      %20 = arith.maximumf %18, %19 : vector<128x64xf32>
      %21 = arith.truncf %20 : vector<128x64xf32> to vector<128x64xbf16>
      %c0_16 = arith.constant 0 : index
      %c0_17 = arith.constant 0 : index
      %22 = vector.load %arg5[%c0_16, %c0_17] : memref<128x64xbf16, #tpu.memory_space<vmem>>, vector<128x64xbf16>
      tpu.vector_store %arg5[%c0_16, %c0_17], %21 {strides = array<i32>} : memref<128x64xbf16, #tpu.memory_space<vmem>>, vector<128x64xbf16>,
    } else {
    }
    return
  }
  func.func @transform_0(%arg0: i32, %arg1: i32) -> (i32, i32) {
    %c0_i32 = arith.constant 0 : i32
    return %arg0, %arg1 : i32, i32
  }
  func.func @transform_1(%arg0: i32, %arg1: i32) -> (i32, i32) {
    %c0_i32 = arith.constant 0 : i32
    %c0_i32_0 = arith.constant 0 : i32
    return %arg1, %c0_i32 : i32, i32
  }
  func.func @transform_2(%arg0: i32, %arg1: i32) -> (i32, i32) {
    %c0_i32 = arith.constant 0 : i32
    %c0_i32_0 = arith.constant 0 : i32
    %c0_i32_1 = arith.constant 0 : i32
    return %c0_i32, %c0_i32_0 : i32, i32
  }
  func.func @transform_3(%arg0: i32, %arg1: i32) -> (i32, i32) {
    %c0_i32 = arith.constant 0 : i32
    %c0_i32_0 = arith.constant 0 : i32
    return %arg0, %c0_i32 : i32, i32
  }
}

module attributes {stable_mosaic.version = 11 : i64} {
  func.func @kernel(%arg0: i32, %arg1: i32, %arg2: memref<128x576xbf16, #tpu.memory_space<vmem>>, %arg3: memref<576x64xbf16, #tpu.memory_space<vmem>>, %arg4: memref<2x64xf32, #tpu.memory_space<vmem>>, %arg5: memref<128x64xbf16, #tpu.memory_space<vmem>>, %arg6: memref<128x64xbf16, #tpu.memory_space<vmem>>, %arg7: memref<128x64xf32, #tpu.memory_space<vmem>>) attributes {dimension_semantics = [#tpu.dimension_semantics<parallel>, #tpu.dimension_semantics<arbitrary>], iteration_bounds = array<i64: 1, 1>, scalar_prefetch = 0 : i64, scratch_operands = 1 : i64, tpu.core_type = #tpu.core_type<tc>, window_params = [{transform_indices = @transform_0, window_bounds = array<i64: 128, 576>}, {transform_indices = @transform_1, window_bounds = array<i64: 576, 64>}, {pipeline_mode = #tpu.pipeline_mode<synchronous>, transform_indices = @transform_2, window_bounds = array<i64: 2, 64>}, {transform_indices = @transform_3, window_bounds = array<i64: 128, 64>}, {transform_indices = @transform_4, window_bounds = array<i64: 128, 64>}]} {
    %c0_i32 = arith.constant 0 : i32
    %0 = arith.cmpi eq, %arg1, %c0_i32 : i32
    %1 = arith.extui %0 : i1 to i32
    %c0_i32_0 = arith.constant 0 : i32
    %2 = arith.cmpi ne, %1, %c0_i32_0 : i32
    scf.if %2 {
      %cst_10 = arith.constant 0.000000e+00 : f32
      %12 = vector.broadcast %cst_10 : f32 to vector<128x64xf32>
      %c0_11 = arith.constant 0 : index
      %c0_12 = arith.constant 0 : index
      %13 = vector.load %arg7[%c0_11, %c0_12] : memref<128x64xf32, #tpu.memory_space<vmem>>, vector<128x64xf32>
      tpu.vector_store %arg7[%c0_11, %c0_12], %12 {strides = array<i32>} : memref<128x64xf32, #tpu.memory_space<vmem>>, vector<128x64xf32>,
    } else {
    }
    %c0 = arith.constant 0 : index
    %c0_1 = arith.constant 0 : index
    %3 = vector.load %arg7[%c0, %c0_1] : memref<128x64xf32, #tpu.memory_space<vmem>>, vector<128x64xf32>
    %c0_2 = arith.constant 0 : index
    %c0_3 = arith.constant 0 : index
    %4 = vector.load %arg2[%c0_2, %c0_3] : memref<128x576xbf16, #tpu.memory_space<vmem>>, vector<128x576xbf16>
    %c0_4 = arith.constant 0 : index
    %c0_5 = arith.constant 0 : index
    %5 = vector.load %arg3[%c0_4, %c0_5] : memref<576x64xbf16, #tpu.memory_space<vmem>>, vector<576x64xbf16>
    %cst = arith.constant dense<0.000000e+00> : vector<128x64xf32>
    %6 = tpu.matmul %4, %5, %cst {dimension_numbers = #tpu.dot_dimension_numbers<[1], [0], [0], [1], [0, 0, 1, 1], [], []>} : vector<128x576xbf16>, vector<576x64xbf16>, vector<128x64xf32> -> vector<128x64xf32>
    %7 = arith.addf %3, %6 : vector<128x64xf32>
    %c0_6 = arith.constant 0 : index
    %c0_7 = arith.constant 0 : index
    %8 = vector.load %arg7[%c0_6, %c0_7] : memref<128x64xf32, #tpu.memory_space<vmem>>, vector<128x64xf32>
    tpu.vector_store %arg7[%c0_6, %c0_7], %7 {strides = array<i32>} : memref<128x64xf32, #tpu.memory_space<vmem>>, vector<128x64xf32>,
    %c0_i32_8 = arith.constant 0 : i32
    %9 = arith.cmpi eq, %arg1, %c0_i32_8 : i32
    %10 = arith.extui %9 : i1 to i32
    %c0_i32_9 = arith.constant 0 : i32
    %11 = arith.cmpi ne, %10, %c0_i32_9 : i32
    scf.if %11 {
      %c0_10 = arith.constant 0 : index
      %c0_11 = arith.constant 0 : index
      %12 = vector.load %arg7[%c0_10, %c0_11] : memref<128x64xf32, #tpu.memory_space<vmem>>, vector<128x64xf32>
      %c0_12 = arith.constant 0 : index
      %c0_13 = arith.constant 0 : index
      %13 = vector.load %arg4[%c0_12, %c0_13] : memref<2x64xf32, #tpu.memory_space<vmem>>, vector<1x64xf32>
      %14 = vector.broadcast %13 : vector<1x64xf32> to vector<128x64xf32>
      %15 = arith.mulf %12, %14 : vector<128x64xf32>
      %c1 = arith.constant 1 : index
      %c0_14 = arith.constant 0 : index
      %16 = vector.load %arg4[%c1, %c0_14] : memref<2x64xf32, #tpu.memory_space<vmem>>, vector<1x64xf32>
      %17 = vector.broadcast %16 : vector<1x64xf32> to vector<128x64xf32>
      %18 = arith.addf %15, %17 : vector<128x64xf32>
      %c0_15 = arith.constant 0 : index
      %c0_16 = arith.constant 0 : index
      %19 = vector.load %arg5[%c0_15, %c0_16] : memref<128x64xbf16, #tpu.memory_space<vmem>>, vector<128x64xbf16>
      %20 = arith.extf %19 : vector<128x64xbf16> to vector<128x64xf32>
      %21 = arith.addf %18, %20 : vector<128x64xf32>
      %cst_17 = arith.constant 0.000000e+00 : f32
      %22 = vector.broadcast %cst_17 : f32 to vector<128x64xf32>
      %23 = arith.maximumf %21, %22 : vector<128x64xf32>
      %24 = arith.truncf %23 : vector<128x64xf32> to vector<128x64xbf16>
      %c0_18 = arith.constant 0 : index
      %c0_19 = arith.constant 0 : index
      %25 = vector.load %arg6[%c0_18, %c0_19] : memref<128x64xbf16, #tpu.memory_space<vmem>>, vector<128x64xbf16>
      tpu.vector_store %arg6[%c0_18, %c0_19], %24 {strides = array<i32>} : memref<128x64xbf16, #tpu.memory_space<vmem>>, vector<128x64xbf16>,
    } else {
    }
    return
  }
  func.func @transform_0(%arg0: i32, %arg1: i32) -> (i32, i32) {
    %c0_i32 = arith.constant 0 : i32
    return %arg0, %arg1 : i32, i32
  }
  func.func @transform_1(%arg0: i32, %arg1: i32) -> (i32, i32) {
    %c0_i32 = arith.constant 0 : i32
    %c0_i32_0 = arith.constant 0 : i32
    return %arg1, %c0_i32 : i32, i32
  }
  func.func @transform_2(%arg0: i32, %arg1: i32) -> (i32, i32) {
    %c0_i32 = arith.constant 0 : i32
    %c0_i32_0 = arith.constant 0 : i32
    %c0_i32_1 = arith.constant 0 : i32
    return %c0_i32, %c0_i32_0 : i32, i32
  }
  func.func @transform_3(%arg0: i32, %arg1: i32) -> (i32, i32) {
    %c0_i32 = arith.constant 0 : i32
    %c0_i32_0 = arith.constant 0 : i32
    return %arg0, %c0_i32 : i32, i32
  }
  func.func @transform_4(%arg0: i32, %arg1: i32) -> (i32, i32) {
    %c0_i32 = arith.constant 0 : i32
    %c0_i32_0 = arith.constant 0 : i32
    return %arg0, %c0_i32 : i32, i32
  }
}

module attributes {stable_mosaic.version = 11 : i64} {
  func.func @kernel(%arg0: i32, %arg1: i32, %arg2: memref<32x576xbf16, #tpu.memory_space<vmem>>, %arg3: memref<576x128xbf16, #tpu.memory_space<vmem>>, %arg4: memref<2x128xf32, #tpu.memory_space<vmem>>, %arg5: memref<32x128xbf16, #tpu.memory_space<vmem>>, %arg6: memref<32x128xf32, #tpu.memory_space<vmem>>) attributes {dimension_semantics = [#tpu.dimension_semantics<parallel>, #tpu.dimension_semantics<arbitrary>], iteration_bounds = array<i64: 1, 1>, scalar_prefetch = 0 : i64, scratch_operands = 1 : i64, tpu.core_type = #tpu.core_type<tc>, window_params = [{transform_indices = @transform_0, window_bounds = array<i64: 32, 576>}, {transform_indices = @transform_1, window_bounds = array<i64: 576, 128>}, {pipeline_mode = #tpu.pipeline_mode<synchronous>, transform_indices = @transform_2, window_bounds = array<i64: 2, 128>}, {transform_indices = @transform_3, window_bounds = array<i64: 32, 128>}]} {
    %c0_i32 = arith.constant 0 : i32
    %0 = arith.cmpi eq, %arg1, %c0_i32 : i32
    %1 = arith.extui %0 : i1 to i32
    %c0_i32_0 = arith.constant 0 : i32
    %2 = arith.cmpi ne, %1, %c0_i32_0 : i32
    scf.if %2 {
      %cst_10 = arith.constant 0.000000e+00 : f32
      %12 = vector.broadcast %cst_10 : f32 to vector<32x128xf32>
      %c0_11 = arith.constant 0 : index
      %c0_12 = arith.constant 0 : index
      %13 = vector.load %arg6[%c0_11, %c0_12] : memref<32x128xf32, #tpu.memory_space<vmem>>, vector<32x128xf32>
      tpu.vector_store %arg6[%c0_11, %c0_12], %12 {strides = array<i32>} : memref<32x128xf32, #tpu.memory_space<vmem>>, vector<32x128xf32>,
    } else {
    }
    %c0 = arith.constant 0 : index
    %c0_1 = arith.constant 0 : index
    %3 = vector.load %arg6[%c0, %c0_1] : memref<32x128xf32, #tpu.memory_space<vmem>>, vector<32x128xf32>
    %c0_2 = arith.constant 0 : index
    %c0_3 = arith.constant 0 : index
    %4 = vector.load %arg2[%c0_2, %c0_3] : memref<32x576xbf16, #tpu.memory_space<vmem>>, vector<32x576xbf16>
    %c0_4 = arith.constant 0 : index
    %c0_5 = arith.constant 0 : index
    %5 = vector.load %arg3[%c0_4, %c0_5] : memref<576x128xbf16, #tpu.memory_space<vmem>>, vector<576x128xbf16>
    %cst = arith.constant dense<0.000000e+00> : vector<32x128xf32>
    %6 = tpu.matmul %4, %5, %cst {dimension_numbers = #tpu.dot_dimension_numbers<[1], [0], [0], [1], [0, 0, 1, 1], [], []>} : vector<32x576xbf16>, vector<576x128xbf16>, vector<32x128xf32> -> vector<32x128xf32>
    %7 = arith.addf %3, %6 : vector<32x128xf32>
    %c0_6 = arith.constant 0 : index
    %c0_7 = arith.constant 0 : index
    %8 = vector.load %arg6[%c0_6, %c0_7] : memref<32x128xf32, #tpu.memory_space<vmem>>, vector<32x128xf32>
    tpu.vector_store %arg6[%c0_6, %c0_7], %7 {strides = array<i32>} : memref<32x128xf32, #tpu.memory_space<vmem>>, vector<32x128xf32>,
    %c0_i32_8 = arith.constant 0 : i32
    %9 = arith.cmpi eq, %arg1, %c0_i32_8 : i32
    %10 = arith.extui %9 : i1 to i32
    %c0_i32_9 = arith.constant 0 : i32
    %11 = arith.cmpi ne, %10, %c0_i32_9 : i32
    scf.if %11 {
      %c0_10 = arith.constant 0 : index
      %c0_11 = arith.constant 0 : index
      %12 = vector.load %arg6[%c0_10, %c0_11] : memref<32x128xf32, #tpu.memory_space<vmem>>, vector<32x128xf32>
      %c0_12 = arith.constant 0 : index
      %c0_13 = arith.constant 0 : index
      %13 = vector.load %arg4[%c0_12, %c0_13] : memref<2x128xf32, #tpu.memory_space<vmem>>, vector<1x128xf32>
      %14 = vector.broadcast %13 : vector<1x128xf32> to vector<32x128xf32>
      %15 = arith.mulf %12, %14 : vector<32x128xf32>
      %c1 = arith.constant 1 : index
      %c0_14 = arith.constant 0 : index
      %16 = vector.load %arg4[%c1, %c0_14] : memref<2x128xf32, #tpu.memory_space<vmem>>, vector<1x128xf32>
      %17 = vector.broadcast %16 : vector<1x128xf32> to vector<32x128xf32>
      %18 = arith.addf %15, %17 : vector<32x128xf32>
      %cst_15 = arith.constant 0.000000e+00 : f32
      %19 = vector.broadcast %cst_15 : f32 to vector<32x128xf32>
      %20 = arith.maximumf %18, %19 : vector<32x128xf32>
      %21 = arith.truncf %20 : vector<32x128xf32> to vector<32x128xbf16>
      %c0_16 = arith.constant 0 : index
      %c0_17 = arith.constant 0 : index
      %22 = vector.load %arg5[%c0_16, %c0_17] : memref<32x128xbf16, #tpu.memory_space<vmem>>, vector<32x128xbf16>
      tpu.vector_store %arg5[%c0_16, %c0_17], %21 {strides = array<i32>} : memref<32x128xbf16, #tpu.memory_space<vmem>>, vector<32x128xbf16>,
    } else {
    }
    return
  }
  func.func @transform_0(%arg0: i32, %arg1: i32) -> (i32, i32) {
    %c0_i32 = arith.constant 0 : i32
    return %arg0, %arg1 : i32, i32
  }
  func.func @transform_1(%arg0: i32, %arg1: i32) -> (i32, i32) {
    %c0_i32 = arith.constant 0 : i32
    %c0_i32_0 = arith.constant 0 : i32
    return %arg1, %c0_i32 : i32, i32
  }
  func.func @transform_2(%arg0: i32, %arg1: i32) -> (i32, i32) {
    %c0_i32 = arith.constant 0 : i32
    %c0_i32_0 = arith.constant 0 : i32
    %c0_i32_1 = arith.constant 0 : i32
    return %c0_i32, %c0_i32_0 : i32, i32
  }
  func.func @transform_3(%arg0: i32, %arg1: i32) -> (i32, i32) {
    %c0_i32 = arith.constant 0 : i32
    %c0_i32_0 = arith.constant 0 : i32
    return %arg0, %c0_i32 : i32, i32
  }
}

module attributes {stable_mosaic.version = 11 : i64} {
  func.func @kernel(%arg0: i32, %arg1: i32, %arg2: memref<32x64xbf16, #tpu.memory_space<vmem>>, %arg3: memref<64x128xbf16, #tpu.memory_space<vmem>>, %arg4: memref<2x128xf32, #tpu.memory_space<vmem>>, %arg5: memref<32x128xbf16, #tpu.memory_space<vmem>>, %arg6: memref<32x128xf32, #tpu.memory_space<vmem>>) attributes {dimension_semantics = [#tpu.dimension_semantics<parallel>, #tpu.dimension_semantics<arbitrary>], iteration_bounds = array<i64: 1, 1>, scalar_prefetch = 0 : i64, scratch_operands = 1 : i64, tpu.core_type = #tpu.core_type<tc>, window_params = [{transform_indices = @transform_0, window_bounds = array<i64: 32, 64>}, {transform_indices = @transform_1, window_bounds = array<i64: 64, 128>}, {pipeline_mode = #tpu.pipeline_mode<synchronous>, transform_indices = @transform_2, window_bounds = array<i64: 2, 128>}, {transform_indices = @transform_3, window_bounds = array<i64: 32, 128>}]} {
    %c0_i32 = arith.constant 0 : i32
    %0 = arith.cmpi eq, %arg1, %c0_i32 : i32
    %1 = arith.extui %0 : i1 to i32
    %c0_i32_0 = arith.constant 0 : i32
    %2 = arith.cmpi ne, %1, %c0_i32_0 : i32
    scf.if %2 {
      %cst_10 = arith.constant 0.000000e+00 : f32
      %12 = vector.broadcast %cst_10 : f32 to vector<32x128xf32>
      %c0_11 = arith.constant 0 : index
      %c0_12 = arith.constant 0 : index
      %13 = vector.load %arg6[%c0_11, %c0_12] : memref<32x128xf32, #tpu.memory_space<vmem>>, vector<32x128xf32>
      tpu.vector_store %arg6[%c0_11, %c0_12], %12 {strides = array<i32>} : memref<32x128xf32, #tpu.memory_space<vmem>>, vector<32x128xf32>,
    } else {
    }
    %c0 = arith.constant 0 : index
    %c0_1 = arith.constant 0 : index
    %3 = vector.load %arg6[%c0, %c0_1] : memref<32x128xf32, #tpu.memory_space<vmem>>, vector<32x128xf32>
    %c0_2 = arith.constant 0 : index
    %c0_3 = arith.constant 0 : index
    %4 = vector.load %arg2[%c0_2, %c0_3] : memref<32x64xbf16, #tpu.memory_space<vmem>>, vector<32x64xbf16>
    %c0_4 = arith.constant 0 : index
    %c0_5 = arith.constant 0 : index
    %5 = vector.load %arg3[%c0_4, %c0_5] : memref<64x128xbf16, #tpu.memory_space<vmem>>, vector<64x128xbf16>
    %cst = arith.constant dense<0.000000e+00> : vector<32x128xf32>
    %6 = tpu.matmul %4, %5, %cst {dimension_numbers = #tpu.dot_dimension_numbers<[1], [0], [0], [1], [0, 0, 1, 1], [], []>} : vector<32x64xbf16>, vector<64x128xbf16>, vector<32x128xf32> -> vector<32x128xf32>
    %7 = arith.addf %3, %6 : vector<32x128xf32>
    %c0_6 = arith.constant 0 : index
    %c0_7 = arith.constant 0 : index
    %8 = vector.load %arg6[%c0_6, %c0_7] : memref<32x128xf32, #tpu.memory_space<vmem>>, vector<32x128xf32>
    tpu.vector_store %arg6[%c0_6, %c0_7], %7 {strides = array<i32>} : memref<32x128xf32, #tpu.memory_space<vmem>>, vector<32x128xf32>,
    %c0_i32_8 = arith.constant 0 : i32
    %9 = arith.cmpi eq, %arg1, %c0_i32_8 : i32
    %10 = arith.extui %9 : i1 to i32
    %c0_i32_9 = arith.constant 0 : i32
    %11 = arith.cmpi ne, %10, %c0_i32_9 : i32
    scf.if %11 {
      %c0_10 = arith.constant 0 : index
      %c0_11 = arith.constant 0 : index
      %12 = vector.load %arg6[%c0_10, %c0_11] : memref<32x128xf32, #tpu.memory_space<vmem>>, vector<32x128xf32>
      %c0_12 = arith.constant 0 : index
      %c0_13 = arith.constant 0 : index
      %13 = vector.load %arg4[%c0_12, %c0_13] : memref<2x128xf32, #tpu.memory_space<vmem>>, vector<1x128xf32>
      %14 = vector.broadcast %13 : vector<1x128xf32> to vector<32x128xf32>
      %15 = arith.mulf %12, %14 : vector<32x128xf32>
      %c1 = arith.constant 1 : index
      %c0_14 = arith.constant 0 : index
      %16 = vector.load %arg4[%c1, %c0_14] : memref<2x128xf32, #tpu.memory_space<vmem>>, vector<1x128xf32>
      %17 = vector.broadcast %16 : vector<1x128xf32> to vector<32x128xf32>
      %18 = arith.addf %15, %17 : vector<32x128xf32>
      %19 = arith.truncf %18 : vector<32x128xf32> to vector<32x128xbf16>
      %c0_15 = arith.constant 0 : index
      %c0_16 = arith.constant 0 : index
      %20 = vector.load %arg5[%c0_15, %c0_16] : memref<32x128xbf16, #tpu.memory_space<vmem>>, vector<32x128xbf16>
      tpu.vector_store %arg5[%c0_15, %c0_16], %19 {strides = array<i32>} : memref<32x128xbf16, #tpu.memory_space<vmem>>, vector<32x128xbf16>,
    } else {
    }
    return
  }
  func.func @transform_0(%arg0: i32, %arg1: i32) -> (i32, i32) {
    %c0_i32 = arith.constant 0 : i32
    return %arg0, %arg1 : i32, i32
  }
  func.func @transform_1(%arg0: i32, %arg1: i32) -> (i32, i32) {
    %c0_i32 = arith.constant 0 : i32
    %c0_i32_0 = arith.constant 0 : i32
    return %arg1, %c0_i32 : i32, i32
  }
  func.func @transform_2(%arg0: i32, %arg1: i32) -> (i32, i32) {
    %c0_i32 = arith.constant 0 : i32
    %c0_i32_0 = arith.constant 0 : i32
    %c0_i32_1 = arith.constant 0 : i32
    return %c0_i32, %c0_i32_0 : i32, i32
  }
  func.func @transform_3(%arg0: i32, %arg1: i32) -> (i32, i32) {
    %c0_i32 = arith.constant 0 : i32
    %c0_i32_0 = arith.constant 0 : i32
    return %arg0, %c0_i32 : i32, i32
  }
}

module attributes {stable_mosaic.version = 11 : i64} {
  func.func @kernel(%arg0: i32, %arg1: i32, %arg2: memref<32x384xbf16, #tpu.memory_space<vmem>>, %arg3: memref<384x128xbf16, #tpu.memory_space<vmem>>, %arg4: memref<2x128xf32, #tpu.memory_space<vmem>>, %arg5: memref<32x128xbf16, #tpu.memory_space<vmem>>, %arg6: memref<32x128xbf16, #tpu.memory_space<vmem>>, %arg7: memref<32x128xf32, #tpu.memory_space<vmem>>) attributes {dimension_semantics = [#tpu.dimension_semantics<parallel>, #tpu.dimension_semantics<arbitrary>], iteration_bounds = array<i64: 1, 3>, scalar_prefetch = 0 : i64, scratch_operands = 1 : i64, tpu.core_type = #tpu.core_type<tc>, window_params = [{transform_indices = @transform_0, window_bounds = array<i64: 32, 384>}, {transform_indices = @transform_1, window_bounds = array<i64: 384, 128>}, {pipeline_mode = #tpu.pipeline_mode<synchronous>, transform_indices = @transform_2, window_bounds = array<i64: 2, 128>}, {transform_indices = @transform_3, window_bounds = array<i64: 32, 128>}, {transform_indices = @transform_4, window_bounds = array<i64: 32, 128>}]} {
    %c0_i32 = arith.constant 0 : i32
    %0 = arith.cmpi eq, %arg1, %c0_i32 : i32
    %1 = arith.extui %0 : i1 to i32
    %c0_i32_0 = arith.constant 0 : i32
    %2 = arith.cmpi ne, %1, %c0_i32_0 : i32
    scf.if %2 {
      %cst_9 = arith.constant 0.000000e+00 : f32
      %12 = vector.broadcast %cst_9 : f32 to vector<32x128xf32>
      %c0_10 = arith.constant 0 : index
      %c0_11 = arith.constant 0 : index
      %13 = vector.load %arg7[%c0_10, %c0_11] : memref<32x128xf32, #tpu.memory_space<vmem>>, vector<32x128xf32>
      tpu.vector_store %arg7[%c0_10, %c0_11], %12 {strides = array<i32>} : memref<32x128xf32, #tpu.memory_space<vmem>>, vector<32x128xf32>,
    } else {
    }
    %c0 = arith.constant 0 : index
    %c0_1 = arith.constant 0 : index
    %3 = vector.load %arg7[%c0, %c0_1] : memref<32x128xf32, #tpu.memory_space<vmem>>, vector<32x128xf32>
    %c0_2 = arith.constant 0 : index
    %c0_3 = arith.constant 0 : index
    %4 = vector.load %arg2[%c0_2, %c0_3] : memref<32x384xbf16, #tpu.memory_space<vmem>>, vector<32x384xbf16>
    %c0_4 = arith.constant 0 : index
    %c0_5 = arith.constant 0 : index
    %5 = vector.load %arg3[%c0_4, %c0_5] : memref<384x128xbf16, #tpu.memory_space<vmem>>, vector<384x128xbf16>
    %cst = arith.constant dense<0.000000e+00> : vector<32x128xf32>
    %6 = tpu.matmul %4, %5, %cst {dimension_numbers = #tpu.dot_dimension_numbers<[1], [0], [0], [1], [0, 0, 1, 1], [], []>} : vector<32x384xbf16>, vector<384x128xbf16>, vector<32x128xf32> -> vector<32x128xf32>
    %7 = arith.addf %3, %6 : vector<32x128xf32>
    %c0_6 = arith.constant 0 : index
    %c0_7 = arith.constant 0 : index
    %8 = vector.load %arg7[%c0_6, %c0_7] : memref<32x128xf32, #tpu.memory_space<vmem>>, vector<32x128xf32>
    tpu.vector_store %arg7[%c0_6, %c0_7], %7 {strides = array<i32>} : memref<32x128xf32, #tpu.memory_space<vmem>>, vector<32x128xf32>,
    %c2_i32 = arith.constant 2 : i32
    %9 = arith.cmpi eq, %arg1, %c2_i32 : i32
    %10 = arith.extui %9 : i1 to i32
    %c0_i32_8 = arith.constant 0 : i32
    %11 = arith.cmpi ne, %10, %c0_i32_8 : i32
    scf.if %11 {
      %c0_9 = arith.constant 0 : index
      %c0_10 = arith.constant 0 : index
      %12 = vector.load %arg7[%c0_9, %c0_10] : memref<32x128xf32, #tpu.memory_space<vmem>>, vector<32x128xf32>
      %c0_11 = arith.constant 0 : index
      %c0_12 = arith.constant 0 : index
      %13 = vector.load %arg4[%c0_11, %c0_12] : memref<2x128xf32, #tpu.memory_space<vmem>>, vector<1x128xf32>
      %14 = vector.broadcast %13 : vector<1x128xf32> to vector<32x128xf32>
      %15 = arith.mulf %12, %14 : vector<32x128xf32>
      %c1 = arith.constant 1 : index
      %c0_13 = arith.constant 0 : index
      %16 = vector.load %arg4[%c1, %c0_13] : memref<2x128xf32, #tpu.memory_space<vmem>>, vector<1x128xf32>
      %17 = vector.broadcast %16 : vector<1x128xf32> to vector<32x128xf32>
      %18 = arith.addf %15, %17 : vector<32x128xf32>
      %c0_14 = arith.constant 0 : index
      %c0_15 = arith.constant 0 : index
      %19 = vector.load %arg5[%c0_14, %c0_15] : memref<32x128xbf16, #tpu.memory_space<vmem>>, vector<32x128xbf16>
      %20 = arith.extf %19 : vector<32x128xbf16> to vector<32x128xf32>
      %21 = arith.addf %18, %20 : vector<32x128xf32>
      %cst_16 = arith.constant 0.000000e+00 : f32
      %22 = vector.broadcast %cst_16 : f32 to vector<32x128xf32>
      %23 = arith.maximumf %21, %22 : vector<32x128xf32>
      %24 = arith.truncf %23 : vector<32x128xf32> to vector<32x128xbf16>
      %c0_17 = arith.constant 0 : index
      %c0_18 = arith.constant 0 : index
      %25 = vector.load %arg6[%c0_17, %c0_18] : memref<32x128xbf16, #tpu.memory_space<vmem>>, vector<32x128xbf16>
      tpu.vector_store %arg6[%c0_17, %c0_18], %24 {strides = array<i32>} : memref<32x128xbf16, #tpu.memory_space<vmem>>, vector<32x128xbf16>,
    } else {
    }
    return
  }
  func.func @transform_0(%arg0: i32, %arg1: i32) -> (i32, i32) {
    %c0_i32 = arith.constant 0 : i32
    return %arg0, %arg1 : i32, i32
  }
  func.func @transform_1(%arg0: i32, %arg1: i32) -> (i32, i32) {
    %c0_i32 = arith.constant 0 : i32
    %c0_i32_0 = arith.constant 0 : i32
    return %arg1, %c0_i32 : i32, i32
  }
  func.func @transform_2(%arg0: i32, %arg1: i32) -> (i32, i32) {
    %c0_i32 = arith.constant 0 : i32
    %c0_i32_0 = arith.constant 0 : i32
    %c0_i32_1 = arith.constant 0 : i32
    return %c0_i32, %c0_i32_0 : i32, i32
  }
  func.func @transform_3(%arg0: i32, %arg1: i32) -> (i32, i32) {
    %c0_i32 = arith.constant 0 : i32
    %c0_i32_0 = arith.constant 0 : i32
    return %arg0, %c0_i32 : i32, i32
  }
  func.func @transform_4(%arg0: i32, %arg1: i32) -> (i32, i32) {
    %c0_i32 = arith.constant 0 : i32
    %c0_i32_0 = arith.constant 0 : i32
    return %arg0, %c0_i32 : i32, i32
  }
}

module attributes {stable_mosaic.version = 11 : i64} {
  func.func @kernel(%arg0: i32, %arg1: i32, %arg2: memref<32x384xbf16, #tpu.memory_space<vmem>>, %arg3: memref<384x128xbf16, #tpu.memory_space<vmem>>, %arg4: memref<2x128xf32, #tpu.memory_space<vmem>>, %arg5: memref<32x128xbf16, #tpu.memory_space<vmem>>, %arg6: memref<32x128xf32, #tpu.memory_space<vmem>>) attributes {dimension_semantics = [#tpu.dimension_semantics<parallel>, #tpu.dimension_semantics<arbitrary>], iteration_bounds = array<i64: 1, 3>, scalar_prefetch = 0 : i64, scratch_operands = 1 : i64, tpu.core_type = #tpu.core_type<tc>, window_params = [{transform_indices = @transform_0, window_bounds = array<i64: 32, 384>}, {transform_indices = @transform_1, window_bounds = array<i64: 384, 128>}, {pipeline_mode = #tpu.pipeline_mode<synchronous>, transform_indices = @transform_2, window_bounds = array<i64: 2, 128>}, {transform_indices = @transform_3, window_bounds = array<i64: 32, 128>}]} {
    %c0_i32 = arith.constant 0 : i32
    %0 = arith.cmpi eq, %arg1, %c0_i32 : i32
    %1 = arith.extui %0 : i1 to i32
    %c0_i32_0 = arith.constant 0 : i32
    %2 = arith.cmpi ne, %1, %c0_i32_0 : i32
    scf.if %2 {
      %cst_9 = arith.constant 0.000000e+00 : f32
      %12 = vector.broadcast %cst_9 : f32 to vector<32x128xf32>
      %c0_10 = arith.constant 0 : index
      %c0_11 = arith.constant 0 : index
      %13 = vector.load %arg6[%c0_10, %c0_11] : memref<32x128xf32, #tpu.memory_space<vmem>>, vector<32x128xf32>
      tpu.vector_store %arg6[%c0_10, %c0_11], %12 {strides = array<i32>} : memref<32x128xf32, #tpu.memory_space<vmem>>, vector<32x128xf32>,
    } else {
    }
    %c0 = arith.constant 0 : index
    %c0_1 = arith.constant 0 : index
    %3 = vector.load %arg6[%c0, %c0_1] : memref<32x128xf32, #tpu.memory_space<vmem>>, vector<32x128xf32>
    %c0_2 = arith.constant 0 : index
    %c0_3 = arith.constant 0 : index
    %4 = vector.load %arg2[%c0_2, %c0_3] : memref<32x384xbf16, #tpu.memory_space<vmem>>, vector<32x384xbf16>
    %c0_4 = arith.constant 0 : index
    %c0_5 = arith.constant 0 : index
    %5 = vector.load %arg3[%c0_4, %c0_5] : memref<384x128xbf16, #tpu.memory_space<vmem>>, vector<384x128xbf16>
    %cst = arith.constant dense<0.000000e+00> : vector<32x128xf32>
    %6 = tpu.matmul %4, %5, %cst {dimension_numbers = #tpu.dot_dimension_numbers<[1], [0], [0], [1], [0, 0, 1, 1], [], []>} : vector<32x384xbf16>, vector<384x128xbf16>, vector<32x128xf32> -> vector<32x128xf32>
    %7 = arith.addf %3, %6 : vector<32x128xf32>
    %c0_6 = arith.constant 0 : index
    %c0_7 = arith.constant 0 : index
    %8 = vector.load %arg6[%c0_6, %c0_7] : memref<32x128xf32, #tpu.memory_space<vmem>>, vector<32x128xf32>
    tpu.vector_store %arg6[%c0_6, %c0_7], %7 {strides = array<i32>} : memref<32x128xf32, #tpu.memory_space<vmem>>, vector<32x128xf32>,
    %c2_i32 = arith.constant 2 : i32
    %9 = arith.cmpi eq, %arg1, %c2_i32 : i32
    %10 = arith.extui %9 : i1 to i32
    %c0_i32_8 = arith.constant 0 : i32
    %11 = arith.cmpi ne, %10, %c0_i32_8 : i32
    scf.if %11 {
      %c0_9 = arith.constant 0 : index
      %c0_10 = arith.constant 0 : index
      %12 = vector.load %arg6[%c0_9, %c0_10] : memref<32x128xf32, #tpu.memory_space<vmem>>, vector<32x128xf32>
      %c0_11 = arith.constant 0 : index
      %c0_12 = arith.constant 0 : index
      %13 = vector.load %arg4[%c0_11, %c0_12] : memref<2x128xf32, #tpu.memory_space<vmem>>, vector<1x128xf32>
      %14 = vector.broadcast %13 : vector<1x128xf32> to vector<32x128xf32>
      %15 = arith.mulf %12, %14 : vector<32x128xf32>
      %c1 = arith.constant 1 : index
      %c0_13 = arith.constant 0 : index
      %16 = vector.load %arg4[%c1, %c0_13] : memref<2x128xf32, #tpu.memory_space<vmem>>, vector<1x128xf32>
      %17 = vector.broadcast %16 : vector<1x128xf32> to vector<32x128xf32>
      %18 = arith.addf %15, %17 : vector<32x128xf32>
      %cst_14 = arith.constant 0.000000e+00 : f32
      %19 = vector.broadcast %cst_14 : f32 to vector<32x128xf32>
      %20 = arith.maximumf %18, %19 : vector<32x128xf32>
      %21 = arith.truncf %20 : vector<32x128xf32> to vector<32x128xbf16>
      %c0_15 = arith.constant 0 : index
      %c0_16 = arith.constant 0 : index
      %22 = vector.load %arg5[%c0_15, %c0_16] : memref<32x128xbf16, #tpu.memory_space<vmem>>, vector<32x128xbf16>
      tpu.vector_store %arg5[%c0_15, %c0_16], %21 {strides = array<i32>} : memref<32x128xbf16, #tpu.memory_space<vmem>>, vector<32x128xbf16>,
    } else {
    }
    return
  }
  func.func @transform_0(%arg0: i32, %arg1: i32) -> (i32, i32) {
    %c0_i32 = arith.constant 0 : i32
    return %arg0, %arg1 : i32, i32
  }
  func.func @transform_1(%arg0: i32, %arg1: i32) -> (i32, i32) {
    %c0_i32 = arith.constant 0 : i32
    %c0_i32_0 = arith.constant 0 : i32
    return %arg1, %c0_i32 : i32, i32
  }
  func.func @transform_2(%arg0: i32, %arg1: i32) -> (i32, i32) {
    %c0_i32 = arith.constant 0 : i32
    %c0_i32_0 = arith.constant 0 : i32
    %c0_i32_1 = arith.constant 0 : i32
    return %c0_i32, %c0_i32_0 : i32, i32
  }
  func.func @transform_3(%arg0: i32, %arg1: i32) -> (i32, i32) {
    %c0_i32 = arith.constant 0 : i32
    %c0_i32_0 = arith.constant 0 : i32
    return %arg0, %c0_i32 : i32, i32
  }
}

module attributes {stable_mosaic.version = 11 : i64} {
  func.func @kernel(%arg0: i32, %arg1: i32, %arg2: memref<16x384xbf16, #tpu.memory_space<vmem>>, %arg3: memref<384x256xbf16, #tpu.memory_space<vmem>>, %arg4: memref<2x256xf32, #tpu.memory_space<vmem>>, %arg5: memref<16x256xbf16, #tpu.memory_space<vmem>>, %arg6: memref<16x256xf32, #tpu.memory_space<vmem>>) attributes {dimension_semantics = [#tpu.dimension_semantics<parallel>, #tpu.dimension_semantics<arbitrary>], iteration_bounds = array<i64: 1, 3>, scalar_prefetch = 0 : i64, scratch_operands = 1 : i64, tpu.core_type = #tpu.core_type<tc>, window_params = [{transform_indices = @transform_0, window_bounds = array<i64: 16, 384>}, {transform_indices = @transform_1, window_bounds = array<i64: 384, 256>}, {pipeline_mode = #tpu.pipeline_mode<synchronous>, transform_indices = @transform_2, window_bounds = array<i64: 2, 256>}, {transform_indices = @transform_3, window_bounds = array<i64: 16, 256>}]} {
    %c0_i32 = arith.constant 0 : i32
    %0 = arith.cmpi eq, %arg1, %c0_i32 : i32
    %1 = arith.extui %0 : i1 to i32
    %c0_i32_0 = arith.constant 0 : i32
    %2 = arith.cmpi ne, %1, %c0_i32_0 : i32
    scf.if %2 {
      %cst_9 = arith.constant 0.000000e+00 : f32
      %12 = vector.broadcast %cst_9 : f32 to vector<16x256xf32>
      %c0_10 = arith.constant 0 : index
      %c0_11 = arith.constant 0 : index
      %13 = vector.load %arg6[%c0_10, %c0_11] : memref<16x256xf32, #tpu.memory_space<vmem>>, vector<16x256xf32>
      tpu.vector_store %arg6[%c0_10, %c0_11], %12 {strides = array<i32>} : memref<16x256xf32, #tpu.memory_space<vmem>>, vector<16x256xf32>,
    } else {
    }
    %c0 = arith.constant 0 : index
    %c0_1 = arith.constant 0 : index
    %3 = vector.load %arg6[%c0, %c0_1] : memref<16x256xf32, #tpu.memory_space<vmem>>, vector<16x256xf32>
    %c0_2 = arith.constant 0 : index
    %c0_3 = arith.constant 0 : index
    %4 = vector.load %arg2[%c0_2, %c0_3] : memref<16x384xbf16, #tpu.memory_space<vmem>>, vector<16x384xbf16>
    %c0_4 = arith.constant 0 : index
    %c0_5 = arith.constant 0 : index
    %5 = vector.load %arg3[%c0_4, %c0_5] : memref<384x256xbf16, #tpu.memory_space<vmem>>, vector<384x256xbf16>
    %cst = arith.constant dense<0.000000e+00> : vector<16x256xf32>
    %6 = tpu.matmul %4, %5, %cst {dimension_numbers = #tpu.dot_dimension_numbers<[1], [0], [0], [1], [0, 0, 1, 1], [], []>} : vector<16x384xbf16>, vector<384x256xbf16>, vector<16x256xf32> -> vector<16x256xf32>
    %7 = arith.addf %3, %6 : vector<16x256xf32>
    %c0_6 = arith.constant 0 : index
    %c0_7 = arith.constant 0 : index
    %8 = vector.load %arg6[%c0_6, %c0_7] : memref<16x256xf32, #tpu.memory_space<vmem>>, vector<16x256xf32>
    tpu.vector_store %arg6[%c0_6, %c0_7], %7 {strides = array<i32>} : memref<16x256xf32, #tpu.memory_space<vmem>>, vector<16x256xf32>,
    %c2_i32 = arith.constant 2 : i32
    %9 = arith.cmpi eq, %arg1, %c2_i32 : i32
    %10 = arith.extui %9 : i1 to i32
    %c0_i32_8 = arith.constant 0 : i32
    %11 = arith.cmpi ne, %10, %c0_i32_8 : i32
    scf.if %11 {
      %c0_9 = arith.constant 0 : index
      %c0_10 = arith.constant 0 : index
      %12 = vector.load %arg6[%c0_9, %c0_10] : memref<16x256xf32, #tpu.memory_space<vmem>>, vector<16x256xf32>
      %c0_11 = arith.constant 0 : index
      %c0_12 = arith.constant 0 : index
      %13 = vector.load %arg4[%c0_11, %c0_12] : memref<2x256xf32, #tpu.memory_space<vmem>>, vector<1x256xf32>
      %14 = vector.broadcast %13 : vector<1x256xf32> to vector<16x256xf32>
      %15 = arith.mulf %12, %14 : vector<16x256xf32>
      %c1 = arith.constant 1 : index
      %c0_13 = arith.constant 0 : index
      %16 = vector.load %arg4[%c1, %c0_13] : memref<2x256xf32, #tpu.memory_space<vmem>>, vector<1x256xf32>
      %17 = vector.broadcast %16 : vector<1x256xf32> to vector<16x256xf32>
      %18 = arith.addf %15, %17 : vector<16x256xf32>
      %cst_14 = arith.constant 0.000000e+00 : f32
      %19 = vector.broadcast %cst_14 : f32 to vector<16x256xf32>
      %20 = arith.maximumf %18, %19 : vector<16x256xf32>
      %21 = arith.truncf %20 : vector<16x256xf32> to vector<16x256xbf16>
      %c0_15 = arith.constant 0 : index
      %c0_16 = arith.constant 0 : index
      %22 = vector.load %arg5[%c0_15, %c0_16] : memref<16x256xbf16, #tpu.memory_space<vmem>>, vector<16x256xbf16>
      tpu.vector_store %arg5[%c0_15, %c0_16], %21 {strides = array<i32>} : memref<16x256xbf16, #tpu.memory_space<vmem>>, vector<16x256xbf16>,
    } else {
    }
    return
  }
  func.func @transform_0(%arg0: i32, %arg1: i32) -> (i32, i32) {
    %c0_i32 = arith.constant 0 : i32
    return %arg0, %arg1 : i32, i32
  }
  func.func @transform_1(%arg0: i32, %arg1: i32) -> (i32, i32) {
    %c0_i32 = arith.constant 0 : i32
    %c0_i32_0 = arith.constant 0 : i32
    return %arg1, %c0_i32 : i32, i32
  }
  func.func @transform_2(%arg0: i32, %arg1: i32) -> (i32, i32) {
    %c0_i32 = arith.constant 0 : i32
    %c0_i32_0 = arith.constant 0 : i32
    %c0_i32_1 = arith.constant 0 : i32
    return %c0_i32, %c0_i32_0 : i32, i32
  }
  func.func @transform_3(%arg0: i32, %arg1: i32) -> (i32, i32) {
    %c0_i32 = arith.constant 0 : i32
    %c0_i32_0 = arith.constant 0 : i32
    return %arg0, %c0_i32 : i32, i32
  }
}

module attributes {stable_mosaic.version = 11 : i64} {
  func.func @kernel(%arg0: i32, %arg1: i32, %arg2: memref<16x128xbf16, #tpu.memory_space<vmem>>, %arg3: memref<128x256xbf16, #tpu.memory_space<vmem>>, %arg4: memref<2x256xf32, #tpu.memory_space<vmem>>, %arg5: memref<16x256xbf16, #tpu.memory_space<vmem>>, %arg6: memref<16x256xf32, #tpu.memory_space<vmem>>) attributes {dimension_semantics = [#tpu.dimension_semantics<parallel>, #tpu.dimension_semantics<arbitrary>], iteration_bounds = array<i64: 1, 1>, scalar_prefetch = 0 : i64, scratch_operands = 1 : i64, tpu.core_type = #tpu.core_type<tc>, window_params = [{transform_indices = @transform_0, window_bounds = array<i64: 16, 128>}, {transform_indices = @transform_1, window_bounds = array<i64: 128, 256>}, {pipeline_mode = #tpu.pipeline_mode<synchronous>, transform_indices = @transform_2, window_bounds = array<i64: 2, 256>}, {transform_indices = @transform_3, window_bounds = array<i64: 16, 256>}]} {
    %c0_i32 = arith.constant 0 : i32
    %0 = arith.cmpi eq, %arg1, %c0_i32 : i32
    %1 = arith.extui %0 : i1 to i32
    %c0_i32_0 = arith.constant 0 : i32
    %2 = arith.cmpi ne, %1, %c0_i32_0 : i32
    scf.if %2 {
      %cst_10 = arith.constant 0.000000e+00 : f32
      %12 = vector.broadcast %cst_10 : f32 to vector<16x256xf32>
      %c0_11 = arith.constant 0 : index
      %c0_12 = arith.constant 0 : index
      %13 = vector.load %arg6[%c0_11, %c0_12] : memref<16x256xf32, #tpu.memory_space<vmem>>, vector<16x256xf32>
      tpu.vector_store %arg6[%c0_11, %c0_12], %12 {strides = array<i32>} : memref<16x256xf32, #tpu.memory_space<vmem>>, vector<16x256xf32>,
    } else {
    }
    %c0 = arith.constant 0 : index
    %c0_1 = arith.constant 0 : index
    %3 = vector.load %arg6[%c0, %c0_1] : memref<16x256xf32, #tpu.memory_space<vmem>>, vector<16x256xf32>
    %c0_2 = arith.constant 0 : index
    %c0_3 = arith.constant 0 : index
    %4 = vector.load %arg2[%c0_2, %c0_3] : memref<16x128xbf16, #tpu.memory_space<vmem>>, vector<16x128xbf16>
    %c0_4 = arith.constant 0 : index
    %c0_5 = arith.constant 0 : index
    %5 = vector.load %arg3[%c0_4, %c0_5] : memref<128x256xbf16, #tpu.memory_space<vmem>>, vector<128x256xbf16>
    %cst = arith.constant dense<0.000000e+00> : vector<16x256xf32>
    %6 = tpu.matmul %4, %5, %cst {dimension_numbers = #tpu.dot_dimension_numbers<[1], [0], [0], [1], [0, 0, 1, 1], [], []>} : vector<16x128xbf16>, vector<128x256xbf16>, vector<16x256xf32> -> vector<16x256xf32>
    %7 = arith.addf %3, %6 : vector<16x256xf32>
    %c0_6 = arith.constant 0 : index
    %c0_7 = arith.constant 0 : index
    %8 = vector.load %arg6[%c0_6, %c0_7] : memref<16x256xf32, #tpu.memory_space<vmem>>, vector<16x256xf32>
    tpu.vector_store %arg6[%c0_6, %c0_7], %7 {strides = array<i32>} : memref<16x256xf32, #tpu.memory_space<vmem>>, vector<16x256xf32>,
    %c0_i32_8 = arith.constant 0 : i32
    %9 = arith.cmpi eq, %arg1, %c0_i32_8 : i32
    %10 = arith.extui %9 : i1 to i32
    %c0_i32_9 = arith.constant 0 : i32
    %11 = arith.cmpi ne, %10, %c0_i32_9 : i32
    scf.if %11 {
      %c0_10 = arith.constant 0 : index
      %c0_11 = arith.constant 0 : index
      %12 = vector.load %arg6[%c0_10, %c0_11] : memref<16x256xf32, #tpu.memory_space<vmem>>, vector<16x256xf32>
      %c0_12 = arith.constant 0 : index
      %c0_13 = arith.constant 0 : index
      %13 = vector.load %arg4[%c0_12, %c0_13] : memref<2x256xf32, #tpu.memory_space<vmem>>, vector<1x256xf32>
      %14 = vector.broadcast %13 : vector<1x256xf32> to vector<16x256xf32>
      %15 = arith.mulf %12, %14 : vector<16x256xf32>
      %c1 = arith.constant 1 : index
      %c0_14 = arith.constant 0 : index
      %16 = vector.load %arg4[%c1, %c0_14] : memref<2x256xf32, #tpu.memory_space<vmem>>, vector<1x256xf32>
      %17 = vector.broadcast %16 : vector<1x256xf32> to vector<16x256xf32>
      %18 = arith.addf %15, %17 : vector<16x256xf32>
      %19 = arith.truncf %18 : vector<16x256xf32> to vector<16x256xbf16>
      %c0_15 = arith.constant 0 : index
      %c0_16 = arith.constant 0 : index
      %20 = vector.load %arg5[%c0_15, %c0_16] : memref<16x256xbf16, #tpu.memory_space<vmem>>, vector<16x256xbf16>
      tpu.vector_store %arg5[%c0_15, %c0_16], %19 {strides = array<i32>} : memref<16x256xbf16, #tpu.memory_space<vmem>>, vector<16x256xbf16>,
    } else {
    }
    return
  }
  func.func @transform_0(%arg0: i32, %arg1: i32) -> (i32, i32) {
    %c0_i32 = arith.constant 0 : i32
    return %arg0, %arg1 : i32, i32
  }
  func.func @transform_1(%arg0: i32, %arg1: i32) -> (i32, i32) {
    %c0_i32 = arith.constant 0 : i32
    %c0_i32_0 = arith.constant 0 : i32
    return %arg1, %c0_i32 : i32, i32
  }
  func.func @transform_2(%arg0: i32, %arg1: i32) -> (i32, i32) {
    %c0_i32 = arith.constant 0 : i32
    %c0_i32_0 = arith.constant 0 : i32
    %c0_i32_1 = arith.constant 0 : i32
    return %c0_i32, %c0_i32_0 : i32, i32
  }
  func.func @transform_3(%arg0: i32, %arg1: i32) -> (i32, i32) {
    %c0_i32 = arith.constant 0 : i32
    %c0_i32_0 = arith.constant 0 : i32
    return %arg0, %c0_i32 : i32, i32
  }
}

module attributes {stable_mosaic.version = 11 : i64} {
  func.func @kernel(%arg0: i32, %arg1: i32, %arg2: memref<16x384xbf16, #tpu.memory_space<vmem>>, %arg3: memref<384x256xbf16, #tpu.memory_space<vmem>>, %arg4: memref<2x256xf32, #tpu.memory_space<vmem>>, %arg5: memref<16x256xbf16, #tpu.memory_space<vmem>>, %arg6: memref<16x256xbf16, #tpu.memory_space<vmem>>, %arg7: memref<16x256xf32, #tpu.memory_space<vmem>>) attributes {dimension_semantics = [#tpu.dimension_semantics<parallel>, #tpu.dimension_semantics<arbitrary>], iteration_bounds = array<i64: 1, 6>, scalar_prefetch = 0 : i64, scratch_operands = 1 : i64, tpu.core_type = #tpu.core_type<tc>, window_params = [{transform_indices = @transform_0, window_bounds = array<i64: 16, 384>}, {transform_indices = @transform_1, window_bounds = array<i64: 384, 256>}, {pipeline_mode = #tpu.pipeline_mode<synchronous>, transform_indices = @transform_2, window_bounds = array<i64: 2, 256>}, {transform_indices = @transform_3, window_bounds = array<i64: 16, 256>}, {transform_indices = @transform_4, window_bounds = array<i64: 16, 256>}]} {
    %c0_i32 = arith.constant 0 : i32
    %0 = arith.cmpi eq, %arg1, %c0_i32 : i32
    %1 = arith.extui %0 : i1 to i32
    %c0_i32_0 = arith.constant 0 : i32
    %2 = arith.cmpi ne, %1, %c0_i32_0 : i32
    scf.if %2 {
      %cst_9 = arith.constant 0.000000e+00 : f32
      %12 = vector.broadcast %cst_9 : f32 to vector<16x256xf32>
      %c0_10 = arith.constant 0 : index
      %c0_11 = arith.constant 0 : index
      %13 = vector.load %arg7[%c0_10, %c0_11] : memref<16x256xf32, #tpu.memory_space<vmem>>, vector<16x256xf32>
      tpu.vector_store %arg7[%c0_10, %c0_11], %12 {strides = array<i32>} : memref<16x256xf32, #tpu.memory_space<vmem>>, vector<16x256xf32>,
    } else {
    }
    %c0 = arith.constant 0 : index
    %c0_1 = arith.constant 0 : index
    %3 = vector.load %arg7[%c0, %c0_1] : memref<16x256xf32, #tpu.memory_space<vmem>>, vector<16x256xf32>
    %c0_2 = arith.constant 0 : index
    %c0_3 = arith.constant 0 : index
    %4 = vector.load %arg2[%c0_2, %c0_3] : memref<16x384xbf16, #tpu.memory_space<vmem>>, vector<16x384xbf16>
    %c0_4 = arith.constant 0 : index
    %c0_5 = arith.constant 0 : index
    %5 = vector.load %arg3[%c0_4, %c0_5] : memref<384x256xbf16, #tpu.memory_space<vmem>>, vector<384x256xbf16>
    %cst = arith.constant dense<0.000000e+00> : vector<16x256xf32>
    %6 = tpu.matmul %4, %5, %cst {dimension_numbers = #tpu.dot_dimension_numbers<[1], [0], [0], [1], [0, 0, 1, 1], [], []>} : vector<16x384xbf16>, vector<384x256xbf16>, vector<16x256xf32> -> vector<16x256xf32>
    %7 = arith.addf %3, %6 : vector<16x256xf32>
    %c0_6 = arith.constant 0 : index
    %c0_7 = arith.constant 0 : index
    %8 = vector.load %arg7[%c0_6, %c0_7] : memref<16x256xf32, #tpu.memory_space<vmem>>, vector<16x256xf32>
    tpu.vector_store %arg7[%c0_6, %c0_7], %7 {strides = array<i32>} : memref<16x256xf32, #tpu.memory_space<vmem>>, vector<16x256xf32>,
    %c5_i32 = arith.constant 5 : i32
    %9 = arith.cmpi eq, %arg1, %c5_i32 : i32
    %10 = arith.extui %9 : i1 to i32
    %c0_i32_8 = arith.constant 0 : i32
    %11 = arith.cmpi ne, %10, %c0_i32_8 : i32
    scf.if %11 {
      %c0_9 = arith.constant 0 : index
      %c0_10 = arith.constant 0 : index
      %12 = vector.load %arg7[%c0_9, %c0_10] : memref<16x256xf32, #tpu.memory_space<vmem>>, vector<16x256xf32>
      %c0_11 = arith.constant 0 : index
      %c0_12 = arith.constant 0 : index
      %13 = vector.load %arg4[%c0_11, %c0_12] : memref<2x256xf32, #tpu.memory_space<vmem>>, vector<1x256xf32>
      %14 = vector.broadcast %13 : vector<1x256xf32> to vector<16x256xf32>
      %15 = arith.mulf %12, %14 : vector<16x256xf32>
      %c1 = arith.constant 1 : index
      %c0_13 = arith.constant 0 : index
      %16 = vector.load %arg4[%c1, %c0_13] : memref<2x256xf32, #tpu.memory_space<vmem>>, vector<1x256xf32>
      %17 = vector.broadcast %16 : vector<1x256xf32> to vector<16x256xf32>
      %18 = arith.addf %15, %17 : vector<16x256xf32>
      %c0_14 = arith.constant 0 : index
      %c0_15 = arith.constant 0 : index
      %19 = vector.load %arg5[%c0_14, %c0_15] : memref<16x256xbf16, #tpu.memory_space<vmem>>, vector<16x256xbf16>
      %20 = arith.extf %19 : vector<16x256xbf16> to vector<16x256xf32>
      %21 = arith.addf %18, %20 : vector<16x256xf32>
      %cst_16 = arith.constant 0.000000e+00 : f32
      %22 = vector.broadcast %cst_16 : f32 to vector<16x256xf32>
      %23 = arith.maximumf %21, %22 : vector<16x256xf32>
      %24 = arith.truncf %23 : vector<16x256xf32> to vector<16x256xbf16>
      %c0_17 = arith.constant 0 : index
      %c0_18 = arith.constant 0 : index
      %25 = vector.load %arg6[%c0_17, %c0_18] : memref<16x256xbf16, #tpu.memory_space<vmem>>, vector<16x256xbf16>
      tpu.vector_store %arg6[%c0_17, %c0_18], %24 {strides = array<i32>} : memref<16x256xbf16, #tpu.memory_space<vmem>>, vector<16x256xbf16>,
    } else {
    }
    return
  }
  func.func @transform_0(%arg0: i32, %arg1: i32) -> (i32, i32) {
    %c0_i32 = arith.constant 0 : i32
    return %arg0, %arg1 : i32, i32
  }
  func.func @transform_1(%arg0: i32, %arg1: i32) -> (i32, i32) {
    %c0_i32 = arith.constant 0 : i32
    %c0_i32_0 = arith.constant 0 : i32
    return %arg1, %c0_i32 : i32, i32
  }
  func.func @transform_2(%arg0: i32, %arg1: i32) -> (i32, i32) {
    %c0_i32 = arith.constant 0 : i32
    %c0_i32_0 = arith.constant 0 : i32
    %c0_i32_1 = arith.constant 0 : i32
    return %c0_i32, %c0_i32_0 : i32, i32
  }
  func.func @transform_3(%arg0: i32, %arg1: i32) -> (i32, i32) {
    %c0_i32 = arith.constant 0 : i32
    %c0_i32_0 = arith.constant 0 : i32
    return %arg0, %c0_i32 : i32, i32
  }
  func.func @transform_4(%arg0: i32, %arg1: i32) -> (i32, i32) {
    %c0_i32 = arith.constant 0 : i32
    %c0_i32_0 = arith.constant 0 : i32
    return %arg0, %c0_i32 : i32, i32
  }
}

module attributes {stable_mosaic.version = 11 : i64} {
  func.func @kernel(%arg0: i32, %arg1: i32, %arg2: memref<16x384xbf16, #tpu.memory_space<vmem>>, %arg3: memref<384x256xbf16, #tpu.memory_space<vmem>>, %arg4: memref<2x256xf32, #tpu.memory_space<vmem>>, %arg5: memref<16x256xbf16, #tpu.memory_space<vmem>>, %arg6: memref<16x256xf32, #tpu.memory_space<vmem>>) attributes {dimension_semantics = [#tpu.dimension_semantics<parallel>, #tpu.dimension_semantics<arbitrary>], iteration_bounds = array<i64: 1, 6>, scalar_prefetch = 0 : i64, scratch_operands = 1 : i64, tpu.core_type = #tpu.core_type<tc>, window_params = [{transform_indices = @transform_0, window_bounds = array<i64: 16, 384>}, {transform_indices = @transform_1, window_bounds = array<i64: 384, 256>}, {pipeline_mode = #tpu.pipeline_mode<synchronous>, transform_indices = @transform_2, window_bounds = array<i64: 2, 256>}, {transform_indices = @transform_3, window_bounds = array<i64: 16, 256>}]} {
    %c0_i32 = arith.constant 0 : i32
    %0 = arith.cmpi eq, %arg1, %c0_i32 : i32
    %1 = arith.extui %0 : i1 to i32
    %c0_i32_0 = arith.constant 0 : i32
    %2 = arith.cmpi ne, %1, %c0_i32_0 : i32
    scf.if %2 {
      %cst_9 = arith.constant 0.000000e+00 : f32
      %12 = vector.broadcast %cst_9 : f32 to vector<16x256xf32>
      %c0_10 = arith.constant 0 : index
      %c0_11 = arith.constant 0 : index
      %13 = vector.load %arg6[%c0_10, %c0_11] : memref<16x256xf32, #tpu.memory_space<vmem>>, vector<16x256xf32>
      tpu.vector_store %arg6[%c0_10, %c0_11], %12 {strides = array<i32>} : memref<16x256xf32, #tpu.memory_space<vmem>>, vector<16x256xf32>,
    } else {
    }
    %c0 = arith.constant 0 : index
    %c0_1 = arith.constant 0 : index
    %3 = vector.load %arg6[%c0, %c0_1] : memref<16x256xf32, #tpu.memory_space<vmem>>, vector<16x256xf32>
    %c0_2 = arith.constant 0 : index
    %c0_3 = arith.constant 0 : index
    %4 = vector.load %arg2[%c0_2, %c0_3] : memref<16x384xbf16, #tpu.memory_space<vmem>>, vector<16x384xbf16>
    %c0_4 = arith.constant 0 : index
    %c0_5 = arith.constant 0 : index
    %5 = vector.load %arg3[%c0_4, %c0_5] : memref<384x256xbf16, #tpu.memory_space<vmem>>, vector<384x256xbf16>
    %cst = arith.constant dense<0.000000e+00> : vector<16x256xf32>
    %6 = tpu.matmul %4, %5, %cst {dimension_numbers = #tpu.dot_dimension_numbers<[1], [0], [0], [1], [0, 0, 1, 1], [], []>} : vector<16x384xbf16>, vector<384x256xbf16>, vector<16x256xf32> -> vector<16x256xf32>
    %7 = arith.addf %3, %6 : vector<16x256xf32>
    %c0_6 = arith.constant 0 : index
    %c0_7 = arith.constant 0 : index
    %8 = vector.load %arg6[%c0_6, %c0_7] : memref<16x256xf32, #tpu.memory_space<vmem>>, vector<16x256xf32>
    tpu.vector_store %arg6[%c0_6, %c0_7], %7 {strides = array<i32>} : memref<16x256xf32, #tpu.memory_space<vmem>>, vector<16x256xf32>,
    %c5_i32 = arith.constant 5 : i32
    %9 = arith.cmpi eq, %arg1, %c5_i32 : i32
    %10 = arith.extui %9 : i1 to i32
    %c0_i32_8 = arith.constant 0 : i32
    %11 = arith.cmpi ne, %10, %c0_i32_8 : i32
    scf.if %11 {
      %c0_9 = arith.constant 0 : index
      %c0_10 = arith.constant 0 : index
      %12 = vector.load %arg6[%c0_9, %c0_10] : memref<16x256xf32, #tpu.memory_space<vmem>>, vector<16x256xf32>
      %c0_11 = arith.constant 0 : index
      %c0_12 = arith.constant 0 : index
      %13 = vector.load %arg4[%c0_11, %c0_12] : memref<2x256xf32, #tpu.memory_space<vmem>>, vector<1x256xf32>
      %14 = vector.broadcast %13 : vector<1x256xf32> to vector<16x256xf32>
      %15 = arith.mulf %12, %14 : vector<16x256xf32>
      %c1 = arith.constant 1 : index
      %c0_13 = arith.constant 0 : index
      %16 = vector.load %arg4[%c1, %c0_13] : memref<2x256xf32, #tpu.memory_space<vmem>>, vector<1x256xf32>
      %17 = vector.broadcast %16 : vector<1x256xf32> to vector<16x256xf32>
      %18 = arith.addf %15, %17 : vector<16x256xf32>
      %cst_14 = arith.constant 0.000000e+00 : f32
      %19 = vector.broadcast %cst_14 : f32 to vector<16x256xf32>
      %20 = arith.maximumf %18, %19 : vector<16x256xf32>
      %21 = arith.truncf %20 : vector<16x256xf32> to vector<16x256xbf16>
      %c0_15 = arith.constant 0 : index
      %c0_16 = arith.constant 0 : index
      %22 = vector.load %arg5[%c0_15, %c0_16] : memref<16x256xbf16, #tpu.memory_space<vmem>>, vector<16x256xbf16>
      tpu.vector_store %arg5[%c0_15, %c0_16], %21 {strides = array<i32>} : memref<16x256xbf16, #tpu.memory_space<vmem>>, vector<16x256xbf16>,
    } else {
    }
    return
  }
  func.func @transform_0(%arg0: i32, %arg1: i32) -> (i32, i32) {
    %c0_i32 = arith.constant 0 : i32
    return %arg0, %arg1 : i32, i32
  }
  func.func @transform_1(%arg0: i32, %arg1: i32) -> (i32, i32) {
    %c0_i32 = arith.constant 0 : i32
    %c0_i32_0 = arith.constant 0 : i32
    return %arg1, %c0_i32 : i32, i32
  }
  func.func @transform_2(%arg0: i32, %arg1: i32) -> (i32, i32) {
    %c0_i32 = arith.constant 0 : i32
    %c0_i32_0 = arith.constant 0 : i32
    %c0_i32_1 = arith.constant 0 : i32
    return %c0_i32, %c0_i32_0 : i32, i32
  }
  func.func @transform_3(%arg0: i32, %arg1: i32) -> (i32, i32) {
    %c0_i32 = arith.constant 0 : i32
    %c0_i32_0 = arith.constant 0 : i32
    return %arg0, %c0_i32 : i32, i32
  }
}

module attributes {stable_mosaic.version = 11 : i64} {
  func.func @kernel(%arg0: i32, %arg1: i32, %arg2: memref<16x384xbf16, #tpu.memory_space<vmem>>, %arg3: memref<384x512xbf16, #tpu.memory_space<vmem>>, %arg4: memref<2x512xf32, #tpu.memory_space<vmem>>, %arg5: memref<16x512xbf16, #tpu.memory_space<vmem>>, %arg6: memref<16x512xf32, #tpu.memory_space<vmem>>) attributes {dimension_semantics = [#tpu.dimension_semantics<parallel>, #tpu.dimension_semantics<arbitrary>], iteration_bounds = array<i64: 1, 6>, scalar_prefetch = 0 : i64, scratch_operands = 1 : i64, tpu.core_type = #tpu.core_type<tc>, window_params = [{transform_indices = @transform_0, window_bounds = array<i64: 16, 384>}, {transform_indices = @transform_1, window_bounds = array<i64: 384, 512>}, {pipeline_mode = #tpu.pipeline_mode<synchronous>, transform_indices = @transform_2, window_bounds = array<i64: 2, 512>}, {transform_indices = @transform_3, window_bounds = array<i64: 16, 512>}]} {
    %c0_i32 = arith.constant 0 : i32
    %0 = arith.cmpi eq, %arg1, %c0_i32 : i32
    %1 = arith.extui %0 : i1 to i32
    %c0_i32_0 = arith.constant 0 : i32
    %2 = arith.cmpi ne, %1, %c0_i32_0 : i32
    scf.if %2 {
      %cst_9 = arith.constant 0.000000e+00 : f32
      %12 = vector.broadcast %cst_9 : f32 to vector<16x512xf32>
      %c0_10 = arith.constant 0 : index
      %c0_11 = arith.constant 0 : index
      %13 = vector.load %arg6[%c0_10, %c0_11] : memref<16x512xf32, #tpu.memory_space<vmem>>, vector<16x512xf32>
      tpu.vector_store %arg6[%c0_10, %c0_11], %12 {strides = array<i32>} : memref<16x512xf32, #tpu.memory_space<vmem>>, vector<16x512xf32>,
    } else {
    }
    %c0 = arith.constant 0 : index
    %c0_1 = arith.constant 0 : index
    %3 = vector.load %arg6[%c0, %c0_1] : memref<16x512xf32, #tpu.memory_space<vmem>>, vector<16x512xf32>
    %c0_2 = arith.constant 0 : index
    %c0_3 = arith.constant 0 : index
    %4 = vector.load %arg2[%c0_2, %c0_3] : memref<16x384xbf16, #tpu.memory_space<vmem>>, vector<16x384xbf16>
    %c0_4 = arith.constant 0 : index
    %c0_5 = arith.constant 0 : index
    %5 = vector.load %arg3[%c0_4, %c0_5] : memref<384x512xbf16, #tpu.memory_space<vmem>>, vector<384x512xbf16>
    %cst = arith.constant dense<0.000000e+00> : vector<16x512xf32>
    %6 = tpu.matmul %4, %5, %cst {dimension_numbers = #tpu.dot_dimension_numbers<[1], [0], [0], [1], [0, 0, 1, 1], [], []>} : vector<16x384xbf16>, vector<384x512xbf16>, vector<16x512xf32> -> vector<16x512xf32>
    %7 = arith.addf %3, %6 : vector<16x512xf32>
    %c0_6 = arith.constant 0 : index
    %c0_7 = arith.constant 0 : index
    %8 = vector.load %arg6[%c0_6, %c0_7] : memref<16x512xf32, #tpu.memory_space<vmem>>, vector<16x512xf32>
    tpu.vector_store %arg6[%c0_6, %c0_7], %7 {strides = array<i32>} : memref<16x512xf32, #tpu.memory_space<vmem>>, vector<16x512xf32>,
    %c5_i32 = arith.constant 5 : i32
    %9 = arith.cmpi eq, %arg1, %c5_i32 : i32
    %10 = arith.extui %9 : i1 to i32
    %c0_i32_8 = arith.constant 0 : i32
    %11 = arith.cmpi ne, %10, %c0_i32_8 : i32
    scf.if %11 {
      %c0_9 = arith.constant 0 : index
      %c0_10 = arith.constant 0 : index
      %12 = vector.load %arg6[%c0_9, %c0_10] : memref<16x512xf32, #tpu.memory_space<vmem>>, vector<16x512xf32>
      %c0_11 = arith.constant 0 : index
      %c0_12 = arith.constant 0 : index
      %13 = vector.load %arg4[%c0_11, %c0_12] : memref<2x512xf32, #tpu.memory_space<vmem>>, vector<1x512xf32>
      %14 = vector.broadcast %13 : vector<1x512xf32> to vector<16x512xf32>
      %15 = arith.mulf %12, %14 : vector<16x512xf32>
      %c1 = arith.constant 1 : index
      %c0_13 = arith.constant 0 : index
      %16 = vector.load %arg4[%c1, %c0_13] : memref<2x512xf32, #tpu.memory_space<vmem>>, vector<1x512xf32>
      %17 = vector.broadcast %16 : vector<1x512xf32> to vector<16x512xf32>
      %18 = arith.addf %15, %17 : vector<16x512xf32>
      %cst_14 = arith.constant 0.000000e+00 : f32
      %19 = vector.broadcast %cst_14 : f32 to vector<16x512xf32>
      %20 = arith.maximumf %18, %19 : vector<16x512xf32>
      %21 = arith.truncf %20 : vector<16x512xf32> to vector<16x512xbf16>
      %c0_15 = arith.constant 0 : index
      %c0_16 = arith.constant 0 : index
      %22 = vector.load %arg5[%c0_15, %c0_16] : memref<16x512xbf16, #tpu.memory_space<vmem>>, vector<16x512xbf16>
      tpu.vector_store %arg5[%c0_15, %c0_16], %21 {strides = array<i32>} : memref<16x512xbf16, #tpu.memory_space<vmem>>, vector<16x512xbf16>,
    } else {
    }
    return
  }
  func.func @transform_0(%arg0: i32, %arg1: i32) -> (i32, i32) {
    %c0_i32 = arith.constant 0 : i32
    return %arg0, %arg1 : i32, i32
  }
  func.func @transform_1(%arg0: i32, %arg1: i32) -> (i32, i32) {
    %c0_i32 = arith.constant 0 : i32
    %c0_i32_0 = arith.constant 0 : i32
    return %arg1, %c0_i32 : i32, i32
  }
  func.func @transform_2(%arg0: i32, %arg1: i32) -> (i32, i32) {
    %c0_i32 = arith.constant 0 : i32
    %c0_i32_0 = arith.constant 0 : i32
    %c0_i32_1 = arith.constant 0 : i32
    return %c0_i32, %c0_i32_0 : i32, i32
  }
  func.func @transform_3(%arg0: i32, %arg1: i32) -> (i32, i32) {
    %c0_i32 = arith.constant 0 : i32
    %c0_i32_0 = arith.constant 0 : i32
    return %arg0, %c0_i32 : i32, i32
  }
}

module attributes {stable_mosaic.version = 11 : i64} {
  func.func @kernel(%arg0: i32, %arg1: i32, %arg2: memref<16x256xbf16, #tpu.memory_space<vmem>>, %arg3: memref<256x512xbf16, #tpu.memory_space<vmem>>, %arg4: memref<2x512xf32, #tpu.memory_space<vmem>>, %arg5: memref<16x512xbf16, #tpu.memory_space<vmem>>, %arg6: memref<16x512xf32, #tpu.memory_space<vmem>>) attributes {dimension_semantics = [#tpu.dimension_semantics<parallel>, #tpu.dimension_semantics<arbitrary>], iteration_bounds = array<i64: 1, 1>, scalar_prefetch = 0 : i64, scratch_operands = 1 : i64, tpu.core_type = #tpu.core_type<tc>, window_params = [{transform_indices = @transform_0, window_bounds = array<i64: 16, 256>}, {transform_indices = @transform_1, window_bounds = array<i64: 256, 512>}, {pipeline_mode = #tpu.pipeline_mode<synchronous>, transform_indices = @transform_2, window_bounds = array<i64: 2, 512>}, {transform_indices = @transform_3, window_bounds = array<i64: 16, 512>}]} {
    %c0_i32 = arith.constant 0 : i32
    %0 = arith.cmpi eq, %arg1, %c0_i32 : i32
    %1 = arith.extui %0 : i1 to i32
    %c0_i32_0 = arith.constant 0 : i32
    %2 = arith.cmpi ne, %1, %c0_i32_0 : i32
    scf.if %2 {
      %cst_10 = arith.constant 0.000000e+00 : f32
      %12 = vector.broadcast %cst_10 : f32 to vector<16x512xf32>
      %c0_11 = arith.constant 0 : index
      %c0_12 = arith.constant 0 : index
      %13 = vector.load %arg6[%c0_11, %c0_12] : memref<16x512xf32, #tpu.memory_space<vmem>>, vector<16x512xf32>
      tpu.vector_store %arg6[%c0_11, %c0_12], %12 {strides = array<i32>} : memref<16x512xf32, #tpu.memory_space<vmem>>, vector<16x512xf32>,
    } else {
    }
    %c0 = arith.constant 0 : index
    %c0_1 = arith.constant 0 : index
    %3 = vector.load %arg6[%c0, %c0_1] : memref<16x512xf32, #tpu.memory_space<vmem>>, vector<16x512xf32>
    %c0_2 = arith.constant 0 : index
    %c0_3 = arith.constant 0 : index
    %4 = vector.load %arg2[%c0_2, %c0_3] : memref<16x256xbf16, #tpu.memory_space<vmem>>, vector<16x256xbf16>
    %c0_4 = arith.constant 0 : index
    %c0_5 = arith.constant 0 : index
    %5 = vector.load %arg3[%c0_4, %c0_5] : memref<256x512xbf16, #tpu.memory_space<vmem>>, vector<256x512xbf16>
    %cst = arith.constant dense<0.000000e+00> : vector<16x512xf32>
    %6 = tpu.matmul %4, %5, %cst {dimension_numbers = #tpu.dot_dimension_numbers<[1], [0], [0], [1], [0, 0, 1, 1], [], []>} : vector<16x256xbf16>, vector<256x512xbf16>, vector<16x512xf32> -> vector<16x512xf32>
    %7 = arith.addf %3, %6 : vector<16x512xf32>
    %c0_6 = arith.constant 0 : index
    %c0_7 = arith.constant 0 : index
    %8 = vector.load %arg6[%c0_6, %c0_7] : memref<16x512xf32, #tpu.memory_space<vmem>>, vector<16x512xf32>
    tpu.vector_store %arg6[%c0_6, %c0_7], %7 {strides = array<i32>} : memref<16x512xf32, #tpu.memory_space<vmem>>, vector<16x512xf32>,
    %c0_i32_8 = arith.constant 0 : i32
    %9 = arith.cmpi eq, %arg1, %c0_i32_8 : i32
    %10 = arith.extui %9 : i1 to i32
    %c0_i32_9 = arith.constant 0 : i32
    %11 = arith.cmpi ne, %10, %c0_i32_9 : i32
    scf.if %11 {
      %c0_10 = arith.constant 0 : index
      %c0_11 = arith.constant 0 : index
      %12 = vector.load %arg6[%c0_10, %c0_11] : memref<16x512xf32, #tpu.memory_space<vmem>>, vector<16x512xf32>
      %c0_12 = arith.constant 0 : index
      %c0_13 = arith.constant 0 : index
      %13 = vector.load %arg4[%c0_12, %c0_13] : memref<2x512xf32, #tpu.memory_space<vmem>>, vector<1x512xf32>
      %14 = vector.broadcast %13 : vector<1x512xf32> to vector<16x512xf32>
      %15 = arith.mulf %12, %14 : vector<16x512xf32>
      %c1 = arith.constant 1 : index
      %c0_14 = arith.constant 0 : index
      %16 = vector.load %arg4[%c1, %c0_14] : memref<2x512xf32, #tpu.memory_space<vmem>>, vector<1x512xf32>
      %17 = vector.broadcast %16 : vector<1x512xf32> to vector<16x512xf32>
      %18 = arith.addf %15, %17 : vector<16x512xf32>
      %19 = arith.truncf %18 : vector<16x512xf32> to vector<16x512xbf16>
      %c0_15 = arith.constant 0 : index
      %c0_16 = arith.constant 0 : index
      %20 = vector.load %arg5[%c0_15, %c0_16] : memref<16x512xbf16, #tpu.memory_space<vmem>>, vector<16x512xbf16>
      tpu.vector_store %arg5[%c0_15, %c0_16], %19 {strides = array<i32>} : memref<16x512xbf16, #tpu.memory_space<vmem>>, vector<16x512xbf16>,
    } else {
    }
    return
  }
  func.func @transform_0(%arg0: i32, %arg1: i32) -> (i32, i32) {
    %c0_i32 = arith.constant 0 : i32
    return %arg0, %arg1 : i32, i32
  }
  func.func @transform_1(%arg0: i32, %arg1: i32) -> (i32, i32) {
    %c0_i32 = arith.constant 0 : i32
    %c0_i32_0 = arith.constant 0 : i32
    return %arg1, %c0_i32 : i32, i32
  }
  func.func @transform_2(%arg0: i32, %arg1: i32) -> (i32, i32) {
    %c0_i32 = arith.constant 0 : i32
    %c0_i32_0 = arith.constant 0 : i32
    %c0_i32_1 = arith.constant 0 : i32
    return %c0_i32, %c0_i32_0 : i32, i32
  }
  func.func @transform_3(%arg0: i32, %arg1: i32) -> (i32, i32) {
    %c0_i32 = arith.constant 0 : i32
    %c0_i32_0 = arith.constant 0 : i32
    return %arg0, %c0_i32 : i32, i32
  }
}

module attributes {stable_mosaic.version = 11 : i64} {
  func.func @kernel(%arg0: i32, %arg1: i32, %arg2: memref<16x512xbf16, #tpu.memory_space<vmem>>, %arg3: memref<512x512xbf16, #tpu.memory_space<vmem>>, %arg4: memref<2x512xf32, #tpu.memory_space<vmem>>, %arg5: memref<16x512xbf16, #tpu.memory_space<vmem>>, %arg6: memref<16x512xbf16, #tpu.memory_space<vmem>>, %arg7: memref<16x512xf32, #tpu.memory_space<vmem>>) attributes {dimension_semantics = [#tpu.dimension_semantics<parallel>, #tpu.dimension_semantics<arbitrary>], iteration_bounds = array<i64: 1, 9>, scalar_prefetch = 0 : i64, scratch_operands = 1 : i64, tpu.core_type = #tpu.core_type<tc>, window_params = [{transform_indices = @transform_0, window_bounds = array<i64: 16, 512>}, {transform_indices = @transform_1, window_bounds = array<i64: 512, 512>}, {pipeline_mode = #tpu.pipeline_mode<synchronous>, transform_indices = @transform_2, window_bounds = array<i64: 2, 512>}, {transform_indices = @transform_3, window_bounds = array<i64: 16, 512>}, {transform_indices = @transform_4, window_bounds = array<i64: 16, 512>}]} {
    %c0_i32 = arith.constant 0 : i32
    %0 = arith.cmpi eq, %arg1, %c0_i32 : i32
    %1 = arith.extui %0 : i1 to i32
    %c0_i32_0 = arith.constant 0 : i32
    %2 = arith.cmpi ne, %1, %c0_i32_0 : i32
    scf.if %2 {
      %cst_9 = arith.constant 0.000000e+00 : f32
      %12 = vector.broadcast %cst_9 : f32 to vector<16x512xf32>
      %c0_10 = arith.constant 0 : index
      %c0_11 = arith.constant 0 : index
      %13 = vector.load %arg7[%c0_10, %c0_11] : memref<16x512xf32, #tpu.memory_space<vmem>>, vector<16x512xf32>
      tpu.vector_store %arg7[%c0_10, %c0_11], %12 {strides = array<i32>} : memref<16x512xf32, #tpu.memory_space<vmem>>, vector<16x512xf32>,
    } else {
    }
    %c0 = arith.constant 0 : index
    %c0_1 = arith.constant 0 : index
    %3 = vector.load %arg7[%c0, %c0_1] : memref<16x512xf32, #tpu.memory_space<vmem>>, vector<16x512xf32>
    %c0_2 = arith.constant 0 : index
    %c0_3 = arith.constant 0 : index
    %4 = vector.load %arg2[%c0_2, %c0_3] : memref<16x512xbf16, #tpu.memory_space<vmem>>, vector<16x512xbf16>
    %c0_4 = arith.constant 0 : index
    %c0_5 = arith.constant 0 : index
    %5 = vector.load %arg3[%c0_4, %c0_5] : memref<512x512xbf16, #tpu.memory_space<vmem>>, vector<512x512xbf16>
    %cst = arith.constant dense<0.000000e+00> : vector<16x512xf32>
    %6 = tpu.matmul %4, %5, %cst {dimension_numbers = #tpu.dot_dimension_numbers<[1], [0], [0], [1], [0, 0, 1, 1], [], []>} : vector<16x512xbf16>, vector<512x512xbf16>, vector<16x512xf32> -> vector<16x512xf32>
    %7 = arith.addf %3, %6 : vector<16x512xf32>
    %c0_6 = arith.constant 0 : index
    %c0_7 = arith.constant 0 : index
    %8 = vector.load %arg7[%c0_6, %c0_7] : memref<16x512xf32, #tpu.memory_space<vmem>>, vector<16x512xf32>
    tpu.vector_store %arg7[%c0_6, %c0_7], %7 {strides = array<i32>} : memref<16x512xf32, #tpu.memory_space<vmem>>, vector<16x512xf32>,
    %c8_i32 = arith.constant 8 : i32
    %9 = arith.cmpi eq, %arg1, %c8_i32 : i32
    %10 = arith.extui %9 : i1 to i32
    %c0_i32_8 = arith.constant 0 : i32
    %11 = arith.cmpi ne, %10, %c0_i32_8 : i32
    scf.if %11 {
      %c0_9 = arith.constant 0 : index
      %c0_10 = arith.constant 0 : index
      %12 = vector.load %arg7[%c0_9, %c0_10] : memref<16x512xf32, #tpu.memory_space<vmem>>, vector<16x512xf32>
      %c0_11 = arith.constant 0 : index
      %c0_12 = arith.constant 0 : index
      %13 = vector.load %arg4[%c0_11, %c0_12] : memref<2x512xf32, #tpu.memory_space<vmem>>, vector<1x512xf32>
      %14 = vector.broadcast %13 : vector<1x512xf32> to vector<16x512xf32>
      %15 = arith.mulf %12, %14 : vector<16x512xf32>
      %c1 = arith.constant 1 : index
      %c0_13 = arith.constant 0 : index
      %16 = vector.load %arg4[%c1, %c0_13] : memref<2x512xf32, #tpu.memory_space<vmem>>, vector<1x512xf32>
      %17 = vector.broadcast %16 : vector<1x512xf32> to vector<16x512xf32>
      %18 = arith.addf %15, %17 : vector<16x512xf32>
      %c0_14 = arith.constant 0 : index
      %c0_15 = arith.constant 0 : index
      %19 = vector.load %arg5[%c0_14, %c0_15] : memref<16x512xbf16, #tpu.memory_space<vmem>>, vector<16x512xbf16>
      %20 = arith.extf %19 : vector<16x512xbf16> to vector<16x512xf32>
      %21 = arith.addf %18, %20 : vector<16x512xf32>
      %cst_16 = arith.constant 0.000000e+00 : f32
      %22 = vector.broadcast %cst_16 : f32 to vector<16x512xf32>
      %23 = arith.maximumf %21, %22 : vector<16x512xf32>
      %24 = arith.truncf %23 : vector<16x512xf32> to vector<16x512xbf16>
      %c0_17 = arith.constant 0 : index
      %c0_18 = arith.constant 0 : index
      %25 = vector.load %arg6[%c0_17, %c0_18] : memref<16x512xbf16, #tpu.memory_space<vmem>>, vector<16x512xbf16>
      tpu.vector_store %arg6[%c0_17, %c0_18], %24 {strides = array<i32>} : memref<16x512xbf16, #tpu.memory_space<vmem>>, vector<16x512xbf16>,
    } else {
    }
    return
  }
  func.func @transform_0(%arg0: i32, %arg1: i32) -> (i32, i32) {
    %c0_i32 = arith.constant 0 : i32
    return %arg0, %arg1 : i32, i32
  }
  func.func @transform_1(%arg0: i32, %arg1: i32) -> (i32, i32) {
    %c0_i32 = arith.constant 0 : i32
    %c0_i32_0 = arith.constant 0 : i32
    return %arg1, %c0_i32 : i32, i32
  }
  func.func @transform_2(%arg0: i32, %arg1: i32) -> (i32, i32) {
    %c0_i32 = arith.constant 0 : i32
    %c0_i32_0 = arith.constant 0 : i32
    %c0_i32_1 = arith.constant 0 : i32
    return %c0_i32, %c0_i32_0 : i32, i32
  }
  func.func @transform_3(%arg0: i32, %arg1: i32) -> (i32, i32) {
    %c0_i32 = arith.constant 0 : i32
    %c0_i32_0 = arith.constant 0 : i32
    return %arg0, %c0_i32 : i32, i32
  }
  func.func @transform_4(%arg0: i32, %arg1: i32) -> (i32, i32) {
    %c0_i32 = arith.constant 0 : i32
    %c0_i32_0 = arith.constant 0 : i32
    return %arg0, %c0_i32 : i32, i32
  }
}

module attributes {stable_mosaic.version = 11 : i64} {
  func.func @kernel(%arg0: i32, %arg1: i32, %arg2: memref<16x512xbf16, #tpu.memory_space<vmem>>, %arg3: memref<512x512xbf16, #tpu.memory_space<vmem>>, %arg4: memref<2x512xf32, #tpu.memory_space<vmem>>, %arg5: memref<16x512xbf16, #tpu.memory_space<vmem>>, %arg6: memref<16x512xf32, #tpu.memory_space<vmem>>) attributes {dimension_semantics = [#tpu.dimension_semantics<parallel>, #tpu.dimension_semantics<arbitrary>], iteration_bounds = array<i64: 1, 9>, scalar_prefetch = 0 : i64, scratch_operands = 1 : i64, tpu.core_type = #tpu.core_type<tc>, window_params = [{transform_indices = @transform_0, window_bounds = array<i64: 16, 512>}, {transform_indices = @transform_1, window_bounds = array<i64: 512, 512>}, {pipeline_mode = #tpu.pipeline_mode<synchronous>, transform_indices = @transform_2, window_bounds = array<i64: 2, 512>}, {transform_indices = @transform_3, window_bounds = array<i64: 16, 512>}]} {
    %c0_i32 = arith.constant 0 : i32
    %0 = arith.cmpi eq, %arg1, %c0_i32 : i32
    %1 = arith.extui %0 : i1 to i32
    %c0_i32_0 = arith.constant 0 : i32
    %2 = arith.cmpi ne, %1, %c0_i32_0 : i32
    scf.if %2 {
      %cst_9 = arith.constant 0.000000e+00 : f32
      %12 = vector.broadcast %cst_9 : f32 to vector<16x512xf32>
      %c0_10 = arith.constant 0 : index
      %c0_11 = arith.constant 0 : index
      %13 = vector.load %arg6[%c0_10, %c0_11] : memref<16x512xf32, #tpu.memory_space<vmem>>, vector<16x512xf32>
      tpu.vector_store %arg6[%c0_10, %c0_11], %12 {strides = array<i32>} : memref<16x512xf32, #tpu.memory_space<vmem>>, vector<16x512xf32>,
    } else {
    }
    %c0 = arith.constant 0 : index
    %c0_1 = arith.constant 0 : index
    %3 = vector.load %arg6[%c0, %c0_1] : memref<16x512xf32, #tpu.memory_space<vmem>>, vector<16x512xf32>
    %c0_2 = arith.constant 0 : index
    %c0_3 = arith.constant 0 : index
    %4 = vector.load %arg2[%c0_2, %c0_3] : memref<16x512xbf16, #tpu.memory_space<vmem>>, vector<16x512xbf16>
    %c0_4 = arith.constant 0 : index
    %c0_5 = arith.constant 0 : index
    %5 = vector.load %arg3[%c0_4, %c0_5] : memref<512x512xbf16, #tpu.memory_space<vmem>>, vector<512x512xbf16>
    %cst = arith.constant dense<0.000000e+00> : vector<16x512xf32>
    %6 = tpu.matmul %4, %5, %cst {dimension_numbers = #tpu.dot_dimension_numbers<[1], [0], [0], [1], [0, 0, 1, 1], [], []>} : vector<16x512xbf16>, vector<512x512xbf16>, vector<16x512xf32> -> vector<16x512xf32>
    %7 = arith.addf %3, %6 : vector<16x512xf32>
    %c0_6 = arith.constant 0 : index
    %c0_7 = arith.constant 0 : index
    %8 = vector.load %arg6[%c0_6, %c0_7] : memref<16x512xf32, #tpu.memory_space<vmem>>, vector<16x512xf32>
    tpu.vector_store %arg6[%c0_6, %c0_7], %7 {strides = array<i32>} : memref<16x512xf32, #tpu.memory_space<vmem>>, vector<16x512xf32>,
    %c8_i32 = arith.constant 8 : i32
    %9 = arith.cmpi eq, %arg1, %c8_i32 : i32
    %10 = arith.extui %9 : i1 to i32
    %c0_i32_8 = arith.constant 0 : i32
    %11 = arith.cmpi ne, %10, %c0_i32_8 : i32
    scf.if %11 {
      %c0_9 = arith.constant 0 : index
      %c0_10 = arith.constant 0 : index
      %12 = vector.load %arg6[%c0_9, %c0_10] : memref<16x512xf32, #tpu.memory_space<vmem>>, vector<16x512xf32>
      %c0_11 = arith.constant 0 : index
      %c0_12 = arith.constant 0 : index
      %13 = vector.load %arg4[%c0_11, %c0_12] : memref<2x512xf32, #tpu.memory_space<vmem>>, vector<1x512xf32>
      %14 = vector.broadcast %13 : vector<1x512xf32> to vector<16x512xf32>
      %15 = arith.mulf %12, %14 : vector<16x512xf32>
      %c1 = arith.constant 1 : index
      %c0_13 = arith.constant 0 : index
      %16 = vector.load %arg4[%c1, %c0_13] : memref<2x512xf32, #tpu.memory_space<vmem>>, vector<1x512xf32>
      %17 = vector.broadcast %16 : vector<1x512xf32> to vector<16x512xf32>
      %18 = arith.addf %15, %17 : vector<16x512xf32>
      %cst_14 = arith.constant 0.000000e+00 : f32
      %19 = vector.broadcast %cst_14 : f32 to vector<16x512xf32>
      %20 = arith.maximumf %18, %19 : vector<16x512xf32>
      %21 = arith.truncf %20 : vector<16x512xf32> to vector<16x512xbf16>
      %c0_15 = arith.constant 0 : index
      %c0_16 = arith.constant 0 : index
      %22 = vector.load %arg5[%c0_15, %c0_16] : memref<16x512xbf16, #tpu.memory_space<vmem>>, vector<16x512xbf16>
      tpu.vector_store %arg5[%c0_15, %c0_16], %21 {strides = array<i32>} : memref<16x512xbf16, #tpu.memory_space<vmem>>, vector<16x512xbf16>,
    } else {
    }
    return
  }
  func.func @transform_0(%arg0: i32, %arg1: i32) -> (i32, i32) {
    %c0_i32 = arith.constant 0 : i32
    return %arg0, %arg1 : i32, i32
  }
  func.func @transform_1(%arg0: i32, %arg1: i32) -> (i32, i32) {
    %c0_i32 = arith.constant 0 : i32
    %c0_i32_0 = arith.constant 0 : i32
    return %arg1, %c0_i32 : i32, i32
  }
  func.func @transform_2(%arg0: i32, %arg1: i32) -> (i32, i32) {
    %c0_i32 = arith.constant 0 : i32
    %c0_i32_0 = arith.constant 0 : i32
    %c0_i32_1 = arith.constant 0 : i32
    return %c0_i32, %c0_i32_0 : i32, i32
  }
  func.func @transform_3(%arg0: i32, %arg1: i32) -> (i32, i32) {
    %c0_i32 = arith.constant 0 : i32
    %c0_i32_0 = arith.constant 0 : i32
    return %arg0, %c0_i32 : i32, i32
  }
}

module attributes {stable_mosaic.version = 11 : i64} {
  func.func @_mean_over_axis1_kernel(%arg0: i32, %arg1: memref<2x1x512xbf16, #tpu.memory_space<vmem>>, %arg2: memref<2x512xf32, #tpu.memory_space<vmem>>) attributes {dimension_semantics = [#tpu.dimension_semantics<arbitrary>], iteration_bounds = array<i64: 1>, scalar_prefetch = 0 : i64, scratch_operands = 0 : i64, tpu.core_type = #tpu.core_type<tc>, window_params = [{pipeline_mode = #tpu.pipeline_mode<synchronous>, transform_indices = @transform_0, window_bounds = array<i64: 2, 1, 512>}, {pipeline_mode = #tpu.pipeline_mode<synchronous>, transform_indices = @transform_1, window_bounds = array<i64: 2, 512>}]} {
    %c0 = arith.constant 0 : index
    %c0_0 = arith.constant 0 : index
    %c0_1 = arith.constant 0 : index
    %0 = vector.load %arg1[%c0, %c0_0, %c0_1] : memref<2x1x512xbf16, #tpu.memory_space<vmem>>, vector<2x1x512xbf16>
    %1 = arith.extf %0 : vector<2x1x512xbf16> to vector<2x1x512xf32>
    %cst = arith.constant dense<0.000000e+00> : vector<2x512xf32>
    %2 = vector.multi_reduction <add>, %1, %cst [1] : vector<2x1x512xf32> to vector<2x512xf32>
    %cst_2 = arith.constant 1.000000e+00 : f32
    %3 = vector.broadcast %cst_2 : f32 to vector<2x512xf32>
    %4 = arith.divf %2, %3 : vector<2x512xf32>
    %c0_3 = arith.constant 0 : index
    %c0_4 = arith.constant 0 : index
    %5 = vector.load %arg2[%c0_3, %c0_4] : memref<2x512xf32, #tpu.memory_space<vmem>>, vector<2x512xf32>
    tpu.vector_store %arg2[%c0_3, %c0_4], %4 {strides = array<i32>} : memref<2x512xf32, #tpu.memory_space<vmem>>, vector<2x512xf32>,
    return
  }
  func.func @transform_0(%arg0: i32) -> (i32, i32, i32) {
    %c0_i32 = arith.constant 0 : i32
    %c0_i32_0 = arith.constant 0 : i32
    %c0_i32_1 = arith.constant 0 : i32
    %c0_i32_2 = arith.constant 0 : i32
    return %c0_i32, %c0_i32_0, %c0_i32_1 : i32, i32, i32
  }
  func.func @transform_1(%arg0: i32) -> (i32, i32) {
    %c0_i32 = arith.constant 0 : i32
    %c0_i32_0 = arith.constant 0 : i32
    %c0_i32_1 = arith.constant 0 : i32
    return %c0_i32, %c0_i32_0 : i32, i32
  }
}

</mosaic_0001>

<bundles_post_ra>
// kernel: pretrained_model_forward.21
= control target key start
LH: loop header
LB: loop body
LE: loop exit
PB: predicated region body
PF: predicated region fallthrough
CT: control target
= control target key end

     0   :  { %s1509_s12 = smov 0   ;;  %s1511_s13 = smov 0   ;;  %s1852_s0 = inlined_call_operand.vmem [shape: bf16[512,147], index: 0, kind: input, shape index: {}]   ;;  %s1853_s1 = inlined_call_operand.vmem [shape: bf16[147,64], index: 1, kind: input, shape index: {}]   ;;  %s1854_s2 = inlined_call_operand.vmem [shape: f32[2,64], index: 2, kind: input, shape index: {}]   ;;  %s1855_s3 = inlined_call_operand.vmem [shape: bf16[512,64], index: 3, kind: output, shape index: {}]  }
   0x1   :  { %s1513_s14 = smov 0  }
   0x2 LB: > { %s25_s15 = sadd.s32 1, %s1480_s13  ;;  %p1224_p0 = scmp.ge.s32.totalorder %s1484_s14, 1  ;;  %s1484_s14 = sphi %s1513_s14, %s13_s14   ;;  %s1480_s13 = sphi %s1511_s13, %s1857_s13   ;;  %s1476_s12 = sphi %s1509_s12, %s1856_s12  }
   0x3   : > { %p27_p1 = scmp.ge.s32.totalorder %s25_s15, 2  ;;  %p169_p2 = scmp.lt.s32.totalorder %s1484_s14, 3 }
   0x5   : > { %s1859_s15 = smov (%p27_p1, %s25_s15), 0  ;;  %p170_p3 = pnand %p1224_p0, %p169_p2 }
   0x6   : > { %s1225_s22 = sshll.u32 (!%p170_p3), %s1476_s12, 5 }
   0x7   : > { %173 = sbr.rel (%p170_p3) target bundleno = 326 (0x146), region = 32  ;;  %p205_p4 = scmp.lt.s32.totalorder (!%p170_p3), %s1225_s22, 63 }
   0xc   : > { %v1404_v0 = vld [vmem:[%s1853_s1 + $0x38] sm:$0xff]   ;;  %v1486_v1 = vmov 0   ;;  %v1405_v2 = vld [vmem:[%s1853_s1 + $0x30] sm:$0xff]   ;;  %v1406_v3 = vld [vmem:[%s1853_s1 + $0x28] sm:$0xff]   ;;  %s1861_s22 = smov (!%p205_p4, %s1225_s22), 63  ;;  %vm232_vm0 = vcmask 523264  }
   0xd   : > { %605 = vmatprep.subr.bf16.mxu0 %v1486_v1  ;;  %1357 = vmatprep.subr.bf16.mxu1 %v1486_v1  ;;  %v1407_v4 = vld [vmem:[%s1853_s1 + $0x20] sm:$0xff]   ;;  %s1324_s25 = sshll.u32 %s1861_s22, 3  ;;  %v1487_v5 = vmov 0.0   ;;  %v1408_v6 = vld [vmem:[%s1853_s1 + $0x18] sm:$0xff]   ;;  %vm549_vm1 = vcmask 154624   ;;  %v1409_v9 = vld [vmem:[%s1853_s1 + $0x10] sm:$0xff]  }
   0xe   : > { %606 = vmatpush1.bf16.msra.mxu0 %v1404_v0  ;;  %1367 = vmatpush1.bf16.msra.mxu1 %v1404_v0  ;;  %233 = vst.msk [vmem:[#allocation2] sm:$0xff] %vm232_vm0, %v1487_v5  ;;  %234 = vst.msk [vmem:[#allocation2 + $0x8] sm:$0xff] %vm232_vm0, %v1487_v5  ;;  %s1587_s28 = scalar_lea.vmem %s1852_s0, %s1324_s25  ;;  %vm598_vm2 = vcmask 1040384   ;;  %v1410_v10 = vld [vmem:[%s1853_s1 + $0x8] sm:$0xff]   ;;  %vm599_vm3 = vcmask 1041408   ;;  %v1488_v11 = vmov 65535  }
   0xf   : > { %607 = vmatprep.subr.bf16.mxu0 %v1486_v1  ;;  %1358 = vmatprep.subr.bf16.mxu1 %v1486_v1  ;;  %235 = vst.msk [vmem:[#allocation2 + $0x10] sm:$0xff] %vm232_vm0, %v1487_v5  ;;  %236 = vst.msk [vmem:[#allocation2 + $0x18] sm:$0xff] %vm232_vm0, %v1487_v5  ;;  %v1416_v7 = vld [vmem:[%s1587_s28 + $0x4] ss:$8 sps:$4 sm:$0xff]   ;;  %v600_v12 = vsel %vm598_vm2, 4294967295, %v1488_v11  ;;  %s1229_s21 = sshll.u32 %s1861_s22, 2 }
  0x10   : > { %237 = vst.msk [vmem:[#allocation2 + $0x20] sm:$0xff] %vm232_vm0, %v1487_v5  ;;  %238 = vst.msk [vmem:[#allocation2 + $0x28] sm:$0xff] %vm232_vm0, %v1487_v5  ;;  %v1419_v8 = vld [vmem:[%s1587_s28 + $0x84] ss:$8 sps:$4 sm:$0xff]   ;;  %1272 = vmatprep.mubr.msk.bf16.mxu0 %vm549_vm1, %v1416_v7  ;;  %v601_v15 = vsel %vm599_vm3, %v600_v12, 0  ;;  %s1695_s24 = scalar_lea.vmem %s1855_s3, %s1229_s21  ;;  %vm1100_vm4 = vcmask 519168  }
  0x11   : > { %239 = vst.msk [vmem:[#allocation2 + $0x30] sm:$0xff] %vm232_vm0, %v1487_v5  ;;  %240 = vst.msk [vmem:[#allocation2 + $0x38] sm:$0xff] %vm232_vm0, %v1487_v5  ;;  %1280 = vmatprep.mubr.msk.bf16.mxu1 %vm549_vm1, %v1419_v8  ;;  %v1411_v13 = vld [vmem:[%s1853_s1] sm:$0xff]   ;;  %v1412_v14 = vld [vmem:[%s1853_s1 + $0x48] ss:$0 sps:$4 sm:$0x33]  }
  0x12   : > { %608 = vmatpush1.bf16.msra.mxu0 %v1405_v2  ;;  %1368 = vmatpush1.bf16.msra.mxu1 %v1405_v2  ;;  %241 = vst.msk [vmem:[#allocation2 + $0x40] sm:$0xff] %vm232_vm0, %v1487_v5  ;;  %242 = vst.msk [vmem:[#allocation2 + $0x48] sm:$0xff] %vm232_vm0, %v1487_v5  ;;  %v603_v16 = vand.u32 %v1412_v14, %v601_v15  ;;  %v1413_v17 = vld [vmem:[%s1853_s1 + $0x40] sm:$0xff]   ;;  %v1420_v20 = vld [vmem:[%s1587_s28 + $0x14] ss:$8 sps:$4 sm:$0xff]  }
  0x13   : > { %609 = vmatprep.subr.bf16.mxu0 %v1486_v1  ;;  %1359 = vmatprep.subr.bf16.mxu1 %v1486_v1  ;;  %243 = vst.msk [vmem:[#allocation2 + $0x50] sm:$0xff] %vm232_vm0, %v1487_v5  ;;  %244 = vst.msk [vmem:[#allocation2 + $0x58] sm:$0xff] %vm232_vm0, %v1487_v5  ;;  %v1414_v18 = vld [vmem:[%s1587_s28] ss:$8 sps:$4 sm:$0xff]   ;;  %v1422_v21 = vld [vmem:[%s1587_s28 + $0x94] ss:$8 sps:$4 sm:$0xff]  }
  0x14   : > { %245 = vst.msk [vmem:[#allocation2 + $0x60] sm:$0xff] %vm232_vm0, %v1487_v5  ;;  %246 = vst.msk [vmem:[#allocation2 + $0x68] sm:$0xff] %vm232_vm0, %v1487_v5  ;;  %v1417_v19 = vld [vmem:[%s1587_s28 + $0x80] ss:$8 sps:$4 sm:$0xff]   ;;  %v1424_v22 = vld [vmem:[%s1587_s28 + $0x10] ss:$8 sps:$4 sm:$0xff]  }
  0x15   : > { %247 = vst.msk [vmem:[#allocation2 + $0x70] sm:$0xff] %vm232_vm0, %v1487_v5  ;;  %248 = vst.msk [vmem:[#allocation2 + $0x78] sm:$0xff] %vm232_vm0, %v1487_v5  ;;  %v1425_v23 = vld [vmem:[%s1587_s28 + $0x90] ss:$8 sps:$4 sm:$0xff]   ;;  %v1426_v24 = vld [vmem:[%s1587_s28 + $0x24] ss:$8 sps:$4 sm:$0xff]  }
  0x16   : > { %610 = vmatpush1.bf16.msra.mxu0 %v1406_v3  ;;  %1369 = vmatpush1.bf16.msra.mxu1 %v1406_v3  ;;  %249 = vst.msk [vmem:[#allocation2 + $0x80] sm:$0xff] %vm232_vm0, %v1487_v5  ;;  %250 = vst.msk [vmem:[#allocation2 + $0x88] sm:$0xff] %vm232_vm0, %v1487_v5  ;;  %v1428_v25 = vld [vmem:[%s1587_s28 + $0xa4] ss:$8 sps:$4 sm:$0xff]   ;;  %v1430_v26 = vld [vmem:[%s1587_s28 + $0x20] ss:$8 sps:$4 sm:$0xff]  }
  0x17   : > { %611 = vmatprep.subr.bf16.mxu0 %v1486_v1  ;;  %1360 = vmatprep.subr.bf16.mxu1 %v1486_v1  ;;  %251 = vst.msk [vmem:[#allocation2 + $0x90] sm:$0xff] %vm232_vm0, %v1487_v5  ;;  %252 = vst.msk [vmem:[#allocation2 + $0x98] sm:$0xff] %vm232_vm0, %v1487_v5  ;;  %v1431_v27 = vld [vmem:[%s1587_s28 + $0xa0] ss:$8 sps:$4 sm:$0xff]   ;;  %v1432_v28 = vld [vmem:[%s1587_s28 + $0x34] ss:$8 sps:$4 sm:$0xff]  }
  0x18   : > { %253 = vst.msk [vmem:[#allocation2 + $0xa0] sm:$0xff] %vm232_vm0, %v1487_v5  ;;  %254 = vst.msk [vmem:[#allocation2 + $0xa8] sm:$0xff] %vm232_vm0, %v1487_v5  ;;  %v1434_v29 = vld [vmem:[%s1587_s28 + $0xb4] ss:$8 sps:$4 sm:$0xff]   ;;  %v1436_v30 = vld [vmem:[%s1587_s28 + $0x30] ss:$8 sps:$4 sm:$0xff]  }
  0x19   : > { %255 = vst.msk [vmem:[#allocation2 + $0xb0] sm:$0xff] %vm232_vm0, %v1487_v5  ;;  %256 = vst.msk [vmem:[#allocation2 + $0xb8] sm:$0xff] %vm232_vm0, %v1487_v5  ;;  %v1437_v31 = vld [vmem:[%s1587_s28 + $0xb0] ss:$8 sps:$4 sm:$0xff]   ;;  %v1438_v32 = vld [vmem:[%s1587_s28 + $0x44] ss:$8 sps:$4 sm:$0xff]  }
  0x1a   : > { %257 = vst.msk [vmem:[#allocation2 + $0xc0] sm:$0xff] %vm232_vm0, %v1487_v5  ;;  %258 = vst.msk [vmem:[#allocation2 + $0xc8] sm:$0xff] %vm232_vm0, %v1487_v5  ;;  %612 = vmatpush1.bf16.msra.mxu0 %v1407_v4  ;;  %1370 = vmatpush1.bf16.msra.mxu1 %v1407_v4  ;;  %v1440_v33 = vld [vmem:[%s1587_s28 + $0xc4] ss:$8 sps:$4 sm:$0xff]   ;;  %v1442_v34 = vld [vmem:[%s1587_s28 + $0x40] ss:$8 sps:$4 sm:$0xff]  }
  0x1b   : > { %259 = vst.msk [vmem:[#allocation2 + $0xd0] sm:$0xff] %vm232_vm0, %v1487_v5  ;;  %260 = vst.msk [vmem:[#allocation2 + $0xd8] sm:$0xff] %vm232_vm0, %v1487_v5  ;;  %613 = vmatprep.subr.bf16.mxu0 %v1486_v1  ;;  %1361 = vmatprep.subr.bf16.mxu1 %v1486_v1  ;;  %v1443_v35 = vld [vmem:[%s1587_s28 + $0xc0] ss:$8 sps:$4 sm:$0xff]   ;;  %v1444_v36 = vld [vmem:[%s1587_s28 + $0x54] ss:$8 sps:$4 sm:$0xff]  }
  0x1c   : > { %261 = vst.msk [vmem:[#allocation2 + $0xe0] sm:$0xff] %vm232_vm0, %v1487_v5  ;;  %262 = vst.msk [vmem:[#allocation2 + $0xe8] sm:$0xff] %vm232_vm0, %v1487_v5  ;;  %v1446_v37 = vld [vmem:[%s1587_s28 + $0xd4] ss:$8 sps:$4 sm:$0xff]   ;;  %v1448_v38 = vld [vmem:[%s1587_s28 + $0x50] ss:$8 sps:$4 sm:$0xff]  }
  0x1d   : > { %263 = vst.msk [vmem:[#allocation2 + $0xf0] sm:$0xff] %vm232_vm0, %v1487_v5  ;;  %264 = vst.msk [vmem:[#allocation2 + $0xf8] sm:$0xff] %vm232_vm0, %v1487_v5  ;;  %v1449_v39 = vld [vmem:[%s1587_s28 + $0xd0] ss:$8 sps:$4 sm:$0xff]   ;;  %v1450_v40 = vld [vmem:[%s1587_s28 + $0x64] ss:$8 sps:$4 sm:$0xff]  }
  0x1e   : > { %614 = vmatpush1.bf16.msra.mxu0 %v1408_v6  ;;  %1371 = vmatpush1.bf16.msra.mxu1 %v1408_v6  ;;  %v1452_v41 = vld [vmem:[%s1587_s28 + $0xe4] ss:$8 sps:$4 sm:$0xff]   ;;  %v1454_v42 = vld [vmem:[%s1587_s28 + $0x60] ss:$8 sps:$4 sm:$0xff]   ;;  %v1456_v44 = vld [vmem:[%s1587_s28 + $0x74] ss:$8 sps:$4 sm:$0xff]  }
  0x1f   : > { %615 = vmatprep.subr.bf16.mxu0 %v1486_v1  ;;  %1362 = vmatprep.subr.bf16.mxu1 %v1486_v1  ;;  %v1455_v43 = vld [vmem:[%s1587_s28 + $0xe0] ss:$8 sps:$4 sm:$0xff]   ;;  %v1458_v45 = vld [vmem:[%s1587_s28 + $0xf4] ss:$8 sps:$4 sm:$0xff]   ;;  %v1460_v46 = vld [vmem:[%s1587_s28 + $0x70] ss:$8 sps:$4 sm:$0xff]  }
  0x20   : > { %v1461_v47 = vld [vmem:[%s1587_s28 + $0xf0] ss:$8 sps:$4 sm:$0xff]   ;;  %v265_v48 = vld [vmem:[#allocation2] sm:$0xff]  ;;  %v266_v56 = vld [vmem:[#allocation2 + $0x8] sm:$0xff] }
  0x21   : > { %v281_v49 = vld [vmem:[#allocation2 + $0x80] sm:$0xff]  ;;  %v282_v57 = vld [vmem:[#allocation2 + $0x88] sm:$0xff]  ;;  %v267_v0 = vld [vmem:[#allocation2 + $0x10] sm:$0xff] }
  0x22   : > { %616 = vmatpush1.bf16.msra.mxu0 %v1409_v9  ;;  %1372 = vmatpush1.bf16.msra.mxu1 %v1409_v9  ;;  %v1674_v2 = vld [vmem:[%s1854_s2] ss:$0 sm:$0xff]  ;;  %v1679_v5 = vld [vmem:[%s1854_s2 + $0x1] ss:$0 sm:$0xff]  ;;  %v268_v8 = vld [vmem:[#allocation2 + $0x18] sm:$0xff] }
  0x23   : > { %617 = vmatprep.subr.bf16.mxu0 %v1486_v1  ;;  %1363 = vmatprep.subr.bf16.mxu1 %v1486_v1 }
  0x26   : > { %618 = vmatpush1.bf16.msra.mxu0 %v1410_v10  ;;  %1373 = vmatpush1.bf16.msra.mxu1 %v1410_v10 }
  0x27   : > { %619 = vmatprep.subr.bf16.mxu0 %v1486_v1  ;;  %1364 = vmatprep.subr.bf16.mxu1 %v1486_v1 }
  0x2a   : > { %620 = vmatpush1.bf16.msra.mxu0 %v1411_v13  ;;  %1374 = vmatpush1.bf16.msra.mxu1 %v1411_v13  ;;  %v284_v13 = vld [vmem:[#allocation2 + $0x98] sm:$0xff] }
  0x2b   : > { %633 = vmatprep.subr.bf16.mxu0 %v1486_v1  ;;  %1365 = vmatprep.subr.bf16.mxu1 %v1486_v1 }
  0x2e   : > { %634 = vmatpush2.bf16.msra.mxu0 %v603_v16  ;;  %1375 = vmatpush2.bf16.msra.mxu1 %v603_v16 }
  0x2f   : > { %635 = vmatprep.subr.bf16.mxu0 %v1486_v1  ;;  %1366 = vmatprep.subr.bf16.mxu1 %v1486_v1  ;;  %v283_v1 = vld [vmem:[#allocation2 + $0x90] sm:$0xff] }
  0x32   : > { %636 = vmatpush2.bf16.msra.mxu0 %v1413_v17  ;;  %1376 = vmatpush2.bf16.msra.mxu1 %v1413_v17 }
  0x35   : > { %638 = vmatmul.mubr.bf16.vlgmr.msra.gmra.mxu0 %v1414_v18  ;;  %702 = vmatmul.mubr.bf16.vlgmr.msra.gmra.mxu1 %v1417_v19 }
  0x36   : > { %1273 = vmatprep.mubr.msk.bf16.mxu0 %vm549_vm1, %v1420_v20  ;;  %1281 = vmatprep.mubr.msk.bf16.mxu1 %vm549_vm1, %v1422_v21 }
  0x3d   : > { %646 = vmatmul.mubr.bf16.gmra.mxu0 %v1424_v22  ;;  %710 = vmatmul.mubr.bf16.gmra.mxu1 %v1425_v23 }
  0x3e   : > { %1274 = vmatprep.mubr.msk.bf16.mxu0 %vm549_vm1, %v1426_v24  ;;  %1282 = vmatprep.mubr.msk.bf16.mxu1 %vm549_vm1, %v1428_v25 }
  0x45   : > { %654 = vmatmul.mubr.bf16.gmra.mxu0 %v1430_v26  ;;  %718 = vmatmul.mubr.bf16.gmra.mxu1 %v1431_v27 }
  0x46   : > { %1275 = vmatprep.mubr.msk.bf16.mxu0 %vm549_vm1, %v1432_v28  ;;  %1283 = vmatprep.mubr.msk.bf16.mxu1 %vm549_vm1, %v1434_v29 }
  0x4d   : > { %662 = vmatmul.mubr.bf16.gmra.mxu0 %v1436_v30  ;;  %726 = vmatmul.mubr.bf16.gmra.mxu1 %v1437_v31  ;;  %v269_v30 = vld [vmem:[#allocation2 + $0x20] sm:$0xff] }
  0x4e   : > { %1276 = vmatprep.mubr.msk.bf16.mxu0 %vm549_vm1, %v1438_v32  ;;  %1284 = vmatprep.mubr.msk.bf16.mxu1 %vm549_vm1, %v1440_v33  ;;  %v285_v31 = vld [vmem:[#allocation2 + $0xa0] sm:$0xff] }
  0x55   : > { %670 = vmatmul.mubr.bf16.gmra.mxu0 %v1442_v34  ;;  %734 = vmatmul.mubr.bf16.gmra.mxu1 %v1443_v35 }
  0x56   : > { %1277 = vmatprep.mubr.msk.bf16.mxu0 %vm549_vm1, %v1444_v36  ;;  %1285 = vmatprep.mubr.msk.bf16.mxu1 %vm549_vm1, %v1446_v37 }
  0x5d   : > { %678 = vmatmul.mubr.bf16.gmra.mxu0 %v1448_v38  ;;  %742 = vmatmul.mubr.bf16.gmra.mxu1 %v1449_v39 }
  0x5e   : > { %1278 = vmatprep.mubr.msk.bf16.mxu0 %vm549_vm1, %v1450_v40  ;;  %1286 = vmatprep.mubr.msk.bf16.mxu1 %vm549_vm1, %v1452_v41 }
  0x65   : > { %686 = vmatmul.mubr.bf16.gmra.mxu0 %v1454_v42  ;;  %750 = vmatmul.mubr.bf16.gmra.mxu1 %v1455_v43 }
  0x66   : > { %1279 = vmatprep.mubr.msk.bf16.mxu0 %vm549_vm1, %v1456_v44  ;;  %1287 = vmatprep.mubr.msk.bf16.mxu1 %vm549_vm1, %v1458_v45 }
  0x6d   : > { %694 = vmatmul.mubr.bf16.gmra.mxu0 %v1460_v46  ;;  %758 = vmatmul.mubr.bf16.gmra.mxu1 %v1461_v47 }
  0xf5   : > { %v639_v50 = vpop.f32.mrf.mxu0  ;;  %v703_v51 = vpop.f32.mrf.mxu1 }
  0xf6   : > { %v766_v52 = vadd.f32 %v639_v50, %v265_v48  ;;  %v782_v53 = vadd.f32 %v703_v51, %v281_v49  ;;  %v270_v48 = vld [vmem:[#allocation2 + $0x28] sm:$0xff] }
  0xf7   : > { %v641_v54 = vpop.f32.mrf.mxu0  ;;  %v705_v55 = vpop.f32.mrf.mxu1  ;;  %v286_v49 = vld [vmem:[#allocation2 + $0xa8] sm:$0xff] }
  0xf8   : > { %799 = vst.msk [vmem:[#allocation2] sm:$0xff] %vm232_vm0, %v766_v52  ;;  %815 = vst.msk [vmem:[#allocation2 + $0x80] sm:$0xff] %vm232_vm0, %v782_v53 }
  0xf9   : > { %v642_v58 = vpop.f32.mrf.mxu0  ;;  %v706_v59 = vpop.f32.mrf.mxu1 }
  0xfa   : > { %v767_v60 = vadd.f32 %v642_v58, %v266_v56  ;;  %v783_v61 = vadd.f32 %v706_v59, %v282_v57 }
  0xfb   : > { %v644_v62 = vpop.f32.mrf.mxu0  ;;  %v708_v63 = vpop.f32.mrf.mxu1 }
  0xfc   : > { %800 = vst.msk [vmem:[#allocation2 + $0x8] sm:$0xff] %vm232_vm0, %v767_v60  ;;  %816 = vst.msk [vmem:[#allocation2 + $0x88] sm:$0xff] %vm232_vm0, %v783_v61 }
  0xfd   : > { %v647_v3 = vpop.f32.mrf.mxu0  ;;  %v711_v4 = vpop.f32.mrf.mxu1 }
  0xfe   : > { %v768_v6 = vadd.f32 %v647_v3, %v267_v0  ;;  %v784_v7 = vadd.f32 %v711_v4, %v283_v1  ;;  %v271_v3 = vld [vmem:[#allocation2 + $0x30] sm:$0xff] }
  0xff   : > { %v834_v9 = vld [vmem:[#allocation2] sm:$0xff]  ;;  %v649_v11 = vpop.f32.mrf.mxu0  ;;  %v713_v12 = vpop.f32.mrf.mxu1  ;;  %v287_v4 = vld [vmem:[#allocation2 + $0xb0] sm:$0xff] }
 0x100   : > { %v850_v10 = vld [vmem:[#allocation2 + $0x80] sm:$0xff]  ;;  %v871_v14 = vmul.f32 %v1674_v2, %v834_v9  ;;  %801 = vst.msk [vmem:[#allocation2 + $0x10] sm:$0xff] %vm232_vm0, %v768_v6  ;;  %817 = vst.msk [vmem:[#allocation2 + $0x90] sm:$0xff] %vm232_vm0, %v784_v7 }
 0x101   : > { %v887_v15 = vmul.f32 %v1674_v2, %v850_v10  ;;  %v650_v16 = vpop.f32.mrf.mxu0  ;;  %v714_v17 = vpop.f32.mrf.mxu1 }
 0x102   : > { %v908_v18 = vadd.f32 %v1679_v5, %v871_v14  ;;  %v769_v20 = vadd.f32 %v650_v16, %v268_v8  ;;  %v785_v21 = vadd.f32 %v714_v17, %v284_v13  ;;  %v272_v16 = vld [vmem:[#allocation2 + $0x38] sm:$0xff] }
 0x103   : > { %v924_v19 = vadd.f32 %v1679_v5, %v887_v15  ;;  %v835_v22 = vld [vmem:[#allocation2 + $0x8] sm:$0xff]  ;;  %v652_v24 = vpop.f32.mrf.mxu0  ;;  %v716_v25 = vpop.f32.mrf.mxu1  ;;  %v288_v17 = vld [vmem:[#allocation2 + $0xb8] sm:$0xff] }
 0x104   : > { %v851_v23 = vld [vmem:[#allocation2 + $0x88] sm:$0xff]  ;;  %v940_v26 = vmax.f32 %v908_v18, 0.0  ;;  %v872_v28 = vmul.f32 %v1674_v2, %v835_v22  ;;  %802 = vst.msk [vmem:[#allocation2 + $0x18] sm:$0xff] %vm232_vm0, %v769_v20  ;;  %818 = vst.msk [vmem:[#allocation2 + $0x98] sm:$0xff] %vm232_vm0, %v785_v21 }
 0x105   : > { %v956_v27 = vmax.f32 %v924_v19, 0.0  ;;  %v888_v29 = vmul.f32 %v1674_v2, %v851_v23  ;;  %v655_v32 = vpop.f32.mrf.mxu0  ;;  %v719_v33 = vpop.f32.mrf.mxu1 }
 0x106   : > { %v1325_v34 = vpack.c.bf16 %v940_v26, %v940_v26  ;;  %v909_v36 = vadd.f32 %v1679_v5, %v872_v28  ;;  %v770_v40 = vadd.f32 %v655_v32, %v269_v30  ;;  %v786_v41 = vadd.f32 %v719_v33, %v285_v31 }
 0x107   : > { %v1341_v35 = vpack.c.bf16 %v956_v27, %v956_v27  ;;  %v925_v37 = vadd.f32 %v1679_v5, %v888_v29  ;;  %v836_v38 = vld [vmem:[#allocation2 + $0x10] sm:$0xff]  ;;  %v657_v42 = vpop.f32.mrf.mxu0  ;;  %v721_v43 = vpop.f32.mrf.mxu1 }
 0x108   : > { %v852_v39 = vld [vmem:[#allocation2 + $0x90] sm:$0xff]  ;;  %1101 = vst.msk [vmem:[%s1695_s24] sm:$0xf] %vm1100_vm4, %v1325_v34  ;;  %v941_v44 = vmax.f32 %v909_v36, 0.0  ;;  %v873_v46 = vmul.f32 %v1674_v2, %v836_v38  ;;  %v273_v34 = vld [vmem:[#allocation2 + $0x40] sm:$0xff] }
 0x109   : > { %1117 = vst.msk [vmem:[%s1695_s24 + $0x40] sm:$0xf] %vm1100_vm4, %v1341_v35  ;;  %v957_v45 = vmax.f32 %v925_v37, 0.0  ;;  %v889_v47 = vmul.f32 %v1674_v2, %v852_v39  ;;  %v658_v50 = vpop.f32.mrf.mxu0  ;;  %v722_v51 = vpop.f32.mrf.mxu1  ;;  %v289_v35 = vld [vmem:[#allocation2 + $0xc0] sm:$0xff] }
 0x10a   : > { %803 = vst.msk [vmem:[#allocation2 + $0x20] sm:$0xff] %vm232_vm0, %v770_v40  ;;  %819 = vst.msk [vmem:[#allocation2 + $0xa0] sm:$0xff] %vm232_vm0, %v786_v41  ;;  %v1326_v52 = vpack.c.bf16 %v941_v44, %v941_v44  ;;  %v910_v54 = vadd.f32 %v1679_v5, %v873_v46  ;;  %v771_v58 = vadd.f32 %v658_v50, %v270_v48 }
 0x10b   : > { %v1342_v53 = vpack.c.bf16 %v957_v45, %v957_v45  ;;  %v926_v55 = vadd.f32 %v1679_v5, %v889_v47  ;;  %v837_v56 = vld [vmem:[#allocation2 + $0x18] sm:$0xff]  ;;  %v787_v59 = vadd.f32 %v722_v51, %v286_v49  ;;  %v660_v60 = vpop.f32.mrf.mxu0  ;;  %v724_v61 = vpop.f32.mrf.mxu1 }
 0x10c   : > { %v853_v57 = vld [vmem:[#allocation2 + $0x98] sm:$0xff]  ;;  %1102 = vst.msk [vmem:[%s1695_s24 + $0x4] sm:$0xf] %vm1100_vm4, %v1326_v52  ;;  %v942_v62 = vmax.f32 %v910_v54, 0.0  ;;  %v874_v0 = vmul.f32 %v1674_v2, %v837_v56  ;;  %v274_v52 = vld [vmem:[#allocation2 + $0x48] sm:$0xff] }
 0x10d   : > { %1118 = vst.msk [vmem:[%s1695_s24 + $0x44] sm:$0xf] %vm1100_vm4, %v1342_v53  ;;  %v958_v63 = vmax.f32 %v926_v55, 0.0  ;;  %v890_v1 = vmul.f32 %v1674_v2, %v853_v57  ;;  %v663_v6 = vpop.f32.mrf.mxu0  ;;  %v727_v7 = vpop.f32.mrf.mxu1  ;;  %v290_v53 = vld [vmem:[#allocation2 + $0xc8] sm:$0xff] }
 0x10e   : > { %804 = vst.msk [vmem:[#allocation2 + $0x28] sm:$0xff] %vm232_vm0, %v771_v58  ;;  %820 = vst.msk [vmem:[#allocation2 + $0xa8] sm:$0xff] %vm232_vm0, %v787_v59  ;;  %v1327_v8 = vpack.c.bf16 %v942_v62, %v942_v62  ;;  %v911_v10 = vadd.f32 %v1679_v5, %v874_v0  ;;  %v772_v12 = vadd.f32 %v663_v6, %v271_v3  ;;  %v275_v0 = vld [vmem:[#allocation2 + $0x50] sm:$0xff] }
 0x10f   : > { %v1343_v9 = vpack.c.bf16 %v958_v63, %v958_v63  ;;  %v927_v11 = vadd.f32 %v1679_v5, %v890_v1  ;;  %v788_v13 = vadd.f32 %v727_v7, %v287_v4  ;;  %v665_v14 = vpop.f32.mrf.mxu0  ;;  %v729_v15 = vpop.f32.mrf.mxu1 }
 0x110   : > { %1103 = vst.msk [vmem:[%s1695_s24 + $0x8] sm:$0xf] %vm1100_vm4, %v1327_v8  ;;  %v943_v18 = vmax.f32 %v911_v10, 0.0 }
 0x111   : > { %1119 = vst.msk [vmem:[%s1695_s24 + $0x48] sm:$0xf] %vm1100_vm4, %v1343_v9  ;;  %v959_v19 = vmax.f32 %v927_v11, 0.0  ;;  %v838_v20 = vld [vmem:[#allocation2 + $0x20] sm:$0xff]  ;;  %v666_v24 = vpop.f32.mrf.mxu0  ;;  %v730_v25 = vpop.f32.mrf.mxu1  ;;  %v291_v11 = vld [vmem:[#allocation2 + $0xd0] sm:$0xff] }
 0x112   : > { %v854_v21 = vld [vmem:[#allocation2 + $0xa0] sm:$0xff]  ;;  %v875_v22 = vmul.f32 %v1674_v2, %v838_v20  ;;  %805 = vst.msk [vmem:[#allocation2 + $0x30] sm:$0xff] %vm232_vm0, %v772_v12  ;;  %821 = vst.msk [vmem:[#allocation2 + $0xb0] sm:$0xff] %vm232_vm0, %v788_v13  ;;  %v1328_v26 = vpack.c.bf16 %v943_v18, %v943_v18  ;;  %v773_v28 = vadd.f32 %v666_v24, %v272_v16 }
 0x113   : > { %v891_v23 = vmul.f32 %v1674_v2, %v854_v21  ;;  %v1344_v27 = vpack.c.bf16 %v959_v19, %v959_v19  ;;  %v789_v29 = vadd.f32 %v730_v25, %v288_v17  ;;  %v668_v32 = vpop.f32.mrf.mxu0  ;;  %v732_v33 = vpop.f32.mrf.mxu1 }
 0x114   : > { %v912_v30 = vadd.f32 %v1679_v5, %v875_v22  ;;  %1104 = vst.msk [vmem:[%s1695_s24 + $0xc] sm:$0xf] %vm1100_vm4, %v1328_v26  ;;  %v276_v32 = vld [vmem:[#allocation2 + $0x58] sm:$0xff] }
 0x115   : > { %v928_v31 = vadd.f32 %v1679_v5, %v891_v23  ;;  %1120 = vst.msk [vmem:[%s1695_s24 + $0x4c] sm:$0xf] %vm1100_vm4, %v1344_v27  ;;  %v839_v36 = vld [vmem:[#allocation2 + $0x28] sm:$0xff]  ;;  %v671_v42 = vpop.f32.mrf.mxu0  ;;  %v735_v43 = vpop.f32.mrf.mxu1  ;;  %v292_v33 = vld [vmem:[#allocation2 + $0xd8] sm:$0xff] }
 0x116   : > { %v855_v37 = vld [vmem:[#allocation2 + $0xa8] sm:$0xff]  ;;  %806 = vst.msk [vmem:[#allocation2 + $0x38] sm:$0xff] %vm232_vm0, %v773_v28  ;;  %822 = vst.msk [vmem:[#allocation2 + $0xb8] sm:$0xff] %vm232_vm0, %v789_v29  ;;  %v944_v38 = vmax.f32 %v912_v30, 0.0  ;;  %v876_v40 = vmul.f32 %v1674_v2, %v839_v36  ;;  %v774_v44 = vadd.f32 %v671_v42, %v273_v34  ;;  %v790_v45 = vadd.f32 %v735_v43, %v289_v35 }
 0x117   : > { %v960_v39 = vmax.f32 %v928_v31, 0.0  ;;  %v892_v41 = vmul.f32 %v1674_v2, %v855_v37  ;;  %v673_v50 = vpop.f32.mrf.mxu0  ;;  %v737_v51 = vpop.f32.mrf.mxu1 }
 0x118   : > { %v1329_v46 = vpack.c.bf16 %v944_v38, %v944_v38  ;;  %v913_v48 = vadd.f32 %v1679_v5, %v876_v40  ;;  %807 = vst.msk [vmem:[#allocation2 + $0x40] sm:$0xff] %vm232_vm0, %v774_v44  ;;  %823 = vst.msk [vmem:[#allocation2 + $0xc0] sm:$0xff] %vm232_vm0, %v790_v45  ;;  %v277_v50 = vld [vmem:[#allocation2 + $0x60] sm:$0xff] }
 0x119   : > { %v1345_v47 = vpack.c.bf16 %v960_v39, %v960_v39  ;;  %v929_v49 = vadd.f32 %v1679_v5, %v892_v41  ;;  %v840_v54 = vld [vmem:[#allocation2 + $0x30] sm:$0xff]  ;;  %v674_v60 = vpop.f32.mrf.mxu0  ;;  %v738_v61 = vpop.f32.mrf.mxu1  ;;  %v293_v51 = vld [vmem:[#allocation2 + $0xe0] sm:$0xff] }
 0x11a   : > { %v856_v55 = vld [vmem:[#allocation2 + $0xb0] sm:$0xff]  ;;  %1105 = vst.msk [vmem:[%s1695_s24 + $0x10] sm:$0xf] %vm1100_vm4, %v1329_v46  ;;  %v945_v56 = vmax.f32 %v913_v48, 0.0  ;;  %v877_v58 = vmul.f32 %v1674_v2, %v840_v54  ;;  %v775_v62 = vadd.f32 %v674_v60, %v274_v52  ;;  %v791_v63 = vadd.f32 %v738_v61, %v290_v53 }
 0x11b   : > { %1121 = vst.msk [vmem:[%s1695_s24 + $0x50] sm:$0xf] %vm1100_vm4, %v1345_v47  ;;  %v961_v57 = vmax.f32 %v929_v49, 0.0  ;;  %v893_v59 = vmul.f32 %v1674_v2, %v856_v55  ;;  %v676_v9 = vpop.f32.mrf.mxu0  ;;  %v740_v10 = vpop.f32.mrf.mxu1 }
 0x11c   : > { %v1330_v1 = vpack.c.bf16 %v945_v56, %v945_v56  ;;  %v914_v4 = vadd.f32 %v1679_v5, %v877_v58  ;;  %808 = vst.msk [vmem:[#allocation2 + $0x48] sm:$0xff] %vm232_vm0, %v775_v62  ;;  %824 = vst.msk [vmem:[#allocation2 + $0xc8] sm:$0xff] %vm232_vm0, %v791_v63 }
 0x11d   : > { %v1346_v3 = vpack.c.bf16 %v961_v57, %v961_v57  ;;  %v930_v6 = vadd.f32 %v1679_v5, %v893_v59  ;;  %v841_v7 = vld [vmem:[#allocation2 + $0x38] sm:$0xff]  ;;  %v679_v16 = vpop.f32.mrf.mxu0  ;;  %v743_v17 = vpop.f32.mrf.mxu1 }
 0x11e   : > { %v857_v8 = vld [vmem:[#allocation2 + $0xb8] sm:$0xff]  ;;  %v878_v12 = vmul.f32 %v1674_v2, %v841_v7  ;;  %1106 = vst.msk [vmem:[%s1695_s24 + $0x14] sm:$0xf] %vm1100_vm4, %v1330_v1  ;;  %v946_v14 = vmax.f32 %v914_v4, 0.0  ;;  %v776_v20 = vadd.f32 %v679_v16, %v275_v0  ;;  %v792_v21 = vadd.f32 %v743_v17, %v291_v11  ;;  %v294_v7 = vld [vmem:[#allocation2 + $0xe8] sm:$0xff] }
 0x11f   : > { %v894_v13 = vmul.f32 %v1674_v2, %v857_v8  ;;  %1122 = vst.msk [vmem:[%s1695_s24 + $0x54] sm:$0xf] %vm1100_vm4, %v1346_v3  ;;  %v962_v15 = vmax.f32 %v930_v6, 0.0  ;;  %v842_v24 = vld [vmem:[#allocation2 + $0x40] sm:$0xff]  ;;  %v681_v26 = vpop.f32.mrf.mxu0  ;;  %v745_v27 = vpop.f32.mrf.mxu1  ;;  %v278_v6 = vld [vmem:[#allocation2 + $0x68] sm:$0xff] }
 0x120   : > { %v915_v18 = vadd.f32 %v1679_v5, %v878_v12  ;;  %v1331_v22 = vpack.c.bf16 %v946_v14, %v946_v14  ;;  %v858_v25 = vld [vmem:[#allocation2 + $0xc0] sm:$0xff]  ;;  %v879_v30 = vmul.f32 %v1674_v2, %v842_v24  ;;  %809 = vst.msk [vmem:[#allocation2 + $0x50] sm:$0xff] %vm232_vm0, %v776_v20  ;;  %825 = vst.msk [vmem:[#allocation2 + $0xd0] sm:$0xff] %vm232_vm0, %v792_v21 }
 0x121   : > { %v931_v19 = vadd.f32 %v1679_v5, %v894_v13  ;;  %v1347_v23 = vpack.c.bf16 %v962_v15, %v962_v15  ;;  %v895_v31 = vmul.f32 %v1674_v2, %v858_v25  ;;  %v682_v34 = vpop.f32.mrf.mxu0  ;;  %v746_v35 = vpop.f32.mrf.mxu1 }
 0x122   : > { %v947_v28 = vmax.f32 %v915_v18, 0.0  ;;  %1107 = vst.msk [vmem:[%s1695_s24 + $0x18] sm:$0xf] %vm1100_vm4, %v1331_v22  ;;  %v916_v38 = vadd.f32 %v1679_v5, %v879_v30  ;;  %v777_v42 = vadd.f32 %v682_v34, %v276_v32  ;;  %v793_v43 = vadd.f32 %v746_v35, %v292_v33  ;;  %v279_v18 = vld [vmem:[#allocation2 + $0x70] sm:$0xff] }
 0x123   : > { %v963_v29 = vmax.f32 %v931_v19, 0.0  ;;  %1123 = vst.msk [vmem:[%s1695_s24 + $0x58] sm:$0xf] %vm1100_vm4, %v1347_v23  ;;  %v932_v39 = vadd.f32 %v1679_v5, %v895_v31  ;;  %v843_v40 = vld [vmem:[#allocation2 + $0x48] sm:$0xff]  ;;  %v684_v44 = vpop.f32.mrf.mxu0  ;;  %v748_v45 = vpop.f32.mrf.mxu1  ;;  %v295_v19 = vld [vmem:[#allocation2 + $0xf0] sm:$0xff] }
 0x124   : > { %v1332_v36 = vpack.c.bf16 %v947_v28, %v947_v28  ;;  %v859_v41 = vld [vmem:[#allocation2 + $0xc8] sm:$0xff]  ;;  %v948_v46 = vmax.f32 %v916_v38, 0.0  ;;  %v880_v48 = vmul.f32 %v1674_v2, %v843_v40  ;;  %810 = vst.msk [vmem:[#allocation2 + $0x58] sm:$0xff] %vm232_vm0, %v777_v42  ;;  %826 = vst.msk [vmem:[#allocation2 + $0xd8] sm:$0xff] %vm232_vm0, %v793_v43 }
 0x125   : > { %v1348_v37 = vpack.c.bf16 %v963_v29, %v963_v29  ;;  %v964_v47 = vmax.f32 %v932_v39, 0.0  ;;  %v896_v49 = vmul.f32 %v1674_v2, %v859_v41  ;;  %v687_v52 = vpop.f32.mrf.mxu0  ;;  %v751_v53 = vpop.f32.mrf.mxu1 }
 0x126   : > { %1108 = vst.msk [vmem:[%s1695_s24 + $0x1c] sm:$0xf] %vm1100_vm4, %v1332_v36  ;;  %v1333_v54 = vpack.c.bf16 %v948_v46, %v948_v46  ;;  %v917_v56 = vadd.f32 %v1679_v5, %v880_v48  ;;  %v778_v60 = vadd.f32 %v687_v52, %v277_v50  ;;  %v794_v61 = vadd.f32 %v751_v53, %v293_v51  ;;  %v280_v36 = vld [vmem:[#allocation2 + $0x78] sm:$0xff] }
 0x127   : > { %1124 = vst.msk [vmem:[%s1695_s24 + $0x5c] sm:$0xf] %vm1100_vm4, %v1348_v37  ;;  %v1349_v55 = vpack.c.bf16 %v964_v47, %v964_v47  ;;  %v933_v57 = vadd.f32 %v1679_v5, %v896_v49  ;;  %v844_v58 = vld [vmem:[#allocation2 + $0x50] sm:$0xff]  ;;  %v689_v62 = vpop.f32.mrf.mxu0  ;;  %v753_v63 = vpop.f32.mrf.mxu1  ;;  %v296_v37 = vld [vmem:[#allocation2 + $0xf8] sm:$0xff] }
 0x128   : > { %v860_v59 = vld [vmem:[#allocation2 + $0xd0] sm:$0xff]  ;;  %1109 = vst.msk [vmem:[%s1695_s24 + $0x20] sm:$0xf] %vm1100_vm4, %v1333_v54  ;;  %v949_v0 = vmax.f32 %v917_v56, 0.0  ;;  %v881_v3 = vmul.f32 %v1674_v2, %v844_v58 }
 0x129   : > { %1125 = vst.msk [vmem:[%s1695_s24 + $0x60] sm:$0xf] %vm1100_vm4, %v1349_v55  ;;  %v965_v1 = vmax.f32 %v933_v57, 0.0  ;;  %v897_v4 = vmul.f32 %v1674_v2, %v860_v59  ;;  %v690_v8 = vpop.f32.mrf.mxu0  ;;  %v754_v9 = vpop.f32.mrf.mxu1 }
 0x12a   : > { %811 = vst.msk [vmem:[#allocation2 + $0x60] sm:$0xff] %vm232_vm0, %v778_v60  ;;  %827 = vst.msk [vmem:[#allocation2 + $0xe0] sm:$0xff] %vm232_vm0, %v794_v61  ;;  %v1334_v10 = vpack.c.bf16 %v949_v0, %v949_v0  ;;  %v918_v12 = vadd.f32 %v1679_v5, %v881_v3  ;;  %v779_v14 = vadd.f32 %v690_v8, %v278_v6 }
 0x12b   : > { %v1350_v11 = vpack.c.bf16 %v965_v1, %v965_v1  ;;  %v934_v13 = vadd.f32 %v1679_v5, %v897_v4  ;;  %v795_v15 = vadd.f32 %v754_v9, %v294_v7  ;;  %v692_v16 = vpop.f32.mrf.mxu0  ;;  %v756_v17 = vpop.f32.mrf.mxu1  ;;  %v845_v22 = vld [vmem:[#allocation2 + $0x58] sm:$0xff] }
 0x12c   : > { %1110 = vst.msk [vmem:[%s1695_s24 + $0x24] sm:$0xf] %vm1100_vm4, %v1334_v10  ;;  %v950_v20 = vmax.f32 %v918_v12, 0.0  ;;  %v861_v23 = vld [vmem:[#allocation2 + $0xd8] sm:$0xff]  ;;  %v882_v24 = vmul.f32 %v1674_v2, %v845_v22 }
 0x12d   : > { %1126 = vst.msk [vmem:[%s1695_s24 + $0x64] sm:$0xf] %vm1100_vm4, %v1350_v11  ;;  %v966_v21 = vmax.f32 %v934_v13, 0.0  ;;  %v898_v25 = vmul.f32 %v1674_v2, %v861_v23  ;;  %v695_v26 = vpop.f32.mrf.mxu0  ;;  %v759_v27 = vpop.f32.mrf.mxu1 }
 0x12e   : > { %812 = vst.msk [vmem:[#allocation2 + $0x68] sm:$0xff] %vm232_vm0, %v779_v14  ;;  %828 = vst.msk [vmem:[#allocation2 + $0xe8] sm:$0xff] %vm232_vm0, %v795_v15  ;;  %v1335_v28 = vpack.c.bf16 %v950_v20, %v950_v20  ;;  %v780_v30 = vadd.f32 %v695_v26, %v279_v18  ;;  %v796_v31 = vadd.f32 %v759_v27, %v295_v19 }
 0x12f   : > { %v1351_v29 = vpack.c.bf16 %v966_v21, %v966_v21  ;;  %v919_v32 = vadd.f32 %v1679_v5, %v882_v24  ;;  %v935_v33 = vadd.f32 %v1679_v5, %v898_v25  ;;  %v697_v34 = vpop.f32.mrf.mxu0  ;;  %v761_v35 = vpop.f32.mrf.mxu1 }
 0x130   : > { %1111 = vst.msk [vmem:[%s1695_s24 + $0x28] sm:$0xf] %vm1100_vm4, %v1335_v28 }
 0x131   : > { %1127 = vst.msk [vmem:[%s1695_s24 + $0x68] sm:$0xf] %vm1100_vm4, %v1351_v29  ;;  %v846_v38 = vld [vmem:[#allocation2 + $0x60] sm:$0xff]  ;;  %v951_v40 = vmax.f32 %v919_v32, 0.0  ;;  %v967_v41 = vmax.f32 %v935_v33, 0.0  ;;  %v698_v44 = vpop.f32.mrf.mxu0  ;;  %v762_v45 = vpop.f32.mrf.mxu1 }
 0x132   : > { %v862_v39 = vld [vmem:[#allocation2 + $0xe0] sm:$0xff]  ;;  %813 = vst.msk [vmem:[#allocation2 + $0x70] sm:$0xff] %vm232_vm0, %v780_v30  ;;  %829 = vst.msk [vmem:[#allocation2 + $0xf0] sm:$0xff] %vm232_vm0, %v796_v31  ;;  %v883_v42 = vmul.f32 %v1674_v2, %v846_v38  ;;  %v781_v46 = vadd.f32 %v698_v44, %v280_v36  ;;  %v797_v47 = vadd.f32 %v762_v45, %v296_v37 }
 0x133   : > { %v899_v43 = vmul.f32 %v1674_v2, %v862_v39  ;;  %v1336_v48 = vpack.c.bf16 %v951_v40, %v951_v40  ;;  %v1352_v49 = vpack.c.bf16 %v967_v41, %v967_v41  ;;  %v700_v52 = vpop.f32.mrf.mxu0  ;;  %v764_v53 = vpop.f32.mrf.mxu1 }
 0x134   : > { %v920_v50 = vadd.f32 %v1679_v5, %v883_v42  ;;  %814 = vst.msk [vmem:[#allocation2 + $0x78] sm:$0xff] %vm232_vm0, %v781_v46  ;;  %830 = vst.msk [vmem:[#allocation2 + $0xf8] sm:$0xff] %vm232_vm0, %v797_v47 }
 0x135   : > { %v936_v51 = vadd.f32 %v1679_v5, %v899_v43  ;;  %v847_v54 = vld [vmem:[#allocation2 + $0x68] sm:$0xff]  ;;  %1112 = vst.msk [vmem:[%s1695_s24 + $0x2c] sm:$0xf] %vm1100_vm4, %v1336_v48  ;;  %1128 = vst.msk [vmem:[%s1695_s24 + $0x6c] sm:$0xf] %vm1100_vm4, %v1352_v49 }
 0x136   : > { %v863_v55 = vld [vmem:[#allocation2 + $0xe8] sm:$0xff]  ;;  %v952_v56 = vmax.f32 %v920_v50, 0.0  ;;  %v884_v58 = vmul.f32 %v1674_v2, %v847_v54 }
 0x137   : > { %v968_v57 = vmax.f32 %v936_v51, 0.0  ;;  %v900_v59 = vmul.f32 %v1674_v2, %v863_v55 }
 0x138   : > { %v1337_v60 = vpack.c.bf16 %v952_v56, %v952_v56  ;;  %v921_v62 = vadd.f32 %v1679_v5, %v884_v58 }
 0x139   : > { %v1353_v61 = vpack.c.bf16 %v968_v57, %v968_v57  ;;  %v937_v63 = vadd.f32 %v1679_v5, %v900_v59  ;;  %v848_v0 = vld [vmem:[#allocation2 + $0x70] sm:$0xff] }
 0x13a   : > { %v864_v1 = vld [vmem:[#allocation2 + $0xf0] sm:$0xff]  ;;  %v885_v3 = vmul.f32 %v1674_v2, %v848_v0  ;;  %1113 = vst.msk [vmem:[%s1695_s24 + $0x30] sm:$0xf] %vm1100_vm4, %v1337_v60  ;;  %v953_v6 = vmax.f32 %v921_v62, 0.0 }
 0x13b   : > { %v901_v4 = vmul.f32 %v1674_v2, %v864_v1  ;;  %1129 = vst.msk [vmem:[%s1695_s24 + $0x70] sm:$0xf] %vm1100_vm4, %v1353_v61  ;;  %v969_v7 = vmax.f32 %v937_v63, 0.0  ;;  %v849_v12 = vld [vmem:[#allocation2 + $0x78] sm:$0xff] }
 0x13c   : > { %v922_v8 = vadd.f32 %v1679_v5, %v885_v3  ;;  %v1338_v10 = vpack.c.bf16 %v953_v6, %v953_v6  ;;  %v865_v13 = vld [vmem:[#allocation2 + $0xf8] sm:$0xff]  ;;  %v886_v16 = vmul.f32 %v1674_v2, %v849_v12 }
 0x13d   : > { %v938_v9 = vadd.f32 %v1679_v5, %v901_v4  ;;  %v1354_v11 = vpack.c.bf16 %v969_v7, %v969_v7  ;;  %v902_v17 = vmul.f32 %v1674_v2, %v865_v13 }
 0x13e   : > { %v954_v14 = vmax.f32 %v922_v8, 0.0  ;;  %1114 = vst.msk [vmem:[%s1695_s24 + $0x34] sm:$0xf] %vm1100_vm4, %v1338_v10  ;;  %v923_v20 = vadd.f32 %v1679_v5, %v886_v16 }
 0x13f   : > { %v970_v15 = vmax.f32 %v938_v9, 0.0  ;;  %1130 = vst.msk [vmem:[%s1695_s24 + $0x74] sm:$0xf] %vm1100_vm4, %v1354_v11  ;;  %v939_v21 = vadd.f32 %v1679_v5, %v902_v17 }
 0x140   : > { %v1339_v18 = vpack.c.bf16 %v954_v14, %v954_v14  ;;  %v955_v22 = vmax.f32 %v923_v20, 0.0 }
 0x141   : > { %v1355_v19 = vpack.c.bf16 %v970_v15, %v970_v15  ;;  %v971_v23 = vmax.f32 %v939_v21, 0.0 }
 0x142   : > { %1115 = vst.msk [vmem:[%s1695_s24 + $0x38] sm:$0xf] %vm1100_vm4, %v1339_v18  ;;  %v1340_v24 = vpack.c.bf16 %v955_v22, %v955_v22 }
 0x143   : > { %1131 = vst.msk [vmem:[%s1695_s24 + $0x78] sm:$0xf] %vm1100_vm4, %v1355_v19  ;;  %v1356_v25 = vpack.c.bf16 %v971_v23, %v971_v23 }
 0x144   : > { %1116 = vst.msk [vmem:[%s1695_s24 + $0x3c] sm:$0xf] %vm1100_vm4, %v1340_v24 }
 0x145   : > { %1132 = vst.msk [vmem:[%s1695_s24 + $0x7c] sm:$0xf] %vm1100_vm4, %v1356_v25 }
 0x146 PF: > { %s13_s14 = sadd.s32 1, %s1484_s14   ;;  %s1856_s12 = smov %s1480_s13 }
 0x147   : > { %p10_p5 = scmp.ge.s32.totalorder %s13_s14, 4   ;;  %s1857_s13 = smov %s1859_s15 }
 0x149   :  { %12 = sbr.rel (!%p10_p5) target bundleno = 2 (0x2), region = 73 }

// kernel: pretrained_model_forward.22
= control target key start
LH: loop header
LB: loop body
LE: loop exit
PB: predicated region body
PF: predicated region fallthrough
CT: control target
= control target key end

     0   :  { %vm19_vm0 = vcmask 523264   ;;  %vm1077_vm1 = vcmask 519168   ;;  %s1927_s1 = inlined_call_operand.vmem [shape: bf16[576,64], index: 1, kind: input, shape index: {}]   ;;  %s1928_s0 = inlined_call_operand.vmem [shape: bf16[128,576], index: 0, kind: input, shape index: {}]   ;;  %s1929_s2 = inlined_call_operand.vmem [shape: f32[2,64], index: 2, kind: input, shape index: {}]   ;;  %s1930_s3 = inlined_call_operand.vmem [shape: bf16[128,64], index: 3, kind: output, shape index: {}]  }
   0x1   :  { %v1389_v0 = vld [vmem:[%s1927_s1 + $0x78] sm:$0xff]   ;;  %v1393_v4 = vld [vmem:[%s1927_s1 + $0x70] sm:$0xff]   ;;  %v1397_v8 = vld [vmem:[%s1927_s1 + $0x68] sm:$0xff]  }
   0x2   :  { %v1390_v1 = vld [vmem:[%s1927_s1 + $0xf8] sm:$0xff]   ;;  %1216 = vmatprep.subr.bf16.mxu0 %v1389_v0  ;;  %v1394_v5 = vld [vmem:[%s1927_s1 + $0xf0] sm:$0xff]   ;;  %v1398_v9 = vld [vmem:[%s1927_s1 + $0xe8] sm:$0xff]  }
   0x3   :  { %v1391_v2 = vld [vmem:[%s1927_s1 + $0x38] sm:$0xff]   ;;  %1280 = vmatprep.subr.bf16.mxu1 %v1390_v1  ;;  %v1395_v6 = vld [vmem:[%s1927_s1 + $0x30] sm:$0xff]   ;;  %v1399_v10 = vld [vmem:[%s1927_s1 + $0x28] sm:$0xff]  }
   0x4   :  { %v1392_v3 = vld [vmem:[%s1927_s1 + $0xb8] sm:$0xff]   ;;  %1217 = vmatpush3.bf16.msra.mxu0 %v1391_v2  ;;  %v1396_v7 = vld [vmem:[%s1927_s1 + $0xb0] sm:$0xff]   ;;  %v1400_v11 = vld [vmem:[%s1927_s1 + $0xa8] sm:$0xff]  }
   0x5   :  { %1281 = vmatpush3.bf16.msra.mxu1 %v1392_v3  ;;  %1218 = vmatprep.subr.bf16.mxu0 %v1393_v4  ;;  %v1401_v12 = vld [vmem:[%s1927_s1 + $0x60] sm:$0xff]   ;;  %v1405_v16 = vld [vmem:[%s1927_s1 + $0x58] sm:$0xff]   ;;  %v1409_v20 = vld [vmem:[%s1927_s1 + $0x50] sm:$0xff]  }
   0x6   :  { %1282 = vmatprep.subr.bf16.mxu1 %v1394_v5  ;;  %v1402_v13 = vld [vmem:[%s1927_s1 + $0xe0] sm:$0xff]   ;;  %v1406_v17 = vld [vmem:[%s1927_s1 + $0xd8] sm:$0xff]   ;;  %v1410_v21 = vld [vmem:[%s1927_s1 + $0xd0] sm:$0xff]  }
   0x7   :  { %v1403_v14 = vld [vmem:[%s1927_s1 + $0x20] sm:$0xff]   ;;  %v1407_v18 = vld [vmem:[%s1927_s1 + $0x18] sm:$0xff]   ;;  %v1411_v22 = vld [vmem:[%s1927_s1 + $0x10] sm:$0xff]  }
   0x8   :  { %1219 = vmatpush3.bf16.msra.mxu0 %v1395_v6  ;;  %v1404_v15 = vld [vmem:[%s1927_s1 + $0xa0] sm:$0xff]   ;;  %v1408_v19 = vld [vmem:[%s1927_s1 + $0x98] sm:$0xff]   ;;  %v1412_v23 = vld [vmem:[%s1927_s1 + $0x90] sm:$0xff]  }
   0x9   :  { %1283 = vmatpush3.bf16.msra.mxu1 %v1396_v7  ;;  %1220 = vmatprep.subr.bf16.mxu0 %v1397_v8  ;;  %v1413_v24 = vld [vmem:[%s1927_s1 + $0x48] sm:$0xff]   ;;  %v1417_v28 = vld [vmem:[%s1927_s1 + $0x40] sm:$0xff]   ;;  %v1427_v36 = vld [vmem:[%s1927_s1 + $0x118] sm:$0xff]  }
   0xa   :  { %1284 = vmatprep.subr.bf16.mxu1 %v1398_v9  ;;  %v1414_v25 = vld [vmem:[%s1927_s1 + $0xc8] sm:$0xff]   ;;  %v1418_v29 = vld [vmem:[%s1927_s1 + $0xc0] sm:$0xff]   ;;  %v1440_v42 = vld [vmem:[%s1927_s1 + $0x110] sm:$0xff]  }
   0xb   :  { %v1415_v26 = vld [vmem:[%s1927_s1 + $0x8] sm:$0xff]   ;;  %v1419_v30 = vld [vmem:[%s1927_s1] sm:$0xff]   ;;  %v1436_v43 = vld [vmem:[%s1928_s0 + $0x5c] ss:$20 sps:$4 sm:$0xff]  }
   0xc   :  { %1221 = vmatpush3.bf16.msra.mxu0 %v1399_v10  ;;  %v1416_v27 = vld [vmem:[%s1927_s1 + $0x88] sm:$0xff]   ;;  %v1420_v31 = vld [vmem:[%s1927_s1 + $0x80] sm:$0xff]   ;;  %v1441_v47 = vld [vmem:[%s1928_s0 + $0x7c] ss:$20 sps:$4 sm:$0xff]  }
   0xd   :  { %1285 = vmatpush3.bf16.msra.mxu1 %v1400_v11  ;;  %1222 = vmatprep.subr.bf16.mxu0 %v1401_v12  ;;  %v1421_v32 = vld [vmem:[%s1928_s0] ss:$20 sps:$4 sm:$0xff]   ;;  %v1423_v33 = vld [vmem:[%s1928_s0 + $0x4] ss:$20 sps:$4 sm:$0xff]   ;;  %v1424_v34 = vld [vmem:[%s1928_s0 + $0x8] ss:$20 sps:$4 sm:$0xff]  }
   0xe   :  { %1286 = vmatprep.subr.bf16.mxu1 %v1402_v13  ;;  %v1426_v35 = vld [vmem:[%s1928_s0 + $0xc] ss:$20 sps:$4 sm:$0xff]   ;;  %645 = vmatprep.mubr.bf16.mxu0 %v1423_v33  ;;  %v1430_v38 = vld [vmem:[%s1928_s0 + $0x34] ss:$20 sps:$4 sm:$0xff]   ;;  %v1433_v40 = vld [vmem:[%s1928_s0 + $0x30] ss:$20 sps:$4 sm:$0xff]  }
   0xf   :  { %742 = vmatprep.mubr.bf16.mxu1 %v1426_v35  ;;  %v1428_v37 = vld [vmem:[%s1928_s0 + $0x2c] ss:$20 sps:$4 sm:$0xff]   ;;  %v1432_v39 = vld [vmem:[%s1928_s0 + $0x28] ss:$20 sps:$4 sm:$0xff]   ;;  %v1438_v44 = vld [vmem:[%s1928_s0 + $0x50] ss:$20 sps:$4 sm:$0xff]  }
  0x10   :  { %1223 = vmatpush3.bf16.msra.mxu0 %v1403_v14  ;;  %v1434_v41 = vld [vmem:[%s1928_s0 + $0x54] ss:$20 sps:$4 sm:$0xff]   ;;  %v1439_v45 = vld [vmem:[%s1928_s0 + $0x58] ss:$20 sps:$4 sm:$0xff]   ;;  %v1466_v49 = vld [vmem:[%s1927_s1 + $0x100] sm:$0xff]   ;;  %v1481_v12 = vmov 0.0  }
  0x11   :  { %1287 = vmatpush3.bf16.msra.mxu1 %v1404_v15  ;;  %1224 = vmatprep.subr.bf16.mxu0 %v1405_v16  ;;  %v1453_v46 = vld [vmem:[%s1927_s1 + $0x108] sm:$0xff]   ;;  %v1443_v48 = vld [vmem:[%s1928_s0 + $0x84] ss:$20 sps:$4 sm:$0xff]   ;;  %v1446_v51 = vld [vmem:[%s1928_s0 + $0x80] ss:$20 sps:$4 sm:$0xff]   ;;  %22 = vst.msk [vmem:[#allocation2 + $0x10] sm:$0xff] %vm19_vm0, %v1481_v12 }
  0x12   :  { %1288 = vmatprep.subr.bf16.mxu1 %v1406_v17  ;;  %v1445_v50 = vld [vmem:[%s1928_s0 + $0x78] ss:$20 sps:$4 sm:$0xff]   ;;  %v1451_v54 = vld [vmem:[%s1928_s0 + $0xa0] ss:$20 sps:$4 sm:$0xff]   ;;  %v1452_v55 = vld [vmem:[%s1928_s0 + $0xa8] ss:$20 sps:$4 sm:$0xff]  }
  0x13   :  { %v1447_v52 = vld [vmem:[%s1928_s0 + $0xa4] ss:$20 sps:$4 sm:$0xff]   ;;  %v1449_v53 = vld [vmem:[%s1928_s0 + $0xac] ss:$20 sps:$4 sm:$0xff]   ;;  %v1456_v57 = vld [vmem:[%s1928_s0 + $0xd4] ss:$20 sps:$4 sm:$0xff]  }
  0x14   :  { %1225 = vmatpush3.bf16.msra.mxu0 %v1407_v18  ;;  %v1454_v56 = vld [vmem:[%s1928_s0 + $0xcc] ss:$20 sps:$4 sm:$0xff]   ;;  %v1458_v58 = vld [vmem:[%s1928_s0 + $0xc8] ss:$20 sps:$4 sm:$0xff]   ;;  %v1459_v59 = vld [vmem:[%s1928_s0 + $0xd0] ss:$20 sps:$4 sm:$0xff]  }
  0x15   :  { %1289 = vmatpush3.bf16.msra.mxu1 %v1408_v19  ;;  %1226 = vmatprep.subr.bf16.mxu0 %v1409_v20  ;;  %v1460_v60 = vld [vmem:[%s1928_s0 + $0xf4] ss:$20 sps:$4 sm:$0xff]   ;;  %v1462_v61 = vld [vmem:[%s1928_s0 + $0xfc] ss:$20 sps:$4 sm:$0xff]   ;;  %v1465_v63 = vld [vmem:[%s1928_s0 + $0xf8] ss:$20 sps:$4 sm:$0xff]  }
  0x16   :  { %1290 = vmatprep.subr.bf16.mxu1 %v1410_v21  ;;  %v1464_v62 = vld [vmem:[%s1928_s0 + $0xf0] ss:$20 sps:$4 sm:$0xff]   ;;  %v1471_v2 = vld [vmem:[%s1928_s0 + $0x118] ss:$20 sps:$4 sm:$0xff]   ;;  %v1472_v3 = vld [vmem:[%s1928_s0 + $0x120] ss:$20 sps:$4 sm:$0xff]  }
  0x17   :  { %v1467_v0 = vld [vmem:[%s1928_s0 + $0x11c] ss:$20 sps:$4 sm:$0xff]   ;;  %v1469_v1 = vld [vmem:[%s1928_s0 + $0x124] ss:$20 sps:$4 sm:$0xff]   ;;  %v1477_v8 = vld [vmem:[%s1928_s0 + $0x60] ss:$20 sps:$4 sm:$0xff]  }
  0x18   :  { %1227 = vmatpush3.bf16.msra.mxu0 %v1411_v22  ;;  %v1473_v4 = vld [vmem:[%s1928_s0 + $0x10] ss:$20 sps:$4 sm:$0xff]   ;;  %v1475_v6 = vld [vmem:[%s1928_s0 + $0x38] ss:$20 sps:$4 sm:$0xff]   ;;  %v1478_v9 = vld [vmem:[%s1928_s0 + $0x100] ss:$20 sps:$4 sm:$0xff]  }
  0x19   :  { %1291 = vmatpush3.bf16.msra.mxu1 %v1412_v23  ;;  %1228 = vmatprep.subr.bf16.mxu0 %v1413_v24  ;;  %v1474_v5 = vld [vmem:[%s1928_s0 + $0xb0] ss:$20 sps:$4 sm:$0xff]   ;;  %v1476_v7 = vld [vmem:[%s1928_s0 + $0xd8] ss:$20 sps:$4 sm:$0xff]   ;;  %v1479_v10 = vld [vmem:[%s1928_s0 + $0x88] ss:$20 sps:$4 sm:$0xff]  }
  0x1a   :  { %1292 = vmatprep.subr.bf16.mxu1 %v1414_v25  ;;  %v1480_v11 = vld [vmem:[%s1928_s0 + $0x128] ss:$20 sps:$4 sm:$0xff]   ;;  %20 = vst.msk [vmem:[#allocation2] sm:$0xff] %vm19_vm0, %v1481_v12  ;;  %21 = vst.msk [vmem:[#allocation2 + $0x8] sm:$0xff] %vm19_vm0, %v1481_v12 }
  0x1b   :  { %23 = vst.msk [vmem:[#allocation2 + $0x18] sm:$0xff] %vm19_vm0, %v1481_v12  ;;  %24 = vst.msk [vmem:[#allocation2 + $0x20] sm:$0xff] %vm19_vm0, %v1481_v12 }
  0x1c   :  { %1229 = vmatpush3.bf16.msra.mxu0 %v1415_v26  ;;  %25 = vst.msk [vmem:[#allocation2 + $0x28] sm:$0xff] %vm19_vm0, %v1481_v12  ;;  %26 = vst.msk [vmem:[#allocation2 + $0x30] sm:$0xff] %vm19_vm0, %v1481_v12 }
  0x1d   :  { %1293 = vmatpush3.bf16.msra.mxu1 %v1416_v27  ;;  %1230 = vmatprep.subr.bf16.mxu0 %v1417_v28  ;;  %27 = vst.msk [vmem:[#allocation2 + $0x38] sm:$0xff] %vm19_vm0, %v1481_v12  ;;  %28 = vst.msk [vmem:[#allocation2 + $0x40] sm:$0xff] %vm19_vm0, %v1481_v12 }
  0x1e   :  { %1294 = vmatprep.subr.bf16.mxu1 %v1418_v29  ;;  %29 = vst.msk [vmem:[#allocation2 + $0x48] sm:$0xff] %vm19_vm0, %v1481_v12  ;;  %30 = vst.msk [vmem:[#allocation2 + $0x50] sm:$0xff] %vm19_vm0, %v1481_v12 }
  0x1f   :  { %31 = vst.msk [vmem:[#allocation2 + $0x58] sm:$0xff] %vm19_vm0, %v1481_v12  ;;  %32 = vst.msk [vmem:[#allocation2 + $0x60] sm:$0xff] %vm19_vm0, %v1481_v12 }
  0x20   :  { %1231 = vmatpush3.bf16.msra.mxu0 %v1419_v30  ;;  %33 = vst.msk [vmem:[#allocation2 + $0x68] sm:$0xff] %vm19_vm0, %v1481_v12  ;;  %34 = vst.msk [vmem:[#allocation2 + $0x70] sm:$0xff] %vm19_vm0, %v1481_v12 }
  0x21   :  { %1295 = vmatpush3.bf16.msra.mxu1 %v1420_v31  ;;  %1356 = vmatprep.subr.bf16.mxu0 %v1427_v36  ;;  %35 = vst.msk [vmem:[#allocation2 + $0x78] sm:$0xff] %vm19_vm0, %v1481_v12 }
  0x22   :  { %1380 = vmatprep.subr.bf16.mxu1 %v1427_v36 }
  0x23   :  { %646 = vmatmul.mubr.bf16.vlgmr.msra.gmra.mxu0 %v1421_v32 }
  0x24   :  { %743 = vmatmul.mubr.bf16.vlgmr.msra.gmra.mxu1 %v1424_v34  ;;  %1357 = vmatpush3.bf16.msra.mxu0 %v1427_v36 }
  0x25   :  { %1384 = vmatpush3.bf16.msra.mxu1 %v1427_v36  ;;  %653 = vmatprep.mubr.bf16.mxu0 %v1428_v37 }
  0x26   :  { %750 = vmatprep.mubr.bf16.mxu1 %v1430_v38  ;;  %1358 = vmatprep.subr.bf16.mxu0 %v1440_v42 }
  0x27   :  { %1381 = vmatprep.subr.bf16.mxu1 %v1440_v42 }
  0x28   :  { %1359 = vmatpush3.bf16.msra.mxu0 %v1440_v42 }
  0x29   :  { %1385 = vmatpush3.bf16.msra.mxu1 %v1440_v42  ;;  %1360 = vmatprep.subr.bf16.mxu0 %v1453_v46 }
  0x2a   :  { %1382 = vmatprep.subr.bf16.mxu1 %v1453_v46 }
  0x2b   :  { %654 = vmatmul.mubr.bf16.gmra.mxu0 %v1432_v39 }
  0x2c   :  { %751 = vmatmul.mubr.bf16.gmra.mxu1 %v1433_v40  ;;  %661 = vmatprep.mubr.bf16.mxu0 %v1434_v41 }
  0x2d   :  { %758 = vmatprep.mubr.bf16.mxu1 %v1436_v43  ;;  %1361 = vmatpush3.bf16.msra.mxu0 %v1453_v46 }
  0x2e   :  { %1386 = vmatpush3.bf16.msra.mxu1 %v1453_v46  ;;  %1362 = vmatprep.subr.bf16.mxu0 %v1466_v49 }
  0x2f   :  { %1383 = vmatprep.subr.bf16.mxu1 %v1466_v49 }
  0x31   :  { %1363 = vmatpush3.bf16.msra.mxu0 %v1466_v49 }
  0x32   :  { %1387 = vmatpush3.bf16.msra.mxu1 %v1466_v49 }
  0x33   :  { %662 = vmatmul.mubr.bf16.gmra.mxu0 %v1438_v44 }
  0x34   :  { %759 = vmatmul.mubr.bf16.gmra.mxu1 %v1439_v45  ;;  %669 = vmatprep.mubr.bf16.mxu0 %v1441_v47 }
  0x35   :  { %766 = vmatprep.mubr.bf16.mxu1 %v1443_v48 }
  0x3b   :  { %670 = vmatmul.mubr.bf16.gmra.mxu0 %v1445_v50 }
  0x3c   :  { %767 = vmatmul.mubr.bf16.gmra.mxu1 %v1446_v51  ;;  %677 = vmatprep.mubr.bf16.mxu0 %v1447_v52 }
  0x3d   :  { %774 = vmatprep.mubr.bf16.mxu1 %v1449_v53 }
  0x43   :  { %678 = vmatmul.mubr.bf16.gmra.mxu0 %v1451_v54 }
  0x44   :  { %775 = vmatmul.mubr.bf16.gmra.mxu1 %v1452_v55  ;;  %685 = vmatprep.mubr.bf16.mxu0 %v1454_v56 }
  0x45   :  { %782 = vmatprep.mubr.bf16.mxu1 %v1456_v57 }
  0x4b   :  { %686 = vmatmul.mubr.bf16.gmra.mxu0 %v1458_v58 }
  0x4c   :  { %783 = vmatmul.mubr.bf16.gmra.mxu1 %v1459_v59  ;;  %693 = vmatprep.mubr.bf16.mxu0 %v1460_v60 }
  0x4d   :  { %790 = vmatprep.mubr.bf16.mxu1 %v1462_v61 }
  0x53   :  { %694 = vmatmul.mubr.bf16.gmra.mxu0 %v1464_v62 }
  0x54   :  { %791 = vmatmul.mubr.bf16.gmra.mxu1 %v1465_v63  ;;  %701 = vmatprep.mubr.bf16.mxu0 %v1467_v0 }
  0x55   :  { %798 = vmatprep.mubr.bf16.mxu1 %v1469_v1 }
  0x5b   :  { %702 = vmatmul.mubr.bf16.gmra.mxu0 %v1471_v2 }
  0x5c   :  { %799 = vmatmul.mubr.bf16.gmra.mxu1 %v1472_v3  ;;  %1364 = vmatprep.mubr.msk.bf16.mxu0 %vm19_vm0, %v1473_v4 }
  0x5d   :  { %1372 = vmatprep.mubr.msk.bf16.mxu1 %vm19_vm0, %v1474_v5 }
  0x63   :  { %1365 = vmatmul.mubr.msk.bf16.vlgmr.msra.gmra.mxu0 %vm19_vm0, %v1475_v6 }
  0x64   :  { %1373 = vmatmul.mubr.msk.bf16.vlgmr.msra.gmra.mxu1 %vm19_vm0, %v1476_v7  ;;  %1368 = vmatprep.mubr.msk.bf16.mxu0 %vm19_vm0, %v1477_v8 }
  0x65   :  { %1376 = vmatprep.mubr.msk.bf16.mxu1 %vm19_vm0, %v1478_v9 }
  0x6b   :  { %1369 = vmatmul.mubr.msk.bf16.gmra.mxu0 %vm19_vm0, %v1479_v10 }
  0x6c   :  { %1377 = vmatmul.mubr.msk.bf16.gmra.mxu1 %vm19_vm0, %v1480_v11 }
  0xe3   :  { %v1232_v13 = vpop.f32.mrf.mxu0 }
  0xe4   :  { %v1296_v14 = vpop.f32.mrf.mxu1 }
  0xe5   :  { %v1233_v15 = vpop.f32.mrf.mxu0 }
  0xe6   :  { %v1297_v16 = vpop.f32.mrf.mxu1  ;;  %v1234_v7 = vadd.f32 %v1233_v15, %v1232_v13 }
  0xe7   :  { %v1235_v17 = vpop.f32.mrf.mxu0  ;;  %v1298_v8 = vadd.f32 %v1297_v16, %v1296_v14 }
  0xe8   :  { %v1299_v18 = vpop.f32.mrf.mxu1 }
  0xe9   :  { %v1236_v19 = vpop.f32.mrf.mxu0  ;;  %v745_v16 = vadd.f32 %v1298_v8, %v1234_v7 }
  0xea   :  { %v1300_v20 = vpop.f32.mrf.mxu1  ;;  %v1237_v10 = vadd.f32 %v1236_v19, %v1235_v17 }
  0xeb   :  { %v1238_v21 = vpop.f32.mrf.mxu0  ;;  %v1301_v11 = vadd.f32 %v1300_v20, %v1299_v18 }
  0xec   :  { %v1302_v22 = vpop.f32.mrf.mxu1 }
  0xed   :  { %v1239_v23 = vpop.f32.mrf.mxu0  ;;  %v748_v17 = vadd.f32 %v1301_v11, %v1237_v10 }
  0xee   :  { %v1303_v24 = vpop.f32.mrf.mxu1  ;;  %v1240_v12 = vadd.f32 %v1239_v23, %v1238_v21  ;;  %v38_v21 = vld [vmem:[#allocation2 + $0x10] sm:$0xff] }
  0xef   :  { %v1241_v25 = vpop.f32.mrf.mxu0 }
  0xf0   :  { %v1305_v26 = vpop.f32.mrf.mxu1 }
  0xf1   :  { %v1242_v27 = vpop.f32.mrf.mxu0 }
  0xf2   :  { %v1306_v28 = vpop.f32.mrf.mxu1 }
  0xf3   :  { %v1244_v29 = vpop.f32.mrf.mxu0 }
  0xf4   :  { %v1308_v30 = vpop.f32.mrf.mxu1 }
  0xf5   :  { %v1245_v31 = vpop.f32.mrf.mxu0 }
  0xf6   :  { %v1309_v32 = vpop.f32.mrf.mxu1 }
  0xf7   :  { %v1754_v33 = vpop.f32.mrf.mxu0 }
  0xf8   :  { %v1756_v34 = vpop.f32.mrf.mxu1 }
  0xf9   :  { %1931 = vst [vmem:[#allocation3_spill] sm:$0xff] %v1756_v34  ;;  %v1758_v35 = vpop.f32.mrf.mxu0 }
  0xfa   :  { %1932 = vst [vmem:[#allocation4_spill] sm:$0xff] %v1758_v35  ;;  %v1760_v36 = vpop.f32.mrf.mxu1 }
  0xfb   :  { %1933 = vst [vmem:[#allocation5_spill] sm:$0xff] %v1760_v36  ;;  %v1250_v37 = vpop.f32.mrf.mxu0  ;;  %v1304_v36 = vadd.f32 %v1303_v24, %v1302_v22 }
  0xfc   :  { %v1314_v38 = vpop.f32.mrf.mxu1 }
  0xfd   :  { %v1251_v39 = vpop.f32.mrf.mxu0  ;;  %v753_v15 = vadd.f32 %v1304_v36, %v1240_v12 }
  0xfe   :  { %v1315_v40 = vpop.f32.mrf.mxu1  ;;  %v1252_v13 = vadd.f32 %v1251_v39, %v1250_v37  ;;  %v36_v37 = vld [vmem:[#allocation2] sm:$0xff] }
  0xff   :  { %v1762_v41 = vpop.f32.mrf.mxu0  ;;  %v1316_v18 = vadd.f32 %v1315_v40, %v1314_v38 }
 0x100   :  { %1934 = vst [vmem:[#allocation6_spill] sm:$0xff] %v1762_v41  ;;  %v1764_v42 = vpop.f32.mrf.mxu1  ;;  %v1246_v41 = vadd.f32 %v1245_v31, %v1244_v29 }
 0x101   :  { %1935 = vst [vmem:[#allocation7_spill] sm:$0xff] %v1764_v42  ;;  %v1766_v43 = vpop.f32.mrf.mxu0  ;;  %v1944_v24 = vld [vmem:[#allocation4_spill] sm:$0xff] }
 0x102   :  { %1936 = vst [vmem:[#allocation8_spill] sm:$0xff] %v1766_v43  ;;  %v1768_v44 = vpop.f32.mrf.mxu1 }
 0x103   :  { %1937 = vst [vmem:[#allocation9_spill] sm:$0xff] %v1768_v44  ;;  %v1256_v45 = vpop.f32.mrf.mxu0 }
 0x104   :  { %v1320_v46 = vpop.f32.mrf.mxu1 }
 0x105   :  { %v1257_v47 = vpop.f32.mrf.mxu0 }
 0x106   :  { %v1321_v48 = vpop.f32.mrf.mxu1 }
 0x107   :  { %v1259_v49 = vpop.f32.mrf.mxu0 }
 0x108   :  { %v1323_v50 = vpop.f32.mrf.mxu1 }
 0x109   :  { %v1260_v51 = vpop.f32.mrf.mxu0 }
 0x10a   :  { %v1324_v52 = vpop.f32.mrf.mxu1  ;;  %v1261_v31 = vadd.f32 %v1260_v51, %v1259_v49 }
 0x10b   :  { %v1262_v53 = vpop.f32.mrf.mxu0 }
 0x10c   :  { %v1326_v54 = vpop.f32.mrf.mxu1 }
 0x10d   :  { %v1263_v55 = vpop.f32.mrf.mxu0 }
 0x10e   :  { %v1327_v56 = vpop.f32.mrf.mxu1  ;;  %v1264_v44 = vadd.f32 %v1263_v55, %v1262_v53  ;;  %v39_v53 = vld [vmem:[#allocation2 + $0x18] sm:$0xff] }
 0x10f   :  { %v1265_v57 = vpop.f32.mrf.mxu0  ;;  %v1328_v42 = vadd.f32 %v1327_v56, %v1326_v54  ;;  %v769_v56 = vadd.f32 %v1316_v18, %v1252_v13  ;;  %v42_v18 = vld [vmem:[#allocation2 + $0x30] sm:$0xff] }
 0x110   :  { %v1329_v58 = vpop.f32.mrf.mxu1 }
 0x111   :  { %v1266_v59 = vpop.f32.mrf.mxu0  ;;  %v785_v23 = vadd.f32 %v1328_v42, %v1264_v44  ;;  %v44_v44 = vld [vmem:[#allocation2 + $0x40] sm:$0xff] }
 0x112   :  { %v1330_v60 = vpop.f32.mrf.mxu1  ;;  %v1267_v19 = vadd.f32 %v1266_v59, %v1265_v57  ;;  %v1947_v59 = vld [vmem:[#allocation6_spill] sm:$0xff] }
 0x113   :  { %v1770_v61 = vpop.f32.mrf.mxu0  ;;  %v1331_v20 = vadd.f32 %v1330_v60, %v1329_v58  ;;  %v47_v58 = vld [vmem:[#allocation2 + $0x58] sm:$0xff]  ;;  %v1948_v60 = vld [vmem:[#allocation8_spill] sm:$0xff] }
 0x114   :  { %1938 = vst [vmem:[#allocation10_spill] sm:$0xff] %v1770_v61  ;;  %v1772_v62 = vpop.f32.mrf.mxu1  ;;  %v1322_v61 = vadd.f32 %v1321_v48, %v1320_v46 }
 0x115   :  { %1939 = vst [vmem:[#allocation11_spill] sm:$0xff] %v1772_v62  ;;  %v1269_v63 = vpop.f32.mrf.mxu0  ;;  %v788_v55 = vadd.f32 %v1331_v20, %v1267_v19  ;;  %v1951_v20 = vld [vmem:[#allocation3_spill] sm:$0xff] }
 0x116   :  { %v1333_v0 = vpop.f32.mrf.mxu1 }
 0x117   :  { %v1774_v1 = vpop.f32.mrf.mxu0 }
 0x118   :  { %1940 = vst [vmem:[#allocation12_spill] sm:$0xff] %v1774_v1  ;;  %v1776_v2 = vpop.f32.mrf.mxu1  ;;  %v1243_v1 = vadd.f32 %v1242_v27, %v1241_v25  ;;  %v1786_v25 = vadd.f32 %v1944_v24, %v1754_v33  ;;  %v46_v27 = vld [vmem:[#allocation2 + $0x50] sm:$0xff] }
 0x119   :  { %1941 = vst [vmem:[#allocation13_spill] sm:$0xff] %v1776_v2  ;;  %v1778_v3 = vpop.f32.mrf.mxu0  ;;  %v1307_v2 = vadd.f32 %v1306_v28, %v1305_v26 }
 0x11a   :  { %1942 = vst [vmem:[#allocation14_spill] sm:$0xff] %v1778_v3  ;;  %v1780_v4 = vpop.f32.mrf.mxu1  ;;  %v1310_v3 = vadd.f32 %v1309_v32, %v1308_v30  ;;  %v1325_v32 = vadd.f32 %v1324_v52, %v1323_v50 }
 0x11b   :  { %1943 = vst [vmem:[#allocation15_spill] sm:$0xff] %v1780_v4  ;;  %v1274_v5 = vpop.f32.mrf.mxu0  ;;  %v1258_v4 = vadd.f32 %v1257_v47, %v1256_v45  ;;  %v756_v29 = vadd.f32 %v1307_v2, %v1243_v1 }
 0x11c   :  { %v1338_v6 = vpop.f32.mrf.mxu1  ;;  %v1788_v30 = vadd.f32 %v1310_v3, %v1246_v41  ;;  %v1945_v41 = vld [vmem:[#allocation10_spill] sm:$0xff]  ;;  %v1946_v49 = vld [vmem:[#allocation11_spill] sm:$0xff]  ;;  %v37_v3 = vld [vmem:[#allocation2 + $0x8] sm:$0xff] }
 0x11d   :  { %v1275_v9 = vpop.f32.mrf.mxu0  ;;  %v777_v39 = vadd.f32 %v1322_v61, %v1258_v4  ;;  %v1270_v57 = vadd.f32 %v1269_v63, %v1945_v41  ;;  %v1334_v50 = vadd.f32 %v1333_v0, %v1946_v49  ;;  %v1255_v61 = vadd.f32 %v1948_v60, %v1947_v59  ;;  %v1950_v63 = vld [vmem:[#allocation9_spill] sm:$0xff]  ;;  %v51_v49 = vld [vmem:[#allocation2 + $0x78] sm:$0xff]  ;;  %v41_v60 = vld [vmem:[#allocation2 + $0x28] sm:$0xff] }
 0x11e   :  { %v1339_v34 = vpop.f32.mrf.mxu1  ;;  %v1276_v40 = vadd.f32 %v1275_v9, %v1274_v5  ;;  %v780_v5 = vadd.f32 %v1325_v32, %v1261_v31  ;;  %v45_v9 = vld [vmem:[#allocation2 + $0x48] sm:$0xff]  ;;  %v1811_v31 = vld [vmem:[%s1929_s2] ss:$0 sm:$0xff] }
 0x11f   :  { %v1782_v43 = vpop.f32.mrf.mxu0  ;;  %v1340_v45 = vadd.f32 %v1339_v34, %v1338_v6  ;;  %v1949_v6 = vld [vmem:[#allocation7_spill] sm:$0xff] }
 0x120   :  { %v1341_v62 = vpop.f32.mrf.mxu1  ;;  %v1319_v7 = vadd.f32 %v1950_v63, %v1949_v6 }
 0x121   :  { %v1278_v35 = vpop.f32.mrf.mxu0  ;;  %v801_v11 = vadd.f32 %v1340_v45, %v1276_v40  ;;  %v48_v45 = vld [vmem:[#allocation2 + $0x60] sm:$0xff] }
 0x122   :  { %v1342_v14 = vpop.f32.mrf.mxu1  ;;  %v1279_v12 = vadd.f32 %v1278_v35, %v1782_v43  ;;  %v1955_v43 = vld [vmem:[#allocation13_spill] sm:$0xff] }
 0x123   :  { %v1366_v22 = vpop.f32.mrf.mxu0  ;;  %v1343_v13 = vadd.f32 %v1342_v14, %v1341_v62  ;;  %v1956_v62 = vld [vmem:[#allocation15_spill] sm:$0xff] }
 0x124   :  { %v850_v26 = vadd.f32 %v1366_v22, %v753_v15  ;;  %v1374_v28 = vpop.f32.mrf.mxu1  ;;  %v1337_v14 = vadd.f32 %v1956_v62, %v1955_v43 }
 0x125   :  { %v882_v36 = vadd.f32 %v1374_v28, %v785_v23  ;;  %v841_v38 = vpop.f32.mrf.mxu0  ;;  %v1953_v28 = vld [vmem:[#allocation12_spill] sm:$0xff] }
 0x126   :  { %v906_v46 = vadd.f32 %v850_v26, %v38_v21  ;;  %v842_v42 = vadd.f32 %v841_v38, %v745_v16  ;;  %v873_v47 = vpop.f32.mrf.mxu1  ;;  %v1952_v21 = vld [vmem:[#allocation5_spill] sm:$0xff] }
 0x127   :  { %v914_v33 = vadd.f32 %v882_v36, %v46_v27  ;;  %v874_v48 = vadd.f32 %v873_v47, %v777_v39  ;;  %v1367_v54 = vpop.f32.mrf.mxu0  ;;  %v1313_v22 = vadd.f32 %v1952_v21, %v1951_v20  ;;  %v793_v27 = vadd.f32 %v1334_v50, %v1270_v57  ;;  %v1819_v47 = vld [vmem:[%s1929_s2 + $0x1] ss:$0 sm:$0xff] }
 0x128   :  { %922 = vst.msk [vmem:[#allocation2 + $0x10] sm:$0xff] %vm19_vm0, %v906_v46  ;;  %v904_v51 = vadd.f32 %v842_v42, %v36_v37  ;;  %v853_v52 = vadd.f32 %v1367_v54, %v756_v29  ;;  %v1375_v34 = vpop.f32.mrf.mxu1  ;;  %v1954_v29 = vld [vmem:[#allocation14_spill] sm:$0xff]  ;;  %v40_v37 = vld [vmem:[#allocation2 + $0x20] sm:$0xff]  ;;  %v772_v42 = vadd.f32 %v1319_v7, %v1255_v61 }
 0x129   :  { %930 = vst.msk [vmem:[#allocation2 + $0x50] sm:$0xff] %vm19_vm0, %v914_v33  ;;  %v912_v1 = vadd.f32 %v874_v48, %v44_v44  ;;  %v885_v2 = vadd.f32 %v1375_v34, %v788_v55  ;;  %v844_v4 = vpop.f32.mrf.mxu0  ;;  %v1273_v35 = vadd.f32 %v1954_v29, %v1953_v28  ;;  %v804_v55 = vadd.f32 %v1343_v13, %v1279_v12 }
 0x12a   :  { %920 = vst.msk [vmem:[#allocation2] sm:$0xff] %vm19_vm0, %v904_v51  ;;  %v907_v0 = vadd.f32 %v853_v52, %v39_v53  ;;  %v845_v8 = vadd.f32 %v844_v4, %v748_v17  ;;  %v876_v10 = vpop.f32.mrf.mxu1  ;;  %v50_v17 = vld [vmem:[#allocation2 + $0x70] sm:$0xff]  ;;  %v43_v53 = vld [vmem:[#allocation2 + $0x38] sm:$0xff]  ;;  %v764_v51 = vadd.f32 %v1313_v22, %v1786_v25  ;;  %v49_v25 = vld [vmem:[#allocation2 + $0x68] sm:$0xff] }
 0x12b   :  { %928 = vst.msk [vmem:[#allocation2 + $0x40] sm:$0xff] %vm19_vm0, %v912_v1  ;;  %v915_v15 = vadd.f32 %v885_v2, %v47_v58  ;;  %v877_v16 = vadd.f32 %v876_v10, %v780_v5  ;;  %v1370_v19 = vpop.f32.mrf.mxu0  ;;  %v796_v1 = vadd.f32 %v1337_v14, %v1273_v35 }
 0x12c   :  { %923 = vst.msk [vmem:[#allocation2 + $0x18] sm:$0xff] %vm19_vm0, %v907_v0  ;;  %v905_v23 = vadd.f32 %v845_v8, %v37_v3  ;;  %v866_v24 = vadd.f32 %v1370_v19, %v769_v56  ;;  %v1378_v26 = vpop.f32.mrf.mxu1 }
 0x12d   :  { %931 = vst.msk [vmem:[#allocation2 + $0x58] sm:$0xff] %vm19_vm0, %v915_v15  ;;  %v913_v32 = vadd.f32 %v877_v16, %v45_v9  ;;  %v898_v36 = vadd.f32 %v1378_v26, %v801_v11  ;;  %v857_v38 = vpop.f32.mrf.mxu0 }
 0x12e   :  { %921 = vst.msk [vmem:[#allocation2 + $0x8] sm:$0xff] %vm19_vm0, %v905_v23  ;;  %v910_v39 = vadd.f32 %v866_v24, %v42_v18  ;;  %v858_v40 = vadd.f32 %v857_v38, %v1788_v30  ;;  %v889_v46 = vpop.f32.mrf.mxu1 }
 0x12f   :  { %v941_v44 = vld [vmem:[#allocation2 + $0x10] sm:$0xff]  ;;  %929 = vst.msk [vmem:[#allocation2 + $0x48] sm:$0xff] %vm19_vm0, %v913_v32  ;;  %v918_v33 = vadd.f32 %v898_v36, %v50_v17  ;;  %v890_v48 = vadd.f32 %v889_v46, %v793_v27  ;;  %v1371_v54 = vpop.f32.mrf.mxu0 }
 0x130   :  { %v962_v56 = vmul.f32 %v1811_v31, %v941_v44  ;;  %v949_v30 = vld [vmem:[#allocation2 + $0x50] sm:$0xff]  ;;  %926 = vst.msk [vmem:[#allocation2 + $0x30] sm:$0xff] %vm19_vm0, %v910_v39  ;;  %v908_v41 = vadd.f32 %v858_v40, %v40_v37  ;;  %v869_v57 = vadd.f32 %v1371_v54, %v772_v42  ;;  %v1379_v50 = vpop.f32.mrf.mxu1 }
 0x131   :  { %v970_v52 = vmul.f32 %v1811_v31, %v949_v30  ;;  %v939_v58 = vld [vmem:[#allocation2] sm:$0xff]  ;;  %934 = vst.msk [vmem:[#allocation2 + $0x70] sm:$0xff] %vm19_vm0, %v918_v33  ;;  %v916_v34 = vadd.f32 %v890_v48, %v48_v45  ;;  %v901_v59 = vadd.f32 %v1379_v50, %v804_v55  ;;  %v860_v61 = vpop.f32.mrf.mxu0 }
 0x132   :  { %v983_v2 = vadd.f32 %v1819_v47, %v962_v56  ;;  %v960_v3 = vmul.f32 %v1811_v31, %v939_v58  ;;  %v947_v4 = vld [vmem:[#allocation2 + $0x40] sm:$0xff]  ;;  %924 = vst.msk [vmem:[#allocation2 + $0x20] sm:$0xff] %vm19_vm0, %v908_v41  ;;  %v911_v5 = vadd.f32 %v869_v57, %v43_v53  ;;  %v861_v6 = vadd.f32 %v860_v61, %v764_v51  ;;  %v892_v63 = vpop.f32.mrf.mxu1 }
 0x133   :  { %v991_v7 = vadd.f32 %v1819_v47, %v970_v52  ;;  %v968_v0 = vmul.f32 %v1811_v31, %v947_v4  ;;  %v942_v8 = vld [vmem:[#allocation2 + $0x18] sm:$0xff]  ;;  %932 = vst.msk [vmem:[#allocation2 + $0x60] sm:$0xff] %vm19_vm0, %v916_v34  ;;  %v919_v9 = vadd.f32 %v901_v59, %v51_v49  ;;  %v893_v10 = vadd.f32 %v892_v63, %v796_v1 }
 0x134   :  { %v999_v11 = vmax.f32 %v983_v2, 0.0  ;;  %v981_v12 = vadd.f32 %v1819_v47, %v960_v3  ;;  %v963_v13 = vmul.f32 %v1811_v31, %v942_v8  ;;  %v950_v15 = vld [vmem:[#allocation2 + $0x58] sm:$0xff]  ;;  %927 = vst.msk [vmem:[#allocation2 + $0x38] sm:$0xff] %vm19_vm0, %v911_v5  ;;  %v909_v16 = vadd.f32 %v861_v6, %v41_v60 }
 0x135   :  { %v1007_v18 = vmax.f32 %v991_v7, 0.0  ;;  %v989_v19 = vadd.f32 %v1819_v47, %v968_v0  ;;  %v971_v20 = vmul.f32 %v1811_v31, %v950_v15  ;;  %v940_v21 = vld [vmem:[#allocation2 + $0x8] sm:$0xff]  ;;  %935 = vst.msk [vmem:[#allocation2 + $0x78] sm:$0xff] %vm19_vm0, %v919_v9  ;;  %v917_v22 = vadd.f32 %v893_v10, %v49_v25 }
 0x136   :  { %v1202_v23 = vpack.c.bf16 %v999_v11, %v999_v11  ;;  %v997_v24 = vmax.f32 %v981_v12, 0.0  ;;  %v984_v17 = vadd.f32 %v1819_v47, %v963_v13  ;;  %v961_v26 = vmul.f32 %v1811_v31, %v940_v21  ;;  %v948_v27 = vld [vmem:[#allocation2 + $0x48] sm:$0xff]  ;;  %925 = vst.msk [vmem:[#allocation2 + $0x28] sm:$0xff] %vm19_vm0, %v909_v16 }
 0x137   :  { %v1210_v28 = vpack.c.bf16 %v1007_v18, %v1007_v18  ;;  %v1005_v29 = vmax.f32 %v989_v19, 0.0  ;;  %v992_v35 = vadd.f32 %v1819_v47, %v971_v20  ;;  %v969_v43 = vmul.f32 %v1811_v31, %v948_v27  ;;  %v945_v62 = vld [vmem:[#allocation2 + $0x30] sm:$0xff]  ;;  %933 = vst.msk [vmem:[#allocation2 + $0x68] sm:$0xff] %vm19_vm0, %v917_v22 }
 0x138   :  { %1080 = vst.msk [vmem:[%s1930_s3 + $0x8] sm:$0xf] %vm1077_vm1, %v1202_v23  ;;  %v1200_v14 = vpack.c.bf16 %v997_v24, %v997_v24  ;;  %v1000_v32 = vmax.f32 %v984_v17, 0.0  ;;  %v982_v36 = vadd.f32 %v1819_v47, %v961_v26  ;;  %v966_v37 = vmul.f32 %v1811_v31, %v945_v62  ;;  %v953_v38 = vld [vmem:[#allocation2 + $0x70] sm:$0xff] }
 0x139   :  { %1088 = vst.msk [vmem:[%s1930_s3 + $0x28] sm:$0xf] %vm1077_vm1, %v1210_v28  ;;  %v1208_v39 = vpack.c.bf16 %v1005_v29, %v1005_v29  ;;  %v1008_v40 = vmax.f32 %v992_v35, 0.0  ;;  %v990_v45 = vadd.f32 %v1819_v47, %v969_v43  ;;  %v974_v46 = vmul.f32 %v1811_v31, %v953_v38  ;;  %v943_v42 = vld [vmem:[#allocation2 + $0x20] sm:$0xff] }
 0x13a   :  { %1078 = vst.msk [vmem:[%s1930_s3] sm:$0xf] %vm1077_vm1, %v1200_v14  ;;  %v1203_v44 = vpack.c.bf16 %v1000_v32, %v1000_v32  ;;  %v998_v33 = vmax.f32 %v982_v36, 0.0  ;;  %v987_v48 = vadd.f32 %v1819_v47, %v966_v37  ;;  %v964_v53 = vmul.f32 %v1811_v31, %v943_v42  ;;  %v951_v54 = vld [vmem:[#allocation2 + $0x60] sm:$0xff] }
 0x13b   :  { %1086 = vst.msk [vmem:[%s1930_s3 + $0x20] sm:$0xf] %vm1077_vm1, %v1208_v39  ;;  %v1211_v55 = vpack.c.bf16 %v1008_v40, %v1008_v40  ;;  %v1006_v56 = vmax.f32 %v990_v45, 0.0  ;;  %v995_v30 = vadd.f32 %v1819_v47, %v974_v46  ;;  %v972_v41 = vmul.f32 %v1811_v31, %v951_v54  ;;  %v946_v57 = vld [vmem:[#allocation2 + $0x38] sm:$0xff] }
 0x13c   :  { %1081 = vst.msk [vmem:[%s1930_s3 + $0xc] sm:$0xf] %vm1077_vm1, %v1203_v44  ;;  %v1201_v49 = vpack.c.bf16 %v998_v33, %v998_v33  ;;  %v1003_v50 = vmax.f32 %v987_v48, 0.0  ;;  %v985_v51 = vadd.f32 %v1819_v47, %v964_v53  ;;  %v967_v52 = vmul.f32 %v1811_v31, %v946_v57  ;;  %v954_v58 = vld [vmem:[#allocation2 + $0x78] sm:$0xff] }
 0x13d   :  { %1089 = vst.msk [vmem:[%s1930_s3 + $0x2c] sm:$0xf] %vm1077_vm1, %v1211_v55  ;;  %v1209_v34 = vpack.c.bf16 %v1006_v56, %v1006_v56  ;;  %v1011_v59 = vmax.f32 %v995_v30, 0.0  ;;  %v993_v60 = vadd.f32 %v1819_v47, %v972_v41  ;;  %v975_v61 = vmul.f32 %v1811_v31, %v954_v58  ;;  %v944_v1 = vld [vmem:[#allocation2 + $0x28] sm:$0xff] }
 0x13e   :  { %1079 = vst.msk [vmem:[%s1930_s3 + $0x4] sm:$0xf] %vm1077_vm1, %v1201_v49  ;;  %v1206_v2 = vpack.c.bf16 %v1003_v50, %v1003_v50  ;;  %v1001_v3 = vmax.f32 %v985_v51, 0.0  ;;  %v988_v4 = vadd.f32 %v1819_v47, %v967_v52  ;;  %v965_v5 = vmul.f32 %v1811_v31, %v944_v1  ;;  %v952_v6 = vld [vmem:[#allocation2 + $0x68] sm:$0xff] }
 0x13f   :  { %1087 = vst.msk [vmem:[%s1930_s3 + $0x24] sm:$0xf] %vm1077_vm1, %v1209_v34  ;;  %v1214_v25 = vpack.c.bf16 %v1011_v59, %v1011_v59  ;;  %v1009_v63 = vmax.f32 %v993_v60, 0.0  ;;  %v996_v7 = vadd.f32 %v1819_v47, %v975_v61  ;;  %v973_v0 = vmul.f32 %v1811_v31, %v952_v6 }
 0x140   :  { %1084 = vst.msk [vmem:[%s1930_s3 + $0x18] sm:$0xf] %vm1077_vm1, %v1206_v2  ;;  %v1204_v8 = vpack.c.bf16 %v1001_v3, %v1001_v3  ;;  %v1004_v9 = vmax.f32 %v988_v4, 0.0  ;;  %v986_v10 = vadd.f32 %v1819_v47, %v965_v5 }
 0x141   :  { %1092 = vst.msk [vmem:[%s1930_s3 + $0x38] sm:$0xf] %vm1077_vm1, %v1214_v25  ;;  %v1212_v11 = vpack.c.bf16 %v1009_v63, %v1009_v63  ;;  %v1012_v12 = vmax.f32 %v996_v7, 0.0  ;;  %v994_v13 = vadd.f32 %v1819_v47, %v973_v0 }
 0x142   :  { %1082 = vst.msk [vmem:[%s1930_s3 + $0x10] sm:$0xf] %vm1077_vm1, %v1204_v8  ;;  %v1207_v31 = vpack.c.bf16 %v1004_v9, %v1004_v9  ;;  %v1002_v15 = vmax.f32 %v986_v10, 0.0 }
 0x143   :  { %1090 = vst.msk [vmem:[%s1930_s3 + $0x30] sm:$0xf] %vm1077_vm1, %v1212_v11  ;;  %v1215_v16 = vpack.c.bf16 %v1012_v12, %v1012_v12  ;;  %v1010_v18 = vmax.f32 %v994_v13, 0.0 }
 0x144   :  { %1085 = vst.msk [vmem:[%s1930_s3 + $0x1c] sm:$0xf] %vm1077_vm1, %v1207_v31  ;;  %v1205_v47 = vpack.c.bf16 %v1002_v15, %v1002_v15 }
 0x145   :  { %1093 = vst.msk [vmem:[%s1930_s3 + $0x3c] sm:$0xf] %vm1077_vm1, %v1215_v16  ;;  %v1213_v19 = vpack.c.bf16 %v1010_v18, %v1010_v18 }
 0x146   :  { %1083 = vst.msk [vmem:[%s1930_s3 + $0x14] sm:$0xf] %vm1077_vm1, %v1205_v47 }
 0x147   :  { %1091 = vst.msk [vmem:[%s1930_s3 + $0x34] sm:$0xf] %vm1077_vm1, %v1213_v19 }

// kernel: pretrained_model_forward.23
= control target key start
LH: loop header
LB: loop body
LE: loop exit
PB: predicated region body
PF: predicated region fallthrough
CT: control target
= control target key end

     0   :  { %vm22_vm0 = vcmask 523264   ;;  %vm1128_vm1 = vcmask 519168   ;;  %s2209_s1 = inlined_call_operand.vmem [shape: bf16[576,64], index: 1, kind: input, shape index: {}]   ;;  %s2210_s0 = inlined_call_operand.vmem [shape: bf16[128,576], index: 0, kind: input, shape index: {}]   ;;  %s2211_s3 = inlined_call_operand.vmem [shape: bf16[128,64], index: 3, kind: input, shape index: {}]   ;;  %s2212_s2 = inlined_call_operand.vmem [shape: f32[2,64], index: 2, kind: input, shape index: {}]   ;;  %s2213_s4 = inlined_call_operand.vmem [shape: bf16[128,64], index: 4, kind: output, shape index: {}]  }
   0x1   :  { %v1479_v0 = vld [vmem:[%s2209_s1 + $0x78] sm:$0xff]   ;;  %v1483_v4 = vld [vmem:[%s2209_s1 + $0x70] sm:$0xff]   ;;  %v1487_v8 = vld [vmem:[%s2209_s1 + $0x68] sm:$0xff]  }
   0x2   :  { %v1480_v1 = vld [vmem:[%s2209_s1 + $0xf8] sm:$0xff]   ;;  %1306 = vmatprep.subr.bf16.mxu0 %v1479_v0  ;;  %v1484_v5 = vld [vmem:[%s2209_s1 + $0xf0] sm:$0xff]   ;;  %v1488_v9 = vld [vmem:[%s2209_s1 + $0xe8] sm:$0xff]  }
   0x3   :  { %v1481_v2 = vld [vmem:[%s2209_s1 + $0x38] sm:$0xff]   ;;  %1370 = vmatprep.subr.bf16.mxu1 %v1480_v1  ;;  %v1485_v6 = vld [vmem:[%s2209_s1 + $0x30] sm:$0xff]   ;;  %v1489_v10 = vld [vmem:[%s2209_s1 + $0x28] sm:$0xff]  }
   0x4   :  { %v1482_v3 = vld [vmem:[%s2209_s1 + $0xb8] sm:$0xff]   ;;  %1307 = vmatpush3.bf16.msra.mxu0 %v1481_v2  ;;  %v1486_v7 = vld [vmem:[%s2209_s1 + $0xb0] sm:$0xff]   ;;  %v1490_v11 = vld [vmem:[%s2209_s1 + $0xa8] sm:$0xff]  }
   0x5   :  { %1371 = vmatpush3.bf16.msra.mxu1 %v1482_v3  ;;  %1308 = vmatprep.subr.bf16.mxu0 %v1483_v4  ;;  %v1491_v12 = vld [vmem:[%s2209_s1 + $0x60] sm:$0xff]   ;;  %v1495_v16 = vld [vmem:[%s2209_s1 + $0x58] sm:$0xff]   ;;  %v1499_v20 = vld [vmem:[%s2209_s1 + $0x50] sm:$0xff]  }
   0x6   :  { %1372 = vmatprep.subr.bf16.mxu1 %v1484_v5  ;;  %v1492_v13 = vld [vmem:[%s2209_s1 + $0xe0] sm:$0xff]   ;;  %v1496_v17 = vld [vmem:[%s2209_s1 + $0xd8] sm:$0xff]   ;;  %v1500_v21 = vld [vmem:[%s2209_s1 + $0xd0] sm:$0xff]  }
   0x7   :  { %v1493_v14 = vld [vmem:[%s2209_s1 + $0x20] sm:$0xff]   ;;  %v1497_v18 = vld [vmem:[%s2209_s1 + $0x18] sm:$0xff]   ;;  %v1501_v22 = vld [vmem:[%s2209_s1 + $0x10] sm:$0xff]  }
   0x8   :  { %1309 = vmatpush3.bf16.msra.mxu0 %v1485_v6  ;;  %v1494_v15 = vld [vmem:[%s2209_s1 + $0xa0] sm:$0xff]   ;;  %v1498_v19 = vld [vmem:[%s2209_s1 + $0x98] sm:$0xff]   ;;  %v1502_v23 = vld [vmem:[%s2209_s1 + $0x90] sm:$0xff]  }
   0x9   :  { %1373 = vmatpush3.bf16.msra.mxu1 %v1486_v7  ;;  %1310 = vmatprep.subr.bf16.mxu0 %v1487_v8  ;;  %v1503_v24 = vld [vmem:[%s2209_s1 + $0x48] sm:$0xff]   ;;  %v1507_v28 = vld [vmem:[%s2209_s1 + $0x40] sm:$0xff]   ;;  %v1517_v36 = vld [vmem:[%s2209_s1 + $0x118] sm:$0xff]  }
   0xa   :  { %1374 = vmatprep.subr.bf16.mxu1 %v1488_v9  ;;  %v1504_v25 = vld [vmem:[%s2209_s1 + $0xc8] sm:$0xff]   ;;  %v1508_v29 = vld [vmem:[%s2209_s1 + $0xc0] sm:$0xff]   ;;  %v1530_v42 = vld [vmem:[%s2209_s1 + $0x110] sm:$0xff]  }
   0xb   :  { %v1505_v26 = vld [vmem:[%s2209_s1 + $0x8] sm:$0xff]   ;;  %v1509_v30 = vld [vmem:[%s2209_s1] sm:$0xff]   ;;  %v1526_v43 = vld [vmem:[%s2210_s0 + $0x5c] ss:$20 sps:$4 sm:$0xff]  }
   0xc   :  { %1311 = vmatpush3.bf16.msra.mxu0 %v1489_v10  ;;  %v1506_v27 = vld [vmem:[%s2209_s1 + $0x88] sm:$0xff]   ;;  %v1510_v31 = vld [vmem:[%s2209_s1 + $0x80] sm:$0xff]   ;;  %v1531_v47 = vld [vmem:[%s2210_s0 + $0x7c] ss:$20 sps:$4 sm:$0xff]  }
   0xd   :  { %1375 = vmatpush3.bf16.msra.mxu1 %v1490_v11  ;;  %1312 = vmatprep.subr.bf16.mxu0 %v1491_v12  ;;  %v1511_v32 = vld [vmem:[%s2210_s0] ss:$20 sps:$4 sm:$0xff]   ;;  %v1513_v33 = vld [vmem:[%s2210_s0 + $0x4] ss:$20 sps:$4 sm:$0xff]   ;;  %v1514_v34 = vld [vmem:[%s2210_s0 + $0x8] ss:$20 sps:$4 sm:$0xff]  }
   0xe   :  { %1376 = vmatprep.subr.bf16.mxu1 %v1492_v13  ;;  %v1516_v35 = vld [vmem:[%s2210_s0 + $0xc] ss:$20 sps:$4 sm:$0xff]   ;;  %648 = vmatprep.mubr.bf16.mxu0 %v1513_v33  ;;  %v1520_v38 = vld [vmem:[%s2210_s0 + $0x34] ss:$20 sps:$4 sm:$0xff]   ;;  %v1523_v40 = vld [vmem:[%s2210_s0 + $0x30] ss:$20 sps:$4 sm:$0xff]  }
   0xf   :  { %745 = vmatprep.mubr.bf16.mxu1 %v1516_v35  ;;  %v1518_v37 = vld [vmem:[%s2210_s0 + $0x2c] ss:$20 sps:$4 sm:$0xff]   ;;  %v1522_v39 = vld [vmem:[%s2210_s0 + $0x28] ss:$20 sps:$4 sm:$0xff]   ;;  %v1528_v44 = vld [vmem:[%s2210_s0 + $0x50] ss:$20 sps:$4 sm:$0xff]  }
  0x10   :  { %1313 = vmatpush3.bf16.msra.mxu0 %v1493_v14  ;;  %v1524_v41 = vld [vmem:[%s2210_s0 + $0x54] ss:$20 sps:$4 sm:$0xff]   ;;  %v1529_v45 = vld [vmem:[%s2210_s0 + $0x58] ss:$20 sps:$4 sm:$0xff]   ;;  %v1556_v49 = vld [vmem:[%s2209_s1 + $0x100] sm:$0xff]   ;;  %v1571_v12 = vmov 0.0  }
  0x11   :  { %1377 = vmatpush3.bf16.msra.mxu1 %v1494_v15  ;;  %1314 = vmatprep.subr.bf16.mxu0 %v1495_v16  ;;  %v1543_v46 = vld [vmem:[%s2209_s1 + $0x108] sm:$0xff]   ;;  %v1533_v48 = vld [vmem:[%s2210_s0 + $0x84] ss:$20 sps:$4 sm:$0xff]   ;;  %v1536_v51 = vld [vmem:[%s2210_s0 + $0x80] ss:$20 sps:$4 sm:$0xff]   ;;  %25 = vst.msk [vmem:[#allocation2 + $0x10] sm:$0xff] %vm22_vm0, %v1571_v12 }
  0x12   :  { %1378 = vmatprep.subr.bf16.mxu1 %v1496_v17  ;;  %v1535_v50 = vld [vmem:[%s2210_s0 + $0x78] ss:$20 sps:$4 sm:$0xff]   ;;  %v1541_v54 = vld [vmem:[%s2210_s0 + $0xa0] ss:$20 sps:$4 sm:$0xff]   ;;  %v1542_v55 = vld [vmem:[%s2210_s0 + $0xa8] ss:$20 sps:$4 sm:$0xff]  }
  0x13   :  { %v1537_v52 = vld [vmem:[%s2210_s0 + $0xa4] ss:$20 sps:$4 sm:$0xff]   ;;  %v1539_v53 = vld [vmem:[%s2210_s0 + $0xac] ss:$20 sps:$4 sm:$0xff]   ;;  %v1546_v57 = vld [vmem:[%s2210_s0 + $0xd4] ss:$20 sps:$4 sm:$0xff]  }
  0x14   :  { %1315 = vmatpush3.bf16.msra.mxu0 %v1497_v18  ;;  %v1544_v56 = vld [vmem:[%s2210_s0 + $0xcc] ss:$20 sps:$4 sm:$0xff]   ;;  %v1548_v58 = vld [vmem:[%s2210_s0 + $0xc8] ss:$20 sps:$4 sm:$0xff]   ;;  %v1549_v59 = vld [vmem:[%s2210_s0 + $0xd0] ss:$20 sps:$4 sm:$0xff]  }
  0x15   :  { %1379 = vmatpush3.bf16.msra.mxu1 %v1498_v19  ;;  %1316 = vmatprep.subr.bf16.mxu0 %v1499_v20  ;;  %v1550_v60 = vld [vmem:[%s2210_s0 + $0xf4] ss:$20 sps:$4 sm:$0xff]   ;;  %v1552_v61 = vld [vmem:[%s2210_s0 + $0xfc] ss:$20 sps:$4 sm:$0xff]   ;;  %v1555_v63 = vld [vmem:[%s2210_s0 + $0xf8] ss:$20 sps:$4 sm:$0xff]  }
  0x16   :  { %1380 = vmatprep.subr.bf16.mxu1 %v1500_v21  ;;  %v1554_v62 = vld [vmem:[%s2210_s0 + $0xf0] ss:$20 sps:$4 sm:$0xff]   ;;  %v1561_v2 = vld [vmem:[%s2210_s0 + $0x118] ss:$20 sps:$4 sm:$0xff]   ;;  %v1562_v3 = vld [vmem:[%s2210_s0 + $0x120] ss:$20 sps:$4 sm:$0xff]  }
  0x17   :  { %v1557_v0 = vld [vmem:[%s2210_s0 + $0x11c] ss:$20 sps:$4 sm:$0xff]   ;;  %v1559_v1 = vld [vmem:[%s2210_s0 + $0x124] ss:$20 sps:$4 sm:$0xff]   ;;  %v1567_v8 = vld [vmem:[%s2210_s0 + $0x60] ss:$20 sps:$4 sm:$0xff]  }
  0x18   :  { %1317 = vmatpush3.bf16.msra.mxu0 %v1501_v22  ;;  %v1563_v4 = vld [vmem:[%s2210_s0 + $0x10] ss:$20 sps:$4 sm:$0xff]   ;;  %v1565_v6 = vld [vmem:[%s2210_s0 + $0x38] ss:$20 sps:$4 sm:$0xff]   ;;  %v1568_v9 = vld [vmem:[%s2210_s0 + $0x100] ss:$20 sps:$4 sm:$0xff]  }
  0x19   :  { %1381 = vmatpush3.bf16.msra.mxu1 %v1502_v23  ;;  %1318 = vmatprep.subr.bf16.mxu0 %v1503_v24  ;;  %v1564_v5 = vld [vmem:[%s2210_s0 + $0xb0] ss:$20 sps:$4 sm:$0xff]   ;;  %v1566_v7 = vld [vmem:[%s2210_s0 + $0xd8] ss:$20 sps:$4 sm:$0xff]   ;;  %v1569_v10 = vld [vmem:[%s2210_s0 + $0x88] ss:$20 sps:$4 sm:$0xff]  }
  0x1a   :  { %1382 = vmatprep.subr.bf16.mxu1 %v1504_v25  ;;  %v1570_v11 = vld [vmem:[%s2210_s0 + $0x128] ss:$20 sps:$4 sm:$0xff]   ;;  %23 = vst.msk [vmem:[#allocation2] sm:$0xff] %vm22_vm0, %v1571_v12  ;;  %24 = vst.msk [vmem:[#allocation2 + $0x8] sm:$0xff] %vm22_vm0, %v1571_v12 }
  0x1b   :  { %26 = vst.msk [vmem:[#allocation2 + $0x18] sm:$0xff] %vm22_vm0, %v1571_v12  ;;  %27 = vst.msk [vmem:[#allocation2 + $0x20] sm:$0xff] %vm22_vm0, %v1571_v12 }
  0x1c   :  { %1319 = vmatpush3.bf16.msra.mxu0 %v1505_v26  ;;  %28 = vst.msk [vmem:[#allocation2 + $0x28] sm:$0xff] %vm22_vm0, %v1571_v12  ;;  %29 = vst.msk [vmem:[#allocation2 + $0x30] sm:$0xff] %vm22_vm0, %v1571_v12 }
  0x1d   :  { %1383 = vmatpush3.bf16.msra.mxu1 %v1506_v27  ;;  %1320 = vmatprep.subr.bf16.mxu0 %v1507_v28  ;;  %30 = vst.msk [vmem:[#allocation2 + $0x38] sm:$0xff] %vm22_vm0, %v1571_v12  ;;  %31 = vst.msk [vmem:[#allocation2 + $0x40] sm:$0xff] %vm22_vm0, %v1571_v12 }
  0x1e   :  { %1384 = vmatprep.subr.bf16.mxu1 %v1508_v29  ;;  %32 = vst.msk [vmem:[#allocation2 + $0x48] sm:$0xff] %vm22_vm0, %v1571_v12  ;;  %33 = vst.msk [vmem:[#allocation2 + $0x50] sm:$0xff] %vm22_vm0, %v1571_v12 }
  0x1f   :  { %34 = vst.msk [vmem:[#allocation2 + $0x58] sm:$0xff] %vm22_vm0, %v1571_v12  ;;  %35 = vst.msk [vmem:[#allocation2 + $0x60] sm:$0xff] %vm22_vm0, %v1571_v12 }
  0x20   :  { %1321 = vmatpush3.bf16.msra.mxu0 %v1509_v30  ;;  %36 = vst.msk [vmem:[#allocation2 + $0x68] sm:$0xff] %vm22_vm0, %v1571_v12  ;;  %37 = vst.msk [vmem:[#allocation2 + $0x70] sm:$0xff] %vm22_vm0, %v1571_v12 }
  0x21   :  { %1385 = vmatpush3.bf16.msra.mxu1 %v1510_v31  ;;  %1446 = vmatprep.subr.bf16.mxu0 %v1517_v36  ;;  %38 = vst.msk [vmem:[#allocation2 + $0x78] sm:$0xff] %vm22_vm0, %v1571_v12 }
  0x22   :  { %1470 = vmatprep.subr.bf16.mxu1 %v1517_v36 }
  0x23   :  { %649 = vmatmul.mubr.bf16.vlgmr.msra.gmra.mxu0 %v1511_v32 }
  0x24   :  { %746 = vmatmul.mubr.bf16.vlgmr.msra.gmra.mxu1 %v1514_v34  ;;  %1447 = vmatpush3.bf16.msra.mxu0 %v1517_v36 }
  0x25   :  { %1474 = vmatpush3.bf16.msra.mxu1 %v1517_v36  ;;  %656 = vmatprep.mubr.bf16.mxu0 %v1518_v37 }
  0x26   :  { %753 = vmatprep.mubr.bf16.mxu1 %v1520_v38  ;;  %1448 = vmatprep.subr.bf16.mxu0 %v1530_v42 }
  0x27   :  { %1471 = vmatprep.subr.bf16.mxu1 %v1530_v42 }
  0x28   :  { %1449 = vmatpush3.bf16.msra.mxu0 %v1530_v42 }
  0x29   :  { %1475 = vmatpush3.bf16.msra.mxu1 %v1530_v42  ;;  %1450 = vmatprep.subr.bf16.mxu0 %v1543_v46 }
  0x2a   :  { %1472 = vmatprep.subr.bf16.mxu1 %v1543_v46 }
  0x2b   :  { %657 = vmatmul.mubr.bf16.gmra.mxu0 %v1522_v39 }
  0x2c   :  { %754 = vmatmul.mubr.bf16.gmra.mxu1 %v1523_v40  ;;  %664 = vmatprep.mubr.bf16.mxu0 %v1524_v41 }
  0x2d   :  { %761 = vmatprep.mubr.bf16.mxu1 %v1526_v43  ;;  %1451 = vmatpush3.bf16.msra.mxu0 %v1543_v46 }
  0x2e   :  { %1476 = vmatpush3.bf16.msra.mxu1 %v1543_v46  ;;  %1452 = vmatprep.subr.bf16.mxu0 %v1556_v49 }
  0x2f   :  { %1473 = vmatprep.subr.bf16.mxu1 %v1556_v49 }
  0x31   :  { %1453 = vmatpush3.bf16.msra.mxu0 %v1556_v49 }
  0x32   :  { %1477 = vmatpush3.bf16.msra.mxu1 %v1556_v49 }
  0x33   :  { %665 = vmatmul.mubr.bf16.gmra.mxu0 %v1528_v44 }
  0x34   :  { %762 = vmatmul.mubr.bf16.gmra.mxu1 %v1529_v45  ;;  %672 = vmatprep.mubr.bf16.mxu0 %v1531_v47 }
  0x35   :  { %769 = vmatprep.mubr.bf16.mxu1 %v1533_v48 }
  0x3b   :  { %673 = vmatmul.mubr.bf16.gmra.mxu0 %v1535_v50 }
  0x3c   :  { %770 = vmatmul.mubr.bf16.gmra.mxu1 %v1536_v51  ;;  %680 = vmatprep.mubr.bf16.mxu0 %v1537_v52 }
  0x3d   :  { %777 = vmatprep.mubr.bf16.mxu1 %v1539_v53 }
  0x43   :  { %681 = vmatmul.mubr.bf16.gmra.mxu0 %v1541_v54 }
  0x44   :  { %778 = vmatmul.mubr.bf16.gmra.mxu1 %v1542_v55  ;;  %688 = vmatprep.mubr.bf16.mxu0 %v1544_v56 }
  0x45   :  { %785 = vmatprep.mubr.bf16.mxu1 %v1546_v57 }
  0x4b   :  { %689 = vmatmul.mubr.bf16.gmra.mxu0 %v1548_v58 }
  0x4c   :  { %786 = vmatmul.mubr.bf16.gmra.mxu1 %v1549_v59  ;;  %696 = vmatprep.mubr.bf16.mxu0 %v1550_v60 }
  0x4d   :  { %793 = vmatprep.mubr.bf16.mxu1 %v1552_v61 }
  0x53   :  { %697 = vmatmul.mubr.bf16.gmra.mxu0 %v1554_v62 }
  0x54   :  { %794 = vmatmul.mubr.bf16.gmra.mxu1 %v1555_v63  ;;  %704 = vmatprep.mubr.bf16.mxu0 %v1557_v0 }
  0x55   :  { %801 = vmatprep.mubr.bf16.mxu1 %v1559_v1 }
  0x5b   :  { %705 = vmatmul.mubr.bf16.gmra.mxu0 %v1561_v2  ;;  %v1938_v2 = vld [vmem:[%s2211_s3 + $0x8] sm:$0xff]  }
  0x5c   :  { %802 = vmatmul.mubr.bf16.gmra.mxu1 %v1562_v3  ;;  %1454 = vmatprep.mubr.msk.bf16.mxu0 %vm22_vm0, %v1563_v4  ;;  %v1945_v4 = vld [vmem:[%s2211_s3 + $0x28] sm:$0xff]  }
  0x5d   :  { %1462 = vmatprep.mubr.msk.bf16.mxu1 %vm22_vm0, %v1564_v5  ;;  %v1950_v5 = vld [vmem:[%s2211_s3] sm:$0xff]  }
  0x5e   :  { %2225 = vst [vmem:[#allocation10_spill] sm:$0xff] %v1950_v5 }
  0x63   :  { %1455 = vmatmul.mubr.msk.bf16.vlgmr.msra.gmra.mxu0 %vm22_vm0, %v1565_v6  ;;  %v1955_v6 = vld [vmem:[%s2211_s3 + $0x20] sm:$0xff]  }
  0x64   :  { %1463 = vmatmul.mubr.msk.bf16.vlgmr.msra.gmra.mxu1 %vm22_vm0, %v1566_v7  ;;  %1458 = vmatprep.mubr.msk.bf16.mxu0 %vm22_vm0, %v1567_v8  ;;  %2226 = vst [vmem:[#allocation11_spill] sm:$0xff] %v1955_v6 }
  0x65   :  { %1466 = vmatprep.mubr.msk.bf16.mxu1 %vm22_vm0, %v1568_v9  ;;  %v1964_v9 = vld [vmem:[%s2211_s3 + $0x18] sm:$0xff]  }
  0x6b   :  { %1459 = vmatmul.mubr.msk.bf16.gmra.mxu0 %vm22_vm0, %v1569_v10  ;;  %v1969_v10 = vld [vmem:[%s2211_s3 + $0x38] sm:$0xff]  }
  0x6c   :  { %1467 = vmatmul.mubr.msk.bf16.gmra.mxu1 %vm22_vm0, %v1570_v11 }
  0xe3   :  { %v1849_v13 = vpop.f32.mrf.mxu0 }
  0xe4   :  { %v1851_v14 = vpop.f32.mrf.mxu1 }
  0xe5   :  { %v1853_v15 = vpop.f32.mrf.mxu0 }
  0xe6   :  { %v1855_v16 = vpop.f32.mrf.mxu1 }
  0xe7   :  { %v1857_v17 = vpop.f32.mrf.mxu0 }
  0xe8   :  { %v1859_v18 = vpop.f32.mrf.mxu1 }
  0xe9   :  { %v1861_v19 = vpop.f32.mrf.mxu0 }
  0xea   :  { %v1863_v20 = vpop.f32.mrf.mxu1 }
  0xeb   :  { %v1865_v21 = vpop.f32.mrf.mxu0  ;;  %v1391_v12 = vadd.f32 %v1863_v20, %v1859_v18 }
  0xec   :  { %v1867_v22 = vpop.f32.mrf.mxu1 }
  0xed   :  { %v1869_v23 = vpop.f32.mrf.mxu0 }
  0xee   :  { %v1871_v24 = vpop.f32.mrf.mxu1  ;;  %v1330_v6 = vadd.f32 %v1869_v23, %v1865_v21 }
  0xef   :  { %v1873_v25 = vpop.f32.mrf.mxu0 }
  0xf0   :  { %v1875_v26 = vpop.f32.mrf.mxu1 }
  0xf1   :  { %v1877_v27 = vpop.f32.mrf.mxu0 }
  0xf2   :  { %v1879_v28 = vpop.f32.mrf.mxu1 }
  0xf3   :  { %v1881_v29 = vpop.f32.mrf.mxu0  ;;  %v1397_v18 = vadd.f32 %v1879_v28, %v1875_v26 }
  0xf4   :  { %v1883_v30 = vpop.f32.mrf.mxu1 }
  0xf5   :  { %v1885_v31 = vpop.f32.mrf.mxu0 }
  0xf6   :  { %v1887_v32 = vpop.f32.mrf.mxu1 }
  0xf7   :  { %v1889_v33 = vpop.f32.mrf.mxu0  ;;  %v1400_v20 = vadd.f32 %v1887_v32, %v1883_v30 }
  0xf8   :  { %v1891_v34 = vpop.f32.mrf.mxu1 }
  0xf9   :  { %2218 = vst [vmem:[#allocation3_spill] sm:$0xff] %v1891_v34  ;;  %v1893_v35 = vpop.f32.mrf.mxu0  ;;  %v1388_v34 = vadd.f32 %v1855_v16, %v1851_v14 }
  0xfa   :  { %v1895_v36 = vpop.f32.mrf.mxu1 }
  0xfb   :  { %2219 = vst [vmem:[#allocation4_spill] sm:$0xff] %v1895_v36  ;;  %v1897_v37 = vpop.f32.mrf.mxu0 }
  0xfc   :  { %v1899_v38 = vpop.f32.mrf.mxu1 }
  0xfd   :  { %v1901_v39 = vpop.f32.mrf.mxu0 }
  0xfe   :  { %v1903_v40 = vpop.f32.mrf.mxu1  ;;  %v1342_v26 = vadd.f32 %v1901_v39, %v1897_v37 }
  0xff   :  { %v1905_v41 = vpop.f32.mrf.mxu0  ;;  %v1406_v30 = vadd.f32 %v1903_v40, %v1899_v38 }
 0x100   :  { %v1907_v42 = vpop.f32.mrf.mxu1 }
 0x101   :  { %2220 = vst [vmem:[#allocation5_spill] sm:$0xff] %v1907_v42  ;;  %v1909_v43 = vpop.f32.mrf.mxu0 }
 0x102   :  { %2221 = vst [vmem:[#allocation6_spill] sm:$0xff] %v1909_v43  ;;  %v1911_v44 = vpop.f32.mrf.mxu1  ;;  %v1982_v43 = vld [vmem:[%s2211_s3 + $0x10] sm:$0xff]  }
 0x103   :  { %2222 = vst [vmem:[#allocation7_spill] sm:$0xff] %v1911_v44  ;;  %v1913_v45 = vpop.f32.mrf.mxu0  ;;  %v1277_v44 = vunpack.c.l.bf16 %v1982_v43 }
 0x104   :  { %v1915_v46 = vpop.f32.mrf.mxu1 }
 0x105   :  { %v1347_v47 = vpop.f32.mrf.mxu0 }
 0x106   :  { %v1411_v48 = vpop.f32.mrf.mxu1 }
 0x107   :  { %v1917_v49 = vpop.f32.mrf.mxu0  ;;  %v1412_v23 = vadd.f32 %v1411_v48, %v1915_v46  ;;  %v2027_v48 = vadd.f32 %v1893_v35, %v1889_v33 }
 0x108   :  { %v1919_v50 = vpop.f32.mrf.mxu1 }
 0x109   :  { %v1921_v51 = vpop.f32.mrf.mxu0 }
 0x10a   :  { %v1923_v52 = vpop.f32.mrf.mxu1 }
 0x10b   :  { %v1352_v53 = vpop.f32.mrf.mxu0  ;;  %v1415_v38 = vadd.f32 %v1923_v52, %v1919_v50  ;;  %v50_v52 = vld [vmem:[#allocation2 + $0x58] sm:$0xff] }
 0x10c   :  { %v1416_v54 = vpop.f32.mrf.mxu1 }
 0x10d   :  { %v1353_v55 = vpop.f32.mrf.mxu0 }
 0x10e   :  { %v1417_v56 = vpop.f32.mrf.mxu1  ;;  %v1354_v5 = vadd.f32 %v1353_v55, %v1352_v53  ;;  %v1282_v53 = vunpack.c.h.bf16 %v1964_v9 }
 0x10f   :  { %v1355_v57 = vpop.f32.mrf.mxu0  ;;  %v1418_v14 = vadd.f32 %v1417_v56, %v1416_v54  ;;  %v49_v56 = vld [vmem:[#allocation2 + $0x50] sm:$0xff] }
 0x110   :  { %v1419_v58 = vpop.f32.mrf.mxu1 }
 0x111   :  { %v1356_v59 = vpop.f32.mrf.mxu0  ;;  %v788_v46 = vadd.f32 %v1418_v14, %v1354_v5  ;;  %v47_v5 = vld [vmem:[#allocation2 + $0x40] sm:$0xff] }
 0x112   :  { %v1420_v60 = vpop.f32.mrf.mxu1  ;;  %v1357_v32 = vadd.f32 %v1356_v59, %v1355_v57  ;;  %v39_v57 = vld [vmem:[#allocation2] sm:$0xff] }
 0x113   :  { %v1925_v61 = vpop.f32.mrf.mxu0  ;;  %v1421_v54 = vadd.f32 %v1420_v60, %v1419_v58 }
 0x114   :  { %v1927_v62 = vpop.f32.mrf.mxu1 }
 0x115   :  { %v1929_v63 = vpop.f32.mrf.mxu0 }
 0x116   :  { %v1931_v0 = vpop.f32.mrf.mxu1 }
 0x117   :  { %v1933_v1 = vpop.f32.mrf.mxu0  ;;  %v1424_v50 = vadd.f32 %v1931_v0, %v1927_v62 }
 0x118   :  { %2223 = vst [vmem:[#allocation8_spill] sm:$0xff] %v1933_v1  ;;  %v1940_v3 = vpop.f32.mrf.mxu1  ;;  %v1987_v1 = vld [vmem:[%s2211_s3 + $0x30] sm:$0xff]  }
 0x119   :  { %2224 = vst [vmem:[#allocation9_spill] sm:$0xff] %v1940_v3  ;;  %v1957_v7 = vpop.f32.mrf.mxu0  ;;  %v1327_v3 = vadd.f32 %v1861_v19, %v1857_v17  ;;  %v1293_v42 = vunpack.c.l.bf16 %v1987_v1  ;;  %v1333_v17 = vadd.f32 %v1877_v27, %v1873_v25  ;;  %v1336_v19 = vadd.f32 %v1885_v31, %v1881_v29 }
 0x11a   :  { %2227 = vst [vmem:[#allocation12_spill] sm:$0xff] %v1957_v7  ;;  %v1959_v8 = vpop.f32.mrf.mxu1  ;;  %v1324_v7 = vadd.f32 %v1853_v15, %v1849_v13  ;;  %v1394_v13 = vadd.f32 %v1871_v24, %v1867_v22  ;;  %v1348_v22 = vadd.f32 %v1347_v47, %v1913_v45  ;;  %v41_v45 = vld [vmem:[#allocation2 + $0x10] sm:$0xff] }
 0x11b   :  { %2228 = vst [vmem:[#allocation13_spill] sm:$0xff] %v1959_v8  ;;  %v1364_v11 = vpop.f32.mrf.mxu0  ;;  %v751_v31 = vadd.f32 %v1391_v12, %v1327_v3  ;;  %v759_v37 = vadd.f32 %v1397_v18, %v1333_v17  ;;  %v2029_v39 = vadd.f32 %v1400_v20, %v1336_v19  ;;  %v791_v17 = vadd.f32 %v1421_v54, %v1357_v32 }
 0x11c   :  { %v1428_v8 = vpop.f32.mrf.mxu1  ;;  %v756_v28 = vadd.f32 %v1394_v13, %v1330_v6  ;;  %v748_v29 = vadd.f32 %v1388_v34, %v1324_v7  ;;  %v1351_v34 = vadd.f32 %v1921_v51, %v1917_v49  ;;  %v780_v59 = vadd.f32 %v1412_v23, %v1348_v22  ;;  %v42_v13 = vld [vmem:[#allocation2 + $0x18] sm:$0xff]  ;;  %v40_v22 = vld [vmem:[#allocation2 + $0x8] sm:$0xff] }
 0x11d   :  { %v1365_v36 = vpop.f32.mrf.mxu0  ;;  %v772_v18 = vadd.f32 %v1406_v30, %v1342_v26  ;;  %v1360_v49 = vadd.f32 %v1929_v63, %v1925_v61  ;;  %v2230_v61 = vld [vmem:[#allocation5_spill] sm:$0xff]  ;;  %v2231_v63 = vld [vmem:[#allocation7_spill] sm:$0xff] }
 0x11e   :  { %v1429_v15 = vpop.f32.mrf.mxu1  ;;  %v1366_v60 = vadd.f32 %v1365_v36, %v1364_v11  ;;  %v2229_v11 = vld [vmem:[#allocation6_spill] sm:$0xff]  ;;  %v1409_v26 = vadd.f32 %v2231_v63, %v2230_v61 }
 0x11f   :  { %v2003_v16 = vpop.f32.mrf.mxu0  ;;  %v1430_v3 = vadd.f32 %v1429_v15, %v1428_v8  ;;  %v1345_v15 = vadd.f32 %v2229_v11, %v1905_v41 }
 0x120   :  { %v2015_v21 = vpop.f32.mrf.mxu1 }
 0x121   :  { %v1368_v24 = vpop.f32.mrf.mxu0  ;;  %v804_v30 = vadd.f32 %v1430_v3, %v1366_v60  ;;  %v2059_v60 = vld [vmem:[%s2212_s2] ss:$0 sm:$0xff] }
 0x122   :  { %v1432_v27 = vpop.f32.mrf.mxu1  ;;  %v1369_v32 = vadd.f32 %v1368_v24, %v2003_v16  ;;  %v2235_v16 = vld [vmem:[#allocation12_spill] sm:$0xff] }
 0x123   :  { %v1456_v47 = vpop.f32.mrf.mxu0  ;;  %v1433_v41 = vadd.f32 %v1432_v27, %v2015_v21  ;;  %v2236_v21 = vld [vmem:[#allocation9_spill] sm:$0xff] }
 0x124   :  { %v853_v55 = vadd.f32 %v1456_v47, %v756_v28  ;;  %v1464_v25 = vpop.f32.mrf.mxu1  ;;  %v48_v28 = vld [vmem:[#allocation2 + $0x48] sm:$0xff]  ;;  %v45_v47 = vld [vmem:[#allocation2 + $0x30] sm:$0xff] }
 0x125   :  { %v885_v40 = vadd.f32 %v1464_v25, %v788_v46  ;;  %v844_v58 = vpop.f32.mrf.mxu0  ;;  %v783_v25 = vadd.f32 %v1415_v38, %v1351_v34  ;;  %v53_v38 = vld [vmem:[#allocation2 + $0x70] sm:$0xff] }
 0x126   :  { %v909_v33 = vadd.f32 %v853_v55, %v41_v45  ;;  %v845_v35 = vadd.f32 %v844_v58, %v748_v29  ;;  %v876_v6 = vpop.f32.mrf.mxu1  ;;  %v2232_v55 = vld [vmem:[#allocation3_spill] sm:$0xff]  ;;  %v2234_v58 = vld [vmem:[#allocation8_spill] sm:$0xff]  ;;  %v2237_v27 = vld [vmem:[#allocation13_spill] sm:$0xff] }
 0x127   :  { %v917_v7 = vadd.f32 %v885_v40, %v49_v56  ;;  %v877_v12 = vadd.f32 %v876_v6, %v780_v59  ;;  %v1457_v14 = vpop.f32.mrf.mxu0  ;;  %v2233_v56 = vld [vmem:[#allocation4_spill] sm:$0xff]  ;;  %v1363_v24 = vadd.f32 %v2235_v16, %v2234_v58  ;;  %v1427_v59 = vadd.f32 %v2237_v27, %v2236_v21 }
 0x128   :  { %925 = vst.msk [vmem:[#allocation2 + $0x10] sm:$0xff] %vm22_vm0, %v909_v33  ;;  %v907_v36 = vadd.f32 %v845_v35, %v39_v57  ;;  %v856_v51 = vadd.f32 %v1457_v14, %v759_v37  ;;  %v1465_v8 = vpop.f32.mrf.mxu1  ;;  %v1403_v37 = vadd.f32 %v2233_v56, %v2232_v55  ;;  %v796_v57 = vadd.f32 %v1424_v50, %v1360_v49  ;;  %v43_v35 = vld [vmem:[#allocation2 + $0x20] sm:$0xff] }
 0x129   :  { %933 = vst.msk [vmem:[#allocation2 + $0x50] sm:$0xff] %vm22_vm0, %v917_v7  ;;  %v915_v19 = vadd.f32 %v877_v12, %v47_v5  ;;  %v888_v20 = vadd.f32 %v1465_v8, %v791_v17  ;;  %v847_v23 = vpop.f32.mrf.mxu0  ;;  %v51_v12 = vld [vmem:[#allocation2 + $0x60] sm:$0xff]  ;;  %v775_v14 = vadd.f32 %v1409_v26, %v1345_v15  ;;  %v1278_v17 = vunpack.c.h.bf16 %v1982_v43 }
 0x12a   :  { %923 = vst.msk [vmem:[#allocation2] sm:$0xff] %vm22_vm0, %v907_v36  ;;  %v910_v62 = vadd.f32 %v856_v51, %v42_v13  ;;  %v848_v0 = vadd.f32 %v847_v23, %v751_v31  ;;  %v879_v29 = vpop.f32.mrf.mxu1  ;;  %v2068_v49 = vld [vmem:[%s2212_s2 + $0x1] ss:$0 sm:$0xff]  ;;  %v46_v51 = vld [vmem:[#allocation2 + $0x38] sm:$0xff]  ;;  %v807_v8 = vadd.f32 %v1433_v41, %v1369_v32 }
 0x12b   :  { %931 = vst.msk [vmem:[#allocation2 + $0x40] sm:$0xff] %vm22_vm0, %v915_v19  ;;  %v918_v54 = vadd.f32 %v888_v20, %v50_v52  ;;  %v880_v45 = vadd.f32 %v879_v29, %v783_v25  ;;  %v1460_v46 = vpop.f32.mrf.mxu0  ;;  %v767_v25 = vadd.f32 %v1403_v37, %v2027_v48  ;;  %v799_v29 = vadd.f32 %v1427_v59, %v1363_v24  ;;  %v52_v48 = vld [vmem:[#allocation2 + $0x68] sm:$0xff] }
 0x12c   :  { %926 = vst.msk [vmem:[#allocation2 + $0x18] sm:$0xff] %vm22_vm0, %v910_v62  ;;  %v908_v34 = vadd.f32 %v848_v0, %v40_v22  ;;  %v869_v31 = vadd.f32 %v1460_v46, %v772_v18  ;;  %v1468_v40 = vpop.f32.mrf.mxu1  ;;  %v54_v22 = vld [vmem:[#allocation2 + $0x78] sm:$0xff]  ;;  %v44_v0 = vld [vmem:[#allocation2 + $0x28] sm:$0xff]  ;;  %v2239_v24 = vunpack.c.l.bf16 %v1945_v4 }
 0x12d   :  { %934 = vst.msk [vmem:[#allocation2 + $0x58] sm:$0xff] %vm22_vm0, %v918_v54  ;;  %v916_v3 = vadd.f32 %v880_v45, %v48_v28  ;;  %v901_v33 = vadd.f32 %v1468_v40, %v804_v30  ;;  %v860_v5 = vpop.f32.mrf.mxu0 }
 0x12e   :  { %924 = vst.msk [vmem:[#allocation2 + $0x8] sm:$0xff] %vm22_vm0, %v908_v34  ;;  %v913_v6 = vadd.f32 %v869_v31, %v45_v47  ;;  %v861_v7 = vadd.f32 %v860_v5, %v2029_v39  ;;  %v892_v13 = vpop.f32.mrf.mxu1  ;;  %v1294_v39 = vunpack.c.h.bf16 %v1987_v1  ;;  %v2238_v31 = vunpack.c.l.bf16 %v1938_v2  ;;  %v2240_v5 = vld [vmem:[#allocation10_spill] sm:$0xff] }
 0x12f   :  { %v944_v18 = vld [vmem:[#allocation2 + $0x10] sm:$0xff]  ;;  %932 = vst.msk [vmem:[#allocation2 + $0x48] sm:$0xff] %vm22_vm0, %v916_v3  ;;  %v921_v50 = vadd.f32 %v901_v33, %v53_v38  ;;  %v893_v36 = vadd.f32 %v892_v13, %v796_v57  ;;  %v1461_v52 = vpop.f32.mrf.mxu0 }
 0x130   :  { %v965_v11 = vmul.f32 %v2059_v60, %v944_v18  ;;  %v952_v15 = vld [vmem:[#allocation2 + $0x50] sm:$0xff]  ;;  %929 = vst.msk [vmem:[#allocation2 + $0x30] sm:$0xff] %vm22_vm0, %v913_v6  ;;  %v911_v19 = vadd.f32 %v861_v7, %v43_v35  ;;  %v872_v20 = vadd.f32 %v1461_v52, %v775_v14  ;;  %v1469_v23 = vpop.f32.mrf.mxu1  ;;  %v2241_v6 = vunpack.c.l.bf16 %v2240_v5 }
 0x131   :  { %v973_v61 = vmul.f32 %v2059_v60, %v952_v15  ;;  %v942_v63 = vld [vmem:[#allocation2] sm:$0xff]  ;;  %937 = vst.msk [vmem:[#allocation2 + $0x70] sm:$0xff] %vm22_vm0, %v921_v50  ;;  %v919_v26 = vadd.f32 %v893_v36, %v51_v12  ;;  %v904_v62 = vadd.f32 %v1469_v23, %v807_v8  ;;  %v863_v28 = vpop.f32.mrf.mxu0 }
 0x132   :  { %v986_v30 = vadd.f32 %v2068_v49, %v965_v11  ;;  %v963_v32 = vmul.f32 %v2059_v60, %v942_v63  ;;  %v950_v41 = vld [vmem:[#allocation2 + $0x40] sm:$0xff]  ;;  %927 = vst.msk [vmem:[#allocation2 + $0x20] sm:$0xff] %vm22_vm0, %v911_v19  ;;  %v914_v54 = vadd.f32 %v872_v20, %v46_v51  ;;  %v864_v45 = vadd.f32 %v863_v28, %v767_v25  ;;  %v895_v47 = vpop.f32.mrf.mxu1 }
 0x133   :  { %v994_v46 = vadd.f32 %v2068_v49, %v973_v61  ;;  %v971_v55 = vmul.f32 %v2059_v60, %v950_v41  ;;  %v945_v56 = vld [vmem:[#allocation2 + $0x18] sm:$0xff]  ;;  %935 = vst.msk [vmem:[#allocation2 + $0x60] sm:$0xff] %vm22_vm0, %v919_v26  ;;  %v922_v37 = vadd.f32 %v904_v62, %v54_v22  ;;  %v896_v34 = vadd.f32 %v895_v47, %v799_v29  ;;  %v2242_v50 = vld [vmem:[#allocation11_spill] sm:$0xff] }
 0x134   :  { %v1034_v38 = vadd.f32 %v2238_v31, %v986_v30  ;;  %v984_v40 = vadd.f32 %v2068_v49, %v963_v32  ;;  %v966_v57 = vmul.f32 %v2059_v60, %v945_v56  ;;  %v953_v58 = vld [vmem:[#allocation2 + $0x58] sm:$0xff]  ;;  %930 = vst.msk [vmem:[#allocation2 + $0x38] sm:$0xff] %vm22_vm0, %v914_v54  ;;  %v912_v16 = vadd.f32 %v864_v45, %v44_v0 }
 0x135   :  { %v1042_v21 = vadd.f32 %v2239_v24, %v994_v46  ;;  %v992_v27 = vadd.f32 %v2068_v49, %v971_v55  ;;  %v974_v59 = vmul.f32 %v2059_v60, %v953_v58  ;;  %v943_v3 = vld [vmem:[#allocation2 + $0x8] sm:$0xff]  ;;  %938 = vst.msk [vmem:[#allocation2 + $0x78] sm:$0xff] %vm22_vm0, %v922_v37  ;;  %v920_v33 = vadd.f32 %v896_v34, %v52_v48 }
 0x136   :  { %v1050_v35 = vmax.f32 %v1034_v38, 0.0  ;;  %v1032_v7 = vadd.f32 %v2241_v6, %v984_v40  ;;  %v987_v12 = vadd.f32 %v2068_v49, %v966_v57  ;;  %v964_v13 = vmul.f32 %v2059_v60, %v943_v3  ;;  %v951_v14 = vld [vmem:[#allocation2 + $0x48] sm:$0xff]  ;;  %928 = vst.msk [vmem:[#allocation2 + $0x28] sm:$0xff] %vm22_vm0, %v912_v16 }
 0x137   :  { %v1058_v18 = vmax.f32 %v1042_v21, 0.0  ;;  %v2243_v36 = vunpack.c.l.bf16 %v2242_v50  ;;  %v995_v52 = vadd.f32 %v2068_v49, %v974_v59  ;;  %v972_v8 = vmul.f32 %v2059_v60, %v951_v14  ;;  %v948_v11 = vld [vmem:[#allocation2 + $0x30] sm:$0xff]  ;;  %936 = vst.msk [vmem:[#allocation2 + $0x68] sm:$0xff] %vm22_vm0, %v920_v33 }
 0x138   :  { %v1253_v15 = vpack.c.bf16 %v1050_v35, %v1050_v35  ;;  %v1048_v19 = vmax.f32 %v1032_v7, 0.0  ;;  %v2244_v20 = vunpack.c.h.bf16 %v1938_v2  ;;  %v985_v23 = vadd.f32 %v2068_v49, %v964_v13  ;;  %v956_v25 = vld [vmem:[#allocation2 + $0x70] sm:$0xff] }
 0x139   :  { %v1040_v51 = vadd.f32 %v2243_v36, %v992_v27  ;;  %v1261_v61 = vpack.c.bf16 %v1058_v18, %v1058_v18  ;;  %v2245_v26 = vunpack.c.h.bf16 %v1945_v4  ;;  %v993_v0 = vadd.f32 %v2068_v49, %v972_v8  ;;  %v946_v28 = vld [vmem:[#allocation2 + $0x20] sm:$0xff] }
 0x13a   :  { %v1035_v22 = vadd.f32 %v2244_v20, %v987_v12  ;;  %1131 = vst.msk [vmem:[%s2213_s4 + $0x8] sm:$0xf] %vm1128_vm1, %v1253_v15  ;;  %v1251_v29 = vpack.c.bf16 %v1048_v19, %v1048_v19  ;;  %v2246_v2 = vunpack.c.h.bf16 %v2240_v5  ;;  %v969_v41 = vmul.f32 %v2059_v60, %v948_v11  ;;  %v954_v54 = vld [vmem:[#allocation2 + $0x60] sm:$0xff] }
 0x13b   :  { %v1056_v63 = vmax.f32 %v1040_v51, 0.0  ;;  %v1043_v62 = vadd.f32 %v2245_v26, %v995_v52  ;;  %1139 = vst.msk [vmem:[%s2213_s4 + $0x28] sm:$0xf] %vm1128_vm1, %v1261_v61  ;;  %v2247_v48 = vunpack.c.h.bf16 %v2242_v50  ;;  %v977_v46 = vmul.f32 %v2059_v60, %v956_v25  ;;  %v949_v55 = vld [vmem:[#allocation2 + $0x38] sm:$0xff] }
 0x13c   :  { %v1051_v30 = vmax.f32 %v1035_v22, 0.0  ;;  %v1033_v32 = vadd.f32 %v2246_v2, %v985_v23  ;;  %1129 = vst.msk [vmem:[%s2213_s4] sm:$0xf] %vm1128_vm1, %v1251_v29  ;;  %v990_v34 = vadd.f32 %v2068_v49, %v969_v41  ;;  %v967_v31 = vmul.f32 %v2059_v60, %v946_v28  ;;  %v957_v38 = vld [vmem:[#allocation2 + $0x78] sm:$0xff] }
 0x13d   :  { %v1259_v4 = vpack.c.bf16 %v1056_v63, %v1056_v63  ;;  %v1059_v45 = vmax.f32 %v1043_v62, 0.0  ;;  %v1041_v47 = vadd.f32 %v2247_v48, %v993_v0  ;;  %v998_v58 = vadd.f32 %v2068_v49, %v977_v46  ;;  %v947_v24 = vld [vmem:[#allocation2 + $0x28] sm:$0xff] }
 0x13e   :  { %v1254_v56 = vpack.c.bf16 %v1051_v30, %v1051_v30  ;;  %v1049_v37 = vmax.f32 %v1033_v32, 0.0  ;;  %v975_v16 = vmul.f32 %v2059_v60, %v954_v54  ;;  %v2248_v27 = vunpack.c.l.bf16 %v1964_v9  ;;  %v955_v35 = vld [vmem:[#allocation2 + $0x68] sm:$0xff] }
 0x13f   :  { %1137 = vst.msk [vmem:[%s2213_s4 + $0x20] sm:$0xf] %vm1128_vm1, %v1259_v4  ;;  %v1262_v40 = vpack.c.bf16 %v1059_v45, %v1059_v45  ;;  %v1057_v57 = vmax.f32 %v1041_v47, 0.0  ;;  %v988_v3 = vadd.f32 %v2068_v49, %v967_v31  ;;  %v970_v33 = vmul.f32 %v2059_v60, %v949_v55 }
 0x140   :  { %1132 = vst.msk [vmem:[%s2213_s4 + $0xc] sm:$0xf] %vm1128_vm1, %v1254_v56  ;;  %v1252_v21 = vpack.c.bf16 %v1049_v37, %v1049_v37  ;;  %v1038_v59 = vadd.f32 %v2248_v27, %v990_v34  ;;  %v2249_v6 = vunpack.c.l.bf16 %v1969_v10  ;;  %v996_v12 = vadd.f32 %v2068_v49, %v975_v16 }
 0x141   :  { %1140 = vst.msk [vmem:[%s2213_s4 + $0x2c] sm:$0xf] %vm1128_vm1, %v1262_v40  ;;  %v1260_v5 = vpack.c.bf16 %v1057_v57, %v1057_v57  ;;  %v978_v13 = vmul.f32 %v2059_v60, %v957_v38  ;;  %v1036_v18 = vadd.f32 %v1277_v44, %v988_v3  ;;  %v991_v50 = vadd.f32 %v2068_v49, %v970_v33 }
 0x142   :  { %v1046_v7 = vadd.f32 %v2249_v6, %v998_v58  ;;  %1130 = vst.msk [vmem:[%s2213_s4 + $0x4] sm:$0xf] %vm1128_vm1, %v1252_v21  ;;  %v1054_v14 = vmax.f32 %v1038_v59, 0.0  ;;  %v968_v36 = vmul.f32 %v2059_v60, %v947_v24  ;;  %v1044_v52 = vadd.f32 %v1293_v42, %v996_v12 }
 0x143   :  { %1138 = vst.msk [vmem:[%s2213_s4 + $0x24] sm:$0xf] %vm1128_vm1, %v1260_v5  ;;  %v999_v8 = vadd.f32 %v2068_v49, %v978_v13  ;;  %v976_v11 = vmul.f32 %v2059_v60, %v955_v35  ;;  %v1052_v19 = vmax.f32 %v1036_v18, 0.0  ;;  %v1039_v44 = vadd.f32 %v1282_v53, %v991_v50 }
 0x144   :  { %v1062_v51 = vmax.f32 %v1046_v7, 0.0  ;;  %v1257_v15 = vpack.c.bf16 %v1054_v14, %v1054_v14  ;;  %v989_v20 = vadd.f32 %v2068_v49, %v968_v36  ;;  %v1060_v23 = vmax.f32 %v1044_v52, 0.0 }
 0x145   :  { %v2250_v25 = vunpack.c.h.bf16 %v1969_v10  ;;  %v997_v63 = vadd.f32 %v2068_v49, %v976_v11  ;;  %v1255_v42 = vpack.c.bf16 %v1052_v19, %v1052_v19  ;;  %v1055_v60 = vmax.f32 %v1039_v44, 0.0 }
 0x146   :  { %v1265_v22 = vpack.c.bf16 %v1062_v51, %v1062_v51  ;;  %1135 = vst.msk [vmem:[%s2213_s4 + $0x18] sm:$0xf] %vm1128_vm1, %v1257_v15  ;;  %v1037_v9 = vadd.f32 %v1278_v17, %v989_v20  ;;  %v1263_v53 = vpack.c.bf16 %v1060_v23, %v1060_v23 }
 0x147   :  { %v1047_v61 = vadd.f32 %v2250_v25, %v999_v8  ;;  %v1045_v49 = vadd.f32 %v1294_v39, %v997_v63  ;;  %1133 = vst.msk [vmem:[%s2213_s4 + $0x10] sm:$0xf] %vm1128_vm1, %v1255_v42  ;;  %v1258_v26 = vpack.c.bf16 %v1055_v60, %v1055_v60 }
 0x148   :  { %1143 = vst.msk [vmem:[%s2213_s4 + $0x38] sm:$0xf] %vm1128_vm1, %v1265_v22  ;;  %v1053_v62 = vmax.f32 %v1037_v9, 0.0  ;;  %1141 = vst.msk [vmem:[%s2213_s4 + $0x30] sm:$0xf] %vm1128_vm1, %v1263_v53 }
 0x149   :  { %v1063_v10 = vmax.f32 %v1047_v61, 0.0  ;;  %v1061_v17 = vmax.f32 %v1045_v49, 0.0  ;;  %1136 = vst.msk [vmem:[%s2213_s4 + $0x1c] sm:$0xf] %vm1128_vm1, %v1258_v26 }
 0x14a   :  { %v1256_v1 = vpack.c.bf16 %v1053_v62, %v1053_v62 }
 0x14b   :  { %v1266_v43 = vpack.c.bf16 %v1063_v10, %v1063_v10  ;;  %v1264_v39 = vpack.c.bf16 %v1061_v17, %v1061_v17 }
 0x14c   :  { %1134 = vst.msk [vmem:[%s2213_s4 + $0x14] sm:$0xf] %vm1128_vm1, %v1256_v1 }
 0x14d   :  { %1144 = vst.msk [vmem:[%s2213_s4 + $0x3c] sm:$0xf] %vm1128_vm1, %v1266_v43  ;;  %1142 = vst.msk [vmem:[%s2213_s4 + $0x34] sm:$0xf] %vm1128_vm1, %v1264_v39 }

// kernel: pretrained_model_forward.27
= control target key start
LH: loop header
LB: loop body
LE: loop exit
PB: predicated region body
PF: predicated region fallthrough
CT: control target
= control target key end

     0   :  { %vm377_vm0 = vcmask 523264   ;;  %s955_s1 = inlined_call_operand.vmem [shape: bf16[576,128], index: 1, kind: input, shape index: {}]   ;;  %s956_s0 = inlined_call_operand.vmem [shape: bf16[32,576], index: 0, kind: input, shape index: {}]   ;;  %s957_s2 = inlined_call_operand.vmem [shape: f32[2,128], index: 2, kind: input, shape index: {}]   ;;  %s958_s3 = inlined_call_operand.vmem [shape: bf16[32,128], index: 3, kind: output, shape index: {}]  }
   0x1   :  { %v735_v0 = vld [vmem:[%s955_s1 + $0x78] sm:$0xff]   ;;  %v739_v4 = vld [vmem:[%s955_s1 + $0x70] sm:$0xff]   ;;  %v743_v8 = vld [vmem:[%s955_s1 + $0x68] sm:$0xff]  }
   0x2   :  { %v736_v1 = vld [vmem:[%s955_s1 + $0xf8] sm:$0xff]   ;;  %661 = vmatprep.subr.bf16.mxu0 %v735_v0  ;;  %v740_v5 = vld [vmem:[%s955_s1 + $0xf0] sm:$0xff]   ;;  %v744_v9 = vld [vmem:[%s955_s1 + $0xe8] sm:$0xff]  }
   0x3   :  { %v737_v2 = vld [vmem:[%s955_s1 + $0x38] sm:$0xff]   ;;  %689 = vmatprep.subr.bf16.mxu1 %v736_v1  ;;  %v741_v6 = vld [vmem:[%s955_s1 + $0x30] sm:$0xff]   ;;  %v745_v10 = vld [vmem:[%s955_s1 + $0x28] sm:$0xff]  }
   0x4   :  { %v738_v3 = vld [vmem:[%s955_s1 + $0xb8] sm:$0xff]   ;;  %662 = vmatpush3.bf16.msra.mxu0 %v737_v2  ;;  %v742_v7 = vld [vmem:[%s955_s1 + $0xb0] sm:$0xff]   ;;  %v746_v11 = vld [vmem:[%s955_s1 + $0xa8] sm:$0xff]  }
   0x5   :  { %690 = vmatpush3.bf16.msra.mxu1 %v738_v3  ;;  %663 = vmatprep.subr.bf16.mxu0 %v739_v4  ;;  %v747_v12 = vld [vmem:[%s955_s1 + $0x60] sm:$0xff]   ;;  %v751_v16 = vld [vmem:[%s955_s1 + $0x58] sm:$0xff]   ;;  %v755_v20 = vld [vmem:[%s955_s1 + $0x50] sm:$0xff]  }
   0x6   :  { %691 = vmatprep.subr.bf16.mxu1 %v740_v5  ;;  %v748_v13 = vld [vmem:[%s955_s1 + $0xe0] sm:$0xff]   ;;  %v752_v17 = vld [vmem:[%s955_s1 + $0xd8] sm:$0xff]   ;;  %v756_v21 = vld [vmem:[%s955_s1 + $0xd0] sm:$0xff]  }
   0x7   :  { %v749_v14 = vld [vmem:[%s955_s1 + $0x20] sm:$0xff]   ;;  %v753_v18 = vld [vmem:[%s955_s1 + $0x18] sm:$0xff]   ;;  %v757_v22 = vld [vmem:[%s955_s1 + $0x10] sm:$0xff]  }
   0x8   :  { %664 = vmatpush3.bf16.msra.mxu0 %v741_v6  ;;  %v750_v15 = vld [vmem:[%s955_s1 + $0xa0] sm:$0xff]   ;;  %v754_v19 = vld [vmem:[%s955_s1 + $0x98] sm:$0xff]   ;;  %v758_v23 = vld [vmem:[%s955_s1 + $0x90] sm:$0xff]  }
   0x9   :  { %692 = vmatpush3.bf16.msra.mxu1 %v742_v7  ;;  %665 = vmatprep.subr.bf16.mxu0 %v743_v8  ;;  %v759_v24 = vld [vmem:[%s955_s1 + $0x48] sm:$0xff]   ;;  %v763_v28 = vld [vmem:[%s955_s1 + $0x40] sm:$0xff]   ;;  %v773_v36 = vld [vmem:[%s955_s1 + $0x118] sm:$0xff]  }
   0xa   :  { %693 = vmatprep.subr.bf16.mxu1 %v744_v9  ;;  %v760_v25 = vld [vmem:[%s955_s1 + $0xc8] sm:$0xff]   ;;  %v764_v29 = vld [vmem:[%s955_s1 + $0xc0] sm:$0xff]   ;;  %v774_v37 = vld [vmem:[%s955_s1 + $0x110] sm:$0xff]  }
   0xb   :  { %v761_v26 = vld [vmem:[%s955_s1 + $0x8] sm:$0xff]   ;;  %v765_v30 = vld [vmem:[%s955_s1] sm:$0xff]  }
   0xc   :  { %666 = vmatpush3.bf16.msra.mxu0 %v745_v10  ;;  %v762_v27 = vld [vmem:[%s955_s1 + $0x88] sm:$0xff]   ;;  %v766_v31 = vld [vmem:[%s955_s1 + $0x80] sm:$0xff]  }
   0xd   :  { %694 = vmatpush3.bf16.msra.mxu1 %v746_v11  ;;  %667 = vmatprep.subr.bf16.mxu0 %v747_v12  ;;  %v767_v32 = vld [vmem:[%s956_s0] ss:$20 sps:$4 sm:$0xff]   ;;  %v769_v33 = vld [vmem:[%s956_s0 + $0x4] ss:$20 sps:$4 sm:$0xff]   ;;  %v770_v34 = vld [vmem:[%s956_s0 + $0x8] ss:$20 sps:$4 sm:$0xff]  }
   0xe   :  { %695 = vmatprep.subr.bf16.mxu1 %v748_v13  ;;  %v772_v35 = vld [vmem:[%s956_s0 + $0xc] ss:$20 sps:$4 sm:$0xff]   ;;  %416 = vmatprep.mubr.bf16.mxu0 %v769_v33  ;;  %v777_v39 = vld [vmem:[%s956_s0 + $0x34] ss:$20 sps:$4 sm:$0xff]   ;;  %v780_v42 = vld [vmem:[%s956_s0 + $0x30] ss:$20 sps:$4 sm:$0xff]  }
   0xf   :  { %465 = vmatprep.mubr.bf16.mxu1 %v772_v35  ;;  %v775_v38 = vld [vmem:[%s956_s0 + $0x2c] ss:$20 sps:$4 sm:$0xff]   ;;  %v779_v40 = vld [vmem:[%s956_s0 + $0x28] ss:$20 sps:$4 sm:$0xff]   ;;  %v783_v43 = vld [vmem:[%s956_s0 + $0x10] ss:$20 sps:$4 sm:$0xff]  }
  0x10   :  { %668 = vmatpush3.bf16.msra.mxu0 %v749_v14  ;;  %v781_v41 = vld [vmem:[%s955_s1 + $0x108] sm:$0xff]   ;;  %v782_v44 = vld [vmem:[%s955_s1 + $0x100] sm:$0xff]  }
  0x11   :  { %696 = vmatpush3.bf16.msra.mxu1 %v750_v15  ;;  %669 = vmatprep.subr.bf16.mxu0 %v751_v16  ;;  %v784_v45 = vld [vmem:[%s956_s0 + $0x38] ss:$20 sps:$4 sm:$0xff]   ;;  %v640_v6 = vld [vmem:[%s957_s2] ss:$0 sm:$0xff]  ;;  %v641_v15 = vld [vmem:[%s957_s2 + $0x1] ss:$0 sm:$0xff] }
  0x12   :  { %697 = vmatprep.subr.bf16.mxu1 %v752_v17 }
  0x14   :  { %670 = vmatpush3.bf16.msra.mxu0 %v753_v18 }
  0x15   :  { %698 = vmatpush3.bf16.msra.mxu1 %v754_v19  ;;  %671 = vmatprep.subr.bf16.mxu0 %v755_v20 }
  0x16   :  { %699 = vmatprep.subr.bf16.mxu1 %v756_v21 }
  0x18   :  { %672 = vmatpush3.bf16.msra.mxu0 %v757_v22 }
  0x19   :  { %700 = vmatpush3.bf16.msra.mxu1 %v758_v23  ;;  %673 = vmatprep.subr.bf16.mxu0 %v759_v24 }
  0x1a   :  { %701 = vmatprep.subr.bf16.mxu1 %v760_v25 }
  0x1c   :  { %674 = vmatpush3.bf16.msra.mxu0 %v761_v26 }
  0x1d   :  { %702 = vmatpush3.bf16.msra.mxu1 %v762_v27  ;;  %675 = vmatprep.subr.bf16.mxu0 %v763_v28 }
  0x1e   :  { %703 = vmatprep.subr.bf16.mxu1 %v764_v29 }
  0x20   :  { %676 = vmatpush3.bf16.msra.mxu0 %v765_v30 }
  0x21   :  { %704 = vmatpush3.bf16.msra.mxu1 %v766_v31  ;;  %723 = vmatprep.subr.bf16.mxu0 %v773_v36 }
  0x23   :  { %417 = vmatmul.mubr.bf16.vlgmr.msra.gmra.mxu0 %v767_v32 }
  0x24   :  { %466 = vmatmul.mubr.bf16.vlgmr.msra.gmra.mxu1 %v770_v34  ;;  %724 = vmatpush3.bf16.msra.mxu0 %v773_v36 }
  0x25   :  { %725 = vmatprep.subr.bf16.mxu0 %v774_v37  ;;  %424 = vmatprep.mubr.bf16.mxu0 %v775_v38 }
  0x26   :  { %473 = vmatprep.mubr.bf16.mxu1 %v777_v39 }
  0x28   :  { %726 = vmatpush3.bf16.msra.mxu0 %v774_v37 }
  0x29   :  { %727 = vmatprep.subr.bf16.mxu0 %v781_v41 }
  0x2b   :  { %425 = vmatmul.mubr.bf16.gmra.mxu0 %v779_v40 }
  0x2c   :  { %474 = vmatmul.mubr.bf16.gmra.mxu1 %v780_v42  ;;  %731 = vmatprep.mubr.msk.bf16.mxu0 %vm377_vm0, %v783_v43 }
  0x2d   :  { %728 = vmatpush3.bf16.msra.mxu0 %v781_v41 }
  0x2e   :  { %729 = vmatprep.subr.bf16.mxu0 %v782_v44 }
  0x31   :  { %730 = vmatpush3.bf16.msra.mxu0 %v782_v44 }
  0x34   :  { %732 = vmatmul.mubr.msk.bf16.vlgmr.msra.gmra.mxu0 %vm377_vm0, %v784_v45 }
  0xe3   :  { %v677_v46 = vpop.f32.mrf.mxu0 }
  0xe4   :  { %v705_v47 = vpop.f32.mrf.mxu1 }
  0xe5   :  { %v678_v48 = vpop.f32.mrf.mxu0 }
  0xe6   :  { %v706_v49 = vpop.f32.mrf.mxu1  ;;  %v679_v62 = vadd.f32 %v678_v48, %v677_v46 }
  0xe7   :  { %v680_v50 = vpop.f32.mrf.mxu0  ;;  %v707_v63 = vadd.f32 %v706_v49, %v705_v47 }
  0xe8   :  { %v708_v51 = vpop.f32.mrf.mxu1 }
  0xe9   :  { %v681_v52 = vpop.f32.mrf.mxu0  ;;  %v468_v10 = vadd.f32 %v707_v63, %v679_v62 }
  0xea   :  { %v709_v53 = vpop.f32.mrf.mxu1  ;;  %v682_v7 = vadd.f32 %v681_v52, %v680_v50 }
  0xeb   :  { %v683_v54 = vpop.f32.mrf.mxu0  ;;  %v710_v8 = vadd.f32 %v709_v53, %v708_v51 }
  0xec   :  { %v711_v55 = vpop.f32.mrf.mxu1 }
  0xed   :  { %v684_v56 = vpop.f32.mrf.mxu0  ;;  %v471_v19 = vadd.f32 %v710_v8, %v682_v7 }
  0xee   :  { %v712_v57 = vpop.f32.mrf.mxu1  ;;  %v685_v58 = vadd.f32 %v684_v56, %v683_v54 }
  0xef   :  { %v713_v59 = vadd.f32 %v712_v57, %v711_v55  ;;  %v686_v60 = vpop.f32.mrf.mxu0 }
  0xf0   :  { %v714_v61 = vpop.f32.mrf.mxu1 }
  0xf1   :  { %v687_v0 = vpop.f32.mrf.mxu0  ;;  %v476_v4 = vadd.f32 %v713_v59, %v685_v58 }
  0xf2   :  { %v715_v1 = vpop.f32.mrf.mxu1  ;;  %v688_v2 = vadd.f32 %v687_v0, %v686_v60 }
  0xf3   :  { %v716_v3 = vadd.f32 %v715_v1, %v714_v61 }
  0xf4   :  { %v733_v5 = vpop.f32.mrf.mxu0 }
  0xf5   :  { %v525_v9 = vadd.f32 %v733_v5, %v476_v4  ;;  %v479_v14 = vadd.f32 %v716_v3, %v688_v2 }
  0xf6   :  { %v516_v11 = vpop.f32.mrf.mxu0 }
  0xf7   :  { %v553_v12 = vmul.f32 %v640_v6, %v525_v9  ;;  %v517_v13 = vadd.f32 %v516_v11, %v468_v10 }
  0xf8   :  { %v734_v16 = vpop.f32.mrf.mxu0 }
  0xf9   :  { %v551_v17 = vmul.f32 %v640_v6, %v517_v13  ;;  %v528_v18 = vadd.f32 %v734_v16, %v479_v14  ;;  %v562_v21 = vadd.f32 %v641_v15, %v553_v12 }
  0xfa   :  { %v519_v20 = vpop.f32.mrf.mxu0 }
  0xfb   :  { %v554_v22 = vmul.f32 %v640_v6, %v528_v18  ;;  %v520_v23 = vadd.f32 %v519_v20, %v471_v19  ;;  %v560_v24 = vadd.f32 %v641_v15, %v551_v17  ;;  %v566_v27 = vmax.f32 %v562_v21, 0.0 }
  0xfd   :  { %v563_v25 = vadd.f32 %v641_v15, %v554_v22  ;;  %v552_v26 = vmul.f32 %v640_v6, %v520_v23  ;;  %v564_v30 = vmax.f32 %v560_v24, 0.0 }
  0xff   :  { %v567_v28 = vmax.f32 %v563_v25, 0.0  ;;  %v561_v29 = vadd.f32 %v641_v15, %v552_v26 }
 0x101   :  { %v658_v31 = vpack.c.bf16 %v567_v28, %v566_v27  ;;  %v565_v32 = vmax.f32 %v561_v29, 0.0 }
 0x103   :  { %660 = vst [vmem:[%s958_s3 + $0x8] sm:$0xff] %v658_v31   ;;  %v653_v33 = vpack.c.bf16 %v565_v32, %v564_v30 }
 0x105   :  { %654 = vst [vmem:[%s958_s3] sm:$0xff] %v653_v33  }

// kernel: pretrained_model_forward.26
= control target key start
LH: loop header
LB: loop body
LE: loop exit
PB: predicated region body
PF: predicated region fallthrough
CT: control target
= control target key end

     0   :  { %vm73_vm0 = vcmask 523264   ;;  %s289_s1 = inlined_call_operand.vmem [shape: bf16[64,128], index: 1, kind: input, shape index: {}]   ;;  %s290_s0 = inlined_call_operand.vmem [shape: bf16[32,64], index: 0, kind: input, shape index: {}]   ;;  %s291_s2 = inlined_call_operand.vmem [shape: f32[2,128], index: 2, kind: input, shape index: {}]   ;;  %s292_s3 = inlined_call_operand.vmem [shape: bf16[32,128], index: 3, kind: output, shape index: {}]  }
   0x1   :  { %v233_v0 = vld [vmem:[%s289_s1 + $0x18] sm:$0xff]   ;;  %v234_v1 = vld [vmem:[%s289_s1 + $0x10] sm:$0xff]   ;;  %v235_v2 = vld [vmem:[%s289_s1 + $0x8] sm:$0xff]  }
   0x2   :  { %221 = vmatprep.subr.bf16.mxu0 %v233_v0  ;;  %v237_v3 = vld [vmem:[%s290_s0] sm:$0xff]   ;;  %v238_v5 = vld [vmem:[%s290_s0 + $0x8] sm:$0xff]  }
   0x3   :  { %222 = vmatpush3.bf16.msra.mxu0 %v233_v0  ;;  %229 = vmatprep.mubr.msk.bf16.mxu0 %vm73_vm0, %v237_v3  ;;  %v236_v4 = vld [vmem:[%s289_s1] sm:$0xff]  }
   0x4   :  { %223 = vmatprep.subr.bf16.mxu0 %v234_v1  ;;  %v194_v7 = vld [vmem:[%s291_s2] ss:$0 sm:$0xff]  ;;  %v195_v10 = vld [vmem:[%s291_s2 + $0x1] ss:$0 sm:$0xff] }
   0x7   :  { %224 = vmatpush3.bf16.msra.mxu0 %v234_v1 }
   0x8   :  { %225 = vmatprep.subr.bf16.mxu0 %v235_v2 }
   0xb   :  { %226 = vmatpush3.bf16.msra.mxu0 %v235_v2 }
   0xc   :  { %227 = vmatprep.subr.bf16.mxu0 %v236_v4 }
   0xf   :  { %228 = vmatpush3.bf16.msra.mxu0 %v236_v4 }
  0x12   :  { %230 = vmatmul.mubr.msk.bf16.vlgmr.msra.gmra.mxu0 %vm73_vm0, %v238_v5 }
  0xd2   :  { %v231_v6 = vpop.f32.mrf.mxu0 }
  0xd3   :  { %v151_v9 = vmul.f32 %v231_v6, %v194_v7 }
  0xd4   :  { %v114_v8 = vpop.f32.mrf.mxu0 }
  0xd5   :  { %v149_v12 = vmul.f32 %v194_v7, %v114_v8  ;;  %v160_v15 = vadd.f32 %v195_v10, %v151_v9 }
  0xd6   :  { %v232_v11 = vpop.f32.mrf.mxu0 }
  0xd7   :  { %v152_v13 = vmul.f32 %v232_v11, %v194_v7  ;;  %v158_v18 = vadd.f32 %v195_v10, %v149_v12 }
  0xd8   :  { %v117_v14 = vpop.f32.mrf.mxu0 }
  0xd9   :  { %v161_v16 = vadd.f32 %v195_v10, %v152_v13  ;;  %v150_v17 = vmul.f32 %v194_v7, %v117_v14 }
  0xdb   :  { %v212_v19 = vpack.c.bf16 %v161_v16, %v160_v15  ;;  %v159_v20 = vadd.f32 %v195_v10, %v150_v17 }
  0xdd   :  { %214 = vst [vmem:[%s292_s3 + $0x8] sm:$0xff] %v212_v19   ;;  %v207_v21 = vpack.c.bf16 %v159_v20, %v158_v18 }
  0xdf   :  { %208 = vst [vmem:[%s292_s3] sm:$0xff] %v207_v21  }

// kernel: pretrained_model_forward.28
= control target key start
LH: loop header
LB: loop body
LE: loop exit
PB: predicated region body
PF: predicated region fallthrough
CT: control target
= control target key end

     0   :  { %s1102_s15 = smov 0   ;;  %s1104_s16 = smov 0   ;;  %s1221_s0 = inlined_call_operand.vmem [shape: bf16[32,1152], index: 0, kind: input, shape index: {}]   ;;  %s1222_s1 = inlined_call_operand.vmem [shape: bf16[1152,128], index: 1, kind: input, shape index: {}]   ;;  %s1223_s2 = inlined_call_operand.vmem [shape: f32[2,128], index: 2, kind: input, shape index: {}]   ;;  %s1224_s3 = inlined_call_operand.vmem [shape: bf16[32,128], index: 3, kind: input, shape index: {}]   ;;  %s1225_s4 = inlined_call_operand.vmem [shape: bf16[32,128], index: 4, kind: output, shape index: {}]  }
   0x1   :  { %s1106_s17 = smov 0   ;;  %s1108_s18 = smov 0  }
   0x2   :  { %s1110_s19 = smov 0  }
   0x3 LB: > { %s23_s20 = sadd.s32 1, %s1070_s18  ;;  %p42_p1 = scmp.ne.s32.totalorder %s1062_s16, %s1058_s15  ;;  %s1074_s19 = sphi %s1110_s19, %s14_s19   ;;  %s1070_s18 = sphi %s1108_s18, %s1229_s18   ;;  %s1066_s17 = sphi %s1106_s17, %s1228_s17   ;;  %s1062_s16 = sphi %s1104_s16, %s1227_s16   ;;  %s1058_s15 = sphi %s1102_s15, %s1226_s15  }
   0x4   : > { %p24_p0 = scmp.ge.s32.totalorder %s23_s20, 3  ;;  %p43_p2 = scmp.eq.s32.totalorder %s1074_s19, 0 }
   0x5   : > { %s35_s22 = sadd.s32 1, %s1062_s16  ;;  %p824_p5 = scmp.ge.s32.totalorder %s1074_s19, 3 }
   0x6   : > { %s1231_s20 = smov (%p24_p0, %s23_s20), 0  ;;  %p44_p3 = por %p43_p2, %p42_p1 }
   0x7   : > { %s31_s21 = ssub.s32 %s1070_s18, %s1231_s20  ;;  %179 = sbr.rel (%p824_p5) target bundleno = 21 (0x15), region = 24 }
   0x8   : > { %p33_p4 = scmp.eq.s32.totalorder %s31_s21, 0 }
   0xa   : > { %s1137_s23 = scalar_select %p33_p4, %s1062_s16, %s35_s22  }
   0xc   : > { %182 = sbr.rel (!%p44_p3) target bundleno = 21 (0x15), region = 28  ;;  %s184_s24 = sand.u32 (%p44_p3), 1, %s1062_s16  }
   0xd   : > { %s878_s25 = smul.u32 (%p44_p3), 12, %s1070_s18 }
   0xe   : > { %s961_s26 = smul.u32 (%p44_p3), 48, %s184_s24 }
   0xf   : > { %s192_s29 = scalar_lea.vmem (%p44_p3), %s1221_s0, %s878_s25 }
  0x10   : > { %v207_v0 = vld [vmem:[%s192_s29] sm:$0xff] (%p44_p3)  ;;  %v211_v2 = vld [vmem:[%s192_s29 + $0x48] sm:$0xff] (%p44_p3)  ;;  %s186_s30 = scalar_lea.vmem (%p44_p3), [#allocation3], %s961_s26  ;;  %v830_v6 = vld [vmem:[%s192_s29 + $0x50] sm:$0xf] (%p44_p3) }
  0x11   : > { %v209_v1 = vld [vmem:[%s192_s29 + $0x24] sm:$0xff]  ;;  %208 = vst [vmem:[%s186_s30] sm:$0xff] %v207_v0  ;;  %212 = vst [vmem:[%s186_s30 + $0x18] sm:$0xff] %v211_v2  ;;  %v213_v3 = vld [vmem:[%s192_s29 + $0x6c] sm:$0xff] }
  0x12   : > { %210 = vst [vmem:[%s186_s30 + $0xc] sm:$0xff] %v209_v1  ;;  %v826_v4 = vld [vmem:[%s192_s29 + $0x8] sm:$0xf]  ;;  %v828_v5 = vld [vmem:[%s192_s29 + $0x2c] sm:$0xf]  ;;  %214 = vst [vmem:[%s186_s30 + $0x24] sm:$0xff] %v213_v3 }
  0x13   : > { %827 = vst [vmem:[%s186_s30 + $0x8] sm:$0xf] %v826_v4  ;;  %829 = vst [vmem:[%s186_s30 + $0x14] sm:$0xf] %v828_v5  ;;  %v832_v7 = vld [vmem:[%s192_s29 + $0x74] sm:$0xf] }
  0x14   : > { %831 = vst [vmem:[%s186_s30 + $0x20] sm:$0xf] %v830_v6  ;;  %833 = vst [vmem:[%s186_s30 + $0x2c] sm:$0xf] %v832_v7 }
  0x15 PF: > { %p834_p6 = scmp.ge.s32.totalorder %s1074_s19, 1  ;;  %p244_p7 = scmp.lt.s32.totalorder %s1074_s19, 4 }
  0x17   : > { %p245_p8 = pnand %p834_p6, %p244_p7 }
  0x18   : > { %s251_s5 = sand.u32 (!%p245_p8), 1, %s1058_s15   ;;  %s288_s6 = smul.u32 (!%p245_p8), 48, %s1066_s17 }
  0x19   : > { %248 = sbr.rel (%p245_p8) target bundleno = 303 (0x12f), region = 58  ;;  %p836_p10 = scmp.ne.s32.totalorder (!%p245_p8), %s1066_s17, 0 }
  0x1a   : > { %s962_s7 = smul.u32 (!%p245_p8), 48, %s251_s5  ;;  %p289_p9 = scmp.lt.s32.totalorder (!%p245_p8), %s288_s6, 143 }
  0x1c   : > { %s1154_s12 = scalar_lea.vmem (!%p245_p8), [#allocation3], %s962_s7 }
  0x1e   : > { %s1233_s6 = smov (!%p289_p9, %s288_s6), 143  ;;  %310 = sbr.rel (%p836_p10) target bundleno = 38 (0x26), region = 66 }
  0x1f   : > { %s835_s8 = sshll.u32 %s1233_s6, 2 }
  0x20   : > { %s1152_s11 = scalar_lea.vmem %s1222_s1, %s835_s8 }
  0x23   : > { %v1076_v8 = vmov 0.0  }
  0x24   : > { %311 = vst [vmem:[#allocation2 + $0x10] sm:$0xff] %v1076_v8  ;;  %312 = vst [vmem:[#allocation2] sm:$0xff] %v1076_v8 }
  0x25   : > { %313 = vst [vmem:[#allocation2 + $0x18] sm:$0xff] %v1076_v8  ;;  %314 = vst [vmem:[#allocation2 + $0x8] sm:$0xff] %v1076_v8 }
  0x26 PF: > { %v1004_v9 = vld [vmem:[%s1152_s11 + $0x78] sm:$0xff]   ;;  %v1007_v12 = vld [vmem:[%s1152_s11 + $0x70] sm:$0xff]   ;;  %v1010_v15 = vld [vmem:[%s1152_s11 + $0x68] sm:$0xff]   ;;  %p867_p11 = scmp.ne.s32.totalorder %s1066_s17, 2 }
  0x27   : > { %v1005_v10 = vld [vmem:[%s1152_s11 + $0x38] sm:$0xff]   ;;  %903 = vmatprep.subr.bf16.mxu0 %v1004_v9  ;;  %v1008_v13 = vld [vmem:[%s1152_s11 + $0x30] sm:$0xff]   ;;  %v1011_v16 = vld [vmem:[%s1152_s11 + $0x28] sm:$0xff]  }
  0x28   : > { %v1006_v11 = vld [vmem:[%s1152_s11 + $0xb8] sm:$0xff]   ;;  %904 = vmatpush3.bf16.msra.mxu0 %v1005_v10  ;;  %v1009_v14 = vld [vmem:[%s1152_s11 + $0xb0] sm:$0xff]   ;;  %v1012_v17 = vld [vmem:[%s1152_s11 + $0xa8] sm:$0xff]  }
  0x29   : > { %941 = vmatprep.subr.bf16.mxu1 %v1006_v11  ;;  %905 = vmatprep.subr.bf16.mxu0 %v1007_v12  ;;  %v1013_v18 = vld [vmem:[%s1152_s11 + $0x60] sm:$0xff]   ;;  %v1016_v21 = vld [vmem:[%s1152_s11 + $0x58] sm:$0xff]   ;;  %v1019_v24 = vld [vmem:[%s1152_s11 + $0x50] sm:$0xff]  }
  0x2a   : > { %942 = vmatpush3.bf16.msra.mxu1 %v1006_v11  ;;  %v1014_v19 = vld [vmem:[%s1152_s11 + $0x20] sm:$0xff]   ;;  %v1018_v22 = vld [vmem:[%s1152_s11 + $0x98] sm:$0xff]   ;;  %v1021_v25 = vld [vmem:[%s1152_s11 + $0x90] sm:$0xff]  }
  0x2b   : > { %943 = vmatprep.subr.bf16.mxu1 %v1009_v14  ;;  %v1015_v20 = vld [vmem:[%s1152_s11 + $0xa0] sm:$0xff]   ;;  %v1017_v23 = vld [vmem:[%s1152_s11 + $0x18] sm:$0xff]   ;;  %v1020_v26 = vld [vmem:[%s1152_s11 + $0x10] sm:$0xff]  }
  0x2c   : > { %906 = vmatpush3.bf16.msra.mxu0 %v1008_v13  ;;  %v1022_v27 = vld [vmem:[%s1152_s11 + $0x48] sm:$0xff]   ;;  %v1025_v30 = vld [vmem:[%s1152_s11 + $0x40] sm:$0xff]   ;;  %v315_v44 = vld [vmem:[#allocation2 + $0x10] sm:$0xff] }
  0x2d   : > { %907 = vmatprep.subr.bf16.mxu0 %v1010_v15  ;;  %v1023_v28 = vld [vmem:[%s1152_s11 + $0x8] sm:$0xff]   ;;  %v1027_v31 = vld [vmem:[%s1152_s11 + $0x80] sm:$0xff]   ;;  %v317_v58 = vld [vmem:[#allocation2 + $0x18] sm:$0xff] }
  0x2e   : > { %944 = vmatpush3.bf16.msra.mxu1 %v1009_v14  ;;  %v1024_v29 = vld [vmem:[%s1152_s11 + $0x88] sm:$0xff]   ;;  %v1030_v32 = vld [vmem:[%s1154_s12 + $0x4] ss:$12 sps:$4 sm:$0xff]  }
  0x2f   : > { %945 = vmatprep.subr.bf16.mxu1 %v1012_v17  ;;  %v1031_v33 = vld [vmem:[%s1154_s12 + $0x8] ss:$12 sps:$4 sm:$0xff]   ;;  %583 = vmatprep.mubr.bf16.mxu0 %v1030_v32  ;;  %v1028_v35 = vld [vmem:[%s1154_s12] ss:$12 sps:$4 sm:$0xff]   ;;  %v1035_v38 = vld [vmem:[%s1154_s12 + $0x18] ss:$12 sps:$4 sm:$0xff]  }
  0x30   : > { %908 = vmatpush3.bf16.msra.mxu0 %v1011_v16  ;;  %v1026_v34 = vld [vmem:[%s1152_s11] sm:$0xff]   ;;  %957 = vmatprep.mubr.bf16.mxu1 %v1031_v33  ;;  %v1033_v36 = vld [vmem:[%s1154_s12 + $0x1c] ss:$12 sps:$4 sm:$0xff]  }
  0x31   : > { %909 = vmatprep.subr.bf16.mxu0 %v1013_v18  ;;  %v1032_v37 = vld [vmem:[%s1154_s12 + $0x20] ss:$12 sps:$4 sm:$0xff]  }
  0x32   : > { %946 = vmatpush3.bf16.msra.mxu1 %v1012_v17  ;;  %v316_v52 = vld [vmem:[#allocation2] sm:$0xff]  ;;  %v318_v0 = vld [vmem:[#allocation2 + $0x8] sm:$0xff] }
  0x33   : > { %947 = vmatprep.subr.bf16.mxu1 %v1015_v20 }
  0x34   : > { %910 = vmatpush3.bf16.msra.mxu0 %v1014_v19 }
  0x35   : > { %911 = vmatprep.subr.bf16.mxu0 %v1016_v21 }
  0x36   : > { %948 = vmatpush3.bf16.msra.mxu1 %v1015_v20 }
  0x37   : > { %949 = vmatprep.subr.bf16.mxu1 %v1018_v22 }
  0x38   : > { %912 = vmatpush3.bf16.msra.mxu0 %v1017_v23 }
  0x39   : > { %913 = vmatprep.subr.bf16.mxu0 %v1019_v24 }
  0x3a   : > { %950 = vmatpush3.bf16.msra.mxu1 %v1018_v22 }
  0x3b   : > { %951 = vmatprep.subr.bf16.mxu1 %v1021_v25 }
  0x3c   : > { %914 = vmatpush3.bf16.msra.mxu0 %v1020_v26 }
  0x3d   : > { %915 = vmatprep.subr.bf16.mxu0 %v1022_v27 }
  0x3e   : > { %952 = vmatpush3.bf16.msra.mxu1 %v1021_v25 }
  0x3f   : > { %953 = vmatprep.subr.bf16.mxu1 %v1024_v29 }
  0x40   : > { %916 = vmatpush3.bf16.msra.mxu0 %v1023_v28 }
  0x41   : > { %917 = vmatprep.subr.bf16.mxu0 %v1025_v30 }
  0x42   : > { %954 = vmatpush3.bf16.msra.mxu1 %v1024_v29 }
  0x43   : > { %955 = vmatprep.subr.bf16.mxu1 %v1027_v31 }
  0x44   : > { %918 = vmatpush3.bf16.msra.mxu0 %v1026_v34 }
  0x46   : > { %956 = vmatpush3.bf16.msra.mxu1 %v1027_v31 }
  0x47   : > { %584 = vmatmul.mubr.bf16.vlgmr.msra.gmra.mxu0 %v1028_v35 }
  0x48   : > { %591 = vmatprep.mubr.bf16.mxu0 %v1033_v36 }
  0x49   : > { %958 = vmatmul.mubr.bf16.vlgmr.msra.gmra.mxu1 %v1032_v37 }
  0x4f   : > { %592 = vmatmul.mubr.bf16.gmra.mxu0 %v1035_v38 }
 0x107   : > { %v919_v39 = vpop.f32.mrf.mxu0 }
 0x109   : > { %v920_v40 = vpop.f32.mrf.mxu0  ;;  %v959_v41 = vpop.f32.mrf.mxu1 }
 0x10a   : > { %v921_v42 = vadd.f32 %v920_v40, %v919_v39 }
 0x10b   : > { %v922_v43 = vpop.f32.mrf.mxu0  ;;  %v634_v45 = vpop.f32.mrf.mxu1 }
 0x10c   : > { %v635_v46 = vadd.f32 %v921_v42, %v634_v45 }
 0x10d   : > { %v923_v47 = vpop.f32.mrf.mxu0  ;;  %v960_v48 = vpop.f32.mrf.mxu1 }
 0x10e   : > { %v649_v49 = vadd.f32 %v635_v46, %v315_v44  ;;  %v924_v50 = vadd.f32 %v923_v47, %v922_v43 }
 0x10f   : > { %v925_v51 = vpop.f32.mrf.mxu0  ;;  %v637_v53 = vpop.f32.mrf.mxu1 }
 0x110   : > { %653 = vst [vmem:[#allocation2 + $0x10] sm:$0xff] %v649_v49  ;;  %v638_v54 = vadd.f32 %v924_v50, %v637_v53 }
 0x111   : > { %v926_v55 = vpop.f32.mrf.mxu0 }
 0x112   : > { %v650_v56 = vadd.f32 %v638_v54, %v316_v52  ;;  %v927_v57 = vadd.f32 %v926_v55, %v925_v51 }
 0x113   : > { %v928_v59 = vpop.f32.mrf.mxu0 }
 0x114   : > { %654 = vst [vmem:[#allocation2] sm:$0xff] %v650_v56  ;;  %v643_v60 = vadd.f32 %v959_v41, %v927_v57 }
 0x115   : > { %v929_v61 = vpop.f32.mrf.mxu0 }
 0x116   : > { %v651_v62 = vadd.f32 %v643_v60, %v317_v58  ;;  %v930_v63 = vadd.f32 %v929_v61, %v928_v59 }
 0x118   : > { %655 = vst [vmem:[#allocation2 + $0x18] sm:$0xff] %v651_v62  ;;  %v646_v1 = vadd.f32 %v960_v48, %v930_v63  ;;  %660 = sbr.rel (%p867_p11) target bundleno = 303 (0x12f), region = 70 }
 0x11a   : > { %v652_v2 = vadd.f32 %v646_v1, %v318_v0 }
 0x11c   : > { %656 = vst [vmem:[#allocation2 + $0x8] sm:$0xff] %v652_v2 }
 0x11d   : > { %v661_v3 = vld [vmem:[#allocation2 + $0x10] sm:$0xff]  ;;  %v662_v4 = vld [vmem:[#allocation2] sm:$0xff]  ;;  %v901_v15 = vld [vmem:[%s1224_s3 + $0x8] sm:$0xff]  }
 0x11e   : > { %v868_v5 = vld [vmem:[%s1223_s2] ss:$0 sm:$0xff]  ;;  %v869_v8 = vld [vmem:[%s1223_s2 + $0x1] ss:$0 sm:$0xff]  ;;  %v889_v19 = vunpack.c.l.bf16 %v901_v15  ;;  %v890_v21 = vunpack.c.h.bf16 %v901_v15 }
 0x11f   : > { %v670_v6 = vmul.f32 %v868_v5, %v661_v3  ;;  %v671_v7 = vmul.f32 %v868_v5, %v662_v4  ;;  %v884_v9 = vld [vmem:[%s1224_s3] sm:$0xff]   ;;  %v663_v10 = vld [vmem:[#allocation2 + $0x18] sm:$0xff] }
 0x120   : > { %v885_v11 = vunpack.c.l.bf16 %v884_v9  ;;  %v886_v12 = vunpack.c.h.bf16 %v884_v9  ;;  %v672_v14 = vmul.f32 %v868_v5, %v663_v10 }
 0x121   : > { %v679_v16 = vadd.f32 %v869_v8, %v670_v6  ;;  %v680_v17 = vadd.f32 %v869_v8, %v671_v7 }
 0x122   : > { %v681_v20 = vadd.f32 %v869_v8, %v672_v14 }
 0x123   : > { %v664_v13 = vld [vmem:[#allocation2 + $0x8] sm:$0xff]  ;;  %v691_v22 = vadd.f32 %v885_v11, %v679_v16  ;;  %v692_v23 = vadd.f32 %v886_v12, %v680_v17 }
 0x124   : > { %v673_v18 = vmul.f32 %v868_v5, %v664_v13  ;;  %v693_v25 = vadd.f32 %v889_v19, %v681_v20 }
 0x125   : > { %v695_v26 = vmax.f32 %v691_v22, 0.0  ;;  %v696_v27 = vmax.f32 %v692_v23, 0.0 }
 0x126   : > { %v682_v24 = vadd.f32 %v869_v8, %v673_v18  ;;  %v697_v29 = vmax.f32 %v693_v25, 0.0 }
 0x127   : > { %v894_v30 = vpack.c.bf16 %v696_v27, %v695_v26 }
 0x128   : > { %v694_v28 = vadd.f32 %v890_v21, %v682_v24 }
 0x129   : > { %895 = vst [vmem:[%s1225_s4] sm:$0xff] %v894_v30  }
 0x12a   : > { %v698_v31 = vmax.f32 %v694_v28, 0.0 }
 0x12c   : > { %v899_v32 = vpack.c.bf16 %v698_v31, %v697_v29 }
 0x12e   : > { %902 = vst [vmem:[%s1225_s4 + $0x8] sm:$0xff] %v899_v32  }
 0x12f PF: > { %s14_s19 = sadd.s32 1, %s1074_s19   ;;  %s1226_s15 = smov %s1062_s16 }
 0x130   : > { %p11_p12 = scmp.ge.s32.totalorder %s14_s19, 5   ;;  %s1227_s16 = smov %s1137_s23 }
 0x131   : > { %s1228_s17 = smov %s1070_s18  ;;  %s1229_s18 = smov %s1231_s20 }
 0x132   :  { %13 = sbr.rel (!%p11_p12) target bundleno = 3 (0x3), region = 117 }

// kernel: pretrained_model_forward.29
= control target key start
LH: loop header
LB: loop body
LE: loop exit
PB: predicated region body
PF: predicated region fallthrough
CT: control target
= control target key end

     0   :  { %s1011_s12 = smov 0   ;;  %s1013_s13 = smov 0   ;;  %s1124_s0 = inlined_call_operand.vmem [shape: bf16[32,1152], index: 0, kind: input, shape index: {}]   ;;  %s1125_s1 = inlined_call_operand.vmem [shape: bf16[1152,128], index: 1, kind: input, shape index: {}]   ;;  %s1126_s2 = inlined_call_operand.vmem [shape: f32[2,128], index: 2, kind: input, shape index: {}]   ;;  %s1127_s3 = inlined_call_operand.vmem [shape: bf16[32,128], index: 3, kind: output, shape index: {}]  }
   0x1   :  { %s1015_s14 = smov 0   ;;  %s1017_s15 = smov 0  }
   0x2   :  { %s1019_s16 = smov 0  }
   0x3 LB: > { %s22_s17 = sadd.s32 1, %s984_s15  ;;  %p41_p1 = scmp.ne.s32.totalorder %s976_s13, %s972_s12  ;;  %s988_s16 = sphi %s1019_s16, %s13_s16   ;;  %s984_s15 = sphi %s1017_s15, %s1131_s15   ;;  %s980_s14 = sphi %s1015_s14, %s1130_s14   ;;  %s976_s13 = sphi %s1013_s13, %s1129_s13   ;;  %s972_s12 = sphi %s1011_s12, %s1128_s12  }
   0x4   : > { %p23_p0 = scmp.ge.s32.totalorder %s22_s17, 3  ;;  %p42_p2 = scmp.eq.s32.totalorder %s988_s16, 0 }
   0x5   : > { %s34_s19 = sadd.s32 1, %s976_s13  ;;  %p747_p5 = scmp.ge.s32.totalorder %s988_s16, 3 }
   0x6   : > { %s1133_s17 = smov (%p23_p0, %s22_s17), 0  ;;  %p43_p3 = por %p42_p2, %p41_p1 }
   0x7   : > { %s30_s18 = ssub.s32 %s984_s15, %s1133_s17  ;;  %143 = sbr.rel (%p747_p5) target bundleno = 21 (0x15), region = 20 }
   0x8   : > { %p32_p4 = scmp.eq.s32.totalorder %s30_s18, 0 }
   0xa   : > { %s1046_s20 = scalar_select %p32_p4, %s976_s13, %s34_s19  }
   0xc   : > { %146 = sbr.rel (!%p43_p3) target bundleno = 21 (0x15), region = 24  ;;  %s148_s21 = sand.u32 (%p43_p3), 1, %s976_s13  }
   0xd   : > { %s801_s22 = smul.u32 (%p43_p3), 12, %s984_s15 }
   0xe   : > { %s875_s23 = smul.u32 (%p43_p3), 48, %s148_s21 }
   0xf   : > { %s156_s26 = scalar_lea.vmem (%p43_p3), %s1124_s0, %s801_s22 }
  0x10   : > { %v171_v0 = vld [vmem:[%s156_s26] sm:$0xff] (%p43_p3)  ;;  %v175_v2 = vld [vmem:[%s156_s26 + $0x48] sm:$0xff] (%p43_p3)  ;;  %s150_s27 = scalar_lea.vmem (%p43_p3), [#allocation3], %s875_s23  ;;  %v753_v6 = vld [vmem:[%s156_s26 + $0x50] sm:$0xf] (%p43_p3) }
  0x11   : > { %v173_v1 = vld [vmem:[%s156_s26 + $0x24] sm:$0xff]  ;;  %172 = vst [vmem:[%s150_s27] sm:$0xff] %v171_v0  ;;  %176 = vst [vmem:[%s150_s27 + $0x18] sm:$0xff] %v175_v2  ;;  %v177_v3 = vld [vmem:[%s156_s26 + $0x6c] sm:$0xff] }
  0x12   : > { %174 = vst [vmem:[%s150_s27 + $0xc] sm:$0xff] %v173_v1  ;;  %v749_v4 = vld [vmem:[%s156_s26 + $0x8] sm:$0xf]  ;;  %v751_v5 = vld [vmem:[%s156_s26 + $0x2c] sm:$0xf]  ;;  %178 = vst [vmem:[%s150_s27 + $0x24] sm:$0xff] %v177_v3 }
  0x13   : > { %750 = vst [vmem:[%s150_s27 + $0x8] sm:$0xf] %v749_v4  ;;  %752 = vst [vmem:[%s150_s27 + $0x14] sm:$0xf] %v751_v5  ;;  %v755_v7 = vld [vmem:[%s156_s26 + $0x74] sm:$0xf] }
  0x14   : > { %754 = vst [vmem:[%s150_s27 + $0x20] sm:$0xf] %v753_v6  ;;  %756 = vst [vmem:[%s150_s27 + $0x2c] sm:$0xf] %v755_v7 }
  0x15 PF: > { %p757_p6 = scmp.ge.s32.totalorder %s988_s16, 1  ;;  %p208_p7 = scmp.lt.s32.totalorder %s988_s16, 4 }
  0x17   : > { %p209_p8 = pnand %p757_p6, %p208_p7 }
  0x18   : > { %s215_s28 = sand.u32 (!%p209_p8), 1, %s972_s12   ;;  %s245_s29 = smul.u32 (!%p209_p8), 48, %s980_s14 }
  0x19   : > { %212 = sbr.rel (%p209_p8) target bundleno = 301 (0x12d), region = 54  ;;  %p759_p10 = scmp.ne.s32.totalorder (!%p209_p8), %s980_s14, 0 }
  0x1a   : > { %s876_s30 = smul.u32 (!%p209_p8), 48, %s215_s28  ;;  %p246_p9 = scmp.lt.s32.totalorder (!%p209_p8), %s245_s29, 143 }
  0x1c   : > { %s1063_s8 = scalar_lea.vmem (!%p209_p8), [#allocation3], %s876_s30 }
  0x1e   : > { %s1135_s29 = smov (!%p246_p9, %s245_s29), 143  ;;  %261 = sbr.rel (%p759_p10) target bundleno = 38 (0x26), region = 62 }
  0x1f   : > { %s758_s4 = sshll.u32 %s1135_s29, 2 }
  0x20   : > { %s1061_s7 = scalar_lea.vmem %s1125_s1, %s758_s4 }
  0x23   : > { %v990_v8 = vmov 0.0  }
  0x24   : > { %262 = vst [vmem:[#allocation2 + $0x10] sm:$0xff] %v990_v8  ;;  %263 = vst [vmem:[#allocation2] sm:$0xff] %v990_v8 }
  0x25   : > { %264 = vst [vmem:[#allocation2 + $0x18] sm:$0xff] %v990_v8  ;;  %265 = vst [vmem:[#allocation2 + $0x8] sm:$0xff] %v990_v8 }
  0x26 PF: > { %v918_v9 = vld [vmem:[%s1061_s7 + $0x78] sm:$0xff]   ;;  %v921_v12 = vld [vmem:[%s1061_s7 + $0x70] sm:$0xff]   ;;  %v924_v15 = vld [vmem:[%s1061_s7 + $0x68] sm:$0xff]   ;;  %p790_p11 = scmp.ne.s32.totalorder %s980_s14, 2 }
  0x27   : > { %v919_v10 = vld [vmem:[%s1061_s7 + $0x38] sm:$0xff]   ;;  %817 = vmatprep.subr.bf16.mxu0 %v918_v9  ;;  %v922_v13 = vld [vmem:[%s1061_s7 + $0x30] sm:$0xff]   ;;  %v925_v16 = vld [vmem:[%s1061_s7 + $0x28] sm:$0xff]  }
  0x28   : > { %v920_v11 = vld [vmem:[%s1061_s7 + $0xb8] sm:$0xff]   ;;  %818 = vmatpush3.bf16.msra.mxu0 %v919_v10  ;;  %v923_v14 = vld [vmem:[%s1061_s7 + $0xb0] sm:$0xff]   ;;  %v926_v17 = vld [vmem:[%s1061_s7 + $0xa8] sm:$0xff]  }
  0x29   : > { %855 = vmatprep.subr.bf16.mxu1 %v920_v11  ;;  %819 = vmatprep.subr.bf16.mxu0 %v921_v12  ;;  %v927_v18 = vld [vmem:[%s1061_s7 + $0x60] sm:$0xff]   ;;  %v930_v21 = vld [vmem:[%s1061_s7 + $0x58] sm:$0xff]   ;;  %v933_v24 = vld [vmem:[%s1061_s7 + $0x50] sm:$0xff]  }
  0x2a   : > { %856 = vmatpush3.bf16.msra.mxu1 %v920_v11  ;;  %v928_v19 = vld [vmem:[%s1061_s7 + $0x20] sm:$0xff]   ;;  %v932_v22 = vld [vmem:[%s1061_s7 + $0x98] sm:$0xff]   ;;  %v935_v25 = vld [vmem:[%s1061_s7 + $0x90] sm:$0xff]  }
  0x2b   : > { %857 = vmatprep.subr.bf16.mxu1 %v923_v14  ;;  %v929_v20 = vld [vmem:[%s1061_s7 + $0xa0] sm:$0xff]   ;;  %v931_v23 = vld [vmem:[%s1061_s7 + $0x18] sm:$0xff]   ;;  %v934_v26 = vld [vmem:[%s1061_s7 + $0x10] sm:$0xff]  }
  0x2c   : > { %820 = vmatpush3.bf16.msra.mxu0 %v922_v13  ;;  %v936_v27 = vld [vmem:[%s1061_s7 + $0x48] sm:$0xff]   ;;  %v939_v30 = vld [vmem:[%s1061_s7 + $0x40] sm:$0xff]   ;;  %v266_v44 = vld [vmem:[#allocation2 + $0x10] sm:$0xff] }
  0x2d   : > { %821 = vmatprep.subr.bf16.mxu0 %v924_v15  ;;  %v937_v28 = vld [vmem:[%s1061_s7 + $0x8] sm:$0xff]   ;;  %v941_v31 = vld [vmem:[%s1061_s7 + $0x80] sm:$0xff]   ;;  %v268_v58 = vld [vmem:[#allocation2 + $0x18] sm:$0xff] }
  0x2e   : > { %858 = vmatpush3.bf16.msra.mxu1 %v923_v14  ;;  %v938_v29 = vld [vmem:[%s1061_s7 + $0x88] sm:$0xff]   ;;  %v944_v32 = vld [vmem:[%s1063_s8 + $0x4] ss:$12 sps:$4 sm:$0xff]  }
  0x2f   : > { %859 = vmatprep.subr.bf16.mxu1 %v926_v17  ;;  %v945_v33 = vld [vmem:[%s1063_s8 + $0x8] ss:$12 sps:$4 sm:$0xff]   ;;  %534 = vmatprep.mubr.bf16.mxu0 %v944_v32  ;;  %v942_v35 = vld [vmem:[%s1063_s8] ss:$12 sps:$4 sm:$0xff]   ;;  %v949_v38 = vld [vmem:[%s1063_s8 + $0x18] ss:$12 sps:$4 sm:$0xff]  }
  0x30   : > { %822 = vmatpush3.bf16.msra.mxu0 %v925_v16  ;;  %v940_v34 = vld [vmem:[%s1061_s7] sm:$0xff]   ;;  %871 = vmatprep.mubr.bf16.mxu1 %v945_v33  ;;  %v947_v36 = vld [vmem:[%s1063_s8 + $0x1c] ss:$12 sps:$4 sm:$0xff]  }
  0x31   : > { %823 = vmatprep.subr.bf16.mxu0 %v927_v18  ;;  %v946_v37 = vld [vmem:[%s1063_s8 + $0x20] ss:$12 sps:$4 sm:$0xff]  }
  0x32   : > { %860 = vmatpush3.bf16.msra.mxu1 %v926_v17  ;;  %v267_v52 = vld [vmem:[#allocation2] sm:$0xff]  ;;  %v269_v0 = vld [vmem:[#allocation2 + $0x8] sm:$0xff] }
  0x33   : > { %861 = vmatprep.subr.bf16.mxu1 %v929_v20 }
  0x34   : > { %824 = vmatpush3.bf16.msra.mxu0 %v928_v19 }
  0x35   : > { %825 = vmatprep.subr.bf16.mxu0 %v930_v21 }
  0x36   : > { %862 = vmatpush3.bf16.msra.mxu1 %v929_v20 }
  0x37   : > { %863 = vmatprep.subr.bf16.mxu1 %v932_v22 }
  0x38   : > { %826 = vmatpush3.bf16.msra.mxu0 %v931_v23 }
  0x39   : > { %827 = vmatprep.subr.bf16.mxu0 %v933_v24 }
  0x3a   : > { %864 = vmatpush3.bf16.msra.mxu1 %v932_v22 }
  0x3b   : > { %865 = vmatprep.subr.bf16.mxu1 %v935_v25 }
  0x3c   : > { %828 = vmatpush3.bf16.msra.mxu0 %v934_v26 }
  0x3d   : > { %829 = vmatprep.subr.bf16.mxu0 %v936_v27 }
  0x3e   : > { %866 = vmatpush3.bf16.msra.mxu1 %v935_v25 }
  0x3f   : > { %867 = vmatprep.subr.bf16.mxu1 %v938_v29 }
  0x40   : > { %830 = vmatpush3.bf16.msra.mxu0 %v937_v28 }
  0x41   : > { %831 = vmatprep.subr.bf16.mxu0 %v939_v30 }
  0x42   : > { %868 = vmatpush3.bf16.msra.mxu1 %v938_v29 }
  0x43   : > { %869 = vmatprep.subr.bf16.mxu1 %v941_v31 }
  0x44   : > { %832 = vmatpush3.bf16.msra.mxu0 %v940_v34 }
  0x46   : > { %870 = vmatpush3.bf16.msra.mxu1 %v941_v31 }
  0x47   : > { %535 = vmatmul.mubr.bf16.vlgmr.msra.gmra.mxu0 %v942_v35 }
  0x48   : > { %542 = vmatprep.mubr.bf16.mxu0 %v947_v36 }
  0x49   : > { %872 = vmatmul.mubr.bf16.vlgmr.msra.gmra.mxu1 %v946_v37 }
  0x4f   : > { %543 = vmatmul.mubr.bf16.gmra.mxu0 %v949_v38 }
 0x107   : > { %v833_v39 = vpop.f32.mrf.mxu0 }
 0x109   : > { %v834_v40 = vpop.f32.mrf.mxu0  ;;  %v873_v41 = vpop.f32.mrf.mxu1 }
 0x10a   : > { %v835_v42 = vadd.f32 %v834_v40, %v833_v39 }
 0x10b   : > { %v836_v43 = vpop.f32.mrf.mxu0  ;;  %v585_v45 = vpop.f32.mrf.mxu1 }
 0x10c   : > { %v586_v46 = vadd.f32 %v835_v42, %v585_v45 }
 0x10d   : > { %v837_v47 = vpop.f32.mrf.mxu0  ;;  %v874_v48 = vpop.f32.mrf.mxu1 }
 0x10e   : > { %v600_v49 = vadd.f32 %v586_v46, %v266_v44  ;;  %v838_v50 = vadd.f32 %v837_v47, %v836_v43 }
 0x10f   : > { %v839_v51 = vpop.f32.mrf.mxu0  ;;  %v588_v53 = vpop.f32.mrf.mxu1 }
 0x110   : > { %604 = vst [vmem:[#allocation2 + $0x10] sm:$0xff] %v600_v49  ;;  %v589_v54 = vadd.f32 %v838_v50, %v588_v53 }
 0x111   : > { %v840_v55 = vpop.f32.mrf.mxu0 }
 0x112   : > { %v601_v56 = vadd.f32 %v589_v54, %v267_v52  ;;  %v841_v57 = vadd.f32 %v840_v55, %v839_v51 }
 0x113   : > { %v842_v59 = vpop.f32.mrf.mxu0 }
 0x114   : > { %605 = vst [vmem:[#allocation2] sm:$0xff] %v601_v56  ;;  %v594_v60 = vadd.f32 %v873_v41, %v841_v57 }
 0x115   : > { %v843_v61 = vpop.f32.mrf.mxu0 }
 0x116   : > { %v602_v62 = vadd.f32 %v594_v60, %v268_v58  ;;  %v844_v63 = vadd.f32 %v843_v61, %v842_v59 }
 0x118   : > { %606 = vst [vmem:[#allocation2 + $0x18] sm:$0xff] %v602_v62  ;;  %v597_v1 = vadd.f32 %v874_v48, %v844_v63  ;;  %611 = sbr.rel (%p790_p11) target bundleno = 301 (0x12d), region = 66 }
 0x11a   : > { %v603_v2 = vadd.f32 %v597_v1, %v269_v0 }
 0x11c   : > { %607 = vst [vmem:[#allocation2 + $0x8] sm:$0xff] %v603_v2 }
 0x11d   : > { %v612_v3 = vld [vmem:[#allocation2 + $0x10] sm:$0xff]  ;;  %v613_v4 = vld [vmem:[#allocation2] sm:$0xff] }
 0x11e   : > { %v791_v5 = vld [vmem:[%s1126_s2] ss:$0 sm:$0xff]  ;;  %v792_v8 = vld [vmem:[%s1126_s2 + $0x1] ss:$0 sm:$0xff] }
 0x11f   : > { %v621_v6 = vmul.f32 %v791_v5, %v612_v3  ;;  %v622_v7 = vmul.f32 %v791_v5, %v613_v4  ;;  %v614_v9 = vld [vmem:[#allocation2 + $0x18] sm:$0xff] }
 0x120   : > { %v623_v11 = vmul.f32 %v791_v5, %v614_v9 }
 0x121   : > { %v630_v13 = vadd.f32 %v792_v8, %v621_v6  ;;  %v631_v14 = vadd.f32 %v792_v8, %v622_v7 }
 0x122   : > { %v632_v15 = vadd.f32 %v792_v8, %v623_v11 }
 0x123   : > { %v615_v10 = vld [vmem:[#allocation2 + $0x8] sm:$0xff]  ;;  %v634_v17 = vmax.f32 %v630_v13, 0.0  ;;  %v635_v18 = vmax.f32 %v631_v14, 0.0 }
 0x124   : > { %v624_v12 = vmul.f32 %v791_v5, %v615_v10  ;;  %v636_v19 = vmax.f32 %v632_v15, 0.0 }
 0x125   : > { %v809_v21 = vpack.c.bf16 %v635_v18, %v634_v17 }
 0x126   : > { %v633_v16 = vadd.f32 %v792_v8, %v624_v12 }
 0x127   : > { %810 = vst [vmem:[%s1127_s3] sm:$0xff] %v809_v21  }
 0x128   : > { %v637_v20 = vmax.f32 %v633_v16, 0.0 }
 0x12a   : > { %v814_v22 = vpack.c.bf16 %v637_v20, %v636_v19 }
 0x12c   : > { %816 = vst [vmem:[%s1127_s3 + $0x8] sm:$0xff] %v814_v22  }
 0x12d PF: > { %s13_s16 = sadd.s32 1, %s988_s16   ;;  %s1128_s12 = smov %s976_s13 }
 0x12e   : > { %p10_p12 = scmp.ge.s32.totalorder %s13_s16, 5   ;;  %s1129_s13 = smov %s1046_s20 }
 0x12f   : > { %s1130_s14 = smov %s984_s15  ;;  %s1131_s15 = smov %s1133_s17 }
 0x130   :  { %12 = sbr.rel (!%p10_p12) target bundleno = 3 (0x3), region = 110 }

// kernel: pretrained_model_forward.32
= control target key start
LH: loop header
LB: loop body
LE: loop exit
PB: predicated region body
PF: predicated region fallthrough
CT: control target
= control target key end

     0   :  { %s1074_s12 = smov 0   ;;  %s1076_s13 = smov 0   ;;  %s1208_s0 = inlined_call_operand.vmem [shape: bf16[16,1152], index: 0, kind: input, shape index: {}]   ;;  %s1209_s1 = inlined_call_operand.vmem [shape: bf16[1152,256], index: 1, kind: input, shape index: {}]   ;;  %s1210_s2 = inlined_call_operand.vmem [shape: f32[2,256], index: 2, kind: input, shape index: {}]   ;;  %s1211_s3 = inlined_call_operand.vmem [shape: bf16[16,256], index: 3, kind: output, shape index: {}]  }
   0x1   :  { %s1078_s14 = smov 0   ;;  %s1080_s15 = smov 0  }
   0x2   :  { %s1082_s16 = smov 0  }
   0x3 LB: > { %s22_s17 = sadd.s32 1, %s1046_s15  ;;  %p41_p1 = scmp.ne.s32.totalorder %s1038_s13, %s1034_s12  ;;  %s1050_s16 = sphi %s1082_s16, %s13_s16   ;;  %s1046_s15 = sphi %s1080_s15, %s1215_s15   ;;  %s1042_s14 = sphi %s1078_s14, %s1214_s14   ;;  %s1038_s13 = sphi %s1076_s13, %s1213_s13   ;;  %s1034_s12 = sphi %s1074_s12, %s1212_s12  }
   0x4   : > { %p23_p0 = scmp.ge.s32.totalorder %s22_s17, 3  ;;  %p42_p2 = scmp.eq.s32.totalorder %s1050_s16, 0 }
   0x5   : > { %s34_s19 = sadd.s32 1, %s1038_s13  ;;  %p819_p5 = scmp.ge.s32.totalorder %s1050_s16, 3 }
   0x6   : > { %s1217_s17 = smov (%p23_p0, %s22_s17), 0  ;;  %p43_p3 = por %p42_p2, %p41_p1 }
   0x7   : > { %s30_s18 = ssub.s32 %s1046_s15, %s1217_s17  ;;  %143 = sbr.rel (%p819_p5) target bundleno = 19 (0x13), region = 20 }
   0x8   : > { %p32_p4 = scmp.eq.s32.totalorder %s30_s18, 0 }
   0xa   : > { %s1109_s20 = scalar_select %p32_p4, %s1038_s13, %s34_s19  }
   0xc   : > { %146 = sbr.rel (!%p43_p3) target bundleno = 19 (0x13), region = 24  ;;  %s148_s21 = sand.u32 (%p43_p3), 1, %s1038_s13  }
   0xd   : > { %s888_s22 = smul.u32 (%p43_p3), 12, %s1046_s15 }
   0xe   : > { %s892_s23 = smul.u32 (%p43_p3), 24, %s148_s21 }
   0xf   : > { %s156_s26 = scalar_lea.vmem (%p43_p3), %s1208_s0, %s888_s22 }
  0x10   : > { %v171_v0 = vld [vmem:[%s156_s26] sm:$0xff] (%p43_p3)  ;;  %v821_v2 = vld [vmem:[%s156_s26 + $0x8] sm:$0xf] (%p43_p3)  ;;  %s150_s27 = scalar_lea.vmem (%p43_p3), [#allocation3], %s892_s23  ;;  %v823_v3 = vld [vmem:[%s156_s26 + $0x2c] sm:$0xf] (%p43_p3) }
  0x11   : > { %v173_v1 = vld [vmem:[%s156_s26 + $0x24] sm:$0xff]  ;;  %172 = vst [vmem:[%s150_s27] sm:$0xff] %v171_v0  ;;  %822 = vst [vmem:[%s150_s27 + $0x8] sm:$0xf] %v821_v2 }
  0x12   : > { %174 = vst [vmem:[%s150_s27 + $0xc] sm:$0xff] %v173_v1  ;;  %824 = vst [vmem:[%s150_s27 + $0x14] sm:$0xf] %v823_v3 }
  0x13 PF: > { %p825_p6 = scmp.ge.s32.totalorder %s1050_s16, 1  ;;  %p201_p7 = scmp.lt.s32.totalorder %s1050_s16, 4 }
  0x15   : > { %p202_p8 = pnand %p825_p6, %p201_p7 }
  0x16   : > { %s208_s28 = sand.u32 (!%p202_p8), 1, %s1034_s12   ;;  %s240_s29 = smul.u32 (!%p202_p8), 48, %s1042_s14 }
  0x17   : > { %205 = sbr.rel (%p202_p8) target bundleno = 322 (0x142), region = 54  ;;  %p828_p10 = scmp.ne.s32.totalorder (!%p202_p8), %s1042_s14, 0 }
  0x18   : > { %s893_s30 = smul.u32 (!%p202_p8), 24, %s208_s28  ;;  %p241_p9 = scmp.lt.s32.totalorder (!%p202_p8), %s240_s29, 143 }
  0x1a   : > { %s1126_s8 = scalar_lea.vmem (!%p202_p8), [#allocation3], %s893_s30 }
  0x1c   : > { %s1219_s29 = smov (!%p241_p9, %s240_s29), 143  ;;  %258 = sbr.rel (%p828_p10) target bundleno = 36 (0x24), region = 62 }
  0x1d   : > { %s889_s4 = sshll.u32 %s1219_s29, 3 }
  0x1e   : > { %s1124_s7 = scalar_lea.vmem %s1209_s1, %s889_s4 }
  0x21   : > { %v1052_v4 = vmov 0.0  }
  0x22   : > { %259 = vst [vmem:[#allocation2 + $0x10] sm:$0xff] %v1052_v4  ;;  %260 = vst [vmem:[#allocation2] sm:$0xff] %v1052_v4 }
  0x23   : > { %261 = vst [vmem:[#allocation2 + $0x18] sm:$0xff] %v1052_v4  ;;  %262 = vst [vmem:[#allocation2 + $0x8] sm:$0xff] %v1052_v4 }
  0x24 PF: > { %v936_v5 = vld [vmem:[%s1124_s7 + $0x74] ss:$8 sps:$4 sm:$0xff]   ;;  %v938_v6 = vld [vmem:[%s1124_s7 + $0x70] ss:$8 sps:$4 sm:$0xff]   ;;  %v1053_v7 = vmov 0   ;;  %p880_p11 = scmp.ne.s32.totalorder %s1042_s14, 2 }
  0x25   : > { %650 = vmatprep.mubr.bf16.mxu1 %v1053_v7  ;;  %575 = vmatprep.subr.bf16.mxu0 %v936_v5  ;;  %v939_v8 = vld [vmem:[%s1124_s7 + $0x64] ss:$8 sps:$4 sm:$0xff]   ;;  %v941_v9 = vld [vmem:[%s1124_s7 + $0x60] ss:$8 sps:$4 sm:$0xff]   ;;  %v942_v10 = vld [vmem:[%s1124_s7 + $0x54] ss:$8 sps:$4 sm:$0xff]  }
  0x26   : > { %576 = vmatpush1.bf16.msra.mxu0 %v938_v6  ;;  %v944_v11 = vld [vmem:[%s1124_s7 + $0x50] ss:$8 sps:$4 sm:$0xff]   ;;  %v945_v12 = vld [vmem:[%s1124_s7 + $0x44] ss:$8 sps:$4 sm:$0xff]   ;;  %v957_v13 = vld [vmem:[%s1124_s7 + $0x174] ss:$8 sps:$4 sm:$0xff]  }
  0x27   : > { %577 = vmatprep.subr.bf16.mxu0 %v939_v8  ;;  %v959_v14 = vld [vmem:[%s1124_s7 + $0x170] ss:$8 sps:$4 sm:$0xff]   ;;  %v947_v15 = vld [vmem:[%s1124_s7 + $0x40] ss:$8 sps:$4 sm:$0xff]   ;;  %v948_v16 = vld [vmem:[%s1124_s7 + $0x34] ss:$8 sps:$4 sm:$0xff]   ;;  %618 = vmatprep.subr.bf16.mxu1 %v957_v13 }
  0x28   : > { %v963_v17 = vld [vmem:[%s1124_s7 + $0x164] ss:$8 sps:$4 sm:$0xff]   ;;  %619 = vmatpush1.bf16.msra.mxu1 %v959_v14  ;;  %v965_v18 = vld [vmem:[%s1124_s7 + $0x160] ss:$8 sps:$4 sm:$0xff]   ;;  %v950_v19 = vld [vmem:[%s1124_s7 + $0x30] ss:$8 sps:$4 sm:$0xff]  }
  0x29   : > { %620 = vmatprep.subr.bf16.mxu1 %v963_v17  ;;  %v969_v20 = vld [vmem:[%s1124_s7 + $0x154] ss:$8 sps:$4 sm:$0xff]   ;;  %v951_v21 = vld [vmem:[%s1124_s7 + $0x24] ss:$8 sps:$4 sm:$0xff]   ;;  %v971_v22 = vld [vmem:[%s1124_s7 + $0x150] ss:$8 sps:$4 sm:$0xff]  }
  0x2a   : > { %578 = vmatpush1.bf16.msra.mxu0 %v941_v9  ;;  %v975_v23 = vld [vmem:[%s1124_s7 + $0x144] ss:$8 sps:$4 sm:$0xff]   ;;  %v953_v24 = vld [vmem:[%s1124_s7 + $0x20] ss:$8 sps:$4 sm:$0xff]   ;;  %v954_v25 = vld [vmem:[%s1124_s7 + $0x14] ss:$8 sps:$4 sm:$0xff]  }
  0x2b   : > { %579 = vmatprep.subr.bf16.mxu0 %v942_v10  ;;  %v977_v26 = vld [vmem:[%s1124_s7 + $0x140] ss:$8 sps:$4 sm:$0xff]   ;;  %v981_v27 = vld [vmem:[%s1124_s7 + $0x134] ss:$8 sps:$4 sm:$0xff]   ;;  %v956_v28 = vld [vmem:[%s1124_s7 + $0x10] ss:$8 sps:$4 sm:$0xff]  }
  0x2c   : > { %621 = vmatpush1.bf16.msra.mxu1 %v965_v18  ;;  %v960_v29 = vld [vmem:[%s1124_s7 + $0x4] ss:$8 sps:$4 sm:$0xff]   ;;  %v983_v30 = vld [vmem:[%s1124_s7 + $0x130] ss:$8 sps:$4 sm:$0xff]   ;;  %v962_v32 = vld [vmem:[%s1124_s7] ss:$8 sps:$4 sm:$0xff]  }
  0x2d   : > { %622 = vmatprep.subr.bf16.mxu1 %v969_v20  ;;  %v987_v31 = vld [vmem:[%s1124_s7 + $0x124] ss:$8 sps:$4 sm:$0xff]   ;;  %v966_v33 = vld [vmem:[%s1124_s7 + $0xf4] ss:$8 sps:$4 sm:$0xff]   ;;  %v989_v34 = vld [vmem:[%s1124_s7 + $0x120] ss:$8 sps:$4 sm:$0xff]  }
  0x2e   : > { %580 = vmatpush1.bf16.msra.mxu0 %v944_v11  ;;  %v993_v35 = vld [vmem:[%s1124_s7 + $0x114] ss:$8 sps:$4 sm:$0xff]   ;;  %v968_v36 = vld [vmem:[%s1124_s7 + $0xf0] ss:$8 sps:$4 sm:$0xff]   ;;  %v972_v37 = vld [vmem:[%s1124_s7 + $0xe4] ss:$8 sps:$4 sm:$0xff]  }
  0x2f   : > { %581 = vmatprep.subr.bf16.mxu0 %v945_v12  ;;  %v995_v38 = vld [vmem:[%s1124_s7 + $0x110] ss:$8 sps:$4 sm:$0xff]   ;;  %v999_v39 = vld [vmem:[%s1124_s7 + $0x104] ss:$8 sps:$4 sm:$0xff]   ;;  %v974_v41 = vld [vmem:[%s1124_s7 + $0xe0] ss:$8 sps:$4 sm:$0xff]  }
  0x30   : > { %623 = vmatpush1.bf16.msra.mxu1 %v971_v22  ;;  %v1011_v40 = vld [vmem:[%s1126_s8 + $0x4] ss:$12 sps:$4 sm:$0xff]   ;;  %v1005_v46 = vld [vmem:[%s1126_s8 + $0x8] ss:$12 sps:$4 sm:$0xff]   ;;  %v1009_v56 = vld [vmem:[%s1126_s8] ss:$12 sps:$4 sm:$0xff]  }
  0x31   : > { %624 = vmatprep.subr.bf16.mxu1 %v975_v23  ;;  %v978_v42 = vld [vmem:[%s1124_s7 + $0xd4] ss:$8 sps:$4 sm:$0xff]   ;;  %607 = vmatprep.mubr.bf16.mxu0 %v1011_v40  ;;  %v1001_v43 = vld [vmem:[%s1124_s7 + $0x100] ss:$8 sps:$4 sm:$0xff]   ;;  %v980_v44 = vld [vmem:[%s1124_s7 + $0xd0] ss:$8 sps:$4 sm:$0xff]  }
  0x32   : > { %582 = vmatpush1.bf16.msra.mxu0 %v947_v15  ;;  %v984_v45 = vld [vmem:[%s1124_s7 + $0xc4] ss:$8 sps:$4 sm:$0xff]   ;;  %v986_v47 = vld [vmem:[%s1124_s7 + $0xc0] ss:$8 sps:$4 sm:$0xff]   ;;  %v990_v48 = vld [vmem:[%s1124_s7 + $0xb4] ss:$8 sps:$4 sm:$0xff]  }
  0x33   : > { %583 = vmatprep.subr.bf16.mxu0 %v948_v16  ;;  %v992_v49 = vld [vmem:[%s1124_s7 + $0xb0] ss:$8 sps:$4 sm:$0xff]   ;;  %v996_v50 = vld [vmem:[%s1124_s7 + $0xa4] ss:$8 sps:$4 sm:$0xff]   ;;  %v998_v51 = vld [vmem:[%s1124_s7 + $0xa0] ss:$8 sps:$4 sm:$0xff]  }
  0x34   : > { %625 = vmatpush1.bf16.msra.mxu1 %v977_v26  ;;  %v1002_v52 = vld [vmem:[%s1124_s7 + $0x94] ss:$8 sps:$4 sm:$0xff]   ;;  %v1004_v53 = vld [vmem:[%s1124_s7 + $0x90] ss:$8 sps:$4 sm:$0xff]   ;;  %v1006_v54 = vld [vmem:[%s1124_s7 + $0x84] ss:$8 sps:$4 sm:$0xff]  }
  0x35   : > { %626 = vmatprep.subr.bf16.mxu1 %v981_v27  ;;  %v1008_v55 = vld [vmem:[%s1124_s7 + $0x80] ss:$8 sps:$4 sm:$0xff]   ;;  %v263_v59 = vld [vmem:[#allocation2 + $0x10] sm:$0xff]  ;;  %v265_v3 = vld [vmem:[#allocation2 + $0x18] sm:$0xff] }
  0x36   : > { %584 = vmatpush1.bf16.msra.mxu0 %v950_v19  ;;  %v264_v63 = vld [vmem:[#allocation2] sm:$0xff]  ;;  %v266_v8 = vld [vmem:[#allocation2 + $0x8] sm:$0xff] }
  0x37   : > { %585 = vmatprep.subr.bf16.mxu0 %v951_v21 }
  0x38   : > { %627 = vmatpush1.bf16.msra.mxu1 %v983_v30 }
  0x39   : > { %628 = vmatprep.subr.bf16.mxu1 %v987_v31 }
  0x3a   : > { %586 = vmatpush1.bf16.msra.mxu0 %v953_v24 }
  0x3b   : > { %587 = vmatprep.subr.bf16.mxu0 %v954_v25 }
  0x3c   : > { %629 = vmatpush1.bf16.msra.mxu1 %v989_v34 }
  0x3d   : > { %630 = vmatprep.subr.bf16.mxu1 %v993_v35 }
  0x3e   : > { %588 = vmatpush1.bf16.msra.mxu0 %v956_v28 }
  0x3f   : > { %589 = vmatprep.subr.bf16.mxu0 %v960_v29 }
  0x40   : > { %631 = vmatpush1.bf16.msra.mxu1 %v995_v38 }
  0x41   : > { %632 = vmatprep.subr.bf16.mxu1 %v999_v39 }
  0x42   : > { %590 = vmatpush1.bf16.msra.mxu0 %v962_v32 }
  0x43   : > { %591 = vmatprep.subr.bf16.mxu0 %v966_v33 }
  0x44   : > { %633 = vmatpush1.bf16.msra.mxu1 %v1001_v43 }
  0x46   : > { %592 = vmatpush2.bf16.msra.mxu0 %v968_v36 }
  0x47   : > { %593 = vmatprep.subr.bf16.mxu0 %v972_v37  ;;  %651 = vmatmul.mubr.bf16.vlgmr.msra.gmra.mxu1 %v1005_v46 }
  0x4a   : > { %594 = vmatpush2.bf16.msra.mxu0 %v974_v41 }
  0x4b   : > { %595 = vmatprep.subr.bf16.mxu0 %v978_v42 }
  0x4e   : > { %596 = vmatpush2.bf16.msra.mxu0 %v980_v44 }
  0x4f   : > { %597 = vmatprep.subr.bf16.mxu0 %v984_v45 }
  0x52   : > { %598 = vmatpush2.bf16.msra.mxu0 %v986_v47 }
  0x53   : > { %599 = vmatprep.subr.bf16.mxu0 %v990_v48 }
  0x56   : > { %600 = vmatpush2.bf16.msra.mxu0 %v992_v49 }
  0x57   : > { %601 = vmatprep.subr.bf16.mxu0 %v996_v50 }
  0x5a   : > { %602 = vmatpush2.bf16.msra.mxu0 %v998_v51 }
  0x5b   : > { %603 = vmatprep.subr.bf16.mxu0 %v1002_v52 }
  0x5e   : > { %604 = vmatpush2.bf16.msra.mxu0 %v1004_v53 }
  0x5f   : > { %605 = vmatprep.subr.bf16.mxu0 %v1006_v54 }
  0x62   : > { %606 = vmatpush2.bf16.msra.mxu0 %v1008_v55 }
  0x65   : > { %608 = vmatmul.mubr.bf16.vlgmr.msra.gmra.mxu0 %v1009_v56 }
 0x107   : > { %v652_v57 = vpop.f32.mrf.mxu1 }
 0x109   : > { %v654_v58 = vpop.f32.mrf.mxu1 }
 0x10b   : > { %v656_v62 = vpop.f32.mrf.mxu1 }
 0x10d   : > { %v658_v7 = vpop.f32.mrf.mxu1 }
 0x125   : > { %v609_v60 = vpop.f32.mrf.mxu0 }
 0x126   : > { %v653_v61 = vadd.f32 %v652_v57, %v609_v60 }
 0x127   : > { %v611_v0 = vpop.f32.mrf.mxu0 }
 0x128   : > { %v661_v1 = vadd.f32 %v653_v61, %v263_v59  ;;  %v655_v2 = vadd.f32 %v654_v58, %v611_v0 }
 0x129   : > { %v613_v4 = vpop.f32.mrf.mxu0 }
 0x12a   : > { %665 = vst [vmem:[#allocation2 + $0x10] sm:$0xff] %v661_v1  ;;  %v662_v5 = vadd.f32 %v655_v2, %v264_v63  ;;  %v657_v6 = vadd.f32 %v656_v62, %v613_v4 }
 0x12b   : > { %v615_v9 = vpop.f32.mrf.mxu0 }
 0x12c   : > { %666 = vst [vmem:[#allocation2] sm:$0xff] %v662_v5  ;;  %v663_v10 = vadd.f32 %v657_v6, %v265_v3  ;;  %v659_v11 = vadd.f32 %v658_v7, %v615_v9  ;;  %672 = sbr.rel (%p880_p11) target bundleno = 322 (0x142), region = 66 }
 0x12e   : > { %667 = vst [vmem:[#allocation2 + $0x18] sm:$0xff] %v663_v10  ;;  %v664_v12 = vadd.f32 %v659_v11, %v266_v8 }
 0x130   : > { %668 = vst [vmem:[#allocation2 + $0x8] sm:$0xff] %v664_v12 }
 0x131   : > { %v679_v13 = vlaneseq  ;;  %v677_v15 = vld [vmem:[%s1210_s2] ss:$2 sm:$0x3]  ;;  %v881_v16 = vld [vmem:[%s1210_s2 + $0x1] ss:$2 sm:$0x3] }
 0x132   : > { %v673_v17 = vld [vmem:[#allocation2 + $0x10] sm:$0xff] }
 0x133   : > { %v680_v14 = vshrl.u32 %v679_v13, 7  ;;  %v674_v20 = vld [vmem:[#allocation2] sm:$0xff] }
 0x135   : > { %v681_v18 = vsub.s32 0, %v680_v14  ;;  %v685_v19 = vsub.s32 1, %v680_v14  ;;  %v675_v21 = vld [vmem:[#allocation2 + $0x18] sm:$0xff] }
 0x137   : > { %v676_v22 = vld [vmem:[#allocation2 + $0x8] sm:$0xff]  ;;  %v682_v23 = vrot.slane %v677_v15, %v681_v18  ;;  %v686_v24 = vrot.slane %v677_v15, %v685_v19  ;;  %v699_v25 = vrot.slane %v881_v16, %v681_v18  ;;  %v703_v26 = vrot.slane %v881_v16, %v685_v19 }
 0x139   : > { %v689_v27 = vmul.f32 %v682_v23, %v673_v17  ;;  %v690_v28 = vmul.f32 %v686_v24, %v674_v20  ;;  %v691_v29 = vmul.f32 %v682_v23, %v675_v21  ;;  %v692_v30 = vmul.f32 %v686_v24, %v676_v22 }
 0x13b   : > { %v706_v31 = vadd.f32 %v699_v25, %v689_v27  ;;  %v707_v32 = vadd.f32 %v703_v26, %v690_v28  ;;  %v708_v33 = vadd.f32 %v699_v25, %v691_v29  ;;  %v709_v34 = vadd.f32 %v703_v26, %v692_v30 }
 0x13d   : > { %v710_v35 = vmax.f32 %v706_v31, 0.0  ;;  %v711_v36 = vmax.f32 %v707_v32, 0.0  ;;  %v712_v37 = vmax.f32 %v708_v33, 0.0  ;;  %v713_v38 = vmax.f32 %v709_v34, 0.0 }
 0x13f   : > { %v890_v39 = vpack.c.bf16 %v711_v36, %v710_v35  ;;  %v891_v40 = vpack.c.bf16 %v713_v38, %v712_v37 }
 0x141   : > { %726 = vst [vmem:[%s1211_s3] sm:$0xff] %v890_v39  ;;  %727 = vst [vmem:[%s1211_s3 + $0x8] sm:$0xff] %v891_v40 }
 0x142 PF: > { %s13_s16 = sadd.s32 1, %s1050_s16   ;;  %s1212_s12 = smov %s1038_s13 }
 0x143   : > { %p10_p12 = scmp.ge.s32.totalorder %s13_s16, 5   ;;  %s1213_s13 = smov %s1109_s20 }
 0x144   : > { %s1214_s14 = smov %s1046_s15  ;;  %s1215_s15 = smov %s1217_s17 }
 0x145   :  { %12 = sbr.rel (!%p10_p12) target bundleno = 3 (0x3), region = 111 }

// kernel: pretrained_model_forward.31
= control target key start
LH: loop header
LB: loop body
LE: loop exit
PB: predicated region body
PF: predicated region fallthrough
CT: control target
= control target key end

     0   :  { %v288_v1 = vmov 0   ;;  %v191_v18 = vlaneseq  ;;  %s372_s1 = inlined_call_operand.vmem [shape: bf16[128,256], index: 1, kind: input, shape index: {}]   ;;  %s373_s0 = inlined_call_operand.vmem [shape: bf16[16,128], index: 0, kind: input, shape index: {}]   ;;  %s374_s2 = inlined_call_operand.vmem [shape: f32[2,256], index: 2, kind: input, shape index: {}]   ;;  %s375_s3 = inlined_call_operand.vmem [shape: bf16[16,256], index: 3, kind: output, shape index: {}]  }
   0x1   :  { %v263_v0 = vld [vmem:[%s372_s1 + $0x74] ss:$8 sps:$4 sm:$0xff]   ;;  %163 = vmatprep.mubr.bf16.mxu0 %v288_v1  ;;  %v265_v2 = vld [vmem:[%s372_s1 + $0x70] ss:$8 sps:$4 sm:$0xff]   ;;  %v266_v3 = vld [vmem:[%s372_s1 + $0x64] ss:$8 sps:$4 sm:$0xff]  }
   0x2   :  { %131 = vmatprep.subr.bf16.mxu0 %v263_v0  ;;  %v268_v4 = vld [vmem:[%s372_s1 + $0x60] ss:$8 sps:$4 sm:$0xff]   ;;  %v269_v5 = vld [vmem:[%s372_s1 + $0x54] ss:$8 sps:$4 sm:$0xff]   ;;  %v271_v6 = vld [vmem:[%s372_s1 + $0x50] ss:$8 sps:$4 sm:$0xff]  }
   0x3   :  { %132 = vmatpush1.bf16.msra.mxu0 %v265_v2  ;;  %v272_v7 = vld [vmem:[%s372_s1 + $0x44] ss:$8 sps:$4 sm:$0xff]   ;;  %v274_v8 = vld [vmem:[%s372_s1 + $0x40] ss:$8 sps:$4 sm:$0xff]   ;;  %v275_v9 = vld [vmem:[%s372_s1 + $0x34] ss:$8 sps:$4 sm:$0xff]  }
   0x4   :  { %133 = vmatprep.subr.bf16.mxu0 %v266_v3  ;;  %v277_v10 = vld [vmem:[%s372_s1 + $0x30] ss:$8 sps:$4 sm:$0xff]   ;;  %v278_v11 = vld [vmem:[%s372_s1 + $0x24] ss:$8 sps:$4 sm:$0xff]   ;;  %v280_v12 = vld [vmem:[%s372_s1 + $0x20] ss:$8 sps:$4 sm:$0xff]  }
   0x5   :  { %v281_v13 = vld [vmem:[%s372_s1 + $0x14] ss:$8 sps:$4 sm:$0xff]   ;;  %v283_v14 = vld [vmem:[%s372_s1 + $0x10] ss:$8 sps:$4 sm:$0xff]   ;;  %v284_v15 = vld [vmem:[%s372_s1 + $0x4] ss:$8 sps:$4 sm:$0xff]  }
   0x6   :  { %v286_v16 = vld [vmem:[%s372_s1] ss:$8 sps:$4 sm:$0xff]   ;;  %v192_v19 = vshrl.u32 %v191_v18, 7 }
   0x7   :  { %134 = vmatpush1.bf16.msra.mxu0 %v268_v4  ;;  %v287_v17 = vld [vmem:[%s373_s0] sm:$0xff]  }
   0x8   :  { %135 = vmatprep.subr.bf16.mxu0 %v269_v5  ;;  %v193_v20 = vsub.s32 0, %v192_v19  ;;  %v189_v21 = vld [vmem:[%s374_s2] ss:$2 sm:$0x3]  ;;  %v197_v22 = vsub.s32 1, %v192_v19 }
   0x9   :  { %v257_v24 = vld [vmem:[%s374_s2 + $0x1] ss:$2 sm:$0x3] }
   0xa   :  { %v194_v23 = vrot.slane %v189_v21, %v193_v20  ;;  %v198_v25 = vrot.slane %v189_v21, %v197_v22  ;;  %v211_v28 = vrot.slane %v257_v24, %v193_v20  ;;  %v215_v29 = vrot.slane %v257_v24, %v197_v22 }
   0xb   :  { %136 = vmatpush1.bf16.msra.mxu0 %v271_v6 }
   0xc   :  { %137 = vmatprep.subr.bf16.mxu0 %v272_v7 }
   0xf   :  { %138 = vmatpush1.bf16.msra.mxu0 %v274_v8 }
  0x10   :  { %139 = vmatprep.subr.bf16.mxu0 %v275_v9 }
  0x13   :  { %140 = vmatpush1.bf16.msra.mxu0 %v277_v10 }
  0x14   :  { %141 = vmatprep.subr.bf16.mxu0 %v278_v11 }
  0x17   :  { %142 = vmatpush1.bf16.msra.mxu0 %v280_v12 }
  0x18   :  { %143 = vmatprep.subr.bf16.mxu0 %v281_v13 }
  0x1b   :  { %144 = vmatpush1.bf16.msra.mxu0 %v283_v14 }
  0x1c   :  { %145 = vmatprep.subr.bf16.mxu0 %v284_v15 }
  0x1f   :  { %146 = vmatpush1.bf16.msra.mxu0 %v286_v16 }
  0x22   :  { %164 = vmatmul.mubr.bf16.vlgmr.msra.gmra.mxu0 %v287_v17 }
  0xe2   :  { %v165_v26 = vpop.f32.mrf.mxu0 }
  0xe3   :  { %v201_v27 = vmul.f32 %v194_v23, %v165_v26 }
  0xe4   :  { %v167_v30 = vpop.f32.mrf.mxu0 }
  0xe5   :  { %v202_v31 = vmul.f32 %v198_v25, %v167_v30  ;;  %v218_v33 = vadd.f32 %v211_v28, %v201_v27 }
  0xe6   :  { %v169_v32 = vpop.f32.mrf.mxu0 }
  0xe7   :  { %v219_v34 = vadd.f32 %v215_v29, %v202_v31  ;;  %v203_v35 = vmul.f32 %v194_v23, %v169_v32 }
  0xe8   :  { %v171_v36 = vpop.f32.mrf.mxu0 }
  0xe9   :  { %v260_v37 = vpack.c.bf16 %v219_v34, %v218_v33  ;;  %v204_v38 = vmul.f32 %v198_v25, %v171_v36  ;;  %v220_v39 = vadd.f32 %v211_v28, %v203_v35 }
  0xeb   :  { %234 = vst [vmem:[%s375_s3] sm:$0xff] %v260_v37  ;;  %v221_v40 = vadd.f32 %v215_v29, %v204_v38 }
  0xed   :  { %v261_v41 = vpack.c.bf16 %v221_v40, %v220_v39 }
  0xef   :  { %235 = vst [vmem:[%s375_s3 + $0x8] sm:$0xff] %v261_v41 }

// kernel: pretrained_model_forward.33
= control target key start
LH: loop header
LB: loop body
LE: loop exit
PB: predicated region body
PF: predicated region fallthrough
CT: control target
= control target key end

     0   :  { %s1157_s15 = smov 0   ;;  %s1159_s16 = smov 0   ;;  %s1297_s0 = inlined_call_operand.vmem [shape: bf16[16,2304], index: 0, kind: input, shape index: {}]   ;;  %s1298_s1 = inlined_call_operand.vmem [shape: bf16[2304,256], index: 1, kind: input, shape index: {}]   ;;  %s1299_s2 = inlined_call_operand.vmem [shape: f32[2,256], index: 2, kind: input, shape index: {}]   ;;  %s1300_s3 = inlined_call_operand.vmem [shape: bf16[16,256], index: 3, kind: input, shape index: {}]   ;;  %s1301_s4 = inlined_call_operand.vmem [shape: bf16[16,256], index: 4, kind: output, shape index: {}]  }
   0x1   :  { %s1161_s17 = smov 0   ;;  %s1163_s18 = smov 0  }
   0x2   :  { %s1165_s19 = smov 0  }
   0x3 LB: > { %s23_s20 = sadd.s32 1, %s1124_s18  ;;  %p42_p1 = scmp.ne.s32.totalorder %s1116_s16, %s1112_s15  ;;  %s1128_s19 = sphi %s1165_s19, %s14_s19   ;;  %s1124_s18 = sphi %s1163_s18, %s1305_s18   ;;  %s1120_s17 = sphi %s1161_s17, %s1304_s17   ;;  %s1116_s16 = sphi %s1159_s16, %s1303_s16   ;;  %s1112_s15 = sphi %s1157_s15, %s1302_s15  }
   0x4   : > { %p24_p0 = scmp.ge.s32.totalorder %s23_s20, 6  ;;  %p43_p2 = scmp.eq.s32.totalorder %s1128_s19, 0 }
   0x5   : > { %s35_s22 = sadd.s32 1, %s1116_s16  ;;  %p897_p5 = scmp.ge.s32.totalorder %s1128_s19, 6 }
   0x6   : > { %s1307_s20 = smov (%p24_p0, %s23_s20), 0  ;;  %p44_p3 = por %p43_p2, %p42_p1 }
   0x7   : > { %s31_s21 = ssub.s32 %s1124_s18, %s1307_s20  ;;  %180 = sbr.rel (%p897_p5) target bundleno = 19 (0x13), region = 24 }
   0x8   : > { %p33_p4 = scmp.eq.s32.totalorder %s31_s21, 0 }
   0xa   : > { %s1192_s23 = scalar_select %p33_p4, %s1116_s16, %s35_s22  }
   0xc   : > { %183 = sbr.rel (!%p44_p3) target bundleno = 19 (0x13), region = 28  ;;  %s185_s24 = sand.u32 (%p44_p3), 1, %s1116_s16  }
   0xd   : > { %s966_s25 = smul.u32 (%p44_p3), 12, %s1124_s18 }
   0xe   : > { %s970_s26 = smul.u32 (%p44_p3), 24, %s185_s24 }
   0xf   : > { %s193_s29 = scalar_lea.vmem (%p44_p3), %s1297_s0, %s966_s25 }
  0x10   : > { %v208_v0 = vld [vmem:[%s193_s29] sm:$0xff] (%p44_p3)  ;;  %v210_v1 = vld [vmem:[%s193_s29 + $0x48] sm:$0xff] (%p44_p3)  ;;  %s187_s30 = scalar_lea.vmem (%p44_p3), [#allocation3], %s970_s26  ;;  %v901_v3 = vld [vmem:[%s193_s29 + $0x50] sm:$0xf] (%p44_p3) }
  0x11   : > { %v899_v2 = vld [vmem:[%s193_s29 + $0x8] sm:$0xf]  ;;  %209 = vst [vmem:[%s187_s30] sm:$0xff] %v208_v0  ;;  %211 = vst [vmem:[%s187_s30 + $0xc] sm:$0xff] %v210_v1 }
  0x12   : > { %900 = vst [vmem:[%s187_s30 + $0x8] sm:$0xf] %v899_v2  ;;  %902 = vst [vmem:[%s187_s30 + $0x14] sm:$0xf] %v901_v3 }
  0x13 PF: > { %p903_p6 = scmp.ge.s32.totalorder %s1128_s19, 1  ;;  %p238_p7 = scmp.lt.s32.totalorder %s1128_s19, 7 }
  0x15   : > { %p239_p8 = pnand %p903_p6, %p238_p7 }
  0x16   : > { %s245_s5 = sand.u32 (!%p239_p8), 1, %s1112_s15   ;;  %s285_s6 = smul.u32 (!%p239_p8), 48, %s1120_s17 }
  0x17   : > { %242 = sbr.rel (%p239_p8) target bundleno = 324 (0x144), region = 58  ;;  %p906_p10 = scmp.ne.s32.totalorder (!%p239_p8), %s1120_s17, 0 }
  0x18   : > { %s971_s7 = smul.u32 (!%p239_p8), 24, %s245_s5  ;;  %p286_p9 = scmp.lt.s32.totalorder (!%p239_p8), %s285_s6, 287 }
  0x1a   : > { %s1209_s12 = scalar_lea.vmem (!%p239_p8), [#allocation3], %s971_s7 }
  0x1c   : > { %s1309_s6 = smov (!%p286_p9, %s285_s6), 287  ;;  %310 = sbr.rel (%p906_p10) target bundleno = 36 (0x24), region = 66 }
  0x1d   : > { %s967_s8 = sshll.u32 %s1309_s6, 3 }
  0x1e   : > { %s1207_s11 = scalar_lea.vmem %s1298_s1, %s967_s8 }
  0x21   : > { %v1130_v4 = vmov 0.0  }
  0x22   : > { %311 = vst [vmem:[#allocation2 + $0x10] sm:$0xff] %v1130_v4  ;;  %312 = vst [vmem:[#allocation2] sm:$0xff] %v1130_v4 }
  0x23   : > { %313 = vst [vmem:[#allocation2 + $0x18] sm:$0xff] %v1130_v4  ;;  %314 = vst [vmem:[#allocation2 + $0x8] sm:$0xff] %v1130_v4 }
  0x24 PF: > { %v1014_v5 = vld [vmem:[%s1207_s11 + $0x74] ss:$8 sps:$4 sm:$0xff]   ;;  %v1016_v6 = vld [vmem:[%s1207_s11 + $0x70] ss:$8 sps:$4 sm:$0xff]   ;;  %v1131_v7 = vmov 0   ;;  %p958_p11 = scmp.ne.s32.totalorder %s1120_s17, 5 }
  0x25   : > { %702 = vmatprep.mubr.bf16.mxu1 %v1131_v7  ;;  %627 = vmatprep.subr.bf16.mxu0 %v1014_v5  ;;  %v1017_v8 = vld [vmem:[%s1207_s11 + $0x64] ss:$8 sps:$4 sm:$0xff]   ;;  %v1019_v9 = vld [vmem:[%s1207_s11 + $0x60] ss:$8 sps:$4 sm:$0xff]   ;;  %v1020_v10 = vld [vmem:[%s1207_s11 + $0x54] ss:$8 sps:$4 sm:$0xff]  }
  0x26   : > { %628 = vmatpush1.bf16.msra.mxu0 %v1016_v6  ;;  %v1022_v11 = vld [vmem:[%s1207_s11 + $0x50] ss:$8 sps:$4 sm:$0xff]   ;;  %v1023_v12 = vld [vmem:[%s1207_s11 + $0x44] ss:$8 sps:$4 sm:$0xff]   ;;  %v1035_v13 = vld [vmem:[%s1207_s11 + $0x174] ss:$8 sps:$4 sm:$0xff]  }
  0x27   : > { %629 = vmatprep.subr.bf16.mxu0 %v1017_v8  ;;  %v1037_v14 = vld [vmem:[%s1207_s11 + $0x170] ss:$8 sps:$4 sm:$0xff]   ;;  %v1025_v15 = vld [vmem:[%s1207_s11 + $0x40] ss:$8 sps:$4 sm:$0xff]   ;;  %v1026_v16 = vld [vmem:[%s1207_s11 + $0x34] ss:$8 sps:$4 sm:$0xff]   ;;  %670 = vmatprep.subr.bf16.mxu1 %v1035_v13 }
  0x28   : > { %v1041_v17 = vld [vmem:[%s1207_s11 + $0x164] ss:$8 sps:$4 sm:$0xff]   ;;  %671 = vmatpush1.bf16.msra.mxu1 %v1037_v14  ;;  %v1043_v18 = vld [vmem:[%s1207_s11 + $0x160] ss:$8 sps:$4 sm:$0xff]   ;;  %v1028_v19 = vld [vmem:[%s1207_s11 + $0x30] ss:$8 sps:$4 sm:$0xff]  }
  0x29   : > { %672 = vmatprep.subr.bf16.mxu1 %v1041_v17  ;;  %v1047_v20 = vld [vmem:[%s1207_s11 + $0x154] ss:$8 sps:$4 sm:$0xff]   ;;  %v1029_v21 = vld [vmem:[%s1207_s11 + $0x24] ss:$8 sps:$4 sm:$0xff]   ;;  %v1049_v22 = vld [vmem:[%s1207_s11 + $0x150] ss:$8 sps:$4 sm:$0xff]  }
  0x2a   : > { %630 = vmatpush1.bf16.msra.mxu0 %v1019_v9  ;;  %v1053_v23 = vld [vmem:[%s1207_s11 + $0x144] ss:$8 sps:$4 sm:$0xff]   ;;  %v1031_v24 = vld [vmem:[%s1207_s11 + $0x20] ss:$8 sps:$4 sm:$0xff]   ;;  %v1032_v25 = vld [vmem:[%s1207_s11 + $0x14] ss:$8 sps:$4 sm:$0xff]  }
  0x2b   : > { %631 = vmatprep.subr.bf16.mxu0 %v1020_v10  ;;  %v1055_v26 = vld [vmem:[%s1207_s11 + $0x140] ss:$8 sps:$4 sm:$0xff]   ;;  %v1059_v27 = vld [vmem:[%s1207_s11 + $0x134] ss:$8 sps:$4 sm:$0xff]   ;;  %v1034_v28 = vld [vmem:[%s1207_s11 + $0x10] ss:$8 sps:$4 sm:$0xff]  }
  0x2c   : > { %673 = vmatpush1.bf16.msra.mxu1 %v1043_v18  ;;  %v1038_v29 = vld [vmem:[%s1207_s11 + $0x4] ss:$8 sps:$4 sm:$0xff]   ;;  %v1061_v30 = vld [vmem:[%s1207_s11 + $0x130] ss:$8 sps:$4 sm:$0xff]   ;;  %v1040_v32 = vld [vmem:[%s1207_s11] ss:$8 sps:$4 sm:$0xff]  }
  0x2d   : > { %674 = vmatprep.subr.bf16.mxu1 %v1047_v20  ;;  %v1065_v31 = vld [vmem:[%s1207_s11 + $0x124] ss:$8 sps:$4 sm:$0xff]   ;;  %v1044_v33 = vld [vmem:[%s1207_s11 + $0xf4] ss:$8 sps:$4 sm:$0xff]   ;;  %v1067_v34 = vld [vmem:[%s1207_s11 + $0x120] ss:$8 sps:$4 sm:$0xff]  }
  0x2e   : > { %632 = vmatpush1.bf16.msra.mxu0 %v1022_v11  ;;  %v1071_v35 = vld [vmem:[%s1207_s11 + $0x114] ss:$8 sps:$4 sm:$0xff]   ;;  %v1046_v36 = vld [vmem:[%s1207_s11 + $0xf0] ss:$8 sps:$4 sm:$0xff]   ;;  %v1050_v37 = vld [vmem:[%s1207_s11 + $0xe4] ss:$8 sps:$4 sm:$0xff]  }
  0x2f   : > { %633 = vmatprep.subr.bf16.mxu0 %v1023_v12  ;;  %v1073_v38 = vld [vmem:[%s1207_s11 + $0x110] ss:$8 sps:$4 sm:$0xff]   ;;  %v1077_v39 = vld [vmem:[%s1207_s11 + $0x104] ss:$8 sps:$4 sm:$0xff]   ;;  %v1052_v41 = vld [vmem:[%s1207_s11 + $0xe0] ss:$8 sps:$4 sm:$0xff]  }
  0x30   : > { %675 = vmatpush1.bf16.msra.mxu1 %v1049_v22  ;;  %v1089_v40 = vld [vmem:[%s1209_s12 + $0x4] ss:$12 sps:$4 sm:$0xff]   ;;  %v1083_v46 = vld [vmem:[%s1209_s12 + $0x8] ss:$12 sps:$4 sm:$0xff]   ;;  %v1087_v56 = vld [vmem:[%s1209_s12] ss:$12 sps:$4 sm:$0xff]  }
  0x31   : > { %676 = vmatprep.subr.bf16.mxu1 %v1053_v23  ;;  %v1056_v42 = vld [vmem:[%s1207_s11 + $0xd4] ss:$8 sps:$4 sm:$0xff]   ;;  %659 = vmatprep.mubr.bf16.mxu0 %v1089_v40  ;;  %v1079_v43 = vld [vmem:[%s1207_s11 + $0x100] ss:$8 sps:$4 sm:$0xff]   ;;  %v1058_v44 = vld [vmem:[%s1207_s11 + $0xd0] ss:$8 sps:$4 sm:$0xff]  }
  0x32   : > { %634 = vmatpush1.bf16.msra.mxu0 %v1025_v15  ;;  %v1062_v45 = vld [vmem:[%s1207_s11 + $0xc4] ss:$8 sps:$4 sm:$0xff]   ;;  %v1064_v47 = vld [vmem:[%s1207_s11 + $0xc0] ss:$8 sps:$4 sm:$0xff]   ;;  %v1068_v48 = vld [vmem:[%s1207_s11 + $0xb4] ss:$8 sps:$4 sm:$0xff]  }
  0x33   : > { %635 = vmatprep.subr.bf16.mxu0 %v1026_v16  ;;  %v1070_v49 = vld [vmem:[%s1207_s11 + $0xb0] ss:$8 sps:$4 sm:$0xff]   ;;  %v1074_v50 = vld [vmem:[%s1207_s11 + $0xa4] ss:$8 sps:$4 sm:$0xff]   ;;  %v1076_v51 = vld [vmem:[%s1207_s11 + $0xa0] ss:$8 sps:$4 sm:$0xff]  }
  0x34   : > { %677 = vmatpush1.bf16.msra.mxu1 %v1055_v26  ;;  %v1080_v52 = vld [vmem:[%s1207_s11 + $0x94] ss:$8 sps:$4 sm:$0xff]   ;;  %v1082_v53 = vld [vmem:[%s1207_s11 + $0x90] ss:$8 sps:$4 sm:$0xff]   ;;  %v1084_v54 = vld [vmem:[%s1207_s11 + $0x84] ss:$8 sps:$4 sm:$0xff]  }
  0x35   : > { %678 = vmatprep.subr.bf16.mxu1 %v1059_v27  ;;  %v1086_v55 = vld [vmem:[%s1207_s11 + $0x80] ss:$8 sps:$4 sm:$0xff]   ;;  %v315_v59 = vld [vmem:[#allocation2 + $0x10] sm:$0xff]  ;;  %v317_v3 = vld [vmem:[#allocation2 + $0x18] sm:$0xff] }
  0x36   : > { %636 = vmatpush1.bf16.msra.mxu0 %v1028_v19  ;;  %v316_v63 = vld [vmem:[#allocation2] sm:$0xff]  ;;  %v318_v8 = vld [vmem:[#allocation2 + $0x8] sm:$0xff] }
  0x37   : > { %637 = vmatprep.subr.bf16.mxu0 %v1029_v21 }
  0x38   : > { %679 = vmatpush1.bf16.msra.mxu1 %v1061_v30 }
  0x39   : > { %680 = vmatprep.subr.bf16.mxu1 %v1065_v31 }
  0x3a   : > { %638 = vmatpush1.bf16.msra.mxu0 %v1031_v24 }
  0x3b   : > { %639 = vmatprep.subr.bf16.mxu0 %v1032_v25 }
  0x3c   : > { %681 = vmatpush1.bf16.msra.mxu1 %v1067_v34 }
  0x3d   : > { %682 = vmatprep.subr.bf16.mxu1 %v1071_v35 }
  0x3e   : > { %640 = vmatpush1.bf16.msra.mxu0 %v1034_v28 }
  0x3f   : > { %641 = vmatprep.subr.bf16.mxu0 %v1038_v29 }
  0x40   : > { %683 = vmatpush1.bf16.msra.mxu1 %v1073_v38 }
  0x41   : > { %684 = vmatprep.subr.bf16.mxu1 %v1077_v39 }
  0x42   : > { %642 = vmatpush1.bf16.msra.mxu0 %v1040_v32 }
  0x43   : > { %643 = vmatprep.subr.bf16.mxu0 %v1044_v33 }
  0x44   : > { %685 = vmatpush1.bf16.msra.mxu1 %v1079_v43 }
  0x46   : > { %644 = vmatpush2.bf16.msra.mxu0 %v1046_v36 }
  0x47   : > { %645 = vmatprep.subr.bf16.mxu0 %v1050_v37  ;;  %703 = vmatmul.mubr.bf16.vlgmr.msra.gmra.mxu1 %v1083_v46 }
  0x4a   : > { %646 = vmatpush2.bf16.msra.mxu0 %v1052_v41 }
  0x4b   : > { %647 = vmatprep.subr.bf16.mxu0 %v1056_v42 }
  0x4e   : > { %648 = vmatpush2.bf16.msra.mxu0 %v1058_v44 }
  0x4f   : > { %649 = vmatprep.subr.bf16.mxu0 %v1062_v45 }
  0x52   : > { %650 = vmatpush2.bf16.msra.mxu0 %v1064_v47 }
  0x53   : > { %651 = vmatprep.subr.bf16.mxu0 %v1068_v48 }
  0x56   : > { %652 = vmatpush2.bf16.msra.mxu0 %v1070_v49 }
  0x57   : > { %653 = vmatprep.subr.bf16.mxu0 %v1074_v50 }
  0x5a   : > { %654 = vmatpush2.bf16.msra.mxu0 %v1076_v51 }
  0x5b   : > { %655 = vmatprep.subr.bf16.mxu0 %v1080_v52 }
  0x5e   : > { %656 = vmatpush2.bf16.msra.mxu0 %v1082_v53 }
  0x5f   : > { %657 = vmatprep.subr.bf16.mxu0 %v1084_v54 }
  0x62   : > { %658 = vmatpush2.bf16.msra.mxu0 %v1086_v55 }
  0x65   : > { %660 = vmatmul.mubr.bf16.vlgmr.msra.gmra.mxu0 %v1087_v56 }
 0x107   : > { %v704_v57 = vpop.f32.mrf.mxu1 }
 0x109   : > { %v706_v58 = vpop.f32.mrf.mxu1 }
 0x10b   : > { %v708_v62 = vpop.f32.mrf.mxu1 }
 0x10d   : > { %v710_v7 = vpop.f32.mrf.mxu1 }
 0x125   : > { %v661_v60 = vpop.f32.mrf.mxu0 }
 0x126   : > { %v705_v61 = vadd.f32 %v704_v57, %v661_v60 }
 0x127   : > { %v663_v0 = vpop.f32.mrf.mxu0 }
 0x128   : > { %v713_v1 = vadd.f32 %v705_v61, %v315_v59  ;;  %v707_v2 = vadd.f32 %v706_v58, %v663_v0 }
 0x129   : > { %v665_v4 = vpop.f32.mrf.mxu0 }
 0x12a   : > { %717 = vst [vmem:[#allocation2 + $0x10] sm:$0xff] %v713_v1  ;;  %v714_v5 = vadd.f32 %v707_v2, %v316_v63  ;;  %v709_v6 = vadd.f32 %v708_v62, %v665_v4 }
 0x12b   : > { %v667_v9 = vpop.f32.mrf.mxu0 }
 0x12c   : > { %718 = vst [vmem:[#allocation2] sm:$0xff] %v714_v5  ;;  %v715_v10 = vadd.f32 %v709_v6, %v317_v3  ;;  %v711_v11 = vadd.f32 %v710_v7, %v667_v9  ;;  %724 = sbr.rel (%p958_p11) target bundleno = 324 (0x144), region = 70 }
 0x12e   : > { %719 = vst [vmem:[#allocation2 + $0x18] sm:$0xff] %v715_v10  ;;  %v716_v12 = vadd.f32 %v711_v11, %v318_v8 }
 0x130   : > { %720 = vst [vmem:[#allocation2 + $0x8] sm:$0xff] %v716_v12 }
 0x131   : > { %v731_v13 = vlaneseq  ;;  %v729_v15 = vld [vmem:[%s1299_s2] ss:$2 sm:$0x3]  ;;  %v959_v16 = vld [vmem:[%s1299_s2 + $0x1] ss:$2 sm:$0x3] }
 0x132   : > { %v725_v17 = vld [vmem:[#allocation2 + $0x10] sm:$0xff]  ;;  %v762_v20 = vld [vmem:[%s1300_s3] sm:$0xff]  ;;  %v763_v21 = vld [vmem:[%s1300_s3 + $0x8] sm:$0xff] }
 0x133   : > { %v732_v14 = vshrl.u32 %v731_v13, 7  ;;  %v726_v22 = vld [vmem:[#allocation2] sm:$0xff]  ;;  %v764_v29 = vunpack.c.l.bf16 %v762_v20  ;;  %v765_v30 = vunpack.c.h.bf16 %v762_v20  ;;  %v766_v31 = vunpack.c.l.bf16 %v763_v21 }
 0x134   : > { %v767_v32 = vunpack.c.h.bf16 %v763_v21 }
 0x135   : > { %v733_v18 = vsub.s32 0, %v732_v14  ;;  %v737_v19 = vsub.s32 1, %v732_v14  ;;  %v727_v23 = vld [vmem:[#allocation2 + $0x18] sm:$0xff] }
 0x137   : > { %v728_v24 = vld [vmem:[#allocation2 + $0x8] sm:$0xff]  ;;  %v734_v25 = vrot.slane %v729_v15, %v733_v18  ;;  %v738_v26 = vrot.slane %v729_v15, %v737_v19  ;;  %v751_v27 = vrot.slane %v959_v16, %v733_v18  ;;  %v755_v28 = vrot.slane %v959_v16, %v737_v19 }
 0x139   : > { %v741_v33 = vmul.f32 %v734_v25, %v725_v17  ;;  %v742_v34 = vmul.f32 %v738_v26, %v726_v22  ;;  %v743_v35 = vmul.f32 %v734_v25, %v727_v23  ;;  %v744_v36 = vmul.f32 %v738_v26, %v728_v24 }
 0x13b   : > { %v758_v37 = vadd.f32 %v751_v27, %v741_v33  ;;  %v759_v38 = vadd.f32 %v755_v28, %v742_v34  ;;  %v760_v39 = vadd.f32 %v751_v27, %v743_v35  ;;  %v761_v40 = vadd.f32 %v755_v28, %v744_v36 }
 0x13d   : > { %v768_v41 = vadd.f32 %v764_v29, %v758_v37  ;;  %v769_v42 = vadd.f32 %v765_v30, %v759_v38  ;;  %v770_v43 = vadd.f32 %v766_v31, %v760_v39  ;;  %v771_v44 = vadd.f32 %v767_v32, %v761_v40 }
 0x13f   : > { %v772_v45 = vmax.f32 %v768_v41, 0.0  ;;  %v773_v46 = vmax.f32 %v769_v42, 0.0  ;;  %v774_v47 = vmax.f32 %v770_v43, 0.0  ;;  %v775_v48 = vmax.f32 %v771_v44, 0.0 }
 0x141   : > { %v968_v49 = vpack.c.bf16 %v773_v46, %v772_v45  ;;  %v969_v50 = vpack.c.bf16 %v775_v48, %v774_v47 }
 0x143   : > { %788 = vst [vmem:[%s1301_s4] sm:$0xff] %v968_v49  ;;  %789 = vst [vmem:[%s1301_s4 + $0x8] sm:$0xff] %v969_v50 }
 0x144 PF: > { %s14_s19 = sadd.s32 1, %s1128_s19   ;;  %s1302_s15 = smov %s1116_s16 }
 0x145   : > { %p11_p12 = scmp.ge.s32.totalorder %s14_s19, 8   ;;  %s1303_s16 = smov %s1192_s23 }
 0x146   : > { %s1304_s17 = smov %s1124_s18  ;;  %s1305_s18 = smov %s1307_s20 }
 0x147   :  { %13 = sbr.rel (!%p11_p12) target bundleno = 3 (0x3), region = 118 }

// kernel: pretrained_model_forward.34
= control target key start
LH: loop header
LB: loop body
LE: loop exit
PB: predicated region body
PF: predicated region fallthrough
CT: control target
= control target key end

     0   :  { %s1074_s12 = smov 0   ;;  %s1076_s13 = smov 0   ;;  %s1208_s0 = inlined_call_operand.vmem [shape: bf16[16,2304], index: 0, kind: input, shape index: {}]   ;;  %s1209_s1 = inlined_call_operand.vmem [shape: bf16[2304,256], index: 1, kind: input, shape index: {}]   ;;  %s1210_s2 = inlined_call_operand.vmem [shape: f32[2,256], index: 2, kind: input, shape index: {}]   ;;  %s1211_s3 = inlined_call_operand.vmem [shape: bf16[16,256], index: 3, kind: output, shape index: {}]  }
   0x1   :  { %s1078_s14 = smov 0   ;;  %s1080_s15 = smov 0  }
   0x2   :  { %s1082_s16 = smov 0  }
   0x3 LB: > { %s22_s17 = sadd.s32 1, %s1046_s15  ;;  %p41_p1 = scmp.ne.s32.totalorder %s1038_s13, %s1034_s12  ;;  %s1050_s16 = sphi %s1082_s16, %s13_s16   ;;  %s1046_s15 = sphi %s1080_s15, %s1215_s15   ;;  %s1042_s14 = sphi %s1078_s14, %s1214_s14   ;;  %s1038_s13 = sphi %s1076_s13, %s1213_s13   ;;  %s1034_s12 = sphi %s1074_s12, %s1212_s12  }
   0x4   : > { %p23_p0 = scmp.ge.s32.totalorder %s22_s17, 6  ;;  %p42_p2 = scmp.eq.s32.totalorder %s1050_s16, 0 }
   0x5   : > { %s34_s19 = sadd.s32 1, %s1038_s13  ;;  %p819_p5 = scmp.ge.s32.totalorder %s1050_s16, 6 }
   0x6   : > { %s1217_s17 = smov (%p23_p0, %s22_s17), 0  ;;  %p43_p3 = por %p42_p2, %p41_p1 }
   0x7   : > { %s30_s18 = ssub.s32 %s1046_s15, %s1217_s17  ;;  %143 = sbr.rel (%p819_p5) target bundleno = 19 (0x13), region = 20 }
   0x8   : > { %p32_p4 = scmp.eq.s32.totalorder %s30_s18, 0 }
   0xa   : > { %s1109_s20 = scalar_select %p32_p4, %s1038_s13, %s34_s19  }
   0xc   : > { %146 = sbr.rel (!%p43_p3) target bundleno = 19 (0x13), region = 24  ;;  %s148_s21 = sand.u32 (%p43_p3), 1, %s1038_s13  }
   0xd   : > { %s888_s22 = smul.u32 (%p43_p3), 12, %s1046_s15 }
   0xe   : > { %s892_s23 = smul.u32 (%p43_p3), 24, %s148_s21 }
   0xf   : > { %s156_s26 = scalar_lea.vmem (%p43_p3), %s1208_s0, %s888_s22 }
  0x10   : > { %v171_v0 = vld [vmem:[%s156_s26] sm:$0xff] (%p43_p3)  ;;  %v173_v1 = vld [vmem:[%s156_s26 + $0x48] sm:$0xff] (%p43_p3)  ;;  %s150_s27 = scalar_lea.vmem (%p43_p3), [#allocation3], %s892_s23  ;;  %v823_v3 = vld [vmem:[%s156_s26 + $0x50] sm:$0xf] (%p43_p3) }
  0x11   : > { %v821_v2 = vld [vmem:[%s156_s26 + $0x8] sm:$0xf]  ;;  %172 = vst [vmem:[%s150_s27] sm:$0xff] %v171_v0  ;;  %174 = vst [vmem:[%s150_s27 + $0xc] sm:$0xff] %v173_v1 }
  0x12   : > { %822 = vst [vmem:[%s150_s27 + $0x8] sm:$0xf] %v821_v2  ;;  %824 = vst [vmem:[%s150_s27 + $0x14] sm:$0xf] %v823_v3 }
  0x13 PF: > { %p825_p6 = scmp.ge.s32.totalorder %s1050_s16, 1  ;;  %p201_p7 = scmp.lt.s32.totalorder %s1050_s16, 7 }
  0x15   : > { %p202_p8 = pnand %p825_p6, %p201_p7 }
  0x16   : > { %s208_s28 = sand.u32 (!%p202_p8), 1, %s1034_s12   ;;  %s240_s29 = smul.u32 (!%p202_p8), 48, %s1042_s14 }
  0x17   : > { %205 = sbr.rel (%p202_p8) target bundleno = 322 (0x142), region = 54  ;;  %p828_p10 = scmp.ne.s32.totalorder (!%p202_p8), %s1042_s14, 0 }
  0x18   : > { %s893_s30 = smul.u32 (!%p202_p8), 24, %s208_s28  ;;  %p241_p9 = scmp.lt.s32.totalorder (!%p202_p8), %s240_s29, 287 }
  0x1a   : > { %s1126_s8 = scalar_lea.vmem (!%p202_p8), [#allocation3], %s893_s30 }
  0x1c   : > { %s1219_s29 = smov (!%p241_p9, %s240_s29), 287  ;;  %258 = sbr.rel (%p828_p10) target bundleno = 36 (0x24), region = 62 }
  0x1d   : > { %s889_s4 = sshll.u32 %s1219_s29, 3 }
  0x1e   : > { %s1124_s7 = scalar_lea.vmem %s1209_s1, %s889_s4 }
  0x21   : > { %v1052_v4 = vmov 0.0  }
  0x22   : > { %259 = vst [vmem:[#allocation2 + $0x10] sm:$0xff] %v1052_v4  ;;  %260 = vst [vmem:[#allocation2] sm:$0xff] %v1052_v4 }
  0x23   : > { %261 = vst [vmem:[#allocation2 + $0x18] sm:$0xff] %v1052_v4  ;;  %262 = vst [vmem:[#allocation2 + $0x8] sm:$0xff] %v1052_v4 }
  0x24 PF: > { %v936_v5 = vld [vmem:[%s1124_s7 + $0x74] ss:$8 sps:$4 sm:$0xff]   ;;  %v938_v6 = vld [vmem:[%s1124_s7 + $0x70] ss:$8 sps:$4 sm:$0xff]   ;;  %v1053_v7 = vmov 0   ;;  %p880_p11 = scmp.ne.s32.totalorder %s1042_s14, 5 }
  0x25   : > { %650 = vmatprep.mubr.bf16.mxu1 %v1053_v7  ;;  %575 = vmatprep.subr.bf16.mxu0 %v936_v5  ;;  %v939_v8 = vld [vmem:[%s1124_s7 + $0x64] ss:$8 sps:$4 sm:$0xff]   ;;  %v941_v9 = vld [vmem:[%s1124_s7 + $0x60] ss:$8 sps:$4 sm:$0xff]   ;;  %v942_v10 = vld [vmem:[%s1124_s7 + $0x54] ss:$8 sps:$4 sm:$0xff]  }
  0x26   : > { %576 = vmatpush1.bf16.msra.mxu0 %v938_v6  ;;  %v944_v11 = vld [vmem:[%s1124_s7 + $0x50] ss:$8 sps:$4 sm:$0xff]   ;;  %v945_v12 = vld [vmem:[%s1124_s7 + $0x44] ss:$8 sps:$4 sm:$0xff]   ;;  %v957_v13 = vld [vmem:[%s1124_s7 + $0x174] ss:$8 sps:$4 sm:$0xff]  }
  0x27   : > { %577 = vmatprep.subr.bf16.mxu0 %v939_v8  ;;  %v959_v14 = vld [vmem:[%s1124_s7 + $0x170] ss:$8 sps:$4 sm:$0xff]   ;;  %v947_v15 = vld [vmem:[%s1124_s7 + $0x40] ss:$8 sps:$4 sm:$0xff]   ;;  %v948_v16 = vld [vmem:[%s1124_s7 + $0x34] ss:$8 sps:$4 sm:$0xff]   ;;  %618 = vmatprep.subr.bf16.mxu1 %v957_v13 }
  0x28   : > { %v963_v17 = vld [vmem:[%s1124_s7 + $0x164] ss:$8 sps:$4 sm:$0xff]   ;;  %619 = vmatpush1.bf16.msra.mxu1 %v959_v14  ;;  %v965_v18 = vld [vmem:[%s1124_s7 + $0x160] ss:$8 sps:$4 sm:$0xff]   ;;  %v950_v19 = vld [vmem:[%s1124_s7 + $0x30] ss:$8 sps:$4 sm:$0xff]  }
  0x29   : > { %620 = vmatprep.subr.bf16.mxu1 %v963_v17  ;;  %v969_v20 = vld [vmem:[%s1124_s7 + $0x154] ss:$8 sps:$4 sm:$0xff]   ;;  %v951_v21 = vld [vmem:[%s1124_s7 + $0x24] ss:$8 sps:$4 sm:$0xff]   ;;  %v971_v22 = vld [vmem:[%s1124_s7 + $0x150] ss:$8 sps:$4 sm:$0xff]  }
  0x2a   : > { %578 = vmatpush1.bf16.msra.mxu0 %v941_v9  ;;  %v975_v23 = vld [vmem:[%s1124_s7 + $0x144] ss:$8 sps:$4 sm:$0xff]   ;;  %v953_v24 = vld [vmem:[%s1124_s7 + $0x20] ss:$8 sps:$4 sm:$0xff]   ;;  %v954_v25 = vld [vmem:[%s1124_s7 + $0x14] ss:$8 sps:$4 sm:$0xff]  }
  0x2b   : > { %579 = vmatprep.subr.bf16.mxu0 %v942_v10  ;;  %v977_v26 = vld [vmem:[%s1124_s7 + $0x140] ss:$8 sps:$4 sm:$0xff]   ;;  %v981_v27 = vld [vmem:[%s1124_s7 + $0x134] ss:$8 sps:$4 sm:$0xff]   ;;  %v956_v28 = vld [vmem:[%s1124_s7 + $0x10] ss:$8 sps:$4 sm:$0xff]  }
  0x2c   : > { %621 = vmatpush1.bf16.msra.mxu1 %v965_v18  ;;  %v960_v29 = vld [vmem:[%s1124_s7 + $0x4] ss:$8 sps:$4 sm:$0xff]   ;;  %v983_v30 = vld [vmem:[%s1124_s7 + $0x130] ss:$8 sps:$4 sm:$0xff]   ;;  %v962_v32 = vld [vmem:[%s1124_s7] ss:$8 sps:$4 sm:$0xff]  }
  0x2d   : > { %622 = vmatprep.subr.bf16.mxu1 %v969_v20  ;;  %v987_v31 = vld [vmem:[%s1124_s7 + $0x124] ss:$8 sps:$4 sm:$0xff]   ;;  %v966_v33 = vld [vmem:[%s1124_s7 + $0xf4] ss:$8 sps:$4 sm:$0xff]   ;;  %v989_v34 = vld [vmem:[%s1124_s7 + $0x120] ss:$8 sps:$4 sm:$0xff]  }
  0x2e   : > { %580 = vmatpush1.bf16.msra.mxu0 %v944_v11  ;;  %v993_v35 = vld [vmem:[%s1124_s7 + $0x114] ss:$8 sps:$4 sm:$0xff]   ;;  %v968_v36 = vld [vmem:[%s1124_s7 + $0xf0] ss:$8 sps:$4 sm:$0xff]   ;;  %v972_v37 = vld [vmem:[%s1124_s7 + $0xe4] ss:$8 sps:$4 sm:$0xff]  }
  0x2f   : > { %581 = vmatprep.subr.bf16.mxu0 %v945_v12  ;;  %v995_v38 = vld [vmem:[%s1124_s7 + $0x110] ss:$8 sps:$4 sm:$0xff]   ;;  %v999_v39 = vld [vmem:[%s1124_s7 + $0x104] ss:$8 sps:$4 sm:$0xff]   ;;  %v974_v41 = vld [vmem:[%s1124_s7 + $0xe0] ss:$8 sps:$4 sm:$0xff]  }
  0x30   : > { %623 = vmatpush1.bf16.msra.mxu1 %v971_v22  ;;  %v1011_v40 = vld [vmem:[%s1126_s8 + $0x4] ss:$12 sps:$4 sm:$0xff]   ;;  %v1005_v46 = vld [vmem:[%s1126_s8 + $0x8] ss:$12 sps:$4 sm:$0xff]   ;;  %v1009_v56 = vld [vmem:[%s1126_s8] ss:$12 sps:$4 sm:$0xff]  }
  0x31   : > { %624 = vmatprep.subr.bf16.mxu1 %v975_v23  ;;  %v978_v42 = vld [vmem:[%s1124_s7 + $0xd4] ss:$8 sps:$4 sm:$0xff]   ;;  %607 = vmatprep.mubr.bf16.mxu0 %v1011_v40  ;;  %v1001_v43 = vld [vmem:[%s1124_s7 + $0x100] ss:$8 sps:$4 sm:$0xff]   ;;  %v980_v44 = vld [vmem:[%s1124_s7 + $0xd0] ss:$8 sps:$4 sm:$0xff]  }
  0x32   : > { %582 = vmatpush1.bf16.msra.mxu0 %v947_v15  ;;  %v984_v45 = vld [vmem:[%s1124_s7 + $0xc4] ss:$8 sps:$4 sm:$0xff]   ;;  %v986_v47 = vld [vmem:[%s1124_s7 + $0xc0] ss:$8 sps:$4 sm:$0xff]   ;;  %v990_v48 = vld [vmem:[%s1124_s7 + $0xb4] ss:$8 sps:$4 sm:$0xff]  }
  0x33   : > { %583 = vmatprep.subr.bf16.mxu0 %v948_v16  ;;  %v992_v49 = vld [vmem:[%s1124_s7 + $0xb0] ss:$8 sps:$4 sm:$0xff]   ;;  %v996_v50 = vld [vmem:[%s1124_s7 + $0xa4] ss:$8 sps:$4 sm:$0xff]   ;;  %v998_v51 = vld [vmem:[%s1124_s7 + $0xa0] ss:$8 sps:$4 sm:$0xff]  }
  0x34   : > { %625 = vmatpush1.bf16.msra.mxu1 %v977_v26  ;;  %v1002_v52 = vld [vmem:[%s1124_s7 + $0x94] ss:$8 sps:$4 sm:$0xff]   ;;  %v1004_v53 = vld [vmem:[%s1124_s7 + $0x90] ss:$8 sps:$4 sm:$0xff]   ;;  %v1006_v54 = vld [vmem:[%s1124_s7 + $0x84] ss:$8 sps:$4 sm:$0xff]  }
  0x35   : > { %626 = vmatprep.subr.bf16.mxu1 %v981_v27  ;;  %v1008_v55 = vld [vmem:[%s1124_s7 + $0x80] ss:$8 sps:$4 sm:$0xff]   ;;  %v263_v59 = vld [vmem:[#allocation2 + $0x10] sm:$0xff]  ;;  %v265_v3 = vld [vmem:[#allocation2 + $0x18] sm:$0xff] }
  0x36   : > { %584 = vmatpush1.bf16.msra.mxu0 %v950_v19  ;;  %v264_v63 = vld [vmem:[#allocation2] sm:$0xff]  ;;  %v266_v8 = vld [vmem:[#allocation2 + $0x8] sm:$0xff] }
  0x37   : > { %585 = vmatprep.subr.bf16.mxu0 %v951_v21 }
  0x38   : > { %627 = vmatpush1.bf16.msra.mxu1 %v983_v30 }
  0x39   : > { %628 = vmatprep.subr.bf16.mxu1 %v987_v31 }
  0x3a   : > { %586 = vmatpush1.bf16.msra.mxu0 %v953_v24 }
  0x3b   : > { %587 = vmatprep.subr.bf16.mxu0 %v954_v25 }
  0x3c   : > { %629 = vmatpush1.bf16.msra.mxu1 %v989_v34 }
  0x3d   : > { %630 = vmatprep.subr.bf16.mxu1 %v993_v35 }
  0x3e   : > { %588 = vmatpush1.bf16.msra.mxu0 %v956_v28 }
  0x3f   : > { %589 = vmatprep.subr.bf16.mxu0 %v960_v29 }
  0x40   : > { %631 = vmatpush1.bf16.msra.mxu1 %v995_v38 }
  0x41   : > { %632 = vmatprep.subr.bf16.mxu1 %v999_v39 }
  0x42   : > { %590 = vmatpush1.bf16.msra.mxu0 %v962_v32 }
  0x43   : > { %591 = vmatprep.subr.bf16.mxu0 %v966_v33 }
  0x44   : > { %633 = vmatpush1.bf16.msra.mxu1 %v1001_v43 }
  0x46   : > { %592 = vmatpush2.bf16.msra.mxu0 %v968_v36 }
  0x47   : > { %593 = vmatprep.subr.bf16.mxu0 %v972_v37  ;;  %651 = vmatmul.mubr.bf16.vlgmr.msra.gmra.mxu1 %v1005_v46 }
  0x4a   : > { %594 = vmatpush2.bf16.msra.mxu0 %v974_v41 }
  0x4b   : > { %595 = vmatprep.subr.bf16.mxu0 %v978_v42 }
  0x4e   : > { %596 = vmatpush2.bf16.msra.mxu0 %v980_v44 }
  0x4f   : > { %597 = vmatprep.subr.bf16.mxu0 %v984_v45 }
  0x52   : > { %598 = vmatpush2.bf16.msra.mxu0 %v986_v47 }
  0x53   : > { %599 = vmatprep.subr.bf16.mxu0 %v990_v48 }
  0x56   : > { %600 = vmatpush2.bf16.msra.mxu0 %v992_v49 }
  0x57   : > { %601 = vmatprep.subr.bf16.mxu0 %v996_v50 }
  0x5a   : > { %602 = vmatpush2.bf16.msra.mxu0 %v998_v51 }
  0x5b   : > { %603 = vmatprep.subr.bf16.mxu0 %v1002_v52 }
  0x5e   : > { %604 = vmatpush2.bf16.msra.mxu0 %v1004_v53 }
  0x5f   : > { %605 = vmatprep.subr.bf16.mxu0 %v1006_v54 }
  0x62   : > { %606 = vmatpush2.bf16.msra.mxu0 %v1008_v55 }
  0x65   : > { %608 = vmatmul.mubr.bf16.vlgmr.msra.gmra.mxu0 %v1009_v56 }
 0x107   : > { %v652_v57 = vpop.f32.mrf.mxu1 }
 0x109   : > { %v654_v58 = vpop.f32.mrf.mxu1 }
 0x10b   : > { %v656_v62 = vpop.f32.mrf.mxu1 }
 0x10d   : > { %v658_v7 = vpop.f32.mrf.mxu1 }
 0x125   : > { %v609_v60 = vpop.f32.mrf.mxu0 }
 0x126   : > { %v653_v61 = vadd.f32 %v652_v57, %v609_v60 }
 0x127   : > { %v611_v0 = vpop.f32.mrf.mxu0 }
 0x128   : > { %v661_v1 = vadd.f32 %v653_v61, %v263_v59  ;;  %v655_v2 = vadd.f32 %v654_v58, %v611_v0 }
 0x129   : > { %v613_v4 = vpop.f32.mrf.mxu0 }
 0x12a   : > { %665 = vst [vmem:[#allocation2 + $0x10] sm:$0xff] %v661_v1  ;;  %v662_v5 = vadd.f32 %v655_v2, %v264_v63  ;;  %v657_v6 = vadd.f32 %v656_v62, %v613_v4 }
 0x12b   : > { %v615_v9 = vpop.f32.mrf.mxu0 }
 0x12c   : > { %666 = vst [vmem:[#allocation2] sm:$0xff] %v662_v5  ;;  %v663_v10 = vadd.f32 %v657_v6, %v265_v3  ;;  %v659_v11 = vadd.f32 %v658_v7, %v615_v9  ;;  %672 = sbr.rel (%p880_p11) target bundleno = 322 (0x142), region = 66 }
 0x12e   : > { %667 = vst [vmem:[#allocation2 + $0x18] sm:$0xff] %v663_v10  ;;  %v664_v12 = vadd.f32 %v659_v11, %v266_v8 }
 0x130   : > { %668 = vst [vmem:[#allocation2 + $0x8] sm:$0xff] %v664_v12 }
 0x131   : > { %v679_v13 = vlaneseq  ;;  %v677_v15 = vld [vmem:[%s1210_s2] ss:$2 sm:$0x3]  ;;  %v881_v16 = vld [vmem:[%s1210_s2 + $0x1] ss:$2 sm:$0x3] }
 0x132   : > { %v673_v17 = vld [vmem:[#allocation2 + $0x10] sm:$0xff] }
 0x133   : > { %v680_v14 = vshrl.u32 %v679_v13, 7  ;;  %v674_v20 = vld [vmem:[#allocation2] sm:$0xff] }
 0x135   : > { %v681_v18 = vsub.s32 0, %v680_v14  ;;  %v685_v19 = vsub.s32 1, %v680_v14  ;;  %v675_v21 = vld [vmem:[#allocation2 + $0x18] sm:$0xff] }
 0x137   : > { %v676_v22 = vld [vmem:[#allocation2 + $0x8] sm:$0xff]  ;;  %v682_v23 = vrot.slane %v677_v15, %v681_v18  ;;  %v686_v24 = vrot.slane %v677_v15, %v685_v19  ;;  %v699_v25 = vrot.slane %v881_v16, %v681_v18  ;;  %v703_v26 = vrot.slane %v881_v16, %v685_v19 }
 0x139   : > { %v689_v27 = vmul.f32 %v682_v23, %v673_v17  ;;  %v690_v28 = vmul.f32 %v686_v24, %v674_v20  ;;  %v691_v29 = vmul.f32 %v682_v23, %v675_v21  ;;  %v692_v30 = vmul.f32 %v686_v24, %v676_v22 }
 0x13b   : > { %v706_v31 = vadd.f32 %v699_v25, %v689_v27  ;;  %v707_v32 = vadd.f32 %v703_v26, %v690_v28  ;;  %v708_v33 = vadd.f32 %v699_v25, %v691_v29  ;;  %v709_v34 = vadd.f32 %v703_v26, %v692_v30 }
 0x13d   : > { %v710_v35 = vmax.f32 %v706_v31, 0.0  ;;  %v711_v36 = vmax.f32 %v707_v32, 0.0  ;;  %v712_v37 = vmax.f32 %v708_v33, 0.0  ;;  %v713_v38 = vmax.f32 %v709_v34, 0.0 }
 0x13f   : > { %v890_v39 = vpack.c.bf16 %v711_v36, %v710_v35  ;;  %v891_v40 = vpack.c.bf16 %v713_v38, %v712_v37 }
 0x141   : > { %726 = vst [vmem:[%s1211_s3] sm:$0xff] %v890_v39  ;;  %727 = vst [vmem:[%s1211_s3 + $0x8] sm:$0xff] %v891_v40 }
 0x142 PF: > { %s13_s16 = sadd.s32 1, %s1050_s16   ;;  %s1212_s12 = smov %s1038_s13 }
 0x143   : > { %p10_p12 = scmp.ge.s32.totalorder %s13_s16, 8   ;;  %s1213_s13 = smov %s1109_s20 }
 0x144   : > { %s1214_s14 = smov %s1046_s15  ;;  %s1215_s15 = smov %s1217_s17 }
 0x145   :  { %12 = sbr.rel (!%p10_p12) target bundleno = 3 (0x3), region = 111 }

// kernel: pretrained_model_forward.37
= control target key start
LH: loop header
LB: loop body
LE: loop exit
PB: predicated region body
PF: predicated region fallthrough
CT: control target
= control target key end

     0   :  { %s1638_s12 = smov 0   ;;  %s1640_s13 = smov 0   ;;  %s1836_s0 = inlined_call_operand.vmem [shape: bf16[16,2304], index: 0, kind: input, shape index: {}]   ;;  %s1837_s1 = inlined_call_operand.vmem [shape: bf16[2304,512], index: 1, kind: input, shape index: {}]   ;;  %s1838_s2 = inlined_call_operand.vmem [shape: f32[2,512], index: 2, kind: input, shape index: {}]   ;;  %s1839_s3 = inlined_call_operand.vmem [shape: bf16[16,512], index: 3, kind: output, shape index: {}]  }
   0x1   :  { %s1642_s14 = smov 0   ;;  %s1644_s15 = smov 0  }
   0x2   :  { %s1646_s16 = smov 0  }
   0x3 LB: > { %s22_s17 = sadd.s32 1, %s1610_s15  ;;  %p41_p1 = scmp.ne.s32.totalorder %s1602_s13, %s1598_s12  ;;  %s1614_s16 = sphi %s1646_s16, %s13_s16   ;;  %s1610_s15 = sphi %s1644_s15, %s1843_s15   ;;  %s1606_s14 = sphi %s1642_s14, %s1842_s14   ;;  %s1602_s13 = sphi %s1640_s13, %s1841_s13   ;;  %s1598_s12 = sphi %s1638_s12, %s1840_s12  }
   0x4   : > { %p23_p0 = scmp.ge.s32.totalorder %s22_s17, 6  ;;  %p42_p2 = scmp.eq.s32.totalorder %s1614_s16, 0 }
   0x5   : > { %s34_s19 = sadd.s32 1, %s1602_s13  ;;  %p1259_p5 = scmp.ge.s32.totalorder %s1614_s16, 6 }
   0x6   : > { %s1845_s17 = smov (%p23_p0, %s22_s17), 0  ;;  %p43_p3 = por %p42_p2, %p41_p1 }
   0x7   : > { %s30_s18 = ssub.s32 %s1610_s15, %s1845_s17  ;;  %143 = sbr.rel (%p1259_p5) target bundleno = 19 (0x13), region = 20 }
   0x8   : > { %p32_p4 = scmp.eq.s32.totalorder %s30_s18, 0 }
   0xa   : > { %s1673_s20 = scalar_select %p32_p4, %s1602_s13, %s34_s19  }
   0xc   : > { %146 = sbr.rel (!%p43_p3) target bundleno = 19 (0x13), region = 24  ;;  %s148_s21 = sand.u32 (%p43_p3), 1, %s1602_s13  }
   0xd   : > { %s1378_s22 = smul.u32 (%p43_p3), 12, %s1610_s15 }
   0xe   : > { %s1384_s23 = smul.u32 (%p43_p3), 24, %s148_s21 }
   0xf   : > { %s156_s26 = scalar_lea.vmem (%p43_p3), %s1836_s0, %s1378_s22 }
  0x10   : > { %v171_v0 = vld [vmem:[%s156_s26] sm:$0xff] (%p43_p3)  ;;  %v173_v1 = vld [vmem:[%s156_s26 + $0x48] sm:$0xff] (%p43_p3)  ;;  %s150_s27 = scalar_lea.vmem (%p43_p3), [#allocation3], %s1384_s23  ;;  %v1263_v3 = vld [vmem:[%s156_s26 + $0x50] sm:$0xf] (%p43_p3) }
  0x11   : > { %v1261_v2 = vld [vmem:[%s156_s26 + $0x8] sm:$0xf]  ;;  %172 = vst [vmem:[%s150_s27] sm:$0xff] %v171_v0  ;;  %174 = vst [vmem:[%s150_s27 + $0xc] sm:$0xff] %v173_v1 }
  0x12   : > { %1262 = vst [vmem:[%s150_s27 + $0x8] sm:$0xf] %v1261_v2  ;;  %1264 = vst [vmem:[%s150_s27 + $0x14] sm:$0xf] %v1263_v3 }
  0x13 PF: > { %p1265_p6 = scmp.ge.s32.totalorder %s1614_s16, 1  ;;  %p201_p7 = scmp.lt.s32.totalorder %s1614_s16, 7 }
  0x15   : > { %p202_p8 = pnand %p1265_p6, %p201_p7 }
  0x16   : > { %s208_s28 = sand.u32 (!%p202_p8), 1, %s1598_s12   ;;  %s240_s29 = smul.u32 (!%p202_p8), 48, %s1606_s14 }
  0x17   : > { %205 = sbr.rel (%p202_p8) target bundleno = 358 (0x166), region = 54  ;;  %p1268_p10 = scmp.ne.s32.totalorder (!%p202_p8), %s1606_s14, 0 }
  0x18   : > { %s1385_s30 = smul.u32 (!%p202_p8), 24, %s208_s28  ;;  %p241_p9 = scmp.lt.s32.totalorder (!%p202_p8), %s240_s29, 287 }
  0x1a   : > { %s1690_s8 = scalar_lea.vmem (!%p202_p8), [#allocation3], %s1385_s30 }
  0x1c   : > { %s1847_s29 = smov (!%p241_p9, %s240_s29), 287  ;;  %258 = sbr.rel (%p1268_p10) target bundleno = 38 (0x26), region = 62 }
  0x1d   : > { %s1379_s4 = sshll.u32 %s1847_s29, 4 }
  0x1e   : > { %s1688_s7 = scalar_lea.vmem %s1837_s1, %s1379_s4 }
  0x21   : > { %v1616_v4 = vmov 0.0  }
  0x22   : > { %259 = vst [vmem:[#allocation2 + $0x30] sm:$0xff] %v1616_v4  ;;  %260 = vst [vmem:[#allocation2] sm:$0xff] %v1616_v4 }
  0x23   : > { %261 = vst [vmem:[#allocation2 + $0x18] sm:$0xff] %v1616_v4  ;;  %262 = vst [vmem:[#allocation2 + $0x10] sm:$0xff] %v1616_v4 }
  0x24   : > { %263 = vst [vmem:[#allocation2 + $0x8] sm:$0xff] %v1616_v4  ;;  %264 = vst [vmem:[#allocation2 + $0x20] sm:$0xff] %v1616_v4 }
  0x25   : > { %265 = vst [vmem:[#allocation2 + $0x28] sm:$0xff] %v1616_v4  ;;  %266 = vst [vmem:[#allocation2 + $0x38] sm:$0xff] %v1616_v4 }
  0x26 PF: > { %v1428_v5 = vld [vmem:[%s1688_s7 + $0xe4] ss:$16 sps:$4 sm:$0xff]   ;;  %v1617_v7 = vmov 0   ;;  %v1432_v8 = vld [vmem:[%s1688_s7 + $0xe0] ss:$16 sps:$4 sm:$0xff]   ;;  %p1368_p11 = scmp.ne.s32.totalorder %s1606_s14, 5 }
  0x27   : > { %v1430_v6 = vld [vmem:[%s1688_s7 + $0x2e4] ss:$16 sps:$4 sm:$0xff]   ;;  %946 = vmatprep.mubr.bf16.mxu1 %v1617_v7  ;;  %871 = vmatprep.subr.bf16.mxu0 %v1428_v5  ;;  %v1433_v9 = vld [vmem:[%s1688_s7 + $0x2e0] ss:$16 sps:$4 sm:$0xff]   ;;  %v1481_v39 = vld [vmem:[%s1688_s7 + $0xec] ss:$16 sps:$4 sm:$0xff]  }
  0x28   : > { %914 = vmatprep.subr.bf16.mxu1 %v1430_v6  ;;  %v1434_v10 = vld [vmem:[%s1688_s7 + $0xc4] ss:$16 sps:$4 sm:$0xff]   ;;  %872 = vmatpush1.bf16.msra.mxu0 %v1432_v8  ;;  %v1438_v12 = vld [vmem:[%s1688_s7 + $0xc0] ss:$16 sps:$4 sm:$0xff]   ;;  %v1479_v41 = vld [vmem:[%s1688_s7 + $0xe8] ss:$16 sps:$4 sm:$0xff]  }
  0x29   : > { %915 = vmatpush1.bf16.msra.mxu1 %v1433_v9  ;;  %v1436_v11 = vld [vmem:[%s1688_s7 + $0x2c4] ss:$16 sps:$4 sm:$0xff]   ;;  %873 = vmatprep.subr.bf16.mxu0 %v1434_v10  ;;  %v1439_v13 = vld [vmem:[%s1688_s7 + $0x2c0] ss:$16 sps:$4 sm:$0xff]   ;;  %v1487_v44 = vld [vmem:[%s1688_s7 + $0xcc] ss:$16 sps:$4 sm:$0xff]  }
  0x2a   : > { %916 = vmatprep.subr.bf16.mxu1 %v1436_v11  ;;  %v1440_v14 = vld [vmem:[%s1688_s7 + $0xa4] ss:$16 sps:$4 sm:$0xff]   ;;  %v1444_v16 = vld [vmem:[%s1688_s7 + $0xa0] ss:$16 sps:$4 sm:$0xff]   ;;  %v1485_v45 = vld [vmem:[%s1688_s7 + $0xc8] ss:$16 sps:$4 sm:$0xff]  }
  0x2b   : > { %v1442_v15 = vld [vmem:[%s1688_s7 + $0x2a4] ss:$16 sps:$4 sm:$0xff]   ;;  %v1445_v17 = vld [vmem:[%s1688_s7 + $0x2a0] ss:$16 sps:$4 sm:$0xff]   ;;  %v1493_v48 = vld [vmem:[%s1688_s7 + $0xac] ss:$16 sps:$4 sm:$0xff]  }
  0x2c   : > { %874 = vmatpush1.bf16.msra.mxu0 %v1438_v12  ;;  %v1446_v18 = vld [vmem:[%s1688_s7 + $0x84] ss:$16 sps:$4 sm:$0xff]   ;;  %v1450_v20 = vld [vmem:[%s1688_s7 + $0x80] ss:$16 sps:$4 sm:$0xff]   ;;  %v1491_v49 = vld [vmem:[%s1688_s7 + $0xa8] ss:$16 sps:$4 sm:$0xff]  }
  0x2d   : > { %917 = vmatpush1.bf16.msra.mxu1 %v1439_v13  ;;  %875 = vmatprep.subr.bf16.mxu0 %v1440_v14  ;;  %v1448_v19 = vld [vmem:[%s1688_s7 + $0x284] ss:$16 sps:$4 sm:$0xff]   ;;  %v1451_v21 = vld [vmem:[%s1688_s7 + $0x280] ss:$16 sps:$4 sm:$0xff]   ;;  %v1499_v52 = vld [vmem:[%s1688_s7 + $0x8c] ss:$16 sps:$4 sm:$0xff]  }
  0x2e   : > { %918 = vmatprep.subr.bf16.mxu1 %v1442_v15  ;;  %v1452_v22 = vld [vmem:[%s1688_s7 + $0x64] ss:$16 sps:$4 sm:$0xff]   ;;  %v1456_v24 = vld [vmem:[%s1688_s7 + $0x60] ss:$16 sps:$4 sm:$0xff]   ;;  %v1497_v53 = vld [vmem:[%s1688_s7 + $0x88] ss:$16 sps:$4 sm:$0xff]  }
  0x2f   : > { %v1454_v23 = vld [vmem:[%s1688_s7 + $0x264] ss:$16 sps:$4 sm:$0xff]   ;;  %v1457_v25 = vld [vmem:[%s1688_s7 + $0x260] ss:$16 sps:$4 sm:$0xff]   ;;  %v1505_v57 = vld [vmem:[%s1688_s7 + $0x6c] ss:$16 sps:$4 sm:$0xff]  }
  0x30   : > { %876 = vmatpush1.bf16.msra.mxu0 %v1444_v16  ;;  %v1458_v26 = vld [vmem:[%s1688_s7 + $0x44] ss:$16 sps:$4 sm:$0xff]   ;;  %v1462_v28 = vld [vmem:[%s1688_s7 + $0x40] ss:$16 sps:$4 sm:$0xff]   ;;  %v1503_v58 = vld [vmem:[%s1688_s7 + $0x68] ss:$16 sps:$4 sm:$0xff]  }
  0x31   : > { %919 = vmatpush1.bf16.msra.mxu1 %v1445_v17  ;;  %877 = vmatprep.subr.bf16.mxu0 %v1446_v18  ;;  %v1460_v27 = vld [vmem:[%s1688_s7 + $0x244] ss:$16 sps:$4 sm:$0xff]   ;;  %v1463_v29 = vld [vmem:[%s1688_s7 + $0x240] ss:$16 sps:$4 sm:$0xff]   ;;  %v1511_v61 = vld [vmem:[%s1688_s7 + $0x4c] ss:$16 sps:$4 sm:$0xff]  }
  0x32   : > { %920 = vmatprep.subr.bf16.mxu1 %v1448_v19  ;;  %v1464_v30 = vld [vmem:[%s1688_s7 + $0x24] ss:$16 sps:$4 sm:$0xff]   ;;  %v1468_v32 = vld [vmem:[%s1688_s7 + $0x20] ss:$16 sps:$4 sm:$0xff]   ;;  %v1509_v62 = vld [vmem:[%s1688_s7 + $0x48] ss:$16 sps:$4 sm:$0xff]  }
  0x33   : > { %v1466_v31 = vld [vmem:[%s1688_s7 + $0x224] ss:$16 sps:$4 sm:$0xff]   ;;  %v1469_v33 = vld [vmem:[%s1688_s7 + $0x220] ss:$16 sps:$4 sm:$0xff]   ;;  %v1517_v1 = vld [vmem:[%s1688_s7 + $0x2c] ss:$16 sps:$4 sm:$0xff]  }
  0x34   : > { %878 = vmatpush1.bf16.msra.mxu0 %v1450_v20  ;;  %v1470_v34 = vld [vmem:[%s1688_s7 + $0x4] ss:$16 sps:$4 sm:$0xff]   ;;  %v1474_v36 = vld [vmem:[%s1688_s7] ss:$16 sps:$4 sm:$0xff]   ;;  %v1515_v2 = vld [vmem:[%s1688_s7 + $0x28] ss:$16 sps:$4 sm:$0xff]  }
  0x35   : > { %921 = vmatpush1.bf16.msra.mxu1 %v1451_v21  ;;  %879 = vmatprep.subr.bf16.mxu0 %v1452_v22  ;;  %v1472_v35 = vld [vmem:[%s1688_s7 + $0x204] ss:$16 sps:$4 sm:$0xff]   ;;  %v1475_v37 = vld [vmem:[%s1688_s7 + $0x200] ss:$16 sps:$4 sm:$0xff]   ;;  %v1523_v5 = vld [vmem:[%s1688_s7 + $0xc] ss:$16 sps:$4 sm:$0xff]  }
  0x36   : > { %922 = vmatprep.subr.bf16.mxu1 %v1454_v23  ;;  %v1476_v38 = vld [vmem:[%s1688_s7 + $0x1e4] ss:$16 sps:$4 sm:$0xff]   ;;  %v1482_v42 = vld [vmem:[%s1688_s7 + $0x1e0] ss:$16 sps:$4 sm:$0xff]   ;;  %v1521_v6 = vld [vmem:[%s1688_s7 + $0x8] ss:$16 sps:$4 sm:$0xff]  }
  0x37   : > { %v1729_v40 = vld [vmem:[%s1690_s8 + $0x8] ss:$12 sps:$4 sm:$0xff]   ;;  %v1527_v56 = vld [vmem:[%s1690_s8 + $0x4] ss:$12 sps:$4 sm:$0xff]   ;;  %v1766_v11 = vld [vmem:[%s1690_s8] ss:$12 sps:$4 sm:$0xff]  }
  0x38   : > { %880 = vmatpush1.bf16.msra.mxu0 %v1456_v24  ;;  %v1483_v43 = vld [vmem:[%s1688_s7 + $0x1c4] ss:$16 sps:$4 sm:$0xff]   ;;  %v1488_v46 = vld [vmem:[%s1688_s7 + $0x1c0] ss:$16 sps:$4 sm:$0xff]   ;;  %903 = vmatprep.mubr.bf16.mxu0 %v1527_v56  ;;  %v1530_v9 = vld [vmem:[%s1688_s7 + $0x1ec] ss:$16 sps:$4 sm:$0xff]  }
  0x39   : > { %923 = vmatpush1.bf16.msra.mxu1 %v1457_v25  ;;  %881 = vmatprep.subr.bf16.mxu0 %v1458_v26  ;;  %v1489_v47 = vld [vmem:[%s1688_s7 + $0x1a4] ss:$16 sps:$4 sm:$0xff]   ;;  %v1494_v50 = vld [vmem:[%s1688_s7 + $0x1a0] ss:$16 sps:$4 sm:$0xff]   ;;  %v1533_v10 = vld [vmem:[%s1688_s7 + $0x2ec] ss:$16 sps:$4 sm:$0xff]  }
  0x3a   : > { %924 = vmatprep.subr.bf16.mxu1 %v1460_v27  ;;  %v1495_v51 = vld [vmem:[%s1688_s7 + $0x184] ss:$16 sps:$4 sm:$0xff]   ;;  %v1500_v54 = vld [vmem:[%s1688_s7 + $0x180] ss:$16 sps:$4 sm:$0xff]   ;;  %v1528_v12 = vld [vmem:[%s1688_s7 + $0x1e8] ss:$16 sps:$4 sm:$0xff]  }
  0x3b   : > { %v1501_v55 = vld [vmem:[%s1688_s7 + $0x164] ss:$16 sps:$4 sm:$0xff]   ;;  %v1506_v59 = vld [vmem:[%s1688_s7 + $0x160] ss:$16 sps:$4 sm:$0xff]   ;;  %v1531_v13 = vld [vmem:[%s1688_s7 + $0x2e8] ss:$16 sps:$4 sm:$0xff]  }
  0x3c   : > { %882 = vmatpush1.bf16.msra.mxu0 %v1462_v28  ;;  %v1507_v60 = vld [vmem:[%s1688_s7 + $0x144] ss:$16 sps:$4 sm:$0xff]   ;;  %v1512_v63 = vld [vmem:[%s1688_s7 + $0x140] ss:$16 sps:$4 sm:$0xff]   ;;  %v1536_v14 = vld [vmem:[%s1688_s7 + $0x1cc] ss:$16 sps:$4 sm:$0xff]  }
  0x3d   : > { %925 = vmatpush1.bf16.msra.mxu1 %v1463_v29  ;;  %883 = vmatprep.subr.bf16.mxu0 %v1464_v30  ;;  %v1513_v0 = vld [vmem:[%s1688_s7 + $0x124] ss:$16 sps:$4 sm:$0xff]   ;;  %v1518_v3 = vld [vmem:[%s1688_s7 + $0x120] ss:$16 sps:$4 sm:$0xff]   ;;  %v1539_v15 = vld [vmem:[%s1688_s7 + $0x2cc] ss:$16 sps:$4 sm:$0xff]  }
  0x3e   : > { %926 = vmatprep.subr.bf16.mxu1 %v1466_v31  ;;  %v1519_v4 = vld [vmem:[%s1688_s7 + $0x104] ss:$16 sps:$4 sm:$0xff]   ;;  %v1524_v8 = vld [vmem:[%s1688_s7 + $0x100] ss:$16 sps:$4 sm:$0xff]   ;;  %v1534_v16 = vld [vmem:[%s1688_s7 + $0x1c8] ss:$16 sps:$4 sm:$0xff]  }
  0x3f   : > { %v1537_v17 = vld [vmem:[%s1688_s7 + $0x2c8] ss:$16 sps:$4 sm:$0xff]   ;;  %v1542_v18 = vld [vmem:[%s1688_s7 + $0x1ac] ss:$16 sps:$4 sm:$0xff]  }
  0x40   : > { %884 = vmatpush1.bf16.msra.mxu0 %v1468_v32  ;;  %v1545_v19 = vld [vmem:[%s1688_s7 + $0x2ac] ss:$16 sps:$4 sm:$0xff]   ;;  %v1540_v20 = vld [vmem:[%s1688_s7 + $0x1a8] ss:$16 sps:$4 sm:$0xff]  }
  0x41   : > { %927 = vmatpush1.bf16.msra.mxu1 %v1469_v33  ;;  %885 = vmatprep.subr.bf16.mxu0 %v1470_v34  ;;  %v1543_v21 = vld [vmem:[%s1688_s7 + $0x2a8] ss:$16 sps:$4 sm:$0xff]   ;;  %v1548_v22 = vld [vmem:[%s1688_s7 + $0x18c] ss:$16 sps:$4 sm:$0xff]  }
  0x42   : > { %928 = vmatprep.subr.bf16.mxu1 %v1472_v35  ;;  %v1551_v23 = vld [vmem:[%s1688_s7 + $0x28c] ss:$16 sps:$4 sm:$0xff]   ;;  %v1546_v24 = vld [vmem:[%s1688_s7 + $0x188] ss:$16 sps:$4 sm:$0xff]  }
  0x43   : > { %v1549_v25 = vld [vmem:[%s1688_s7 + $0x288] ss:$16 sps:$4 sm:$0xff]   ;;  %v1557_v26 = vld [vmem:[%s1688_s7 + $0x26c] ss:$16 sps:$4 sm:$0xff]  }
  0x44   : > { %886 = vmatpush1.bf16.msra.mxu0 %v1474_v36  ;;  %v1552_v27 = vld [vmem:[%s1688_s7 + $0x168] ss:$16 sps:$4 sm:$0xff]   ;;  %v1560_v29 = vld [vmem:[%s1688_s7 + $0x14c] ss:$16 sps:$4 sm:$0xff]  }
  0x45   : > { %929 = vmatpush1.bf16.msra.mxu1 %v1475_v37  ;;  %887 = vmatprep.subr.bf16.mxu0 %v1476_v38  ;;  %v1555_v28 = vld [vmem:[%s1688_s7 + $0x268] ss:$16 sps:$4 sm:$0xff]   ;;  %v1563_v30 = vld [vmem:[%s1688_s7 + $0x24c] ss:$16 sps:$4 sm:$0xff]  }
  0x46   : > { %957 = vmatprep.subr.bf16.mxu1 %v1481_v39  ;;  %v1558_v31 = vld [vmem:[%s1688_s7 + $0x148] ss:$16 sps:$4 sm:$0xff]   ;;  %v1566_v33 = vld [vmem:[%s1688_s7 + $0x12c] ss:$16 sps:$4 sm:$0xff]  }
  0x47   : > { %v1561_v32 = vld [vmem:[%s1688_s7 + $0x248] ss:$16 sps:$4 sm:$0xff]   ;;  %v1569_v34 = vld [vmem:[%s1688_s7 + $0x22c] ss:$16 sps:$4 sm:$0xff]  }
  0x48   : > { %947 = vmatmul.mubr.bf16.vlgmr.msra.gmra.mxu1 %v1729_v40  ;;  %888 = vmatpush2.bf16.msra.mxu0 %v1482_v42  ;;  %v1564_v35 = vld [vmem:[%s1688_s7 + $0x128] ss:$16 sps:$4 sm:$0xff]   ;;  %v1572_v37 = vld [vmem:[%s1688_s7 + $0x10c] ss:$16 sps:$4 sm:$0xff]  }
  0x49   : > { %958 = vmatpush1.bf16.msra.mxu1 %v1479_v41  ;;  %889 = vmatprep.subr.bf16.mxu0 %v1483_v43  ;;  %v1567_v36 = vld [vmem:[%s1688_s7 + $0x228] ss:$16 sps:$4 sm:$0xff]   ;;  %v1575_v38 = vld [vmem:[%s1688_s7 + $0x20c] ss:$16 sps:$4 sm:$0xff]  }
  0x4a   : > { %959 = vmatprep.subr.bf16.mxu1 %v1487_v44  ;;  %989 = vmatprep.mubr.bf16.mxu1 %v1527_v56  ;;  %v1570_v39 = vld [vmem:[%s1688_s7 + $0x108] ss:$16 sps:$4 sm:$0xff]   ;;  %v267_v44 = vld [vmem:[#allocation2 + $0x30] sm:$0xff] }
  0x4b   : > { %v1573_v41 = vld [vmem:[%s1688_s7 + $0x208] ss:$16 sps:$4 sm:$0xff]  }
  0x4c   : > { %890 = vmatpush2.bf16.msra.mxu0 %v1488_v46 }
  0x4d   : > { %960 = vmatpush1.bf16.msra.mxu1 %v1485_v45  ;;  %891 = vmatprep.subr.bf16.mxu0 %v1489_v47 }
  0x4e   : > { %961 = vmatprep.subr.bf16.mxu1 %v1493_v48  ;;  %v268_v48 = vld [vmem:[#allocation2] sm:$0xff] }
  0x50   : > { %892 = vmatpush2.bf16.msra.mxu0 %v1494_v50 }
  0x51   : > { %962 = vmatpush1.bf16.msra.mxu1 %v1491_v49  ;;  %893 = vmatprep.subr.bf16.mxu0 %v1495_v51 }
  0x52   : > { %963 = vmatprep.subr.bf16.mxu1 %v1499_v52  ;;  %v271_v52 = vld [vmem:[#allocation2 + $0x8] sm:$0xff] }
  0x54   : > { %894 = vmatpush2.bf16.msra.mxu0 %v1500_v54 }
  0x55   : > { %964 = vmatpush1.bf16.msra.mxu1 %v1497_v53  ;;  %895 = vmatprep.subr.bf16.mxu0 %v1501_v55 }
  0x56   : > { %965 = vmatprep.subr.bf16.mxu1 %v1505_v57  ;;  %v272_v57 = vld [vmem:[#allocation2 + $0x20] sm:$0xff] }
  0x58   : > { %896 = vmatpush2.bf16.msra.mxu0 %v1506_v59 }
  0x59   : > { %966 = vmatpush1.bf16.msra.mxu1 %v1503_v58  ;;  %897 = vmatprep.subr.bf16.mxu0 %v1507_v60 }
  0x5a   : > { %967 = vmatprep.subr.bf16.mxu1 %v1511_v61 }
  0x5c   : > { %898 = vmatpush2.bf16.msra.mxu0 %v1512_v63 }
  0x5d   : > { %968 = vmatpush1.bf16.msra.mxu1 %v1509_v62  ;;  %899 = vmatprep.subr.bf16.mxu0 %v1513_v0  ;;  %v269_v62 = vld [vmem:[#allocation2 + $0x18] sm:$0xff] }
  0x5e   : > { %969 = vmatprep.subr.bf16.mxu1 %v1517_v1 }
  0x60   : > { %900 = vmatpush2.bf16.msra.mxu0 %v1518_v3 }
  0x61   : > { %970 = vmatpush1.bf16.msra.mxu1 %v1515_v2  ;;  %901 = vmatprep.subr.bf16.mxu0 %v1519_v4  ;;  %v270_v2 = vld [vmem:[#allocation2 + $0x10] sm:$0xff] }
  0x62   : > { %971 = vmatprep.subr.bf16.mxu1 %v1523_v5 }
  0x64   : > { %902 = vmatpush2.bf16.msra.mxu0 %v1524_v8  ;;  %v273_v8 = vld [vmem:[#allocation2 + $0x28] sm:$0xff] }
  0x65   : > { %972 = vmatpush1.bf16.msra.mxu1 %v1521_v6  ;;  %1000 = vmatprep.subr.bf16.mxu0 %v1533_v10 }
  0x66   : > { %973 = vmatprep.subr.bf16.mxu1 %v1530_v9 }
  0x67   : > { %904 = vmatmul.mubr.bf16.vlgmr.msra.gmra.mxu0 %v1766_v11 }
  0x68   : > { %1001 = vmatpush1.bf16.msra.mxu0 %v1531_v13  ;;  %1032 = vmatprep.mubr.bf16.mxu0 %v1617_v7  ;;  %v1554_v7 = vld [vmem:[%s1688_s7 + $0x16c] ss:$16 sps:$4 sm:$0xff]  }
  0x69   : > { %974 = vmatpush2.bf16.msra.mxu1 %v1528_v12  ;;  %1002 = vmatprep.subr.bf16.mxu0 %v1539_v15  ;;  %v274_v13 = vld [vmem:[#allocation2 + $0x38] sm:$0xff] }
  0x6a   : > { %975 = vmatprep.subr.bf16.mxu1 %v1536_v14 }
  0x6c   : > { %1003 = vmatpush1.bf16.msra.mxu0 %v1537_v17 }
  0x6d   : > { %976 = vmatpush2.bf16.msra.mxu1 %v1534_v16  ;;  %1004 = vmatprep.subr.bf16.mxu0 %v1545_v19 }
  0x6e   : > { %977 = vmatprep.subr.bf16.mxu1 %v1542_v18 }
  0x70   : > { %1005 = vmatpush1.bf16.msra.mxu0 %v1543_v21 }
  0x71   : > { %978 = vmatpush2.bf16.msra.mxu1 %v1540_v20  ;;  %1006 = vmatprep.subr.bf16.mxu0 %v1551_v23 }
  0x72   : > { %979 = vmatprep.subr.bf16.mxu1 %v1548_v22 }
  0x74   : > { %1007 = vmatpush1.bf16.msra.mxu0 %v1549_v25 }
  0x75   : > { %980 = vmatpush2.bf16.msra.mxu1 %v1546_v24  ;;  %1008 = vmatprep.subr.bf16.mxu0 %v1557_v26 }
  0x76   : > { %981 = vmatprep.subr.bf16.mxu1 %v1554_v7 }
  0x78   : > { %1009 = vmatpush1.bf16.msra.mxu0 %v1555_v28 }
  0x79   : > { %982 = vmatpush2.bf16.msra.mxu1 %v1552_v27  ;;  %1010 = vmatprep.subr.bf16.mxu0 %v1563_v30 }
  0x7a   : > { %983 = vmatprep.subr.bf16.mxu1 %v1560_v29 }
  0x7c   : > { %1011 = vmatpush1.bf16.msra.mxu0 %v1561_v32 }
  0x7d   : > { %984 = vmatpush2.bf16.msra.mxu1 %v1558_v31  ;;  %1012 = vmatprep.subr.bf16.mxu0 %v1569_v34 }
  0x7e   : > { %985 = vmatprep.subr.bf16.mxu1 %v1566_v33 }
  0x80   : > { %1013 = vmatpush1.bf16.msra.mxu0 %v1567_v36 }
  0x81   : > { %986 = vmatpush2.bf16.msra.mxu1 %v1564_v35  ;;  %1014 = vmatprep.subr.bf16.mxu0 %v1575_v38 }
  0x82   : > { %987 = vmatprep.subr.bf16.mxu1 %v1572_v37 }
  0x84   : > { %1015 = vmatpush1.bf16.msra.mxu0 %v1573_v41 }
  0x85   : > { %988 = vmatpush2.bf16.msra.mxu1 %v1570_v39 }
  0x87   : > { %1033 = vmatmul.mubr.bf16.vlgmr.msra.gmra.mxu0 %v1729_v40 }
  0x88   : > { %990 = vmatmul.mubr.bf16.vlgmr.msra.gmra.mxu1 %v1766_v11 }
 0x108   : > { %v948_v42 = vpop.f32.mrf.mxu1 }
 0x10a   : > { %v950_v43 = vpop.f32.mrf.mxu1 }
 0x10c   : > { %v952_v47 = vpop.f32.mrf.mxu1 }
 0x10e   : > { %v954_v56 = vpop.f32.mrf.mxu1 }
 0x127   : > { %v905_v45 = vpop.f32.mrf.mxu0 }
 0x128   : > { %v949_v46 = vadd.f32 %v948_v42, %v905_v45 }
 0x129   : > { %v907_v49 = vpop.f32.mrf.mxu0 }
 0x12a   : > { %v1043_v50 = vadd.f32 %v949_v46, %v267_v44  ;;  %v951_v51 = vadd.f32 %v950_v43, %v907_v49 }
 0x12b   : > { %v909_v53 = vpop.f32.mrf.mxu0 }
 0x12c   : > { %1051 = vst [vmem:[#allocation2 + $0x30] sm:$0xff] %v1043_v50  ;;  %v1044_v54 = vadd.f32 %v951_v51, %v268_v48  ;;  %v953_v55 = vadd.f32 %v952_v47, %v909_v53 }
 0x12d   : > { %v911_v58 = vpop.f32.mrf.mxu0 }
 0x12e   : > { %1052 = vst [vmem:[#allocation2] sm:$0xff] %v1044_v54  ;;  %v1047_v40 = vadd.f32 %v953_v55, %v271_v52  ;;  %v955_v59 = vadd.f32 %v954_v56, %v911_v58 }
 0x130   : > { %1055 = vst [vmem:[#allocation2 + $0x8] sm:$0xff] %v1047_v40  ;;  %v1048_v60 = vadd.f32 %v955_v59, %v272_v57 }
 0x132   : > { %1056 = vst [vmem:[#allocation2 + $0x20] sm:$0xff] %v1048_v60 }
 0x147   : > { %v1034_v63 = vpop.f32.mrf.mxu0 }
 0x148   : > { %v991_v61 = vpop.f32.mrf.mxu1 }
 0x149   : > { %v1035_v0 = vadd.f32 %v1034_v63, %v991_v61  ;;  %v1036_v3 = vpop.f32.mrf.mxu0 }
 0x14a   : > { %v993_v1 = vpop.f32.mrf.mxu1 }
 0x14b   : > { %v1045_v4 = vadd.f32 %v1035_v0, %v269_v62  ;;  %v1037_v5 = vadd.f32 %v1036_v3, %v993_v1  ;;  %v1038_v9 = vpop.f32.mrf.mxu0 }
 0x14c   : > { %v995_v6 = vpop.f32.mrf.mxu1 }
 0x14d   : > { %1053 = vst [vmem:[#allocation2 + $0x18] sm:$0xff] %v1045_v4  ;;  %v1046_v10 = vadd.f32 %v1037_v5, %v270_v2  ;;  %v1039_v11 = vadd.f32 %v1038_v9, %v995_v6  ;;  %v1040_v14 = vpop.f32.mrf.mxu0 }
 0x14e   : > { %v997_v12 = vpop.f32.mrf.mxu1 }
 0x14f   : > { %1054 = vst [vmem:[#allocation2 + $0x10] sm:$0xff] %v1046_v10  ;;  %v1049_v15 = vadd.f32 %v1039_v11, %v273_v8  ;;  %v1041_v16 = vadd.f32 %v1040_v14, %v997_v12  ;;  %1062 = sbr.rel (%p1368_p11) target bundleno = 358 (0x166), region = 66 }
 0x151   : > { %1057 = vst [vmem:[#allocation2 + $0x28] sm:$0xff] %v1049_v15  ;;  %v1050_v17 = vadd.f32 %v1041_v16, %v274_v13 }
 0x153   : > { %1058 = vst [vmem:[#allocation2 + $0x38] sm:$0xff] %v1050_v17 }
 0x154   : > { %v1073_v18 = vlaneseq  ;;  %v1071_v20 = vld [vmem:[%s1838_s2] ss:$2 sm:$0xf]  ;;  %v1369_v21 = vld [vmem:[%s1838_s2 + $0x1] ss:$2 sm:$0xf] }
 0x155   : > { %v1063_v22 = vld [vmem:[#allocation2 + $0x30] sm:$0xff]  ;;  %v1064_v23 = vld [vmem:[#allocation2] sm:$0xff]  ;;  %v1065_v27 = vld [vmem:[#allocation2 + $0x18] sm:$0xff] }
 0x156   : > { %v1074_v19 = vshrl.u32 %v1073_v18, 7  ;;  %v1067_v28 = vld [vmem:[#allocation2 + $0x8] sm:$0xff]  ;;  %v1068_v29 = vld [vmem:[#allocation2 + $0x20] sm:$0xff]  ;;  %v1066_v34 = vld [vmem:[#allocation2 + $0x10] sm:$0xff] }
 0x158   : > { %v1075_v24 = vsub.s32 0, %v1074_v19  ;;  %v1079_v25 = vsub.s32 1, %v1074_v19  ;;  %v1083_v7 = vsub.s32 2, %v1074_v19  ;;  %v1087_v26 = vsub.s32 3, %v1074_v19  ;;  %v1069_v35 = vld [vmem:[#allocation2 + $0x28] sm:$0xff] }
 0x15a   : > { %v1076_v30 = vrot.slane %v1071_v20, %v1075_v24  ;;  %v1080_v31 = vrot.slane %v1071_v20, %v1079_v25  ;;  %v1107_v32 = vrot.slane %v1369_v21, %v1075_v24  ;;  %v1111_v33 = vrot.slane %v1369_v21, %v1079_v25  ;;  %v1070_v36 = vld [vmem:[#allocation2 + $0x38] sm:$0xff] }
 0x15b   : > { %v1084_v37 = vrot.slane %v1071_v20, %v1083_v7  ;;  %v1088_v38 = vrot.slane %v1071_v20, %v1087_v26  ;;  %v1115_v39 = vrot.slane %v1369_v21, %v1083_v7  ;;  %v1119_v41 = vrot.slane %v1369_v21, %v1087_v26 }
 0x15c   : > { %v1093_v42 = vmul.f32 %v1076_v30, %v1063_v22  ;;  %v1094_v43 = vmul.f32 %v1080_v31, %v1064_v23  ;;  %v1097_v44 = vmul.f32 %v1076_v30, %v1067_v28  ;;  %v1098_v45 = vmul.f32 %v1080_v31, %v1068_v29 }
 0x15d   : > { %v1095_v46 = vmul.f32 %v1084_v37, %v1065_v27  ;;  %v1096_v47 = vmul.f32 %v1088_v38, %v1066_v34  ;;  %v1099_v48 = vmul.f32 %v1084_v37, %v1069_v35  ;;  %v1100_v49 = vmul.f32 %v1088_v38, %v1070_v36 }
 0x15e   : > { %v1124_v50 = vadd.f32 %v1107_v32, %v1093_v42  ;;  %v1125_v51 = vadd.f32 %v1111_v33, %v1094_v43  ;;  %v1128_v52 = vadd.f32 %v1107_v32, %v1097_v44  ;;  %v1129_v53 = vadd.f32 %v1111_v33, %v1098_v45 }
 0x15f   : > { %v1126_v54 = vadd.f32 %v1115_v39, %v1095_v46  ;;  %v1127_v55 = vadd.f32 %v1119_v41, %v1096_v47  ;;  %v1130_v56 = vadd.f32 %v1115_v39, %v1099_v48  ;;  %v1131_v57 = vadd.f32 %v1119_v41, %v1100_v49 }
 0x160   : > { %v1132_v58 = vmax.f32 %v1124_v50, 0.0  ;;  %v1133_v40 = vmax.f32 %v1125_v51, 0.0  ;;  %v1136_v59 = vmax.f32 %v1128_v52, 0.0  ;;  %v1137_v60 = vmax.f32 %v1129_v53, 0.0 }
 0x161   : > { %v1134_v61 = vmax.f32 %v1126_v54, 0.0  ;;  %v1135_v62 = vmax.f32 %v1127_v55, 0.0  ;;  %v1138_v63 = vmax.f32 %v1130_v56, 0.0  ;;  %v1139_v0 = vmax.f32 %v1131_v57, 0.0 }
 0x162   : > { %v1380_v1 = vpack.c.bf16 %v1133_v40, %v1132_v58  ;;  %v1382_v2 = vpack.c.bf16 %v1137_v60, %v1136_v59 }
 0x163   : > { %v1381_v3 = vpack.c.bf16 %v1135_v62, %v1134_v61  ;;  %v1383_v4 = vpack.c.bf16 %v1139_v0, %v1138_v63 }
 0x164   : > { %1164 = vst [vmem:[%s1839_s3] sm:$0xff] %v1380_v1  ;;  %1166 = vst [vmem:[%s1839_s3 + $0x10] sm:$0xff] %v1382_v2 }
 0x165   : > { %1165 = vst [vmem:[%s1839_s3 + $0x8] sm:$0xff] %v1381_v3  ;;  %1167 = vst [vmem:[%s1839_s3 + $0x18] sm:$0xff] %v1383_v4 }
 0x166 PF: > { %s13_s16 = sadd.s32 1, %s1614_s16   ;;  %s1840_s12 = smov %s1602_s13 }
 0x167   : > { %p10_p12 = scmp.ge.s32.totalorder %s13_s16, 8   ;;  %s1841_s13 = smov %s1673_s20 }
 0x168   : > { %s1842_s14 = smov %s1610_s15  ;;  %s1843_s15 = smov %s1845_s17 }
 0x169   :  { %12 = sbr.rel (!%p10_p12) target bundleno = 3 (0x3), region = 111 }

// kernel: pretrained_model_forward.36
= control target key start
LH: loop header
LB: loop body
LE: loop exit
PB: predicated region body
PF: predicated region fallthrough
CT: control target
= control target key end

     0   :  { %s1046_s1 = inlined_call_operand.vmem [shape: bf16[256,512], index: 1, kind: input, shape index: {}]   ;;  %s1047_s0 = inlined_call_operand.vmem [shape: bf16[16,256], index: 0, kind: input, shape index: {}]   ;;  %s1048_s2 = inlined_call_operand.vmem [shape: f32[2,512], index: 2, kind: input, shape index: {}]   ;;  %s1049_s3 = inlined_call_operand.vmem [shape: bf16[16,512], index: 3, kind: output, shape index: {}]  }
   0x1   :  { %v711_v0 = vld [vmem:[%s1046_s1 + $0xe4] ss:$16 sps:$4 sm:$0xff]   ;;  %v713_v1 = vld [vmem:[%s1046_s1 + $0xec] ss:$16 sps:$4 sm:$0xff]   ;;  %v715_v2 = vld [vmem:[%s1046_s1 + $0xe0] ss:$16 sps:$4 sm:$0xff]  }
   0x2   :  { %430 = vmatprep.subr.bf16.mxu0 %v711_v0  ;;  %v716_v3 = vld [vmem:[%s1046_s1 + $0xe8] ss:$16 sps:$4 sm:$0xff]   ;;  %473 = vmatprep.subr.bf16.mxu1 %v713_v1  ;;  %v717_v4 = vld [vmem:[%s1046_s1 + $0xc4] ss:$16 sps:$4 sm:$0xff]   ;;  %v719_v5 = vld [vmem:[%s1046_s1 + $0xcc] ss:$16 sps:$4 sm:$0xff]  }
   0x3   :  { %431 = vmatpush1.bf16.msra.mxu0 %v715_v2  ;;  %474 = vmatpush1.bf16.msra.mxu1 %v716_v3  ;;  %v721_v6 = vld [vmem:[%s1046_s1 + $0xc0] ss:$16 sps:$4 sm:$0xff]   ;;  %v722_v7 = vld [vmem:[%s1046_s1 + $0xc8] ss:$16 sps:$4 sm:$0xff]   ;;  %v723_v8 = vld [vmem:[%s1046_s1 + $0xa4] ss:$16 sps:$4 sm:$0xff]   ;;  %v545_v2 = vlaneseq }
   0x4   :  { %432 = vmatprep.subr.bf16.mxu0 %v717_v4  ;;  %475 = vmatprep.subr.bf16.mxu1 %v719_v5  ;;  %v725_v9 = vld [vmem:[%s1046_s1 + $0xac] ss:$16 sps:$4 sm:$0xff]   ;;  %v727_v10 = vld [vmem:[%s1046_s1 + $0xa0] ss:$16 sps:$4 sm:$0xff]   ;;  %v728_v11 = vld [vmem:[%s1046_s1 + $0xa8] ss:$16 sps:$4 sm:$0xff]  }
   0x5   :  { %v729_v12 = vld [vmem:[%s1046_s1 + $0x84] ss:$16 sps:$4 sm:$0xff]   ;;  %v731_v13 = vld [vmem:[%s1046_s1 + $0x8c] ss:$16 sps:$4 sm:$0xff]   ;;  %v733_v14 = vld [vmem:[%s1046_s1 + $0x80] ss:$16 sps:$4 sm:$0xff]  }
   0x6   :  { %v734_v15 = vld [vmem:[%s1046_s1 + $0x88] ss:$16 sps:$4 sm:$0xff]   ;;  %v735_v16 = vld [vmem:[%s1046_s1 + $0x64] ss:$16 sps:$4 sm:$0xff]   ;;  %v737_v17 = vld [vmem:[%s1046_s1 + $0x6c] ss:$16 sps:$4 sm:$0xff]  }
   0x7   :  { %433 = vmatpush1.bf16.msra.mxu0 %v721_v6  ;;  %476 = vmatpush1.bf16.msra.mxu1 %v722_v7  ;;  %v739_v18 = vld [vmem:[%s1046_s1 + $0x60] ss:$16 sps:$4 sm:$0xff]   ;;  %v740_v19 = vld [vmem:[%s1046_s1 + $0x68] ss:$16 sps:$4 sm:$0xff]   ;;  %v741_v20 = vld [vmem:[%s1046_s1 + $0x44] ss:$16 sps:$4 sm:$0xff]  }
   0x8   :  { %434 = vmatprep.subr.bf16.mxu0 %v723_v8  ;;  %477 = vmatprep.subr.bf16.mxu1 %v725_v9  ;;  %v743_v21 = vld [vmem:[%s1046_s1 + $0x4c] ss:$16 sps:$4 sm:$0xff]   ;;  %v745_v22 = vld [vmem:[%s1046_s1 + $0x40] ss:$16 sps:$4 sm:$0xff]   ;;  %v746_v23 = vld [vmem:[%s1046_s1 + $0x48] ss:$16 sps:$4 sm:$0xff]  }
   0x9   :  { %v747_v24 = vld [vmem:[%s1046_s1 + $0x24] ss:$16 sps:$4 sm:$0xff]   ;;  %v749_v25 = vld [vmem:[%s1046_s1 + $0x2c] ss:$16 sps:$4 sm:$0xff]   ;;  %v751_v26 = vld [vmem:[%s1046_s1 + $0x20] ss:$16 sps:$4 sm:$0xff]  }
   0xa   :  { %v752_v27 = vld [vmem:[%s1046_s1 + $0x28] ss:$16 sps:$4 sm:$0xff]   ;;  %v753_v28 = vld [vmem:[%s1046_s1 + $0x4] ss:$16 sps:$4 sm:$0xff]   ;;  %v755_v29 = vld [vmem:[%s1046_s1 + $0xc] ss:$16 sps:$4 sm:$0xff]  }
   0xb   :  { %435 = vmatpush1.bf16.msra.mxu0 %v727_v10  ;;  %478 = vmatpush1.bf16.msra.mxu1 %v728_v11  ;;  %v757_v30 = vld [vmem:[%s1046_s1] ss:$16 sps:$4 sm:$0xff]   ;;  %v758_v31 = vld [vmem:[%s1046_s1 + $0x8] ss:$16 sps:$4 sm:$0xff]   ;;  %v759_v32 = vld [vmem:[%s1046_s1 + $0x1e4] ss:$16 sps:$4 sm:$0xff]  }
   0xc   :  { %436 = vmatprep.subr.bf16.mxu0 %v729_v12  ;;  %479 = vmatprep.subr.bf16.mxu1 %v731_v13  ;;  %v761_v33 = vld [vmem:[%s1046_s1 + $0x1ec] ss:$16 sps:$4 sm:$0xff]   ;;  %v763_v34 = vld [vmem:[%s1046_s1 + $0x1e0] ss:$16 sps:$4 sm:$0xff]   ;;  %v764_v35 = vld [vmem:[%s1046_s1 + $0x1e8] ss:$16 sps:$4 sm:$0xff]  }
   0xd   :  { %v765_v36 = vld [vmem:[%s1046_s1 + $0x1c4] ss:$16 sps:$4 sm:$0xff]   ;;  %v767_v37 = vld [vmem:[%s1046_s1 + $0x1cc] ss:$16 sps:$4 sm:$0xff]   ;;  %v769_v38 = vld [vmem:[%s1046_s1 + $0x1c0] ss:$16 sps:$4 sm:$0xff]  }
   0xe   :  { %v770_v39 = vld [vmem:[%s1046_s1 + $0x1c8] ss:$16 sps:$4 sm:$0xff]   ;;  %v771_v40 = vld [vmem:[%s1046_s1 + $0x1a4] ss:$16 sps:$4 sm:$0xff]   ;;  %v773_v41 = vld [vmem:[%s1046_s1 + $0x1ac] ss:$16 sps:$4 sm:$0xff]  }
   0xf   :  { %437 = vmatpush1.bf16.msra.mxu0 %v733_v14  ;;  %480 = vmatpush1.bf16.msra.mxu1 %v734_v15  ;;  %v775_v42 = vld [vmem:[%s1046_s1 + $0x1a0] ss:$16 sps:$4 sm:$0xff]   ;;  %v776_v43 = vld [vmem:[%s1046_s1 + $0x1a8] ss:$16 sps:$4 sm:$0xff]   ;;  %v777_v44 = vld [vmem:[%s1046_s1 + $0x184] ss:$16 sps:$4 sm:$0xff]  }
  0x10   :  { %438 = vmatprep.subr.bf16.mxu0 %v735_v16  ;;  %481 = vmatprep.subr.bf16.mxu1 %v737_v17  ;;  %v779_v45 = vld [vmem:[%s1046_s1 + $0x18c] ss:$16 sps:$4 sm:$0xff]   ;;  %v781_v47 = vld [vmem:[%s1046_s1 + $0x180] ss:$16 sps:$4 sm:$0xff]   ;;  %v782_v48 = vld [vmem:[%s1046_s1 + $0x188] ss:$16 sps:$4 sm:$0xff]  }
  0x11   :  { %v809_v46 = vld [vmem:[%s1047_s0 + $0x4] ss:$8 sps:$4 sm:$0xff]   ;;  %v787_v51 = vld [vmem:[%s1046_s1 + $0x160] ss:$16 sps:$4 sm:$0xff]   ;;  %v788_v52 = vld [vmem:[%s1046_s1 + $0x168] ss:$16 sps:$4 sm:$0xff]  }
  0x12   :  { %v783_v49 = vld [vmem:[%s1046_s1 + $0x164] ss:$16 sps:$4 sm:$0xff]   ;;  %v785_v50 = vld [vmem:[%s1046_s1 + $0x16c] ss:$16 sps:$4 sm:$0xff]   ;;  %462 = vmatprep.mubr.bf16.mxu0 %v809_v46  ;;  %505 = vmatprep.mubr.bf16.mxu1 %v809_v46  ;;  %v793_v55 = vld [vmem:[%s1046_s1 + $0x140] ss:$16 sps:$4 sm:$0xff]  }
  0x13   :  { %439 = vmatpush1.bf16.msra.mxu0 %v739_v18  ;;  %482 = vmatpush1.bf16.msra.mxu1 %v740_v19  ;;  %v789_v53 = vld [vmem:[%s1046_s1 + $0x144] ss:$16 sps:$4 sm:$0xff]   ;;  %v791_v54 = vld [vmem:[%s1046_s1 + $0x14c] ss:$16 sps:$4 sm:$0xff]   ;;  %v794_v56 = vld [vmem:[%s1046_s1 + $0x148] ss:$16 sps:$4 sm:$0xff]  }
  0x14   :  { %440 = vmatprep.subr.bf16.mxu0 %v741_v20  ;;  %483 = vmatprep.subr.bf16.mxu1 %v743_v21  ;;  %v795_v57 = vld [vmem:[%s1046_s1 + $0x124] ss:$16 sps:$4 sm:$0xff]   ;;  %v797_v58 = vld [vmem:[%s1046_s1 + $0x12c] ss:$16 sps:$4 sm:$0xff]   ;;  %v799_v59 = vld [vmem:[%s1046_s1 + $0x120] ss:$16 sps:$4 sm:$0xff]  }
  0x15   :  { %v800_v60 = vld [vmem:[%s1046_s1 + $0x128] ss:$16 sps:$4 sm:$0xff]   ;;  %v801_v61 = vld [vmem:[%s1046_s1 + $0x104] ss:$16 sps:$4 sm:$0xff]   ;;  %v803_v62 = vld [vmem:[%s1046_s1 + $0x10c] ss:$16 sps:$4 sm:$0xff]  }
  0x16   :  { %v805_v63 = vld [vmem:[%s1046_s1 + $0x100] ss:$16 sps:$4 sm:$0xff]   ;;  %v806_v0 = vld [vmem:[%s1046_s1 + $0x108] ss:$16 sps:$4 sm:$0xff]   ;;  %v546_v3 = vshrl.u32 %v545_v2, 7 }
  0x17   :  { %441 = vmatpush1.bf16.msra.mxu0 %v745_v22  ;;  %484 = vmatpush1.bf16.msra.mxu1 %v746_v23  ;;  %v807_v1 = vld [vmem:[%s1047_s0] ss:$8 sps:$4 sm:$0xff]  }
  0x18   :  { %442 = vmatprep.subr.bf16.mxu0 %v747_v24  ;;  %485 = vmatprep.subr.bf16.mxu1 %v749_v25  ;;  %v547_v4 = vsub.s32 0, %v546_v3  ;;  %v555_v5 = vsub.s32 2, %v546_v3  ;;  %v543_v6 = vld [vmem:[%s1048_s2] ss:$2 sm:$0xf]  ;;  %v551_v7 = vsub.s32 1, %v546_v3 }
  0x19   :  { %v559_v8 = vsub.s32 3, %v546_v3  ;;  %v702_v10 = vld [vmem:[%s1048_s2 + $0x1] ss:$2 sm:$0xf] }
  0x1a   :  { %v548_v9 = vrot.slane %v543_v6, %v547_v4  ;;  %v556_v11 = vrot.slane %v543_v6, %v555_v5  ;;  %v552_v12 = vrot.slane %v543_v6, %v551_v7  ;;  %v579_v15 = vrot.slane %v702_v10, %v547_v4 }
  0x1b   :  { %443 = vmatpush1.bf16.msra.mxu0 %v751_v26  ;;  %486 = vmatpush1.bf16.msra.mxu1 %v752_v27  ;;  %v560_v13 = vrot.slane %v543_v6, %v559_v8  ;;  %v587_v17 = vrot.slane %v702_v10, %v555_v5  ;;  %v583_v20 = vrot.slane %v702_v10, %v551_v7 }
  0x1c   :  { %444 = vmatprep.subr.bf16.mxu0 %v753_v28  ;;  %487 = vmatprep.subr.bf16.mxu1 %v755_v29  ;;  %v591_v21 = vrot.slane %v702_v10, %v559_v8 }
  0x1f   :  { %445 = vmatpush1.bf16.msra.mxu0 %v757_v30  ;;  %488 = vmatpush1.bf16.msra.mxu1 %v758_v31 }
  0x20   :  { %446 = vmatprep.subr.bf16.mxu0 %v759_v32  ;;  %489 = vmatprep.subr.bf16.mxu1 %v761_v33 }
  0x23   :  { %447 = vmatpush2.bf16.msra.mxu0 %v763_v34  ;;  %490 = vmatpush2.bf16.msra.mxu1 %v764_v35 }
  0x24   :  { %448 = vmatprep.subr.bf16.mxu0 %v765_v36  ;;  %491 = vmatprep.subr.bf16.mxu1 %v767_v37 }
  0x27   :  { %449 = vmatpush2.bf16.msra.mxu0 %v769_v38  ;;  %492 = vmatpush2.bf16.msra.mxu1 %v770_v39 }
  0x28   :  { %450 = vmatprep.subr.bf16.mxu0 %v771_v40  ;;  %493 = vmatprep.subr.bf16.mxu1 %v773_v41 }
  0x2b   :  { %451 = vmatpush2.bf16.msra.mxu0 %v775_v42  ;;  %494 = vmatpush2.bf16.msra.mxu1 %v776_v43 }
  0x2c   :  { %452 = vmatprep.subr.bf16.mxu0 %v777_v44  ;;  %495 = vmatprep.subr.bf16.mxu1 %v779_v45 }
  0x2f   :  { %453 = vmatpush2.bf16.msra.mxu0 %v781_v47  ;;  %496 = vmatpush2.bf16.msra.mxu1 %v782_v48 }
  0x30   :  { %454 = vmatprep.subr.bf16.mxu0 %v783_v49  ;;  %497 = vmatprep.subr.bf16.mxu1 %v785_v50 }
  0x33   :  { %455 = vmatpush2.bf16.msra.mxu0 %v787_v51  ;;  %498 = vmatpush2.bf16.msra.mxu1 %v788_v52 }
  0x34   :  { %456 = vmatprep.subr.bf16.mxu0 %v789_v53  ;;  %499 = vmatprep.subr.bf16.mxu1 %v791_v54 }
  0x37   :  { %457 = vmatpush2.bf16.msra.mxu0 %v793_v55  ;;  %500 = vmatpush2.bf16.msra.mxu1 %v794_v56 }
  0x38   :  { %458 = vmatprep.subr.bf16.mxu0 %v795_v57  ;;  %501 = vmatprep.subr.bf16.mxu1 %v797_v58 }
  0x3b   :  { %459 = vmatpush2.bf16.msra.mxu0 %v799_v59  ;;  %502 = vmatpush2.bf16.msra.mxu1 %v800_v60 }
  0x3c   :  { %460 = vmatprep.subr.bf16.mxu0 %v801_v61  ;;  %503 = vmatprep.subr.bf16.mxu1 %v803_v62 }
  0x3f   :  { %461 = vmatpush2.bf16.msra.mxu0 %v805_v63  ;;  %504 = vmatpush2.bf16.msra.mxu1 %v806_v0 }
  0x42   :  { %463 = vmatmul.mubr.bf16.vlgmr.msra.gmra.mxu0 %v807_v1  ;;  %506 = vmatmul.mubr.bf16.vlgmr.msra.gmra.mxu1 %v807_v1 }
 0x102   :  { %v464_v14 = vpop.f32.mrf.mxu0  ;;  %v507_v16 = vpop.f32.mrf.mxu1 }
 0x103   :  { %v565_v18 = vmul.f32 %v548_v9, %v464_v14  ;;  %v567_v19 = vmul.f32 %v556_v11, %v507_v16 }
 0x104   :  { %v466_v22 = vpop.f32.mrf.mxu0  ;;  %v509_v23 = vpop.f32.mrf.mxu1 }
 0x105   :  { %v566_v24 = vmul.f32 %v552_v12, %v466_v22  ;;  %v568_v25 = vmul.f32 %v560_v13, %v509_v23  ;;  %v596_v28 = vadd.f32 %v579_v15, %v565_v18  ;;  %v598_v29 = vadd.f32 %v587_v17, %v567_v19 }
 0x106   :  { %v468_v26 = vpop.f32.mrf.mxu0  ;;  %v511_v27 = vpop.f32.mrf.mxu1 }
 0x107   :  { %v597_v30 = vadd.f32 %v583_v20, %v566_v24  ;;  %v599_v31 = vadd.f32 %v591_v21, %v568_v25  ;;  %v569_v32 = vmul.f32 %v548_v9, %v468_v26  ;;  %v571_v33 = vmul.f32 %v556_v11, %v511_v27 }
 0x108   :  { %v470_v34 = vpop.f32.mrf.mxu0  ;;  %v513_v35 = vpop.f32.mrf.mxu1 }
 0x109   :  { %v707_v36 = vpack.c.bf16 %v597_v30, %v596_v28  ;;  %v708_v37 = vpack.c.bf16 %v599_v31, %v598_v29  ;;  %v570_v38 = vmul.f32 %v552_v12, %v470_v34  ;;  %v572_v39 = vmul.f32 %v560_v13, %v513_v35 }
 0x10a   :  { %v600_v40 = vadd.f32 %v579_v15, %v569_v32  ;;  %v602_v41 = vadd.f32 %v587_v17, %v571_v33 }
 0x10b   :  { %628 = vst [vmem:[%s1049_s3] sm:$0xff] %v707_v36  ;;  %629 = vst [vmem:[%s1049_s3 + $0x8] sm:$0xff] %v708_v37  ;;  %v601_v42 = vadd.f32 %v583_v20, %v570_v38  ;;  %v603_v43 = vadd.f32 %v591_v21, %v572_v39 }
 0x10d   :  { %v709_v44 = vpack.c.bf16 %v601_v42, %v600_v40  ;;  %v710_v45 = vpack.c.bf16 %v603_v43, %v602_v41 }
 0x10f   :  { %630 = vst [vmem:[%s1049_s3 + $0x10] sm:$0xff] %v709_v44  ;;  %631 = vst [vmem:[%s1049_s3 + $0x18] sm:$0xff] %v710_v45 }

// kernel: pretrained_model_forward.39
= control target key start
LH: loop header
LB: loop body
LE: loop exit
PB: predicated region body
PF: predicated region fallthrough
CT: control target
= control target key end

     0   :  { %s1898_s12 = smov 0   ;;  %s1900_s13 = smov 0   ;;  %s2127_s0 = inlined_call_operand.vmem [shape: bf16[16,4608], index: 0, kind: input, shape index: {}]   ;;  %s2128_s1 = inlined_call_operand.vmem [shape: bf16[4608,512], index: 1, kind: input, shape index: {}]   ;;  %s2129_s2 = inlined_call_operand.vmem [shape: f32[2,512], index: 2, kind: input, shape index: {}]   ;;  %s2130_s3 = inlined_call_operand.vmem [shape: bf16[16,512], index: 3, kind: output, shape index: {}]  }
   0x1   :  { %s1902_s14 = smov 0   ;;  %s1904_s15 = smov 0  }
   0x2   :  { %s1906_s16 = smov 0  }
   0x3 LB: > { %s22_s17 = sadd.s32 1, %s1871_s15  ;;  %p41_p1 = scmp.ne.s32.totalorder %s1863_s13, %s1859_s12  ;;  %s1875_s16 = sphi %s1906_s16, %s13_s16   ;;  %s1871_s15 = sphi %s1904_s15, %s2134_s15   ;;  %s1867_s14 = sphi %s1902_s14, %s2133_s14   ;;  %s1863_s13 = sphi %s1900_s13, %s2132_s13   ;;  %s1859_s12 = sphi %s1898_s12, %s2131_s12  }
   0x4   : > { %p23_p0 = scmp.ge.s32.totalorder %s22_s17, 9  ;;  %p42_p2 = scmp.eq.s32.totalorder %s1875_s16, 0 }
   0x5   : > { %s34_s19 = sadd.s32 1, %s1863_s13  ;;  %p1440_p5 = scmp.ge.s32.totalorder %s1875_s16, 9 }
   0x6   : > { %s2136_s17 = smov (%p23_p0, %s22_s17), 0  ;;  %p43_p3 = por %p42_p2, %p41_p1 }
   0x7   : > { %s30_s18 = ssub.s32 %s1871_s15, %s2136_s17  ;;  %143 = sbr.rel (%p1440_p5) target bundleno = 18 (0x12), region = 20 }
   0x8   : > { %p32_p4 = scmp.eq.s32.totalorder %s30_s18, 0 }
   0xa   : > { %s1933_s20 = scalar_select %p32_p4, %s1863_s13, %s34_s19  }
   0xc   : > { %146 = sbr.rel (!%p43_p3) target bundleno = 18 (0x12), region = 24  ;;  %s148_s21 = sand.u32 (%p43_p3), 1, %s1863_s13  }
   0xd   : > { %s1592_s22 = sshll.u32 (%p43_p3), %s1871_s15, 4  ;;  %s1441_s23 = sshll.u32 (%p43_p3), %s148_s21, 5 }
   0xe   : > { %s156_s26 = scalar_lea.vmem (%p43_p3), %s2127_s0, %s1592_s22  ;;  %s150_s27 = scalar_lea.vmem (%p43_p3), [#allocation3], %s1441_s23 }
   0xf   : > { %v169_v0 = vld [vmem:[%s156_s26] sm:$0xff] (%p43_p3)  ;;  %v171_v1 = vld [vmem:[%s156_s26 + $0x8] sm:$0xff] (%p43_p3)  ;;  %v173_v2 = vld [vmem:[%s156_s26 + $0x90] sm:$0xff] (%p43_p3) }
  0x10   : > { %170 = vst [vmem:[%s150_s27] sm:$0xff] (%p43_p3), %v169_v0  ;;  %172 = vst [vmem:[%s150_s27 + $0x8] sm:$0xff] (%p43_p3), %v171_v1  ;;  %v175_v3 = vld [vmem:[%s156_s26 + $0x98] sm:$0xff] (%p43_p3) }
  0x11   : > { %174 = vst [vmem:[%s150_s27 + $0x10] sm:$0xff] %v173_v2  ;;  %176 = vst [vmem:[%s150_s27 + $0x18] sm:$0xff] %v175_v3 }
  0x12 PF: > { %p1444_p6 = scmp.ge.s32.totalorder %s1875_s16, 1  ;;  %p191_p7 = scmp.lt.s32.totalorder %s1875_s16, 10 }
  0x14   : > { %p192_p8 = pnand %p1444_p6, %p191_p7 }
  0x15   : > { %s198_s28 = sand.u32 (!%p192_p8), 1, %s1859_s12   ;;  %s1446_s29 = sshll.u32 (!%p192_p8), %s1867_s14, 6 }
  0x16   : > { %195 = sbr.rel (%p192_p8) target bundleno = 389 (0x185), region = 51  ;;  %s1445_s30 = sshll.u32 (!%p192_p8), %s198_s28, 5 }
  0x17   : > { %p231_p9 = scmp.lt.s32.totalorder (!%p192_p8), %s1446_s29, 575  ;;  %s1950_s8 = scalar_lea.vmem (!%p192_p8), [#allocation3], %s1445_s30 }
  0x18   : > { %p1449_p10 = scmp.ne.s32.totalorder (!%p192_p8), %s1867_s14, 0 }
  0x1b   : > { %s2138_s29 = smov (!%p231_p9, %s1446_s29), 575  ;;  %247 = sbr.rel (%p1449_p10) target bundleno = 37 (0x25), region = 59 }
  0x1c   : > { %s1593_s4 = sshll.u32 %s2138_s29, 4 }
  0x1d   : > { %s1948_s7 = scalar_lea.vmem %s2128_s1, %s1593_s4 }
  0x20   : > { %v1877_v4 = vmov 0.0  }
  0x21   : > { %248 = vst [vmem:[#allocation2 + $0x30] sm:$0xff] %v1877_v4  ;;  %249 = vst [vmem:[#allocation2] sm:$0xff] %v1877_v4 }
  0x22   : > { %250 = vst [vmem:[#allocation2 + $0x18] sm:$0xff] %v1877_v4  ;;  %251 = vst [vmem:[#allocation2 + $0x10] sm:$0xff] %v1877_v4 }
  0x23   : > { %252 = vst [vmem:[#allocation2 + $0x8] sm:$0xff] %v1877_v4  ;;  %253 = vst [vmem:[#allocation2 + $0x20] sm:$0xff] %v1877_v4 }
  0x24   : > { %254 = vst [vmem:[#allocation2 + $0x28] sm:$0xff] %v1877_v4  ;;  %255 = vst [vmem:[#allocation2 + $0x38] sm:$0xff] %v1877_v4 }
  0x25 PF: > { %v1639_v5 = vld [vmem:[%s1948_s7 + $0xe4] ss:$16 sps:$4 sm:$0xff]   ;;  %v1643_v7 = vld [vmem:[%s1948_s7 + $0xe0] ss:$16 sps:$4 sm:$0xff]   ;;  %v1740_v56 = vld [vmem:[%s1950_s8 + $0xc] ss:$16 sps:$4 sm:$0xff]  }
  0x26   : > { %v1641_v6 = vld [vmem:[%s1948_s7 + $0x2e4] ss:$16 sps:$4 sm:$0xff]   ;;  %1056 = vmatprep.subr.bf16.mxu0 %v1639_v5  ;;  %v1644_v8 = vld [vmem:[%s1948_s7 + $0x2e0] ss:$16 sps:$4 sm:$0xff]   ;;  %1131 = vmatprep.mubr.bf16.mxu1 %v1740_v56  ;;  %p1582_p11 = scmp.ne.s32.totalorder %s1867_s14, 8 }
  0x27   : > { %1099 = vmatprep.subr.bf16.mxu1 %v1641_v6  ;;  %v1645_v9 = vld [vmem:[%s1948_s7 + $0xc4] ss:$16 sps:$4 sm:$0xff]   ;;  %1057 = vmatpush1.bf16.msra.mxu0 %v1643_v7  ;;  %v1649_v11 = vld [vmem:[%s1948_s7 + $0xc0] ss:$16 sps:$4 sm:$0xff]   ;;  %v1743_v7 = vld [vmem:[%s1948_s7 + $0xec] ss:$16 sps:$4 sm:$0xff]  }
  0x28   : > { %1100 = vmatpush1.bf16.msra.mxu1 %v1644_v8  ;;  %v1647_v10 = vld [vmem:[%s1948_s7 + $0x2c4] ss:$16 sps:$4 sm:$0xff]   ;;  %1058 = vmatprep.subr.bf16.mxu0 %v1645_v9  ;;  %v1650_v12 = vld [vmem:[%s1948_s7 + $0x2c0] ss:$16 sps:$4 sm:$0xff]   ;;  %v1746_v8 = vld [vmem:[%s1948_s7 + $0x2ec] ss:$16 sps:$4 sm:$0xff]  }
  0x29   : > { %1101 = vmatprep.subr.bf16.mxu1 %v1647_v10  ;;  %v1651_v13 = vld [vmem:[%s1948_s7 + $0xa4] ss:$16 sps:$4 sm:$0xff]   ;;  %v1655_v15 = vld [vmem:[%s1948_s7 + $0xa0] ss:$16 sps:$4 sm:$0xff]   ;;  %v2025_v10 = vld [vmem:[%s1950_s8 + $0x8] ss:$16 sps:$4 sm:$0xff]  }
  0x2a   : > { %v1653_v14 = vld [vmem:[%s1948_s7 + $0x2a4] ss:$16 sps:$4 sm:$0xff]   ;;  %v1656_v16 = vld [vmem:[%s1948_s7 + $0x2a0] ss:$16 sps:$4 sm:$0xff]  }
  0x2b   : > { %1059 = vmatpush1.bf16.msra.mxu0 %v1649_v11  ;;  %v1657_v17 = vld [vmem:[%s1948_s7 + $0x84] ss:$16 sps:$4 sm:$0xff]   ;;  %v1661_v19 = vld [vmem:[%s1948_s7 + $0x80] ss:$16 sps:$4 sm:$0xff]   ;;  %v1741_v11 = vld [vmem:[%s1948_s7 + $0xe8] ss:$16 sps:$4 sm:$0xff]  }
  0x2c   : > { %1102 = vmatpush1.bf16.msra.mxu1 %v1650_v12  ;;  %1060 = vmatprep.subr.bf16.mxu0 %v1651_v13  ;;  %v1659_v18 = vld [vmem:[%s1948_s7 + $0x284] ss:$16 sps:$4 sm:$0xff]   ;;  %v1662_v20 = vld [vmem:[%s1948_s7 + $0x280] ss:$16 sps:$4 sm:$0xff]   ;;  %v1744_v12 = vld [vmem:[%s1948_s7 + $0x2e8] ss:$16 sps:$4 sm:$0xff]  }
  0x2d   : > { %1103 = vmatprep.subr.bf16.mxu1 %v1653_v14  ;;  %v1663_v21 = vld [vmem:[%s1948_s7 + $0x64] ss:$16 sps:$4 sm:$0xff]   ;;  %v1667_v23 = vld [vmem:[%s1948_s7 + $0x60] ss:$16 sps:$4 sm:$0xff]   ;;  %v1749_v13 = vld [vmem:[%s1948_s7 + $0xcc] ss:$16 sps:$4 sm:$0xff]  }
  0x2e   : > { %v1665_v22 = vld [vmem:[%s1948_s7 + $0x264] ss:$16 sps:$4 sm:$0xff]   ;;  %v1668_v24 = vld [vmem:[%s1948_s7 + $0x260] ss:$16 sps:$4 sm:$0xff]   ;;  %v1752_v14 = vld [vmem:[%s1948_s7 + $0x2cc] ss:$16 sps:$4 sm:$0xff]  }
  0x2f   : > { %1061 = vmatpush1.bf16.msra.mxu0 %v1655_v15  ;;  %v1669_v25 = vld [vmem:[%s1948_s7 + $0x44] ss:$16 sps:$4 sm:$0xff]   ;;  %v1673_v27 = vld [vmem:[%s1948_s7 + $0x40] ss:$16 sps:$4 sm:$0xff]   ;;  %v1747_v15 = vld [vmem:[%s1948_s7 + $0xc8] ss:$16 sps:$4 sm:$0xff]  }
  0x30   : > { %1104 = vmatpush1.bf16.msra.mxu1 %v1656_v16  ;;  %1062 = vmatprep.subr.bf16.mxu0 %v1657_v17  ;;  %v1671_v26 = vld [vmem:[%s1948_s7 + $0x244] ss:$16 sps:$4 sm:$0xff]   ;;  %v1674_v28 = vld [vmem:[%s1948_s7 + $0x240] ss:$16 sps:$4 sm:$0xff]   ;;  %v1750_v16 = vld [vmem:[%s1948_s7 + $0x2c8] ss:$16 sps:$4 sm:$0xff]  }
  0x31   : > { %1105 = vmatprep.subr.bf16.mxu1 %v1659_v18  ;;  %v1675_v29 = vld [vmem:[%s1948_s7 + $0x24] ss:$16 sps:$4 sm:$0xff]   ;;  %v1679_v31 = vld [vmem:[%s1948_s7 + $0x20] ss:$16 sps:$4 sm:$0xff]   ;;  %v1755_v17 = vld [vmem:[%s1948_s7 + $0xac] ss:$16 sps:$4 sm:$0xff]  }
  0x32   : > { %v1677_v30 = vld [vmem:[%s1948_s7 + $0x224] ss:$16 sps:$4 sm:$0xff]   ;;  %v1680_v32 = vld [vmem:[%s1948_s7 + $0x220] ss:$16 sps:$4 sm:$0xff]   ;;  %v1758_v18 = vld [vmem:[%s1948_s7 + $0x2ac] ss:$16 sps:$4 sm:$0xff]  }
  0x33   : > { %1063 = vmatpush1.bf16.msra.mxu0 %v1661_v19  ;;  %v1681_v33 = vld [vmem:[%s1948_s7 + $0x4] ss:$16 sps:$4 sm:$0xff]   ;;  %v1685_v35 = vld [vmem:[%s1948_s7] ss:$16 sps:$4 sm:$0xff]   ;;  %v1753_v19 = vld [vmem:[%s1948_s7 + $0xa8] ss:$16 sps:$4 sm:$0xff]  }
  0x34   : > { %1106 = vmatpush1.bf16.msra.mxu1 %v1662_v20  ;;  %1064 = vmatprep.subr.bf16.mxu0 %v1663_v21  ;;  %v1683_v34 = vld [vmem:[%s1948_s7 + $0x204] ss:$16 sps:$4 sm:$0xff]   ;;  %v1686_v36 = vld [vmem:[%s1948_s7 + $0x200] ss:$16 sps:$4 sm:$0xff]   ;;  %v1756_v20 = vld [vmem:[%s1948_s7 + $0x2a8] ss:$16 sps:$4 sm:$0xff]  }
  0x35   : > { %1107 = vmatprep.subr.bf16.mxu1 %v1665_v22  ;;  %v1687_v37 = vld [vmem:[%s1948_s7 + $0x1e4] ss:$16 sps:$4 sm:$0xff]   ;;  %v1691_v39 = vld [vmem:[%s1948_s7 + $0x1e0] ss:$16 sps:$4 sm:$0xff]   ;;  %v1761_v21 = vld [vmem:[%s1948_s7 + $0x8c] ss:$16 sps:$4 sm:$0xff]  }
  0x36   : > { %v1689_v38 = vld [vmem:[%s1948_s7 + $0x3e4] ss:$16 sps:$4 sm:$0xff]   ;;  %v1692_v40 = vld [vmem:[%s1948_s7 + $0x3e0] ss:$16 sps:$4 sm:$0xff]   ;;  %v1764_v22 = vld [vmem:[%s1948_s7 + $0x28c] ss:$16 sps:$4 sm:$0xff]  }
  0x37   : > { %1065 = vmatpush1.bf16.msra.mxu0 %v1667_v23  ;;  %v1693_v41 = vld [vmem:[%s1948_s7 + $0x1c4] ss:$16 sps:$4 sm:$0xff]   ;;  %v1697_v43 = vld [vmem:[%s1948_s7 + $0x1c0] ss:$16 sps:$4 sm:$0xff]   ;;  %v1759_v23 = vld [vmem:[%s1948_s7 + $0x88] ss:$16 sps:$4 sm:$0xff]  }
  0x38   : > { %1108 = vmatpush1.bf16.msra.mxu1 %v1668_v24  ;;  %1066 = vmatprep.subr.bf16.mxu0 %v1669_v25  ;;  %v1695_v42 = vld [vmem:[%s1948_s7 + $0x3c4] ss:$16 sps:$4 sm:$0xff]   ;;  %v1698_v44 = vld [vmem:[%s1948_s7 + $0x3c0] ss:$16 sps:$4 sm:$0xff]   ;;  %v1762_v24 = vld [vmem:[%s1948_s7 + $0x288] ss:$16 sps:$4 sm:$0xff]  }
  0x39   : > { %1109 = vmatprep.subr.bf16.mxu1 %v1671_v26  ;;  %v1699_v45 = vld [vmem:[%s1948_s7 + $0x1a4] ss:$16 sps:$4 sm:$0xff]   ;;  %v1703_v47 = vld [vmem:[%s1948_s7 + $0x1a0] ss:$16 sps:$4 sm:$0xff]   ;;  %v1767_v25 = vld [vmem:[%s1948_s7 + $0x6c] ss:$16 sps:$4 sm:$0xff]  }
  0x3a   : > { %v1701_v46 = vld [vmem:[%s1948_s7 + $0x3a4] ss:$16 sps:$4 sm:$0xff]   ;;  %v1704_v48 = vld [vmem:[%s1948_s7 + $0x3a0] ss:$16 sps:$4 sm:$0xff]   ;;  %v1770_v26 = vld [vmem:[%s1948_s7 + $0x26c] ss:$16 sps:$4 sm:$0xff]  }
  0x3b   : > { %1067 = vmatpush1.bf16.msra.mxu0 %v1673_v27  ;;  %v1705_v49 = vld [vmem:[%s1948_s7 + $0x184] ss:$16 sps:$4 sm:$0xff]   ;;  %v1709_v51 = vld [vmem:[%s1948_s7 + $0x180] ss:$16 sps:$4 sm:$0xff]   ;;  %v1765_v27 = vld [vmem:[%s1948_s7 + $0x68] ss:$16 sps:$4 sm:$0xff]  }
  0x3c   : > { %1110 = vmatpush1.bf16.msra.mxu1 %v1674_v28  ;;  %1068 = vmatprep.subr.bf16.mxu0 %v1675_v29  ;;  %v1707_v50 = vld [vmem:[%s1948_s7 + $0x384] ss:$16 sps:$4 sm:$0xff]   ;;  %v1710_v52 = vld [vmem:[%s1948_s7 + $0x380] ss:$16 sps:$4 sm:$0xff]   ;;  %v1768_v28 = vld [vmem:[%s1948_s7 + $0x268] ss:$16 sps:$4 sm:$0xff]  }
  0x3d   : > { %1111 = vmatprep.subr.bf16.mxu1 %v1677_v30  ;;  %v1711_v53 = vld [vmem:[%s1948_s7 + $0x164] ss:$16 sps:$4 sm:$0xff]   ;;  %v1715_v57 = vld [vmem:[%s1948_s7 + $0x160] ss:$16 sps:$4 sm:$0xff]   ;;  %v1773_v29 = vld [vmem:[%s1948_s7 + $0x4c] ss:$16 sps:$4 sm:$0xff]  }
  0x3e   : > { %v1737_v54 = vld [vmem:[%s1950_s8 + $0x4] ss:$16 sps:$4 sm:$0xff]   ;;  %v1716_v58 = vld [vmem:[%s1948_s7 + $0x360] ss:$16 sps:$4 sm:$0xff]   ;;  %v1776_v30 = vld [vmem:[%s1948_s7 + $0x24c] ss:$16 sps:$4 sm:$0xff]  }
  0x3f   : > { %1069 = vmatpush1.bf16.msra.mxu0 %v1679_v31  ;;  %v1713_v55 = vld [vmem:[%s1948_s7 + $0x364] ss:$16 sps:$4 sm:$0xff]   ;;  %1088 = vmatprep.mubr.bf16.mxu0 %v1737_v54  ;;  %v1721_v61 = vld [vmem:[%s1948_s7 + $0x140] ss:$16 sps:$4 sm:$0xff]   ;;  %v1771_v31 = vld [vmem:[%s1948_s7 + $0x48] ss:$16 sps:$4 sm:$0xff]  }
  0x40   : > { %1112 = vmatpush1.bf16.msra.mxu1 %v1680_v32  ;;  %1070 = vmatprep.subr.bf16.mxu0 %v1681_v33  ;;  %v1717_v59 = vld [vmem:[%s1948_s7 + $0x144] ss:$16 sps:$4 sm:$0xff]   ;;  %v1722_v62 = vld [vmem:[%s1948_s7 + $0x340] ss:$16 sps:$4 sm:$0xff]   ;;  %v1774_v32 = vld [vmem:[%s1948_s7 + $0x248] ss:$16 sps:$4 sm:$0xff]  }
  0x41   : > { %1113 = vmatprep.subr.bf16.mxu1 %v1683_v34  ;;  %v1719_v60 = vld [vmem:[%s1948_s7 + $0x344] ss:$16 sps:$4 sm:$0xff]   ;;  %v1727_v1 = vld [vmem:[%s1948_s7 + $0x120] ss:$16 sps:$4 sm:$0xff]   ;;  %v1779_v33 = vld [vmem:[%s1948_s7 + $0x2c] ss:$16 sps:$4 sm:$0xff]  }
  0x42   : > { %v1723_v63 = vld [vmem:[%s1948_s7 + $0x124] ss:$16 sps:$4 sm:$0xff]   ;;  %v1728_v2 = vld [vmem:[%s1948_s7 + $0x320] ss:$16 sps:$4 sm:$0xff]   ;;  %v1782_v34 = vld [vmem:[%s1948_s7 + $0x22c] ss:$16 sps:$4 sm:$0xff]  }
  0x43   : > { %1071 = vmatpush1.bf16.msra.mxu0 %v1685_v35  ;;  %v1725_v0 = vld [vmem:[%s1948_s7 + $0x324] ss:$16 sps:$4 sm:$0xff]   ;;  %v1733_v5 = vld [vmem:[%s1948_s7 + $0x100] ss:$16 sps:$4 sm:$0xff]   ;;  %v1777_v35 = vld [vmem:[%s1948_s7 + $0x28] ss:$16 sps:$4 sm:$0xff]  }
  0x44   : > { %1114 = vmatpush1.bf16.msra.mxu1 %v1686_v36  ;;  %1072 = vmatprep.subr.bf16.mxu0 %v1687_v37  ;;  %v1729_v3 = vld [vmem:[%s1948_s7 + $0x104] ss:$16 sps:$4 sm:$0xff]   ;;  %v1734_v6 = vld [vmem:[%s1948_s7 + $0x300] ss:$16 sps:$4 sm:$0xff]   ;;  %v1780_v36 = vld [vmem:[%s1948_s7 + $0x228] ss:$16 sps:$4 sm:$0xff]  }
  0x45   : > { %1115 = vmatprep.subr.bf16.mxu1 %v1689_v38  ;;  %v1731_v4 = vld [vmem:[%s1948_s7 + $0x304] ss:$16 sps:$4 sm:$0xff]   ;;  %v2022_v9 = vld [vmem:[%s1950_s8] ss:$16 sps:$4 sm:$0xff]   ;;  %v1785_v37 = vld [vmem:[%s1948_s7 + $0xc] ss:$16 sps:$4 sm:$0xff]  }
  0x46   : > { %v1788_v38 = vld [vmem:[%s1948_s7 + $0x20c] ss:$16 sps:$4 sm:$0xff]  }
  0x47   : > { %1073 = vmatpush2.bf16.msra.mxu0 %v1691_v39  ;;  %v1783_v39 = vld [vmem:[%s1948_s7 + $0x8] ss:$16 sps:$4 sm:$0xff]  }
  0x48   : > { %1116 = vmatpush2.bf16.msra.mxu1 %v1692_v40  ;;  %1074 = vmatprep.subr.bf16.mxu0 %v1693_v41  ;;  %v1786_v40 = vld [vmem:[%s1948_s7 + $0x208] ss:$16 sps:$4 sm:$0xff]   ;;  %v1791_v41 = vld [vmem:[%s1948_s7 + $0x1ec] ss:$16 sps:$4 sm:$0xff]  }
  0x49   : > { %1117 = vmatprep.subr.bf16.mxu1 %v1695_v42  ;;  %v1794_v42 = vld [vmem:[%s1948_s7 + $0x3ec] ss:$16 sps:$4 sm:$0xff]  }
  0x4b   : > { %1075 = vmatpush2.bf16.msra.mxu0 %v1697_v43  ;;  %v1789_v43 = vld [vmem:[%s1948_s7 + $0x1e8] ss:$16 sps:$4 sm:$0xff]  }
  0x4c   : > { %1118 = vmatpush2.bf16.msra.mxu1 %v1698_v44  ;;  %1076 = vmatprep.subr.bf16.mxu0 %v1699_v45  ;;  %v1792_v44 = vld [vmem:[%s1948_s7 + $0x3e8] ss:$16 sps:$4 sm:$0xff]   ;;  %v1797_v45 = vld [vmem:[%s1948_s7 + $0x1cc] ss:$16 sps:$4 sm:$0xff]  }
  0x4d   : > { %1119 = vmatprep.subr.bf16.mxu1 %v1701_v46  ;;  %v1800_v46 = vld [vmem:[%s1948_s7 + $0x3cc] ss:$16 sps:$4 sm:$0xff]  }
  0x4f   : > { %1077 = vmatpush2.bf16.msra.mxu0 %v1703_v47  ;;  %v1795_v47 = vld [vmem:[%s1948_s7 + $0x1c8] ss:$16 sps:$4 sm:$0xff]  }
  0x50   : > { %1120 = vmatpush2.bf16.msra.mxu1 %v1704_v48  ;;  %1078 = vmatprep.subr.bf16.mxu0 %v1705_v49  ;;  %v1798_v48 = vld [vmem:[%s1948_s7 + $0x3c8] ss:$16 sps:$4 sm:$0xff]   ;;  %v1803_v49 = vld [vmem:[%s1948_s7 + $0x1ac] ss:$16 sps:$4 sm:$0xff]  }
  0x51   : > { %1121 = vmatprep.subr.bf16.mxu1 %v1707_v50  ;;  %v1806_v50 = vld [vmem:[%s1948_s7 + $0x3ac] ss:$16 sps:$4 sm:$0xff]  }
  0x53   : > { %1079 = vmatpush2.bf16.msra.mxu0 %v1709_v51  ;;  %v1801_v51 = vld [vmem:[%s1948_s7 + $0x1a8] ss:$16 sps:$4 sm:$0xff]  }
  0x54   : > { %1122 = vmatpush2.bf16.msra.mxu1 %v1710_v52  ;;  %1080 = vmatprep.subr.bf16.mxu0 %v1711_v53  ;;  %v1804_v52 = vld [vmem:[%s1948_s7 + $0x3a8] ss:$16 sps:$4 sm:$0xff]   ;;  %v1809_v53 = vld [vmem:[%s1948_s7 + $0x18c] ss:$16 sps:$4 sm:$0xff]  }
  0x55   : > { %1123 = vmatprep.subr.bf16.mxu1 %v1713_v55  ;;  %v1807_v55 = vld [vmem:[%s1948_s7 + $0x188] ss:$16 sps:$4 sm:$0xff]  }
  0x57   : > { %1081 = vmatpush2.bf16.msra.mxu0 %v1715_v57  ;;  %v1815_v57 = vld [vmem:[%s1948_s7 + $0x16c] ss:$16 sps:$4 sm:$0xff]  }
  0x58   : > { %1124 = vmatpush2.bf16.msra.mxu1 %v1716_v58  ;;  %1082 = vmatprep.subr.bf16.mxu0 %v1717_v59  ;;  %v1818_v58 = vld [vmem:[%s1948_s7 + $0x36c] ss:$16 sps:$4 sm:$0xff]   ;;  %v1813_v59 = vld [vmem:[%s1948_s7 + $0x168] ss:$16 sps:$4 sm:$0xff]  }
  0x59   : > { %1125 = vmatprep.subr.bf16.mxu1 %v1719_v60  ;;  %v1816_v60 = vld [vmem:[%s1948_s7 + $0x368] ss:$16 sps:$4 sm:$0xff]  }
  0x5b   : > { %1083 = vmatpush2.bf16.msra.mxu0 %v1721_v61  ;;  %v1821_v61 = vld [vmem:[%s1948_s7 + $0x14c] ss:$16 sps:$4 sm:$0xff]  }
  0x5c   : > { %1126 = vmatpush2.bf16.msra.mxu1 %v1722_v62  ;;  %1084 = vmatprep.subr.bf16.mxu0 %v1723_v63  ;;  %v1824_v62 = vld [vmem:[%s1948_s7 + $0x34c] ss:$16 sps:$4 sm:$0xff]   ;;  %v1819_v63 = vld [vmem:[%s1948_s7 + $0x148] ss:$16 sps:$4 sm:$0xff]  }
  0x5d   : > { %1127 = vmatprep.subr.bf16.mxu1 %v1725_v0  ;;  %v1822_v0 = vld [vmem:[%s1948_s7 + $0x348] ss:$16 sps:$4 sm:$0xff]  }
  0x5f   : > { %1085 = vmatpush2.bf16.msra.mxu0 %v1727_v1  ;;  %v1827_v1 = vld [vmem:[%s1948_s7 + $0x12c] ss:$16 sps:$4 sm:$0xff]  }
  0x60   : > { %1128 = vmatpush2.bf16.msra.mxu1 %v1728_v2  ;;  %1086 = vmatprep.subr.bf16.mxu0 %v1729_v3  ;;  %v1830_v2 = vld [vmem:[%s1948_s7 + $0x32c] ss:$16 sps:$4 sm:$0xff]   ;;  %v1825_v3 = vld [vmem:[%s1948_s7 + $0x128] ss:$16 sps:$4 sm:$0xff]  }
  0x61   : > { %1129 = vmatprep.subr.bf16.mxu1 %v1731_v4  ;;  %v1828_v4 = vld [vmem:[%s1948_s7 + $0x328] ss:$16 sps:$4 sm:$0xff]  }
  0x63   : > { %1087 = vmatpush2.bf16.msra.mxu0 %v1733_v5  ;;  %v1833_v5 = vld [vmem:[%s1948_s7 + $0x10c] ss:$16 sps:$4 sm:$0xff]  }
  0x64   : > { %1130 = vmatpush2.bf16.msra.mxu1 %v1734_v6  ;;  %1142 = vmatprep.subr.bf16.mxu0 %v1743_v7  ;;  %v1836_v6 = vld [vmem:[%s1948_s7 + $0x30c] ss:$16 sps:$4 sm:$0xff]   ;;  %v1831_v7 = vld [vmem:[%s1948_s7 + $0x108] ss:$16 sps:$4 sm:$0xff]  }
  0x65   : > { %1185 = vmatprep.subr.bf16.mxu1 %v1746_v8  ;;  %v1834_v8 = vld [vmem:[%s1948_s7 + $0x308] ss:$16 sps:$4 sm:$0xff]  }
  0x66   : > { %1089 = vmatmul.mubr.bf16.vlgmr.msra.gmra.mxu0 %v2022_v9 }
  0x67   : > { %1132 = vmatmul.mubr.bf16.vlgmr.msra.gmra.mxu1 %v2025_v10  ;;  %1143 = vmatpush1.bf16.msra.mxu0 %v1741_v11 }
  0x68   : > { %1186 = vmatpush1.bf16.msra.mxu1 %v1744_v12  ;;  %1144 = vmatprep.subr.bf16.mxu0 %v1749_v13  ;;  %v256_v12 = vld [vmem:[#allocation2 + $0x30] sm:$0xff] }
  0x69   : > { %1187 = vmatprep.subr.bf16.mxu1 %v1752_v14  ;;  %1174 = vmatprep.mubr.bf16.mxu0 %v1737_v54  ;;  %v1812_v54 = vld [vmem:[%s1948_s7 + $0x38c] ss:$16 sps:$4 sm:$0xff]  }
  0x6a   : > { %1217 = vmatprep.mubr.bf16.mxu1 %v1740_v56  ;;  %v1810_v56 = vld [vmem:[%s1948_s7 + $0x388] ss:$16 sps:$4 sm:$0xff]  }
  0x6b   : > { %1145 = vmatpush1.bf16.msra.mxu0 %v1747_v15 }
  0x6c   : > { %1188 = vmatpush1.bf16.msra.mxu1 %v1750_v16  ;;  %1146 = vmatprep.subr.bf16.mxu0 %v1755_v17  ;;  %v257_v16 = vld [vmem:[#allocation2] sm:$0xff] }
  0x6d   : > { %1189 = vmatprep.subr.bf16.mxu1 %v1758_v18 }
  0x6f   : > { %1147 = vmatpush1.bf16.msra.mxu0 %v1753_v19 }
  0x70   : > { %1190 = vmatpush1.bf16.msra.mxu1 %v1756_v20  ;;  %1148 = vmatprep.subr.bf16.mxu0 %v1761_v21  ;;  %v260_v21 = vld [vmem:[#allocation2 + $0x8] sm:$0xff] }
  0x71   : > { %1191 = vmatprep.subr.bf16.mxu1 %v1764_v22 }
  0x73   : > { %1149 = vmatpush1.bf16.msra.mxu0 %v1759_v23 }
  0x74   : > { %1192 = vmatpush1.bf16.msra.mxu1 %v1762_v24  ;;  %1150 = vmatprep.subr.bf16.mxu0 %v1767_v25 }
  0x75   : > { %1193 = vmatprep.subr.bf16.mxu1 %v1770_v26  ;;  %v261_v26 = vld [vmem:[#allocation2 + $0x20] sm:$0xff] }
  0x77   : > { %1151 = vmatpush1.bf16.msra.mxu0 %v1765_v27 }
  0x78   : > { %1194 = vmatpush1.bf16.msra.mxu1 %v1768_v28  ;;  %1152 = vmatprep.subr.bf16.mxu0 %v1773_v29 }
  0x79   : > { %1195 = vmatprep.subr.bf16.mxu1 %v1776_v30  ;;  %v258_v30 = vld [vmem:[#allocation2 + $0x18] sm:$0xff] }
  0x7b   : > { %1153 = vmatpush1.bf16.msra.mxu0 %v1771_v31 }
  0x7c   : > { %1196 = vmatpush1.bf16.msra.mxu1 %v1774_v32  ;;  %1154 = vmatprep.subr.bf16.mxu0 %v1779_v33 }
  0x7d   : > { %1197 = vmatprep.subr.bf16.mxu1 %v1782_v34  ;;  %v259_v34 = vld [vmem:[#allocation2 + $0x10] sm:$0xff] }
  0x7f   : > { %1155 = vmatpush1.bf16.msra.mxu0 %v1777_v35 }
  0x80   : > { %1198 = vmatpush1.bf16.msra.mxu1 %v1780_v36  ;;  %1156 = vmatprep.subr.bf16.mxu0 %v1785_v37 }
  0x81   : > { %1199 = vmatprep.subr.bf16.mxu1 %v1788_v38 }
  0x83   : > { %1157 = vmatpush1.bf16.msra.mxu0 %v1783_v39  ;;  %v262_v39 = vld [vmem:[#allocation2 + $0x28] sm:$0xff] }
  0x84   : > { %1200 = vmatpush1.bf16.msra.mxu1 %v1786_v40  ;;  %1158 = vmatprep.subr.bf16.mxu0 %v1791_v41 }
  0x85   : > { %1201 = vmatprep.subr.bf16.mxu1 %v1794_v42 }
  0x87   : > { %1159 = vmatpush2.bf16.msra.mxu0 %v1789_v43 }
  0x88   : > { %1202 = vmatpush2.bf16.msra.mxu1 %v1792_v44  ;;  %1160 = vmatprep.subr.bf16.mxu0 %v1797_v45  ;;  %v263_v44 = vld [vmem:[#allocation2 + $0x38] sm:$0xff] }
  0x89   : > { %1203 = vmatprep.subr.bf16.mxu1 %v1800_v46 }
  0x8b   : > { %1161 = vmatpush2.bf16.msra.mxu0 %v1795_v47 }
  0x8c   : > { %1204 = vmatpush2.bf16.msra.mxu1 %v1798_v48  ;;  %1162 = vmatprep.subr.bf16.mxu0 %v1803_v49 }
  0x8d   : > { %1205 = vmatprep.subr.bf16.mxu1 %v1806_v50 }
  0x8f   : > { %1163 = vmatpush2.bf16.msra.mxu0 %v1801_v51 }
  0x90   : > { %1206 = vmatpush2.bf16.msra.mxu1 %v1804_v52  ;;  %1164 = vmatprep.subr.bf16.mxu0 %v1809_v53 }
  0x91   : > { %1207 = vmatprep.subr.bf16.mxu1 %v1812_v54 }
  0x93   : > { %1165 = vmatpush2.bf16.msra.mxu0 %v1807_v55 }
  0x94   : > { %1208 = vmatpush2.bf16.msra.mxu1 %v1810_v56  ;;  %1166 = vmatprep.subr.bf16.mxu0 %v1815_v57 }
  0x95   : > { %1209 = vmatprep.subr.bf16.mxu1 %v1818_v58 }
  0x97   : > { %1167 = vmatpush2.bf16.msra.mxu0 %v1813_v59 }
  0x98   : > { %1210 = vmatpush2.bf16.msra.mxu1 %v1816_v60  ;;  %1168 = vmatprep.subr.bf16.mxu0 %v1821_v61 }
  0x99   : > { %1211 = vmatprep.subr.bf16.mxu1 %v1824_v62 }
  0x9b   : > { %1169 = vmatpush2.bf16.msra.mxu0 %v1819_v63 }
  0x9c   : > { %1212 = vmatpush2.bf16.msra.mxu1 %v1822_v0  ;;  %1170 = vmatprep.subr.bf16.mxu0 %v1827_v1 }
  0x9d   : > { %1213 = vmatprep.subr.bf16.mxu1 %v1830_v2 }
  0x9f   : > { %1171 = vmatpush2.bf16.msra.mxu0 %v1825_v3 }
  0xa0   : > { %1214 = vmatpush2.bf16.msra.mxu1 %v1828_v4  ;;  %1172 = vmatprep.subr.bf16.mxu0 %v1833_v5 }
  0xa1   : > { %1215 = vmatprep.subr.bf16.mxu1 %v1836_v6 }
  0xa3   : > { %1173 = vmatpush2.bf16.msra.mxu0 %v1831_v7 }
  0xa4   : > { %1216 = vmatpush2.bf16.msra.mxu1 %v1834_v8 }
  0xa6   : > { %1175 = vmatmul.mubr.bf16.vlgmr.msra.gmra.mxu0 %v2022_v9 }
  0xa7   : > { %1218 = vmatmul.mubr.bf16.vlgmr.msra.gmra.mxu1 %v2025_v10 }
 0x126   : > { %v1090_v11 = vpop.f32.mrf.mxu0 }
 0x127   : > { %v1133_v13 = vpop.f32.mrf.mxu1 }
 0x128   : > { %v1134_v14 = vadd.f32 %v1133_v13, %v1090_v11  ;;  %v1092_v15 = vpop.f32.mrf.mxu0 }
 0x129   : > { %v1135_v17 = vpop.f32.mrf.mxu1 }
 0x12a   : > { %v1228_v18 = vadd.f32 %v1134_v14, %v256_v12  ;;  %v1136_v19 = vadd.f32 %v1135_v17, %v1092_v15  ;;  %v1094_v20 = vpop.f32.mrf.mxu0 }
 0x12b   : > { %v1137_v22 = vpop.f32.mrf.mxu1 }
 0x12c   : > { %1236 = vst [vmem:[#allocation2 + $0x30] sm:$0xff] %v1228_v18  ;;  %v1229_v23 = vadd.f32 %v1136_v19, %v257_v16  ;;  %v1138_v24 = vadd.f32 %v1137_v22, %v1094_v20  ;;  %v1096_v25 = vpop.f32.mrf.mxu0 }
 0x12d   : > { %v1139_v9 = vpop.f32.mrf.mxu1 }
 0x12e   : > { %1237 = vst [vmem:[#allocation2] sm:$0xff] %v1229_v23  ;;  %v1232_v10 = vadd.f32 %v1138_v24, %v260_v21  ;;  %v1140_v27 = vadd.f32 %v1139_v9, %v1096_v25 }
 0x130   : > { %1240 = vst [vmem:[#allocation2 + $0x8] sm:$0xff] %v1232_v10  ;;  %v1233_v28 = vadd.f32 %v1140_v27, %v261_v26 }
 0x132   : > { %1241 = vst [vmem:[#allocation2 + $0x20] sm:$0xff] %v1233_v28 }
 0x166   : > { %v1176_v29 = vpop.f32.mrf.mxu0 }
 0x167   : > { %v1219_v31 = vpop.f32.mrf.mxu1 }
 0x168   : > { %v1220_v32 = vadd.f32 %v1219_v31, %v1176_v29  ;;  %v1178_v33 = vpop.f32.mrf.mxu0 }
 0x169   : > { %v1221_v35 = vpop.f32.mrf.mxu1 }
 0x16a   : > { %v1230_v36 = vadd.f32 %v1220_v32, %v258_v30  ;;  %v1222_v37 = vadd.f32 %v1221_v35, %v1178_v33  ;;  %v1180_v38 = vpop.f32.mrf.mxu0 }
 0x16b   : > { %v1223_v40 = vpop.f32.mrf.mxu1 }
 0x16c   : > { %1238 = vst [vmem:[#allocation2 + $0x18] sm:$0xff] %v1230_v36  ;;  %v1231_v41 = vadd.f32 %v1222_v37, %v259_v34  ;;  %v1224_v42 = vadd.f32 %v1223_v40, %v1180_v38  ;;  %v1182_v43 = vpop.f32.mrf.mxu0 }
 0x16d   : > { %v1225_v45 = vpop.f32.mrf.mxu1 }
 0x16e   : > { %1239 = vst [vmem:[#allocation2 + $0x10] sm:$0xff] %v1231_v41  ;;  %v1234_v46 = vadd.f32 %v1224_v42, %v262_v39  ;;  %v1226_v47 = vadd.f32 %v1225_v45, %v1182_v43  ;;  %1247 = sbr.rel (%p1582_p11) target bundleno = 389 (0x185), region = 63 }
 0x170   : > { %1242 = vst [vmem:[#allocation2 + $0x28] sm:$0xff] %v1234_v46  ;;  %v1235_v48 = vadd.f32 %v1226_v47, %v263_v44 }
 0x172   : > { %1243 = vst [vmem:[#allocation2 + $0x38] sm:$0xff] %v1235_v48 }
 0x173   : > { %v1258_v49 = vlaneseq  ;;  %v1256_v51 = vld [vmem:[%s2129_s2] ss:$2 sm:$0xf]  ;;  %v1583_v52 = vld [vmem:[%s2129_s2 + $0x1] ss:$2 sm:$0xf] }
 0x174   : > { %v1248_v53 = vld [vmem:[#allocation2 + $0x30] sm:$0xff]  ;;  %v1249_v54 = vld [vmem:[#allocation2] sm:$0xff]  ;;  %v1250_v59 = vld [vmem:[#allocation2 + $0x18] sm:$0xff] }
 0x175   : > { %v1259_v50 = vshrl.u32 %v1258_v49, 7  ;;  %v1252_v60 = vld [vmem:[#allocation2 + $0x8] sm:$0xff]  ;;  %v1253_v61 = vld [vmem:[#allocation2 + $0x20] sm:$0xff]  ;;  %v1251_v2 = vld [vmem:[#allocation2 + $0x10] sm:$0xff] }
 0x177   : > { %v1260_v55 = vsub.s32 0, %v1259_v50  ;;  %v1264_v56 = vsub.s32 1, %v1259_v50  ;;  %v1268_v57 = vsub.s32 2, %v1259_v50  ;;  %v1272_v58 = vsub.s32 3, %v1259_v50  ;;  %v1254_v3 = vld [vmem:[#allocation2 + $0x28] sm:$0xff] }
 0x179   : > { %v1261_v62 = vrot.slane %v1256_v51, %v1260_v55  ;;  %v1265_v63 = vrot.slane %v1256_v51, %v1264_v56  ;;  %v1292_v0 = vrot.slane %v1583_v52, %v1260_v55  ;;  %v1296_v1 = vrot.slane %v1583_v52, %v1264_v56  ;;  %v1255_v4 = vld [vmem:[#allocation2 + $0x38] sm:$0xff] }
 0x17a   : > { %v1269_v5 = vrot.slane %v1256_v51, %v1268_v57  ;;  %v1273_v6 = vrot.slane %v1256_v51, %v1272_v58  ;;  %v1300_v7 = vrot.slane %v1583_v52, %v1268_v57  ;;  %v1304_v8 = vrot.slane %v1583_v52, %v1272_v58 }
 0x17b   : > { %v1278_v11 = vmul.f32 %v1261_v62, %v1248_v53  ;;  %v1279_v12 = vmul.f32 %v1265_v63, %v1249_v54  ;;  %v1282_v13 = vmul.f32 %v1261_v62, %v1252_v60  ;;  %v1283_v14 = vmul.f32 %v1265_v63, %v1253_v61 }
 0x17c   : > { %v1280_v15 = vmul.f32 %v1269_v5, %v1250_v59  ;;  %v1281_v16 = vmul.f32 %v1273_v6, %v1251_v2  ;;  %v1284_v17 = vmul.f32 %v1269_v5, %v1254_v3  ;;  %v1285_v18 = vmul.f32 %v1273_v6, %v1255_v4 }
 0x17d   : > { %v1309_v19 = vadd.f32 %v1292_v0, %v1278_v11  ;;  %v1310_v20 = vadd.f32 %v1296_v1, %v1279_v12  ;;  %v1313_v21 = vadd.f32 %v1292_v0, %v1282_v13  ;;  %v1314_v22 = vadd.f32 %v1296_v1, %v1283_v14 }
 0x17e   : > { %v1311_v23 = vadd.f32 %v1300_v7, %v1280_v15  ;;  %v1312_v24 = vadd.f32 %v1304_v8, %v1281_v16  ;;  %v1315_v25 = vadd.f32 %v1300_v7, %v1284_v17  ;;  %v1316_v26 = vadd.f32 %v1304_v8, %v1285_v18 }
 0x17f   : > { %v1317_v9 = vmax.f32 %v1309_v19, 0.0  ;;  %v1318_v10 = vmax.f32 %v1310_v20, 0.0  ;;  %v1321_v27 = vmax.f32 %v1313_v21, 0.0  ;;  %v1322_v28 = vmax.f32 %v1314_v22, 0.0 }
 0x180   : > { %v1319_v29 = vmax.f32 %v1311_v23, 0.0  ;;  %v1320_v30 = vmax.f32 %v1312_v24, 0.0  ;;  %v1323_v31 = vmax.f32 %v1315_v25, 0.0  ;;  %v1324_v32 = vmax.f32 %v1316_v26, 0.0 }
 0x181   : > { %v1594_v33 = vpack.c.bf16 %v1318_v10, %v1317_v9  ;;  %v1596_v34 = vpack.c.bf16 %v1322_v28, %v1321_v27 }
 0x182   : > { %v1595_v35 = vpack.c.bf16 %v1320_v30, %v1319_v29  ;;  %v1597_v36 = vpack.c.bf16 %v1324_v32, %v1323_v31 }
 0x183   : > { %1349 = vst [vmem:[%s2130_s3] sm:$0xff] %v1594_v33  ;;  %1351 = vst [vmem:[%s2130_s3 + $0x10] sm:$0xff] %v1596_v34 }
 0x184   : > { %1350 = vst [vmem:[%s2130_s3 + $0x8] sm:$0xff] %v1595_v35  ;;  %1352 = vst [vmem:[%s2130_s3 + $0x18] sm:$0xff] %v1597_v36 }
 0x185 PF: > { %s13_s16 = sadd.s32 1, %s1875_s16   ;;  %s2131_s12 = smov %s1863_s13 }
 0x186   : > { %p10_p12 = scmp.ge.s32.totalorder %s13_s16, 11   ;;  %s2132_s13 = smov %s1933_s20 }
 0x187   : > { %s2133_s14 = smov %s1871_s15  ;;  %s2134_s15 = smov %s2136_s17 }
 0x188   :  { %12 = sbr.rel (!%p10_p12) target bundleno = 3 (0x3), region = 102 }

// kernel: pretrained_model_forward.38
= control target key start
LH: loop header
LB: loop body
LE: loop exit
PB: predicated region body
PF: predicated region fallthrough
CT: control target
= control target key end

     0   :  { %s1991_s15 = smov 0   ;;  %s1993_s16 = smov 0   ;;  %s2232_s0 = inlined_call_operand.vmem [shape: bf16[16,4608], index: 0, kind: input, shape index: {}]   ;;  %s2233_s1 = inlined_call_operand.vmem [shape: bf16[4608,512], index: 1, kind: input, shape index: {}]   ;;  %s2234_s2 = inlined_call_operand.vmem [shape: f32[2,512], index: 2, kind: input, shape index: {}]   ;;  %s2235_s3 = inlined_call_operand.vmem [shape: bf16[16,512], index: 3, kind: input, shape index: {}]   ;;  %s2236_s4 = inlined_call_operand.vmem [shape: bf16[16,512], index: 4, kind: output, shape index: {}]  }
   0x1   :  { %s1995_s17 = smov 0   ;;  %s1997_s18 = smov 0  }
   0x2   :  { %s1999_s19 = smov 0  }
   0x3 LB: > { %s23_s20 = sadd.s32 1, %s1959_s18  ;;  %p42_p1 = scmp.ne.s32.totalorder %s1951_s16, %s1947_s15  ;;  %s1963_s19 = sphi %s1999_s19, %s14_s19   ;;  %s1959_s18 = sphi %s1997_s18, %s2240_s18   ;;  %s1955_s17 = sphi %s1995_s17, %s2239_s17   ;;  %s1951_s16 = sphi %s1993_s16, %s2238_s16   ;;  %s1947_s15 = sphi %s1991_s15, %s2237_s15  }
   0x4   : > { %p24_p0 = scmp.ge.s32.totalorder %s23_s20, 9  ;;  %p43_p2 = scmp.eq.s32.totalorder %s1963_s19, 0 }
   0x5   : > { %s35_s22 = sadd.s32 1, %s1951_s16  ;;  %p1528_p5 = scmp.ge.s32.totalorder %s1963_s19, 9 }
   0x6   : > { %s2242_s20 = smov (%p24_p0, %s23_s20), 0  ;;  %p44_p3 = por %p43_p2, %p42_p1 }
   0x7   : > { %s31_s21 = ssub.s32 %s1959_s18, %s2242_s20  ;;  %180 = sbr.rel (%p1528_p5) target bundleno = 18 (0x12), region = 24 }
   0x8   : > { %p33_p4 = scmp.eq.s32.totalorder %s31_s21, 0 }
   0xa   : > { %s2026_s23 = scalar_select %p33_p4, %s1951_s16, %s35_s22  }
   0xc   : > { %183 = sbr.rel (!%p44_p3) target bundleno = 18 (0x12), region = 28  ;;  %s185_s24 = sand.u32 (%p44_p3), 1, %s1951_s16  }
   0xd   : > { %s1680_s25 = sshll.u32 (%p44_p3), %s1959_s18, 4  ;;  %s1529_s26 = sshll.u32 (%p44_p3), %s185_s24, 5 }
   0xe   : > { %s193_s29 = scalar_lea.vmem (%p44_p3), %s2232_s0, %s1680_s25  ;;  %s187_s30 = scalar_lea.vmem (%p44_p3), [#allocation3], %s1529_s26 }
   0xf   : > { %v206_v0 = vld [vmem:[%s193_s29] sm:$0xff] (%p44_p3)  ;;  %v208_v1 = vld [vmem:[%s193_s29 + $0x8] sm:$0xff] (%p44_p3)  ;;  %v210_v2 = vld [vmem:[%s193_s29 + $0x90] sm:$0xff] (%p44_p3) }
  0x10   : > { %207 = vst [vmem:[%s187_s30] sm:$0xff] (%p44_p3), %v206_v0  ;;  %209 = vst [vmem:[%s187_s30 + $0x8] sm:$0xff] (%p44_p3), %v208_v1  ;;  %v212_v3 = vld [vmem:[%s193_s29 + $0x98] sm:$0xff] (%p44_p3) }
  0x11   : > { %211 = vst [vmem:[%s187_s30 + $0x10] sm:$0xff] %v210_v2  ;;  %213 = vst [vmem:[%s187_s30 + $0x18] sm:$0xff] %v212_v3 }
  0x12 PF: > { %p1532_p6 = scmp.ge.s32.totalorder %s1963_s19, 1  ;;  %p228_p7 = scmp.lt.s32.totalorder %s1963_s19, 10 }
  0x14   : > { %p229_p8 = pnand %p1532_p6, %p228_p7 }
  0x15   : > { %s235_s5 = sand.u32 (!%p229_p8), 1, %s1947_s15   ;;  %s1534_s6 = sshll.u32 (!%p229_p8), %s1955_s17, 6 }
  0x16   : > { %232 = sbr.rel (%p229_p8) target bundleno = 391 (0x187), region = 55  ;;  %s1533_s7 = sshll.u32 (!%p229_p8), %s235_s5, 5 }
  0x17   : > { %p276_p9 = scmp.lt.s32.totalorder (!%p229_p8), %s1534_s6, 575  ;;  %s2043_s12 = scalar_lea.vmem (!%p229_p8), [#allocation3], %s1533_s7 }
  0x18   : > { %p1537_p10 = scmp.ne.s32.totalorder (!%p229_p8), %s1955_s17, 0 }
  0x1b   : > { %s2244_s6 = smov (!%p276_p9, %s1534_s6), 575  ;;  %299 = sbr.rel (%p1537_p10) target bundleno = 37 (0x25), region = 63 }
  0x1c   : > { %s1681_s8 = sshll.u32 %s2244_s6, 4 }
  0x1d   : > { %s2041_s11 = scalar_lea.vmem %s2233_s1, %s1681_s8 }
  0x20   : > { %v1965_v4 = vmov 0.0  }
  0x21   : > { %300 = vst [vmem:[#allocation2 + $0x30] sm:$0xff] %v1965_v4  ;;  %301 = vst [vmem:[#allocation2] sm:$0xff] %v1965_v4 }
  0x22   : > { %302 = vst [vmem:[#allocation2 + $0x18] sm:$0xff] %v1965_v4  ;;  %303 = vst [vmem:[#allocation2 + $0x10] sm:$0xff] %v1965_v4 }
  0x23   : > { %304 = vst [vmem:[#allocation2 + $0x8] sm:$0xff] %v1965_v4  ;;  %305 = vst [vmem:[#allocation2 + $0x20] sm:$0xff] %v1965_v4 }
  0x24   : > { %306 = vst [vmem:[#allocation2 + $0x28] sm:$0xff] %v1965_v4  ;;  %307 = vst [vmem:[#allocation2 + $0x38] sm:$0xff] %v1965_v4 }
  0x25 PF: > { %v1727_v5 = vld [vmem:[%s2041_s11 + $0xe4] ss:$16 sps:$4 sm:$0xff]   ;;  %v1731_v7 = vld [vmem:[%s2041_s11 + $0xe0] ss:$16 sps:$4 sm:$0xff]   ;;  %v1828_v56 = vld [vmem:[%s2043_s12 + $0xc] ss:$16 sps:$4 sm:$0xff]  }
  0x26   : > { %v1729_v6 = vld [vmem:[%s2041_s11 + $0x2e4] ss:$16 sps:$4 sm:$0xff]   ;;  %1108 = vmatprep.subr.bf16.mxu0 %v1727_v5  ;;  %v1732_v8 = vld [vmem:[%s2041_s11 + $0x2e0] ss:$16 sps:$4 sm:$0xff]   ;;  %1183 = vmatprep.mubr.bf16.mxu1 %v1828_v56  ;;  %p1670_p11 = scmp.ne.s32.totalorder %s1955_s17, 8 }
  0x27   : > { %1151 = vmatprep.subr.bf16.mxu1 %v1729_v6  ;;  %v1733_v9 = vld [vmem:[%s2041_s11 + $0xc4] ss:$16 sps:$4 sm:$0xff]   ;;  %1109 = vmatpush1.bf16.msra.mxu0 %v1731_v7  ;;  %v1737_v11 = vld [vmem:[%s2041_s11 + $0xc0] ss:$16 sps:$4 sm:$0xff]   ;;  %v1831_v7 = vld [vmem:[%s2041_s11 + $0xec] ss:$16 sps:$4 sm:$0xff]  }
  0x28   : > { %1152 = vmatpush1.bf16.msra.mxu1 %v1732_v8  ;;  %v1735_v10 = vld [vmem:[%s2041_s11 + $0x2c4] ss:$16 sps:$4 sm:$0xff]   ;;  %1110 = vmatprep.subr.bf16.mxu0 %v1733_v9  ;;  %v1738_v12 = vld [vmem:[%s2041_s11 + $0x2c0] ss:$16 sps:$4 sm:$0xff]   ;;  %v1834_v8 = vld [vmem:[%s2041_s11 + $0x2ec] ss:$16 sps:$4 sm:$0xff]  }
  0x29   : > { %1153 = vmatprep.subr.bf16.mxu1 %v1735_v10  ;;  %v1739_v13 = vld [vmem:[%s2041_s11 + $0xa4] ss:$16 sps:$4 sm:$0xff]   ;;  %v1743_v15 = vld [vmem:[%s2041_s11 + $0xa0] ss:$16 sps:$4 sm:$0xff]   ;;  %v2118_v10 = vld [vmem:[%s2043_s12 + $0x8] ss:$16 sps:$4 sm:$0xff]  }
  0x2a   : > { %v1741_v14 = vld [vmem:[%s2041_s11 + $0x2a4] ss:$16 sps:$4 sm:$0xff]   ;;  %v1744_v16 = vld [vmem:[%s2041_s11 + $0x2a0] ss:$16 sps:$4 sm:$0xff]  }
  0x2b   : > { %1111 = vmatpush1.bf16.msra.mxu0 %v1737_v11  ;;  %v1745_v17 = vld [vmem:[%s2041_s11 + $0x84] ss:$16 sps:$4 sm:$0xff]   ;;  %v1749_v19 = vld [vmem:[%s2041_s11 + $0x80] ss:$16 sps:$4 sm:$0xff]   ;;  %v1829_v11 = vld [vmem:[%s2041_s11 + $0xe8] ss:$16 sps:$4 sm:$0xff]  }
  0x2c   : > { %1154 = vmatpush1.bf16.msra.mxu1 %v1738_v12  ;;  %1112 = vmatprep.subr.bf16.mxu0 %v1739_v13  ;;  %v1747_v18 = vld [vmem:[%s2041_s11 + $0x284] ss:$16 sps:$4 sm:$0xff]   ;;  %v1750_v20 = vld [vmem:[%s2041_s11 + $0x280] ss:$16 sps:$4 sm:$0xff]   ;;  %v1832_v12 = vld [vmem:[%s2041_s11 + $0x2e8] ss:$16 sps:$4 sm:$0xff]  }
  0x2d   : > { %1155 = vmatprep.subr.bf16.mxu1 %v1741_v14  ;;  %v1751_v21 = vld [vmem:[%s2041_s11 + $0x64] ss:$16 sps:$4 sm:$0xff]   ;;  %v1755_v23 = vld [vmem:[%s2041_s11 + $0x60] ss:$16 sps:$4 sm:$0xff]   ;;  %v1837_v13 = vld [vmem:[%s2041_s11 + $0xcc] ss:$16 sps:$4 sm:$0xff]  }
  0x2e   : > { %v1753_v22 = vld [vmem:[%s2041_s11 + $0x264] ss:$16 sps:$4 sm:$0xff]   ;;  %v1756_v24 = vld [vmem:[%s2041_s11 + $0x260] ss:$16 sps:$4 sm:$0xff]   ;;  %v1840_v14 = vld [vmem:[%s2041_s11 + $0x2cc] ss:$16 sps:$4 sm:$0xff]  }
  0x2f   : > { %1113 = vmatpush1.bf16.msra.mxu0 %v1743_v15  ;;  %v1757_v25 = vld [vmem:[%s2041_s11 + $0x44] ss:$16 sps:$4 sm:$0xff]   ;;  %v1761_v27 = vld [vmem:[%s2041_s11 + $0x40] ss:$16 sps:$4 sm:$0xff]   ;;  %v1835_v15 = vld [vmem:[%s2041_s11 + $0xc8] ss:$16 sps:$4 sm:$0xff]  }
  0x30   : > { %1156 = vmatpush1.bf16.msra.mxu1 %v1744_v16  ;;  %1114 = vmatprep.subr.bf16.mxu0 %v1745_v17  ;;  %v1759_v26 = vld [vmem:[%s2041_s11 + $0x244] ss:$16 sps:$4 sm:$0xff]   ;;  %v1762_v28 = vld [vmem:[%s2041_s11 + $0x240] ss:$16 sps:$4 sm:$0xff]   ;;  %v1838_v16 = vld [vmem:[%s2041_s11 + $0x2c8] ss:$16 sps:$4 sm:$0xff]  }
  0x31   : > { %1157 = vmatprep.subr.bf16.mxu1 %v1747_v18  ;;  %v1763_v29 = vld [vmem:[%s2041_s11 + $0x24] ss:$16 sps:$4 sm:$0xff]   ;;  %v1767_v31 = vld [vmem:[%s2041_s11 + $0x20] ss:$16 sps:$4 sm:$0xff]   ;;  %v1843_v17 = vld [vmem:[%s2041_s11 + $0xac] ss:$16 sps:$4 sm:$0xff]  }
  0x32   : > { %v1765_v30 = vld [vmem:[%s2041_s11 + $0x224] ss:$16 sps:$4 sm:$0xff]   ;;  %v1768_v32 = vld [vmem:[%s2041_s11 + $0x220] ss:$16 sps:$4 sm:$0xff]   ;;  %v1846_v18 = vld [vmem:[%s2041_s11 + $0x2ac] ss:$16 sps:$4 sm:$0xff]  }
  0x33   : > { %1115 = vmatpush1.bf16.msra.mxu0 %v1749_v19  ;;  %v1769_v33 = vld [vmem:[%s2041_s11 + $0x4] ss:$16 sps:$4 sm:$0xff]   ;;  %v1773_v35 = vld [vmem:[%s2041_s11] ss:$16 sps:$4 sm:$0xff]   ;;  %v1841_v19 = vld [vmem:[%s2041_s11 + $0xa8] ss:$16 sps:$4 sm:$0xff]  }
  0x34   : > { %1158 = vmatpush1.bf16.msra.mxu1 %v1750_v20  ;;  %1116 = vmatprep.subr.bf16.mxu0 %v1751_v21  ;;  %v1771_v34 = vld [vmem:[%s2041_s11 + $0x204] ss:$16 sps:$4 sm:$0xff]   ;;  %v1774_v36 = vld [vmem:[%s2041_s11 + $0x200] ss:$16 sps:$4 sm:$0xff]   ;;  %v1844_v20 = vld [vmem:[%s2041_s11 + $0x2a8] ss:$16 sps:$4 sm:$0xff]  }
  0x35   : > { %1159 = vmatprep.subr.bf16.mxu1 %v1753_v22  ;;  %v1775_v37 = vld [vmem:[%s2041_s11 + $0x1e4] ss:$16 sps:$4 sm:$0xff]   ;;  %v1779_v39 = vld [vmem:[%s2041_s11 + $0x1e0] ss:$16 sps:$4 sm:$0xff]   ;;  %v1849_v21 = vld [vmem:[%s2041_s11 + $0x8c] ss:$16 sps:$4 sm:$0xff]  }
  0x36   : > { %v1777_v38 = vld [vmem:[%s2041_s11 + $0x3e4] ss:$16 sps:$4 sm:$0xff]   ;;  %v1780_v40 = vld [vmem:[%s2041_s11 + $0x3e0] ss:$16 sps:$4 sm:$0xff]   ;;  %v1852_v22 = vld [vmem:[%s2041_s11 + $0x28c] ss:$16 sps:$4 sm:$0xff]  }
  0x37   : > { %1117 = vmatpush1.bf16.msra.mxu0 %v1755_v23  ;;  %v1781_v41 = vld [vmem:[%s2041_s11 + $0x1c4] ss:$16 sps:$4 sm:$0xff]   ;;  %v1785_v43 = vld [vmem:[%s2041_s11 + $0x1c0] ss:$16 sps:$4 sm:$0xff]   ;;  %v1847_v23 = vld [vmem:[%s2041_s11 + $0x88] ss:$16 sps:$4 sm:$0xff]  }
  0x38   : > { %1160 = vmatpush1.bf16.msra.mxu1 %v1756_v24  ;;  %1118 = vmatprep.subr.bf16.mxu0 %v1757_v25  ;;  %v1783_v42 = vld [vmem:[%s2041_s11 + $0x3c4] ss:$16 sps:$4 sm:$0xff]   ;;  %v1786_v44 = vld [vmem:[%s2041_s11 + $0x3c0] ss:$16 sps:$4 sm:$0xff]   ;;  %v1850_v24 = vld [vmem:[%s2041_s11 + $0x288] ss:$16 sps:$4 sm:$0xff]  }
  0x39   : > { %1161 = vmatprep.subr.bf16.mxu1 %v1759_v26  ;;  %v1787_v45 = vld [vmem:[%s2041_s11 + $0x1a4] ss:$16 sps:$4 sm:$0xff]   ;;  %v1791_v47 = vld [vmem:[%s2041_s11 + $0x1a0] ss:$16 sps:$4 sm:$0xff]   ;;  %v1855_v25 = vld [vmem:[%s2041_s11 + $0x6c] ss:$16 sps:$4 sm:$0xff]  }
  0x3a   : > { %v1789_v46 = vld [vmem:[%s2041_s11 + $0x3a4] ss:$16 sps:$4 sm:$0xff]   ;;  %v1792_v48 = vld [vmem:[%s2041_s11 + $0x3a0] ss:$16 sps:$4 sm:$0xff]   ;;  %v1858_v26 = vld [vmem:[%s2041_s11 + $0x26c] ss:$16 sps:$4 sm:$0xff]  }
  0x3b   : > { %1119 = vmatpush1.bf16.msra.mxu0 %v1761_v27  ;;  %v1793_v49 = vld [vmem:[%s2041_s11 + $0x184] ss:$16 sps:$4 sm:$0xff]   ;;  %v1797_v51 = vld [vmem:[%s2041_s11 + $0x180] ss:$16 sps:$4 sm:$0xff]   ;;  %v1853_v27 = vld [vmem:[%s2041_s11 + $0x68] ss:$16 sps:$4 sm:$0xff]  }
  0x3c   : > { %1162 = vmatpush1.bf16.msra.mxu1 %v1762_v28  ;;  %1120 = vmatprep.subr.bf16.mxu0 %v1763_v29  ;;  %v1795_v50 = vld [vmem:[%s2041_s11 + $0x384] ss:$16 sps:$4 sm:$0xff]   ;;  %v1798_v52 = vld [vmem:[%s2041_s11 + $0x380] ss:$16 sps:$4 sm:$0xff]   ;;  %v1856_v28 = vld [vmem:[%s2041_s11 + $0x268] ss:$16 sps:$4 sm:$0xff]  }
  0x3d   : > { %1163 = vmatprep.subr.bf16.mxu1 %v1765_v30  ;;  %v1799_v53 = vld [vmem:[%s2041_s11 + $0x164] ss:$16 sps:$4 sm:$0xff]   ;;  %v1803_v57 = vld [vmem:[%s2041_s11 + $0x160] ss:$16 sps:$4 sm:$0xff]   ;;  %v1861_v29 = vld [vmem:[%s2041_s11 + $0x4c] ss:$16 sps:$4 sm:$0xff]  }
  0x3e   : > { %v1825_v54 = vld [vmem:[%s2043_s12 + $0x4] ss:$16 sps:$4 sm:$0xff]   ;;  %v1804_v58 = vld [vmem:[%s2041_s11 + $0x360] ss:$16 sps:$4 sm:$0xff]   ;;  %v1864_v30 = vld [vmem:[%s2041_s11 + $0x24c] ss:$16 sps:$4 sm:$0xff]  }
  0x3f   : > { %1121 = vmatpush1.bf16.msra.mxu0 %v1767_v31  ;;  %v1801_v55 = vld [vmem:[%s2041_s11 + $0x364] ss:$16 sps:$4 sm:$0xff]   ;;  %1140 = vmatprep.mubr.bf16.mxu0 %v1825_v54  ;;  %v1809_v61 = vld [vmem:[%s2041_s11 + $0x140] ss:$16 sps:$4 sm:$0xff]   ;;  %v1859_v31 = vld [vmem:[%s2041_s11 + $0x48] ss:$16 sps:$4 sm:$0xff]  }
  0x40   : > { %1164 = vmatpush1.bf16.msra.mxu1 %v1768_v32  ;;  %1122 = vmatprep.subr.bf16.mxu0 %v1769_v33  ;;  %v1805_v59 = vld [vmem:[%s2041_s11 + $0x144] ss:$16 sps:$4 sm:$0xff]   ;;  %v1810_v62 = vld [vmem:[%s2041_s11 + $0x340] ss:$16 sps:$4 sm:$0xff]   ;;  %v1862_v32 = vld [vmem:[%s2041_s11 + $0x248] ss:$16 sps:$4 sm:$0xff]  }
  0x41   : > { %1165 = vmatprep.subr.bf16.mxu1 %v1771_v34  ;;  %v1807_v60 = vld [vmem:[%s2041_s11 + $0x344] ss:$16 sps:$4 sm:$0xff]   ;;  %v1815_v1 = vld [vmem:[%s2041_s11 + $0x120] ss:$16 sps:$4 sm:$0xff]   ;;  %v1867_v33 = vld [vmem:[%s2041_s11 + $0x2c] ss:$16 sps:$4 sm:$0xff]  }
  0x42   : > { %v1811_v63 = vld [vmem:[%s2041_s11 + $0x124] ss:$16 sps:$4 sm:$0xff]   ;;  %v1816_v2 = vld [vmem:[%s2041_s11 + $0x320] ss:$16 sps:$4 sm:$0xff]   ;;  %v1870_v34 = vld [vmem:[%s2041_s11 + $0x22c] ss:$16 sps:$4 sm:$0xff]  }
  0x43   : > { %1123 = vmatpush1.bf16.msra.mxu0 %v1773_v35  ;;  %v1813_v0 = vld [vmem:[%s2041_s11 + $0x324] ss:$16 sps:$4 sm:$0xff]   ;;  %v1821_v5 = vld [vmem:[%s2041_s11 + $0x100] ss:$16 sps:$4 sm:$0xff]   ;;  %v1865_v35 = vld [vmem:[%s2041_s11 + $0x28] ss:$16 sps:$4 sm:$0xff]  }
  0x44   : > { %1166 = vmatpush1.bf16.msra.mxu1 %v1774_v36  ;;  %1124 = vmatprep.subr.bf16.mxu0 %v1775_v37  ;;  %v1817_v3 = vld [vmem:[%s2041_s11 + $0x104] ss:$16 sps:$4 sm:$0xff]   ;;  %v1822_v6 = vld [vmem:[%s2041_s11 + $0x300] ss:$16 sps:$4 sm:$0xff]   ;;  %v1868_v36 = vld [vmem:[%s2041_s11 + $0x228] ss:$16 sps:$4 sm:$0xff]  }
  0x45   : > { %1167 = vmatprep.subr.bf16.mxu1 %v1777_v38  ;;  %v1819_v4 = vld [vmem:[%s2041_s11 + $0x304] ss:$16 sps:$4 sm:$0xff]   ;;  %v2115_v9 = vld [vmem:[%s2043_s12] ss:$16 sps:$4 sm:$0xff]   ;;  %v1873_v37 = vld [vmem:[%s2041_s11 + $0xc] ss:$16 sps:$4 sm:$0xff]  }
  0x46   : > { %v1876_v38 = vld [vmem:[%s2041_s11 + $0x20c] ss:$16 sps:$4 sm:$0xff]  }
  0x47   : > { %1125 = vmatpush2.bf16.msra.mxu0 %v1779_v39  ;;  %v1871_v39 = vld [vmem:[%s2041_s11 + $0x8] ss:$16 sps:$4 sm:$0xff]  }
  0x48   : > { %1168 = vmatpush2.bf16.msra.mxu1 %v1780_v40  ;;  %1126 = vmatprep.subr.bf16.mxu0 %v1781_v41  ;;  %v1874_v40 = vld [vmem:[%s2041_s11 + $0x208] ss:$16 sps:$4 sm:$0xff]   ;;  %v1879_v41 = vld [vmem:[%s2041_s11 + $0x1ec] ss:$16 sps:$4 sm:$0xff]  }
  0x49   : > { %1169 = vmatprep.subr.bf16.mxu1 %v1783_v42  ;;  %v1882_v42 = vld [vmem:[%s2041_s11 + $0x3ec] ss:$16 sps:$4 sm:$0xff]  }
  0x4b   : > { %1127 = vmatpush2.bf16.msra.mxu0 %v1785_v43  ;;  %v1877_v43 = vld [vmem:[%s2041_s11 + $0x1e8] ss:$16 sps:$4 sm:$0xff]  }
  0x4c   : > { %1170 = vmatpush2.bf16.msra.mxu1 %v1786_v44  ;;  %1128 = vmatprep.subr.bf16.mxu0 %v1787_v45  ;;  %v1880_v44 = vld [vmem:[%s2041_s11 + $0x3e8] ss:$16 sps:$4 sm:$0xff]   ;;  %v1885_v45 = vld [vmem:[%s2041_s11 + $0x1cc] ss:$16 sps:$4 sm:$0xff]  }
  0x4d   : > { %1171 = vmatprep.subr.bf16.mxu1 %v1789_v46  ;;  %v1888_v46 = vld [vmem:[%s2041_s11 + $0x3cc] ss:$16 sps:$4 sm:$0xff]  }
  0x4f   : > { %1129 = vmatpush2.bf16.msra.mxu0 %v1791_v47  ;;  %v1883_v47 = vld [vmem:[%s2041_s11 + $0x1c8] ss:$16 sps:$4 sm:$0xff]  }
  0x50   : > { %1172 = vmatpush2.bf16.msra.mxu1 %v1792_v48  ;;  %1130 = vmatprep.subr.bf16.mxu0 %v1793_v49  ;;  %v1886_v48 = vld [vmem:[%s2041_s11 + $0x3c8] ss:$16 sps:$4 sm:$0xff]   ;;  %v1891_v49 = vld [vmem:[%s2041_s11 + $0x1ac] ss:$16 sps:$4 sm:$0xff]  }
  0x51   : > { %1173 = vmatprep.subr.bf16.mxu1 %v1795_v50  ;;  %v1894_v50 = vld [vmem:[%s2041_s11 + $0x3ac] ss:$16 sps:$4 sm:$0xff]  }
  0x53   : > { %1131 = vmatpush2.bf16.msra.mxu0 %v1797_v51  ;;  %v1889_v51 = vld [vmem:[%s2041_s11 + $0x1a8] ss:$16 sps:$4 sm:$0xff]  }
  0x54   : > { %1174 = vmatpush2.bf16.msra.mxu1 %v1798_v52  ;;  %1132 = vmatprep.subr.bf16.mxu0 %v1799_v53  ;;  %v1892_v52 = vld [vmem:[%s2041_s11 + $0x3a8] ss:$16 sps:$4 sm:$0xff]   ;;  %v1897_v53 = vld [vmem:[%s2041_s11 + $0x18c] ss:$16 sps:$4 sm:$0xff]  }
  0x55   : > { %1175 = vmatprep.subr.bf16.mxu1 %v1801_v55  ;;  %v1895_v55 = vld [vmem:[%s2041_s11 + $0x188] ss:$16 sps:$4 sm:$0xff]  }
  0x57   : > { %1133 = vmatpush2.bf16.msra.mxu0 %v1803_v57  ;;  %v1903_v57 = vld [vmem:[%s2041_s11 + $0x16c] ss:$16 sps:$4 sm:$0xff]  }
  0x58   : > { %1176 = vmatpush2.bf16.msra.mxu1 %v1804_v58  ;;  %1134 = vmatprep.subr.bf16.mxu0 %v1805_v59  ;;  %v1906_v58 = vld [vmem:[%s2041_s11 + $0x36c] ss:$16 sps:$4 sm:$0xff]   ;;  %v1901_v59 = vld [vmem:[%s2041_s11 + $0x168] ss:$16 sps:$4 sm:$0xff]  }
  0x59   : > { %1177 = vmatprep.subr.bf16.mxu1 %v1807_v60  ;;  %v1904_v60 = vld [vmem:[%s2041_s11 + $0x368] ss:$16 sps:$4 sm:$0xff]  }
  0x5b   : > { %1135 = vmatpush2.bf16.msra.mxu0 %v1809_v61  ;;  %v1909_v61 = vld [vmem:[%s2041_s11 + $0x14c] ss:$16 sps:$4 sm:$0xff]  }
  0x5c   : > { %1178 = vmatpush2.bf16.msra.mxu1 %v1810_v62  ;;  %1136 = vmatprep.subr.bf16.mxu0 %v1811_v63  ;;  %v1912_v62 = vld [vmem:[%s2041_s11 + $0x34c] ss:$16 sps:$4 sm:$0xff]   ;;  %v1907_v63 = vld [vmem:[%s2041_s11 + $0x148] ss:$16 sps:$4 sm:$0xff]  }
  0x5d   : > { %1179 = vmatprep.subr.bf16.mxu1 %v1813_v0  ;;  %v1910_v0 = vld [vmem:[%s2041_s11 + $0x348] ss:$16 sps:$4 sm:$0xff]  }
  0x5f   : > { %1137 = vmatpush2.bf16.msra.mxu0 %v1815_v1  ;;  %v1915_v1 = vld [vmem:[%s2041_s11 + $0x12c] ss:$16 sps:$4 sm:$0xff]  }
  0x60   : > { %1180 = vmatpush2.bf16.msra.mxu1 %v1816_v2  ;;  %1138 = vmatprep.subr.bf16.mxu0 %v1817_v3  ;;  %v1918_v2 = vld [vmem:[%s2041_s11 + $0x32c] ss:$16 sps:$4 sm:$0xff]   ;;  %v1913_v3 = vld [vmem:[%s2041_s11 + $0x128] ss:$16 sps:$4 sm:$0xff]  }
  0x61   : > { %1181 = vmatprep.subr.bf16.mxu1 %v1819_v4  ;;  %v1916_v4 = vld [vmem:[%s2041_s11 + $0x328] ss:$16 sps:$4 sm:$0xff]  }
  0x63   : > { %1139 = vmatpush2.bf16.msra.mxu0 %v1821_v5  ;;  %v1921_v5 = vld [vmem:[%s2041_s11 + $0x10c] ss:$16 sps:$4 sm:$0xff]  }
  0x64   : > { %1182 = vmatpush2.bf16.msra.mxu1 %v1822_v6  ;;  %1194 = vmatprep.subr.bf16.mxu0 %v1831_v7  ;;  %v1924_v6 = vld [vmem:[%s2041_s11 + $0x30c] ss:$16 sps:$4 sm:$0xff]   ;;  %v1919_v7 = vld [vmem:[%s2041_s11 + $0x108] ss:$16 sps:$4 sm:$0xff]  }
  0x65   : > { %1237 = vmatprep.subr.bf16.mxu1 %v1834_v8  ;;  %v1922_v8 = vld [vmem:[%s2041_s11 + $0x308] ss:$16 sps:$4 sm:$0xff]  }
  0x66   : > { %1141 = vmatmul.mubr.bf16.vlgmr.msra.gmra.mxu0 %v2115_v9 }
  0x67   : > { %1184 = vmatmul.mubr.bf16.vlgmr.msra.gmra.mxu1 %v2118_v10  ;;  %1195 = vmatpush1.bf16.msra.mxu0 %v1829_v11 }
  0x68   : > { %1238 = vmatpush1.bf16.msra.mxu1 %v1832_v12  ;;  %1196 = vmatprep.subr.bf16.mxu0 %v1837_v13  ;;  %v308_v12 = vld [vmem:[#allocation2 + $0x30] sm:$0xff] }
  0x69   : > { %1239 = vmatprep.subr.bf16.mxu1 %v1840_v14  ;;  %1226 = vmatprep.mubr.bf16.mxu0 %v1825_v54  ;;  %v1900_v54 = vld [vmem:[%s2041_s11 + $0x38c] ss:$16 sps:$4 sm:$0xff]  }
  0x6a   : > { %1269 = vmatprep.mubr.bf16.mxu1 %v1828_v56  ;;  %v1898_v56 = vld [vmem:[%s2041_s11 + $0x388] ss:$16 sps:$4 sm:$0xff]  }
  0x6b   : > { %1197 = vmatpush1.bf16.msra.mxu0 %v1835_v15 }
  0x6c   : > { %1240 = vmatpush1.bf16.msra.mxu1 %v1838_v16  ;;  %1198 = vmatprep.subr.bf16.mxu0 %v1843_v17  ;;  %v309_v16 = vld [vmem:[#allocation2] sm:$0xff] }
  0x6d   : > { %1241 = vmatprep.subr.bf16.mxu1 %v1846_v18 }
  0x6f   : > { %1199 = vmatpush1.bf16.msra.mxu0 %v1841_v19 }
  0x70   : > { %1242 = vmatpush1.bf16.msra.mxu1 %v1844_v20  ;;  %1200 = vmatprep.subr.bf16.mxu0 %v1849_v21  ;;  %v312_v21 = vld [vmem:[#allocation2 + $0x8] sm:$0xff] }
  0x71   : > { %1243 = vmatprep.subr.bf16.mxu1 %v1852_v22 }
  0x73   : > { %1201 = vmatpush1.bf16.msra.mxu0 %v1847_v23 }
  0x74   : > { %1244 = vmatpush1.bf16.msra.mxu1 %v1850_v24  ;;  %1202 = vmatprep.subr.bf16.mxu0 %v1855_v25 }
  0x75   : > { %1245 = vmatprep.subr.bf16.mxu1 %v1858_v26  ;;  %v313_v26 = vld [vmem:[#allocation2 + $0x20] sm:$0xff] }
  0x77   : > { %1203 = vmatpush1.bf16.msra.mxu0 %v1853_v27 }
  0x78   : > { %1246 = vmatpush1.bf16.msra.mxu1 %v1856_v28  ;;  %1204 = vmatprep.subr.bf16.mxu0 %v1861_v29 }
  0x79   : > { %1247 = vmatprep.subr.bf16.mxu1 %v1864_v30  ;;  %v310_v30 = vld [vmem:[#allocation2 + $0x18] sm:$0xff] }
  0x7b   : > { %1205 = vmatpush1.bf16.msra.mxu0 %v1859_v31 }
  0x7c   : > { %1248 = vmatpush1.bf16.msra.mxu1 %v1862_v32  ;;  %1206 = vmatprep.subr.bf16.mxu0 %v1867_v33 }
  0x7d   : > { %1249 = vmatprep.subr.bf16.mxu1 %v1870_v34  ;;  %v311_v34 = vld [vmem:[#allocation2 + $0x10] sm:$0xff] }
  0x7f   : > { %1207 = vmatpush1.bf16.msra.mxu0 %v1865_v35 }
  0x80   : > { %1250 = vmatpush1.bf16.msra.mxu1 %v1868_v36  ;;  %1208 = vmatprep.subr.bf16.mxu0 %v1873_v37 }
  0x81   : > { %1251 = vmatprep.subr.bf16.mxu1 %v1876_v38 }
  0x83   : > { %1209 = vmatpush1.bf16.msra.mxu0 %v1871_v39  ;;  %v314_v39 = vld [vmem:[#allocation2 + $0x28] sm:$0xff] }
  0x84   : > { %1252 = vmatpush1.bf16.msra.mxu1 %v1874_v40  ;;  %1210 = vmatprep.subr.bf16.mxu0 %v1879_v41 }
  0x85   : > { %1253 = vmatprep.subr.bf16.mxu1 %v1882_v42 }
  0x87   : > { %1211 = vmatpush2.bf16.msra.mxu0 %v1877_v43 }
  0x88   : > { %1254 = vmatpush2.bf16.msra.mxu1 %v1880_v44  ;;  %1212 = vmatprep.subr.bf16.mxu0 %v1885_v45  ;;  %v315_v44 = vld [vmem:[#allocation2 + $0x38] sm:$0xff] }
  0x89   : > { %1255 = vmatprep.subr.bf16.mxu1 %v1888_v46 }
  0x8b   : > { %1213 = vmatpush2.bf16.msra.mxu0 %v1883_v47 }
  0x8c   : > { %1256 = vmatpush2.bf16.msra.mxu1 %v1886_v48  ;;  %1214 = vmatprep.subr.bf16.mxu0 %v1891_v49 }
  0x8d   : > { %1257 = vmatprep.subr.bf16.mxu1 %v1894_v50 }
  0x8f   : > { %1215 = vmatpush2.bf16.msra.mxu0 %v1889_v51 }
  0x90   : > { %1258 = vmatpush2.bf16.msra.mxu1 %v1892_v52  ;;  %1216 = vmatprep.subr.bf16.mxu0 %v1897_v53 }
  0x91   : > { %1259 = vmatprep.subr.bf16.mxu1 %v1900_v54 }
  0x93   : > { %1217 = vmatpush2.bf16.msra.mxu0 %v1895_v55 }
  0x94   : > { %1260 = vmatpush2.bf16.msra.mxu1 %v1898_v56  ;;  %1218 = vmatprep.subr.bf16.mxu0 %v1903_v57 }
  0x95   : > { %1261 = vmatprep.subr.bf16.mxu1 %v1906_v58 }
  0x97   : > { %1219 = vmatpush2.bf16.msra.mxu0 %v1901_v59 }
  0x98   : > { %1262 = vmatpush2.bf16.msra.mxu1 %v1904_v60  ;;  %1220 = vmatprep.subr.bf16.mxu0 %v1909_v61 }
  0x99   : > { %1263 = vmatprep.subr.bf16.mxu1 %v1912_v62 }
  0x9b   : > { %1221 = vmatpush2.bf16.msra.mxu0 %v1907_v63 }
  0x9c   : > { %1264 = vmatpush2.bf16.msra.mxu1 %v1910_v0  ;;  %1222 = vmatprep.subr.bf16.mxu0 %v1915_v1 }
  0x9d   : > { %1265 = vmatprep.subr.bf16.mxu1 %v1918_v2 }
  0x9f   : > { %1223 = vmatpush2.bf16.msra.mxu0 %v1913_v3 }
  0xa0   : > { %1266 = vmatpush2.bf16.msra.mxu1 %v1916_v4  ;;  %1224 = vmatprep.subr.bf16.mxu0 %v1921_v5 }
  0xa1   : > { %1267 = vmatprep.subr.bf16.mxu1 %v1924_v6 }
  0xa3   : > { %1225 = vmatpush2.bf16.msra.mxu0 %v1919_v7 }
  0xa4   : > { %1268 = vmatpush2.bf16.msra.mxu1 %v1922_v8 }
  0xa6   : > { %1227 = vmatmul.mubr.bf16.vlgmr.msra.gmra.mxu0 %v2115_v9 }
  0xa7   : > { %1270 = vmatmul.mubr.bf16.vlgmr.msra.gmra.mxu1 %v2118_v10 }
 0x126   : > { %v1142_v11 = vpop.f32.mrf.mxu0 }
 0x127   : > { %v1185_v13 = vpop.f32.mrf.mxu1 }
 0x128   : > { %v1186_v14 = vadd.f32 %v1185_v13, %v1142_v11  ;;  %v1144_v15 = vpop.f32.mrf.mxu0 }
 0x129   : > { %v1187_v17 = vpop.f32.mrf.mxu1 }
 0x12a   : > { %v1280_v18 = vadd.f32 %v1186_v14, %v308_v12  ;;  %v1188_v19 = vadd.f32 %v1187_v17, %v1144_v15  ;;  %v1146_v20 = vpop.f32.mrf.mxu0 }
 0x12b   : > { %v1189_v22 = vpop.f32.mrf.mxu1 }
 0x12c   : > { %1288 = vst [vmem:[#allocation2 + $0x30] sm:$0xff] %v1280_v18  ;;  %v1281_v23 = vadd.f32 %v1188_v19, %v309_v16  ;;  %v1190_v24 = vadd.f32 %v1189_v22, %v1146_v20  ;;  %v1148_v25 = vpop.f32.mrf.mxu0 }
 0x12d   : > { %v1191_v9 = vpop.f32.mrf.mxu1 }
 0x12e   : > { %1289 = vst [vmem:[#allocation2] sm:$0xff] %v1281_v23  ;;  %v1284_v10 = vadd.f32 %v1190_v24, %v312_v21  ;;  %v1192_v27 = vadd.f32 %v1191_v9, %v1148_v25 }
 0x130   : > { %1292 = vst [vmem:[#allocation2 + $0x8] sm:$0xff] %v1284_v10  ;;  %v1285_v28 = vadd.f32 %v1192_v27, %v313_v26 }
 0x132   : > { %1293 = vst [vmem:[#allocation2 + $0x20] sm:$0xff] %v1285_v28 }
 0x166   : > { %v1228_v29 = vpop.f32.mrf.mxu0 }
 0x167   : > { %v1271_v31 = vpop.f32.mrf.mxu1 }
 0x168   : > { %v1272_v32 = vadd.f32 %v1271_v31, %v1228_v29  ;;  %v1230_v33 = vpop.f32.mrf.mxu0 }
 0x169   : > { %v1273_v35 = vpop.f32.mrf.mxu1 }
 0x16a   : > { %v1282_v36 = vadd.f32 %v1272_v32, %v310_v30  ;;  %v1274_v37 = vadd.f32 %v1273_v35, %v1230_v33  ;;  %v1232_v38 = vpop.f32.mrf.mxu0 }
 0x16b   : > { %v1275_v40 = vpop.f32.mrf.mxu1 }
 0x16c   : > { %1290 = vst [vmem:[#allocation2 + $0x18] sm:$0xff] %v1282_v36  ;;  %v1283_v41 = vadd.f32 %v1274_v37, %v311_v34  ;;  %v1276_v42 = vadd.f32 %v1275_v40, %v1232_v38  ;;  %v1234_v43 = vpop.f32.mrf.mxu0 }
 0x16d   : > { %v1277_v45 = vpop.f32.mrf.mxu1 }
 0x16e   : > { %1291 = vst [vmem:[#allocation2 + $0x10] sm:$0xff] %v1283_v41  ;;  %v1286_v46 = vadd.f32 %v1276_v42, %v314_v39  ;;  %v1278_v47 = vadd.f32 %v1277_v45, %v1234_v43  ;;  %1299 = sbr.rel (%p1670_p11) target bundleno = 391 (0x187), region = 67 }
 0x170   : > { %1294 = vst [vmem:[#allocation2 + $0x28] sm:$0xff] %v1286_v46  ;;  %v1287_v48 = vadd.f32 %v1278_v47, %v315_v44 }
 0x172   : > { %1295 = vst [vmem:[#allocation2 + $0x38] sm:$0xff] %v1287_v48 }
 0x173   : > { %v1310_v49 = vlaneseq  ;;  %v1369_v50 = vld [vmem:[%s2235_s3] sm:$0xff]  ;;  %v1370_v53 = vld [vmem:[%s2235_s3 + $0x8] sm:$0xff]  ;;  %v1300_v54 = vld [vmem:[#allocation2 + $0x30] sm:$0xff] }
 0x174   : > { %v1308_v51 = vld [vmem:[%s2234_s2] ss:$2 sm:$0xf]  ;;  %v1671_v55 = vld [vmem:[%s2234_s2 + $0x1] ss:$2 sm:$0xf]  ;;  %v1373_v56 = vunpack.c.l.bf16 %v1369_v50  ;;  %v1374_v57 = vunpack.c.h.bf16 %v1369_v50  ;;  %v1375_v58 = vunpack.c.l.bf16 %v1370_v53  ;;  %v1376_v59 = vunpack.c.h.bf16 %v1370_v53 }
 0x175   : > { %v1311_v52 = vshrl.u32 %v1310_v49, 7  ;;  %v1371_v60 = vld [vmem:[%s2235_s3 + $0x10] sm:$0xff]  ;;  %v1301_v61 = vld [vmem:[#allocation2] sm:$0xff]  ;;  %v1372_v2 = vld [vmem:[%s2235_s3 + $0x18] sm:$0xff] }
 0x176   : > { %v1302_v3 = vld [vmem:[#allocation2 + $0x18] sm:$0xff]  ;;  %v1304_v4 = vld [vmem:[#allocation2 + $0x8] sm:$0xff]  ;;  %v1305_v5 = vld [vmem:[#allocation2 + $0x20] sm:$0xff]  ;;  %v1377_v6 = vunpack.c.l.bf16 %v1371_v60  ;;  %v1378_v7 = vunpack.c.h.bf16 %v1371_v60  ;;  %v1379_v8 = vunpack.c.l.bf16 %v1372_v2  ;;  %v1380_v11 = vunpack.c.h.bf16 %v1372_v2 }
 0x177   : > { %v1312_v62 = vsub.s32 0, %v1311_v52  ;;  %v1316_v63 = vsub.s32 1, %v1311_v52  ;;  %v1320_v0 = vsub.s32 2, %v1311_v52  ;;  %v1324_v1 = vsub.s32 3, %v1311_v52  ;;  %v1303_v16 = vld [vmem:[#allocation2 + $0x10] sm:$0xff]  ;;  %v1306_v17 = vld [vmem:[#allocation2 + $0x28] sm:$0xff] }
 0x179   : > { %v1313_v12 = vrot.slane %v1308_v51, %v1312_v62  ;;  %v1317_v13 = vrot.slane %v1308_v51, %v1316_v63  ;;  %v1344_v14 = vrot.slane %v1671_v55, %v1312_v62  ;;  %v1348_v15 = vrot.slane %v1671_v55, %v1316_v63  ;;  %v1307_v18 = vld [vmem:[#allocation2 + $0x38] sm:$0xff] }
 0x17a   : > { %v1321_v19 = vrot.slane %v1308_v51, %v1320_v0  ;;  %v1325_v20 = vrot.slane %v1308_v51, %v1324_v1  ;;  %v1352_v21 = vrot.slane %v1671_v55, %v1320_v0  ;;  %v1356_v22 = vrot.slane %v1671_v55, %v1324_v1 }
 0x17b   : > { %v1330_v23 = vmul.f32 %v1313_v12, %v1300_v54  ;;  %v1331_v24 = vmul.f32 %v1317_v13, %v1301_v61  ;;  %v1334_v25 = vmul.f32 %v1313_v12, %v1304_v4  ;;  %v1335_v26 = vmul.f32 %v1317_v13, %v1305_v5 }
 0x17c   : > { %v1332_v9 = vmul.f32 %v1321_v19, %v1302_v3  ;;  %v1333_v10 = vmul.f32 %v1325_v20, %v1303_v16  ;;  %v1336_v27 = vmul.f32 %v1321_v19, %v1306_v17  ;;  %v1337_v28 = vmul.f32 %v1325_v20, %v1307_v18 }
 0x17d   : > { %v1361_v29 = vadd.f32 %v1344_v14, %v1330_v23  ;;  %v1362_v30 = vadd.f32 %v1348_v15, %v1331_v24  ;;  %v1365_v31 = vadd.f32 %v1344_v14, %v1334_v25  ;;  %v1366_v32 = vadd.f32 %v1348_v15, %v1335_v26 }
 0x17e   : > { %v1363_v33 = vadd.f32 %v1352_v21, %v1332_v9  ;;  %v1364_v34 = vadd.f32 %v1356_v22, %v1333_v10  ;;  %v1367_v35 = vadd.f32 %v1352_v21, %v1336_v27  ;;  %v1368_v36 = vadd.f32 %v1356_v22, %v1337_v28 }
 0x17f   : > { %v1381_v37 = vadd.f32 %v1373_v56, %v1361_v29  ;;  %v1382_v38 = vadd.f32 %v1374_v57, %v1362_v30  ;;  %v1385_v39 = vadd.f32 %v1377_v6, %v1365_v31  ;;  %v1386_v40 = vadd.f32 %v1378_v7, %v1366_v32 }
 0x180   : > { %v1383_v41 = vadd.f32 %v1375_v58, %v1363_v33  ;;  %v1384_v42 = vadd.f32 %v1376_v59, %v1364_v34  ;;  %v1387_v43 = vadd.f32 %v1379_v8, %v1367_v35  ;;  %v1388_v44 = vadd.f32 %v1380_v11, %v1368_v36 }
 0x181   : > { %v1389_v45 = vmax.f32 %v1381_v37, 0.0  ;;  %v1390_v46 = vmax.f32 %v1382_v38, 0.0  ;;  %v1393_v47 = vmax.f32 %v1385_v39, 0.0  ;;  %v1394_v48 = vmax.f32 %v1386_v40, 0.0 }
 0x182   : > { %v1391_v49 = vmax.f32 %v1383_v41, 0.0  ;;  %v1392_v50 = vmax.f32 %v1384_v42, 0.0  ;;  %v1395_v51 = vmax.f32 %v1387_v43, 0.0  ;;  %v1396_v52 = vmax.f32 %v1388_v44, 0.0 }
 0x183   : > { %v1682_v53 = vpack.c.bf16 %v1390_v46, %v1389_v45  ;;  %v1684_v54 = vpack.c.bf16 %v1394_v48, %v1393_v47 }
 0x184   : > { %v1683_v55 = vpack.c.bf16 %v1392_v50, %v1391_v49  ;;  %v1685_v60 = vpack.c.bf16 %v1396_v52, %v1395_v51 }
 0x185   : > { %1421 = vst [vmem:[%s2236_s4] sm:$0xff] %v1682_v53  ;;  %1423 = vst [vmem:[%s2236_s4 + $0x10] sm:$0xff] %v1684_v54 }
 0x186   : > { %1422 = vst [vmem:[%s2236_s4 + $0x8] sm:$0xff] %v1683_v55  ;;  %1424 = vst [vmem:[%s2236_s4 + $0x18] sm:$0xff] %v1685_v60 }
 0x187 PF: > { %s14_s19 = sadd.s32 1, %s1963_s19   ;;  %s2237_s15 = smov %s1951_s16 }
 0x188   : > { %p11_p12 = scmp.ge.s32.totalorder %s14_s19, 11   ;;  %s2238_s16 = smov %s2026_s23 }
 0x189   : > { %s2239_s17 = smov %s1959_s18  ;;  %s2240_s18 = smov %s2242_s20 }
 0x18a   :  { %13 = sbr.rel (!%p11_p12) target bundleno = 3 (0x3), region = 109 }

// kernel: pretrained_model_forward.41
= control target key start
LH: loop header
LB: loop body
LE: loop exit
PB: predicated region body
PF: predicated region fallthrough
CT: control target
= control target key end

     0   :  { %s90_s0 = inlined_call_operand.vmem [shape: bf16[2,1,512], index: 0, kind: input, shape index: {}]   ;;  %s91_s1 = inlined_call_operand.hbm [shape: f32[2,512], index: 1, kind: output, shape index: {}]  }
   0x1   :  { %v47_v0 = vld [vmem:[%s90_s0] sm:$0xff]  }
   0x2   :  { %v48_v1 = vunpack.c.l.bf16 %v47_v0  ;;  %v49_v2 = vunpack.c.h.bf16 %v47_v0 }
   0x3   :  { %6 = vsyncpa [#allocation3], 0  ;;  %vm22_vm0 = vcmask 1041409   ;;  %vm24_vm1 = vcmask 1043459   ;;  %vm26_vm2 = vcmask 1045509   ;;  %s73_s8 = smov [#allocation2]  }
   0x4   :  { %v21_v3 = vrot.slane %v49_v2, 7  ;;  %s38_s9 = sshll.u32 %s73_s8, 4  ;;  %vm28_vm3 = vcmask 1047559   ;;  %s39_s9 = int_to_ptr.vmem [resolvable:$true] %s38_s9 }
   0x5   :  { %s51_s10 = scalar_lea.vmem %s39_s9, 128  ;;  %p56_p1 = scmp.lt.s32.totalorder %s39_s9, %s39_s9 }
   0x6   :  { %v23_v4 = vsel %vm22_vm0, %v21_v3, %v48_v1  ;;  %p52_p0 = scmp.ne.s32.totalorder %s39_s9, %s51_s10  ;;  %p57_p2 = scmp.lt.s32.totalorder %s51_s10, %s51_s10 }
   0x7   :  { %v25_v5 = vsel %vm24_vm1, %v21_v3, %v23_v4 }
   0x8   :  { %v27_v6 = vsel %vm26_vm2, %v21_v3, %v25_v5  ;;  %p58_p3 = por %p57_p2, %p56_p1 }
   0x9   :  { %v29_v7 = vsel %vm28_vm3, %v21_v3, %v27_v6 }
   0xa   :  { %31 = vst [vmem:[#allocation2] sm:$0xff] %v29_v7  ;;  %p59_p4 = pnand %p58_p3, %p52_p0 }
   0xc   :  { %62 = shalt.err (!%p59_p4)
}
   0xd   :  { %41 = dma.vmem_to_hbm [thread:$0]  %s39_s9, 128, %s91_s1, [#allocation3]  }
   0xe   :  { %71 = dma.done.wait [#allocation3], 128  }
   0xf   :  { %72 = vsyncadd [#allocation3], 4294967168 }
  0x10   :  { %45 = vsyncpa [#allocation3], 1 }

</bundles_post_ra>
